<compile_context>
chip_gen: v5e
topology: v5e:2x2
jax: 0.10.0
libtpu: 0.0.40
codegen_flags: <defaults>
</compile_context>

<pallas_src>
import math

import jax
import jax.numpy as jnp
from jax import lax
from jax.experimental import pallas as pl
from jax.experimental.pallas import tpu as pltpu

DILATIONS = (1, 3, 9)
EPS = 1e-9


# ------------------------------------------------------------------ kernel ---

def _make_kernel(Cin, Cout, L, stride):
    """Per-grid-step kernel: Bt batch elements stacked along lanes (N = Bt*L)."""
    s = stride
    half = s // 2
    f32 = jnp.float32

    def snake(v, alpha, inv_alpha):
        t = jnp.sin(alpha * v)
        return v + inv_alpha * (t * t)

    def kernel(x_ref, pos_ref,
               a0_ref, ia0_ref, wy_ref, wm1_ref, wp1_ref, bt_ref,
               a1_ref, ia1_ref, w1_ref, b1_ref,
               a2_ref, ia2_ref, w2_ref, b2_ref,
               out_ref):
        N = x_ref.shape[-1]                     # Bt * L lanes
        cdt = wy_ref.dtype                      # matmul operand dtype (bf16/f32)
        pos = pos_ref[...]                      # (1, N) within-segment position

        def shifted(v, shift):
            """v[:, q+shift] with zeros where q+shift leaves [0, L) of its segment.

            Wrap-around lanes from pltpu.roll always fall in the masked region,
            so batch segments stacked along lanes never leak into each other.
            """
            if shift == 0:
                return v
            rolled = pltpu.roll(v, (-shift) % N, axis=1)
            if shift > 0:
                valid = pos < (L - shift)
            else:
                valid = pos >= (-shift)
            return jnp.where(valid, rolled, 0.0)

        # ---------------- Snake1d(input_dim) ----------------
        x = x_ref[...].astype(f32)              # (Cin, N)
        y = snake(x, a0_ref[...], ia0_ref[...])

        # ------ polyphase WNConvTranspose1d (k=2s, stride=s, pad=s/2) ------
        # out[o, q*s + r] = w[:,:,r+half]^T y_q
        #                 + (r <  half) w[:,:,r+s+half]^T y_{q-1}
        #                 + (r >= half) w[:,:,r-half]^T  y_{q+1}
        y_m1 = shifted(y, -1)                   # y_{q-1}
        y_p1 = shifted(y, +1)                   # y_{q+1}
        u_y = jnp.dot(wy_ref[...], y.astype(cdt), preferred_element_type=f32)
        u_m = jnp.dot(wm1_ref[...], y_m1.astype(cdt), preferred_element_type=f32)
        u_p = jnp.dot(wp1_ref[...], y_p1.astype(cdt), preferred_element_type=f32)
        bt = bt_ref[...]
        z = []
        for r in range(s):
            zr = u_y[r * Cout:(r + 1) * Cout]
            if r < half:
                zr = zr + u_m[r * Cout:(r + 1) * Cout]
            else:
                q = r - half
                zr = zr + u_p[q * Cout:(q + 1) * Cout]
            z.append(zr + bt)

        # ---------------- residual units (dilations 1, 3, 9) ----------------
        a1 = a1_ref[...]; ia1 = ia1_ref[...]
        a2 = a2_ref[...]; ia2 = ia2_ref[...]
        b1 = b1_ref[...]; b2 = b2_ref[...]
        # TODO(synk): at DAC strides (s=8) and real C, drive the phase loop with
        # lax.fori_loop over a VMEM scratch to bound vreg live ranges.
        for i, d in enumerate(DILATIONS):
            zs = [snake(z[r], a1[i], ia1[i]) for r in range(s)]
            w1 = w1_ref[i]                      # (Cout, 7*Cout)
            w2 = w2_ref[i]                      # (Cout, Cout)
            for r in range(s):
                # Tap k at output phase r reads source phase (r+(k-3)d) % s,
                # shifted by (r+(k-3)d) // s along the per-phase time axis.
                slabs = [shifted(zs[(r + (k - 3) * d) % s], (r + (k - 3) * d) // s)
                         for k in range(7)]
                taps = jnp.concatenate(slabs, axis=0)          # (7*Cout, N)
                h = jnp.dot(w1, taps.astype(cdt),
                            preferred_element_type=f32) + b1[i]
                h = snake(h, a2[i], ia2[i])
                h = jnp.dot(w2, h.astype(cdt),
                            preferred_element_type=f32) + b2[i]
                z[r] = z[r] + h                                # residual add

        for r in range(s):
            out_ref[r] = z[r].astype(out_ref.dtype)

    return kernel


# ----------------------------------------------------------------- wrapper ---

def decoder_block(x, p, stride, *, compute_dtype=jnp.bfloat16, lane_target=256):
    """Fused DecoderBlock forward: (B, Cin, L) -> (B, Cout, L*stride)."""
    B, Cin, L = x.shape
    Cout = p["wt"].shape[1]
    s = stride
    assert s >= 2 and s % 2 == 0, "even upsample stride expected"
    # TODO(synk): odd strides (output length L*s - 1, ragged last phase) are not
    # handled by this polyphase decomposition (DAC uses strides 8/8/4/2).
    half = s // 2
    f32 = jnp.float32
    cdt = compute_dtype

    # Batch elements per grid step, stacked along lanes (N = Bt*L) so a single
    # step feeds the MXU a wide RHS and the per-step pipeline cost amortizes.
    Bt = B
    for dd in range(1, B + 1):
        if B % dd == 0 and dd * L <= max(lane_target, L) and (dd * L) % 128 == 0:
            Bt = dd                      # largest qualifying divisor wins
    G = B // Bt
    N = Bt * L

    # Snake parameters + precomputed reciprocals (keeps divides off the VPU).
    def _alpha(a):
        a = a.astype(f32)
        return a[..., None], (1.0 / (a + EPS))[..., None]

    a0, ia0 = _alpha(p["a0"])            # (Cin, 1)
    a1, ia1 = _alpha(p["a1"])            # (3, Cout, 1)
    a2, ia2 = _alpha(p["a2"])

    # Polyphase transposed-conv weights, split by source column (no zero block):
    #   w_y  : all s phases          against y_q        (s*Cout, Cin)
    #   w_m1 : phases r <  half      against y_{q-1}    (half*Cout, Cin)
    #   w_p1 : phases r >= half      against y_{q+1}    (half*Cout, Cin)
    wt = p["wt"].astype(f32)             # (Cin, Cout, 2*s)  PyTorch layout
    w_y = jnp.concatenate([wt[:, :, r + half].T for r in range(s)], axis=0)
    w_m1 = jnp.concatenate([wt[:, :, r + s + half].T for r in range(half)], axis=0)
    w_p1 = jnp.concatenate([wt[:, :, r - half].T for r in range(half, s)], axis=0)
    bt = p["bt"].astype(f32)[:, None]

    # Residual-unit conv weights, 7 taps folded into the contraction (C << 128
    # here; at production C >= 128 accumulate per-tap (C,C) matmuls instead).
    w1s = jnp.transpose(p["w1"].astype(f32), (0, 1, 3, 2)).reshape(3, Cout, 7 * Cout)
    w2s = p["w2"].astype(f32)[:, :, :, 0]                      # (3, C, C)
    b1 = p["b1"].astype(f32)[:, :, None]
    b2 = p["b2"].astype(f32)[:, :, None]

    # Matmul operands in compute_dtype (bf16 on v6e/v7x), accumulation in f32.
    w_y, w_m1, w_p1, w1s, w2s = [w.astype(cdt) for w in (w_y, w_m1, w_p1, w1s, w2s)]

    # Lane-stacked input (Cin, B*L) and within-segment positions for halo masks.
    x_l = jnp.transpose(x, (1, 0, 2)).reshape(Cin, B * L)
    pos = (jnp.arange(B * L, dtype=jnp.int32) % L)[None, :]

    consts = (a0, ia0, w_y, w_m1, w_p1, bt, a1, ia1, w1s, b1, a2, ia2, w2s, b2)

    def const_spec(arr):
        nd = arr.ndim
        # TODO(synk): at production channel counts, tile the weights over a grid
        # axis and single-buffer them (pipeline_mode=pl.Buffered(1)) instead of
        # keeping full double-buffered copies VMEM-resident.
        return pl.BlockSpec(arr.shape, lambda g, _nd=nd: (0,) * _nd)

    kernel = _make_kernel(Cin, Cout, L, s)

    grid_spec = pltpu.PrefetchScalarGridSpec(
        num_scalar_prefetch=0,
        grid=(G,),
        in_specs=[pl.BlockSpec((Cin, N), lambda g: (0, g)),
                  pl.BlockSpec((1, N), lambda g: (0, g))]
                 + [const_spec(c) for c in consts],
        out_specs=pl.BlockSpec((s, Cout, N), lambda g: (0, 0, g)),
    )

    out_pm = pl.pallas_call(
        kernel,
        out_shape=jax.ShapeDtypeStruct((s, Cout, B * L), jnp.float32),
        grid_spec=grid_spec,
        compiler_params=pltpu.CompilerParams(
            dimension_semantics=("parallel",),   # batch blocks are independent
            vmem_limit_bytes=32 * 1024 * 1024),  # actual need << 1 MiB; v7x-safe
    )(x_l, pos, *consts)

    # Phase interleave back to NCL: out[b, o, q*s + r] = out_pm[r, o, b*L + q].
    # TODO(synk): in a full decoder keep the phase-major layout downstream and
    # fold this interleave into the next block's kernel (extra HBM pass here).
    out = out_pm.reshape(s, Cout, B, L)
    return jnp.transpose(out, (2, 1, 3, 0)).reshape(B, Cout, L * s)


# ------------------------------------------------------- pure-JAX reference ---

def _snake_ref(x, alpha):
    a = alpha.reshape(1, -1, 1)
    return x + (1.0 / (a + EPS)) * jnp.sin(a * x) ** 2


def _conv1d_ref(x, w, b, stride=1, padding=0, dilation=1):
    y = lax.conv_general_dilated(
        x, w, (stride,), [(padding, padding)], rhs_dilation=(dilation,),
        dimension_numbers=("NCH", "OIH", "NCH"),
        precision=lax.Precision.HIGHEST)
    return y + b.reshape(1, -1, 1)


def _conv_transpose1d_ref(x, w, b, stride, padding):
    # PyTorch ConvTranspose1d (weight (Cin, Cout, K)) == conv of the stride-
    # dilated input with the spatially flipped, channel-swapped weight.
    K = w.shape[-1]
    w_eff = jnp.transpose(jnp.flip(w, axis=-1), (1, 0, 2))     # (Cout, Cin, K)
    y = lax.conv_general_dilated(
        x, w_eff, (1,), [(K - 1 - padding, K - 1 - padding)],
        lhs_dilation=(stride,), dimension_numbers=("NCH", "OIH", "NCH"),
        precision=lax.Precision.HIGHEST)
    return y + b.reshape(1, -1, 1)


def decoder_block_ref(x, p, stride):
    y = _snake_ref(x, p["a0"])
    y = _conv_transpose1d_ref(y, p["wt"], p["bt"], stride,
                              math.ceil(stride / 2))
    for i, d in enumerate(DILATIONS):
        xi = y
        h = _snake_ref(xi, p["a1"][i])
        h = _conv1d_ref(h, p["w1"][i], p["b1"][i], padding=3 * d, dilation=d)
        h = _snake_ref(h, p["a2"][i])
        h = _conv1d_ref(h, p["w2"][i], p["b2"][i])
        # (xi.shape[-1] - h.shape[-1]) // 2 == 0 here, so no crop
        y = xi + h
    return y


# -------------------------------------------------------------------- main ---

if __name__ == "__main__":
    input_dim, output_dim, stride = 16, 8, 2     # DecoderBlock(16, 8, stride=2)
    B, L = 2, 128                                # upsampled length = 256
    C = output_dim

    key = jax.random.PRNGKey(0)
    ks = jax.random.split(key, 10)
    params = {
        "a0": jax.random.uniform(ks[0], (input_dim,), jnp.float32, 0.5, 1.5),
        "wt": 0.2 * jax.random.normal(ks[1], (input_dim, output_dim, 2 * stride),
                                      jnp.float32),
        "bt": 0.1 * jax.random.normal(ks[2], (output_dim,), jnp.float32),
        "a1": jax.random.uniform(ks[3], (3, C), jnp.float32, 0.5, 1.5),
        "w1": 0.2 * jax.random.normal(ks[4], (3, C, C, 7), jnp.float32),
        "b1": 0.1 * jax.random.normal(ks[5], (3, C), jnp.float32),
        "a2": jax.random.uniform(ks[6], (3, C), jnp.float32, 0.5, 1.5),
        "w2": 0.2 * jax.random.normal(ks[7], (3, C, C, 1), jnp.float32),
        "b2": 0.1 * jax.random.normal(ks[8], (3, C), jnp.float32),
    }
    x = jax.random.normal(ks[9], (B, input_dim, L), jnp.float32)

    ref = decoder_block_ref(x, params, stride)

    # 1) Exact-algorithm check with f32 matmul operands (tight tolerance).
    out_f32 = jax.block_until_ready(
        decoder_block(x, params, stride, compute_dtype=jnp.float32))
    assert out_f32.shape == (B, output_dim, L * stride), out_f32.shape
    if not bool(jnp.allclose(out_f32, ref, rtol=3e-3, atol=3e-3)):
        raise AssertionError(
            "f32 mismatch, max abs err = "
            f"{float(jnp.max(jnp.abs(out_f32 - ref)))}")

    # 2) Production path: bf16 matmul operands, f32 accumulation.
    out_bf = jax.block_until_ready(decoder_block(x, params, stride))
    err = float(jnp.max(jnp.abs(out_bf - ref)))
    scale = float(jnp.max(jnp.abs(ref)))
    if not err <= 5e-2 * scale + 1e-3:
        raise AssertionError(f"bf16 mismatch, max abs err = {err} (scale={scale})")

    print("KERNEL_OK")
</pallas_src>

<mosaic_0001>
module attributes {stable_mosaic.version = 11 : i64} {
  func.func @kernel(%arg0: i32, %arg1: memref<16x256xf32, #tpu.memory_space<vmem>>, %arg2: memref<1x256xi32, #tpu.memory_space<vmem>>, %arg3: memref<16x1xf32, #tpu.memory_space<vmem>>, %arg4: memref<16x1xf32, #tpu.memory_space<vmem>>, %arg5: memref<16x16xf32, #tpu.memory_space<vmem>>, %arg6: memref<8x16xf32, #tpu.memory_space<vmem>>, %arg7: memref<8x16xf32, #tpu.memory_space<vmem>>, %arg8: memref<8x1xf32, #tpu.memory_space<vmem>>, %arg9: memref<3x8x1xf32, #tpu.memory_space<vmem>>, %arg10: memref<3x8x1xf32, #tpu.memory_space<vmem>>, %arg11: memref<3x8x56xf32, #tpu.memory_space<vmem>>, %arg12: memref<3x8x1xf32, #tpu.memory_space<vmem>>, %arg13: memref<3x8x1xf32, #tpu.memory_space<vmem>>, %arg14: memref<3x8x1xf32, #tpu.memory_space<vmem>>, %arg15: memref<3x8x8xf32, #tpu.memory_space<vmem>>, %arg16: memref<3x8x1xf32, #tpu.memory_space<vmem>>, %arg17: memref<2x8x256xf32, #tpu.memory_space<vmem>>) attributes {dimension_semantics = [#tpu.dimension_semantics<parallel>], iteration_bounds = array<i64: 1>, scalar_prefetch = 0 : i64, scratch_operands = 0 : i64, tpu.core_type = #tpu.core_type<tc>, window_params = [{transform_indices = @transform_0, window_bounds = array<i64: 16, 256>}, {transform_indices = @transform_1, window_bounds = array<i64: 1, 256>}, {pipeline_mode = #tpu.pipeline_mode<synchronous>, transform_indices = @transform_2, window_bounds = array<i64: 16, 1>}, {pipeline_mode = #tpu.pipeline_mode<synchronous>, transform_indices = @transform_3, window_bounds = array<i64: 16, 1>}, {pipeline_mode = #tpu.pipeline_mode<synchronous>, transform_indices = @transform_4, window_bounds = array<i64: 16, 16>}, {pipeline_mode = #tpu.pipeline_mode<synchronous>, transform_indices = @transform_5, window_bounds = array<i64: 8, 16>}, {pipeline_mode = #tpu.pipeline_mode<synchronous>, transform_indices = @transform_6, window_bounds = array<i64: 8, 16>}, {pipeline_mode = #tpu.pipeline_mode<synchronous>, transform_indices = @transform_7, window_bounds = array<i64: 8, 1>}, {pipeline_mode = #tpu.pipeline_mode<synchronous>, transform_indices = @transform_8, window_bounds = array<i64: 3, 8, 1>}, {pipeline_mode = #tpu.pipeline_mode<synchronous>, transform_indices = @transform_9, window_bounds = array<i64: 3, 8, 1>}, {pipeline_mode = #tpu.pipeline_mode<synchronous>, transform_indices = @transform_10, window_bounds = array<i64: 3, 8, 56>}, {pipeline_mode = #tpu.pipeline_mode<synchronous>, transform_indices = @transform_11, window_bounds = array<i64: 3, 8, 1>}, {pipeline_mode = #tpu.pipeline_mode<synchronous>, transform_indices = @transform_12, window_bounds = array<i64: 3, 8, 1>}, {pipeline_mode = #tpu.pipeline_mode<synchronous>, transform_indices = @transform_13, window_bounds = array<i64: 3, 8, 1>}, {pipeline_mode = #tpu.pipeline_mode<synchronous>, transform_indices = @transform_14, window_bounds = array<i64: 3, 8, 8>}, {pipeline_mode = #tpu.pipeline_mode<synchronous>, transform_indices = @transform_15, window_bounds = array<i64: 3, 8, 1>}, {transform_indices = @transform_16, window_bounds = array<i64: 2, 8, 256>}]} {
    %c0 = arith.constant 0 : index
    %c0_0 = arith.constant 0 : index
    %0 = vector.load %arg2[%c0, %c0_0] : memref<1x256xi32, #tpu.memory_space<vmem>>, vector<1x256xi32>
    %c0_1 = arith.constant 0 : index
    %c0_2 = arith.constant 0 : index
    %1 = vector.load %arg1[%c0_1, %c0_2] : memref<16x256xf32, #tpu.memory_space<vmem>>, vector<16x256xf32>
    %c0_3 = arith.constant 0 : index
    %c0_4 = arith.constant 0 : index
    %2 = vector.load %arg3[%c0_3, %c0_4] : memref<16x1xf32, #tpu.memory_space<vmem>>, vector<16x1xf32>
    %c0_5 = arith.constant 0 : index
    %c0_6 = arith.constant 0 : index
    %3 = vector.load %arg4[%c0_5, %c0_6] : memref<16x1xf32, #tpu.memory_space<vmem>>, vector<16x1xf32>
    %4 = vector.broadcast %2 : vector<16x1xf32> to vector<16x256xf32>
    %5 = arith.mulf %4, %1 : vector<16x256xf32>
    %6 = math.sin %5 : vector<16x256xf32>
    %7 = arith.mulf %6, %6 : vector<16x256xf32>
    %8 = vector.broadcast %3 : vector<16x1xf32> to vector<16x256xf32>
    %9 = arith.mulf %8, %7 : vector<16x256xf32>
    %10 = arith.addf %1, %9 : vector<16x256xf32>
    %c1_i32 = arith.constant 1 : i32
    %11 = tpu.dynamic_rotate %10 by %c1_i32 dim 1 : vector<16x256xf32>, i32 -> vector<16x256xf32>
    %c1_i32_7 = arith.constant 1 : i32
    %12 = vector.broadcast %c1_i32_7 : i32 to vector<1x256xi32>
    %13 = arith.cmpi sge, %0, %12 : vector<1x256xi32>
    %cst = arith.constant 0.000000e+00 : f32
    %14 = vector.shape_cast %13 : vector<1x256xi1> to vector<1x256xi1>
    %15 = vector.broadcast %14 : vector<1x256xi1> to vector<16x256xi1>
    %16 = vector.broadcast %cst : f32 to vector<16x256xf32>
    %17 = arith.select %15, %11, %16 : vector<16x256xi1>, vector<16x256xf32>
    %c255_i32 = arith.constant 255 : i32
    %18 = tpu.dynamic_rotate %10 by %c255_i32 dim 1 : vector<16x256xf32>, i32 -> vector<16x256xf32>
    %c127_i32 = arith.constant 127 : i32
    %19 = vector.broadcast %c127_i32 : i32 to vector<1x256xi32>
    %20 = arith.cmpi slt, %0, %19 : vector<1x256xi32>
    %cst_8 = arith.constant 0.000000e+00 : f32
    %21 = vector.shape_cast %20 : vector<1x256xi1> to vector<1x256xi1>
    %22 = vector.broadcast %21 : vector<1x256xi1> to vector<16x256xi1>
    %23 = vector.broadcast %cst_8 : f32 to vector<16x256xf32>
    %24 = arith.select %22, %18, %23 : vector<16x256xi1>, vector<16x256xf32>
    %c0_9 = arith.constant 0 : index
    %c0_10 = arith.constant 0 : index
    %25 = vector.load %arg5[%c0_9, %c0_10] : memref<16x16xf32, #tpu.memory_space<vmem>>, vector<16x16xf32>
    %cst_11 = arith.constant dense<0.000000e+00> : vector<16x256xf32>
    %26 = tpu.matmul %25, %10, %cst_11 {dimension_numbers = #tpu.dot_dimension_numbers<[1], [0], [0], [1], [0, 0, 1, 1], [], []>} : vector<16x16xf32>, vector<16x256xf32>, vector<16x256xf32> -> vector<16x256xf32>
    %c0_12 = arith.constant 0 : index
    %c0_13 = arith.constant 0 : index
    %27 = vector.load %arg6[%c0_12, %c0_13] : memref<8x16xf32, #tpu.memory_space<vmem>>, vector<8x16xf32>
    %cst_14 = arith.constant dense<0.000000e+00> : vector<8x256xf32>
    %28 = tpu.matmul %27, %17, %cst_14 {dimension_numbers = #tpu.dot_dimension_numbers<[1], [0], [0], [1], [0, 0, 1, 1], [], []>} : vector<8x16xf32>, vector<16x256xf32>, vector<8x256xf32> -> vector<8x256xf32>
    %c0_15 = arith.constant 0 : index
    %c0_16 = arith.constant 0 : index
    %29 = vector.load %arg7[%c0_15, %c0_16] : memref<8x16xf32, #tpu.memory_space<vmem>>, vector<8x16xf32>
    %cst_17 = arith.constant dense<0.000000e+00> : vector<8x256xf32>
    %30 = tpu.matmul %29, %24, %cst_17 {dimension_numbers = #tpu.dot_dimension_numbers<[1], [0], [0], [1], [0, 0, 1, 1], [], []>} : vector<8x16xf32>, vector<16x256xf32>, vector<8x256xf32> -> vector<8x256xf32>
    %c0_18 = arith.constant 0 : index
    %c0_19 = arith.constant 0 : index
    %31 = vector.load %arg8[%c0_18, %c0_19] : memref<8x1xf32, #tpu.memory_space<vmem>>, vector<8x1xf32>
    %32 = vector.extract_strided_slice %26 {offsets = [0, 0], sizes = [8, 256], strides = [1, 1]} : vector<16x256xf32> to vector<8x256xf32>
    %33 = arith.addf %32, %28 : vector<8x256xf32>
    %34 = vector.broadcast %31 : vector<8x1xf32> to vector<8x256xf32>
    %35 = arith.addf %33, %34 : vector<8x256xf32>
    %36 = vector.extract_strided_slice %26 {offsets = [8, 0], sizes = [8, 256], strides = [1, 1]} : vector<16x256xf32> to vector<8x256xf32>
    %37 = arith.addf %36, %30 : vector<8x256xf32>
    %38 = vector.broadcast %31 : vector<8x1xf32> to vector<8x256xf32>
    %39 = arith.addf %37, %38 : vector<8x256xf32>
    %c0_20 = arith.constant 0 : index
    %c0_21 = arith.constant 0 : index
    %c0_22 = arith.constant 0 : index
    %40 = vector.load %arg9[%c0_20, %c0_21, %c0_22] : memref<3x8x1xf32, #tpu.memory_space<vmem>>, vector<3x8x1xf32>
    %c0_23 = arith.constant 0 : index
    %c0_24 = arith.constant 0 : index
    %c0_25 = arith.constant 0 : index
    %41 = vector.load %arg10[%c0_23, %c0_24, %c0_25] : memref<3x8x1xf32, #tpu.memory_space<vmem>>, vector<3x8x1xf32>
    %c0_26 = arith.constant 0 : index
    %c0_27 = arith.constant 0 : index
    %c0_28 = arith.constant 0 : index
    %42 = vector.load %arg13[%c0_26, %c0_27, %c0_28] : memref<3x8x1xf32, #tpu.memory_space<vmem>>, vector<3x8x1xf32>
    %c0_29 = arith.constant 0 : index
    %c0_30 = arith.constant 0 : index
    %c0_31 = arith.constant 0 : index
    %43 = vector.load %arg14[%c0_29, %c0_30, %c0_31] : memref<3x8x1xf32, #tpu.memory_space<vmem>>, vector<3x8x1xf32>
    %c0_32 = arith.constant 0 : index
    %c0_33 = arith.constant 0 : index
    %c0_34 = arith.constant 0 : index
    %44 = vector.load %arg12[%c0_32, %c0_33, %c0_34] : memref<3x8x1xf32, #tpu.memory_space<vmem>>, vector<3x8x1xf32>
    %c0_35 = arith.constant 0 : index
    %c0_36 = arith.constant 0 : index
    %c0_37 = arith.constant 0 : index
    %45 = vector.load %arg16[%c0_35, %c0_36, %c0_37] : memref<3x8x1xf32, #tpu.memory_space<vmem>>, vector<3x8x1xf32>
    %46 = vector.extract_strided_slice %40 {offsets = [0, 0, 0], sizes = [1, 8, 1], strides = [1, 1, 1]} : vector<3x8x1xf32> to vector<1x8x1xf32>
    %47 = vector.shape_cast %46 : vector<1x8x1xf32> to vector<8x1xf32>
    %48 = vector.extract_strided_slice %41 {offsets = [0, 0, 0], sizes = [1, 8, 1], strides = [1, 1, 1]} : vector<3x8x1xf32> to vector<1x8x1xf32>
    %49 = vector.shape_cast %48 : vector<1x8x1xf32> to vector<8x1xf32>
    %50 = vector.broadcast %47 : vector<8x1xf32> to vector<8x256xf32>
    %51 = arith.mulf %50, %35 : vector<8x256xf32>
    %52 = math.sin %51 : vector<8x256xf32>
    %53 = arith.mulf %52, %52 : vector<8x256xf32>
    %54 = vector.broadcast %49 : vector<8x1xf32> to vector<8x256xf32>
    %55 = arith.mulf %54, %53 : vector<8x256xf32>
    %56 = arith.addf %35, %55 : vector<8x256xf32>
    %57 = vector.extract_strided_slice %40 {offsets = [0, 0, 0], sizes = [1, 8, 1], strides = [1, 1, 1]} : vector<3x8x1xf32> to vector<1x8x1xf32>
    %58 = vector.shape_cast %57 : vector<1x8x1xf32> to vector<8x1xf32>
    %59 = vector.extract_strided_slice %41 {offsets = [0, 0, 0], sizes = [1, 8, 1], strides = [1, 1, 1]} : vector<3x8x1xf32> to vector<1x8x1xf32>
    %60 = vector.shape_cast %59 : vector<1x8x1xf32> to vector<8x1xf32>
    %61 = vector.broadcast %58 : vector<8x1xf32> to vector<8x256xf32>
    %62 = arith.mulf %61, %39 : vector<8x256xf32>
    %63 = math.sin %62 : vector<8x256xf32>
    %64 = arith.mulf %63, %63 : vector<8x256xf32>
    %65 = vector.broadcast %60 : vector<8x1xf32> to vector<8x256xf32>
    %66 = arith.mulf %65, %64 : vector<8x256xf32>
    %67 = arith.addf %39, %66 : vector<8x256xf32>
    %c0_38 = arith.constant 0 : index
    %c0_39 = arith.constant 0 : index
    %c0_40 = arith.constant 0 : index
    %68 = vector.load %arg11[%c0_38, %c0_39, %c0_40] : memref<3x8x56xf32, #tpu.memory_space<vmem>>, vector<1x8x56xf32>
    %69 = vector.shape_cast %68 : vector<1x8x56xf32> to vector<8x56xf32>
    %c0_41 = arith.constant 0 : index
    %c0_42 = arith.constant 0 : index
    %c0_43 = arith.constant 0 : index
    %70 = vector.load %arg15[%c0_41, %c0_42, %c0_43] : memref<3x8x8xf32, #tpu.memory_space<vmem>>, vector<1x8x8xf32>
    %71 = vector.shape_cast %70 : vector<1x8x8xf32> to vector<8x8xf32>
    %c2_i32 = arith.constant 2 : i32
    %72 = tpu.dynamic_rotate %67 by %c2_i32 dim 1 : vector<8x256xf32>, i32 -> vector<8x256xf32>
    %c2_i32_44 = arith.constant 2 : i32
    %73 = vector.broadcast %c2_i32_44 : i32 to vector<1x256xi32>
    %74 = arith.cmpi sge, %0, %73 : vector<1x256xi32>
    %cst_45 = arith.constant 0.000000e+00 : f32
    %75 = vector.shape_cast %74 : vector<1x256xi1> to vector<1x256xi1>
    %76 = vector.broadcast %75 : vector<1x256xi1> to vector<8x256xi1>
    %77 = vector.broadcast %cst_45 : f32 to vector<8x256xf32>
    %78 = arith.select %76, %72, %77 : vector<8x256xi1>, vector<8x256xf32>
    %c1_i32_46 = arith.constant 1 : i32
    %79 = tpu.dynamic_rotate %56 by %c1_i32_46 dim 1 : vector<8x256xf32>, i32 -> vector<8x256xf32>
    %c1_i32_47 = arith.constant 1 : i32
    %80 = vector.broadcast %c1_i32_47 : i32 to vector<1x256xi32>
    %81 = arith.cmpi sge, %0, %80 : vector<1x256xi32>
    %cst_48 = arith.constant 0.000000e+00 : f32
    %82 = vector.shape_cast %81 : vector<1x256xi1> to vector<1x256xi1>
    %83 = vector.broadcast %82 : vector<1x256xi1> to vector<8x256xi1>
    %84 = vector.broadcast %cst_48 : f32 to vector<8x256xf32>
    %85 = arith.select %83, %79, %84 : vector<8x256xi1>, vector<8x256xf32>
    %c1_i32_49 = arith.constant 1 : i32
    %86 = tpu.dynamic_rotate %67 by %c1_i32_49 dim 1 : vector<8x256xf32>, i32 -> vector<8x256xf32>
    %c1_i32_50 = arith.constant 1 : i32
    %87 = vector.broadcast %c1_i32_50 : i32 to vector<1x256xi32>
    %88 = arith.cmpi sge, %0, %87 : vector<1x256xi32>
    %cst_51 = arith.constant 0.000000e+00 : f32
    %89 = vector.shape_cast %88 : vector<1x256xi1> to vector<1x256xi1>
    %90 = vector.broadcast %89 : vector<1x256xi1> to vector<8x256xi1>
    %91 = vector.broadcast %cst_51 : f32 to vector<8x256xf32>
    %92 = arith.select %90, %86, %91 : vector<8x256xi1>, vector<8x256xf32>
    %c255_i32_52 = arith.constant 255 : i32
    %93 = tpu.dynamic_rotate %56 by %c255_i32_52 dim 1 : vector<8x256xf32>, i32 -> vector<8x256xf32>
    %c127_i32_53 = arith.constant 127 : i32
    %94 = vector.broadcast %c127_i32_53 : i32 to vector<1x256xi32>
    %95 = arith.cmpi slt, %0, %94 : vector<1x256xi32>
    %cst_54 = arith.constant 0.000000e+00 : f32
    %96 = vector.shape_cast %95 : vector<1x256xi1> to vector<1x256xi1>
    %97 = vector.broadcast %96 : vector<1x256xi1> to vector<8x256xi1>
    %98 = vector.broadcast %cst_54 : f32 to vector<8x256xf32>
    %99 = arith.select %97, %93, %98 : vector<8x256xi1>, vector<8x256xf32>
    %c255_i32_55 = arith.constant 255 : i32
    %100 = tpu.dynamic_rotate %67 by %c255_i32_55 dim 1 : vector<8x256xf32>, i32 -> vector<8x256xf32>
    %c127_i32_56 = arith.constant 127 : i32
    %101 = vector.broadcast %c127_i32_56 : i32 to vector<1x256xi32>
    %102 = arith.cmpi slt, %0, %101 : vector<1x256xi32>
    %cst_57 = arith.constant 0.000000e+00 : f32
    %103 = vector.shape_cast %102 : vector<1x256xi1> to vector<1x256xi1>
    %104 = vector.broadcast %103 : vector<1x256xi1> to vector<8x256xi1>
    %105 = vector.broadcast %cst_57 : f32 to vector<8x256xf32>
    %106 = arith.select %104, %100, %105 : vector<8x256xi1>, vector<8x256xf32>
    %107 = tpu.concatenate %78, %85, %92, %56, %67, %99, %106 in 0 : vector<8x256xf32>, vector<8x256xf32>, vector<8x256xf32>, vector<8x256xf32>, vector<8x256xf32>, vector<8x256xf32>, vector<8x256xf32> -> vector<56x256xf32>
    %cst_58 = arith.constant dense<0.000000e+00> : vector<8x256xf32>
    %108 = tpu.matmul %69, %107, %cst_58 {dimension_numbers = #tpu.dot_dimension_numbers<[1], [0], [0], [1], [0, 0, 1, 1], [], []>} : vector<8x56xf32>, vector<56x256xf32>, vector<8x256xf32> -> vector<8x256xf32>
    %109 = vector.extract_strided_slice %44 {offsets = [0, 0, 0], sizes = [1, 8, 1], strides = [1, 1, 1]} : vector<3x8x1xf32> to vector<1x8x1xf32>
    %110 = vector.shape_cast %109 : vector<1x8x1xf32> to vector<8x1xf32>
    %111 = vector.broadcast %110 : vector<8x1xf32> to vector<8x256xf32>
    %112 = arith.addf %108, %111 : vector<8x256xf32>
    %113 = vector.extract_strided_slice %42 {offsets = [0, 0, 0], sizes = [1, 8, 1], strides = [1, 1, 1]} : vector<3x8x1xf32> to vector<1x8x1xf32>
    %114 = vector.shape_cast %113 : vector<1x8x1xf32> to vector<8x1xf32>
    %115 = vector.extract_strided_slice %43 {offsets = [0, 0, 0], sizes = [1, 8, 1], strides = [1, 1, 1]} : vector<3x8x1xf32> to vector<1x8x1xf32>
    %116 = vector.shape_cast %115 : vector<1x8x1xf32> to vector<8x1xf32>
    %117 = vector.broadcast %114 : vector<8x1xf32> to vector<8x256xf32>
    %118 = arith.mulf %117, %112 : vector<8x256xf32>
    %119 = math.sin %118 : vector<8x256xf32>
    %120 = arith.mulf %119, %119 : vector<8x256xf32>
    %121 = vector.broadcast %116 : vector<8x1xf32> to vector<8x256xf32>
    %122 = arith.mulf %121, %120 : vector<8x256xf32>
    %123 = arith.addf %112, %122 : vector<8x256xf32>
    %cst_59 = arith.constant dense<0.000000e+00> : vector<8x256xf32>
    %124 = tpu.matmul %71, %123, %cst_59 {dimension_numbers = #tpu.dot_dimension_numbers<[1], [0], [0], [1], [0, 0, 1, 1], [], []>} : vector<8x8xf32>, vector<8x256xf32>, vector<8x256xf32> -> vector<8x256xf32>
    %125 = vector.extract_strided_slice %45 {offsets = [0, 0, 0], sizes = [1, 8, 1], strides = [1, 1, 1]} : vector<3x8x1xf32> to vector<1x8x1xf32>
    %126 = vector.shape_cast %125 : vector<1x8x1xf32> to vector<8x1xf32>
    %127 = vector.broadcast %126 : vector<8x1xf32> to vector<8x256xf32>
    %128 = arith.addf %124, %127 : vector<8x256xf32>
    %129 = arith.addf %35, %128 : vector<8x256xf32>
    %c1_i32_60 = arith.constant 1 : i32
    %130 = tpu.dynamic_rotate %56 by %c1_i32_60 dim 1 : vector<8x256xf32>, i32 -> vector<8x256xf32>
    %c1_i32_61 = arith.constant 1 : i32
    %131 = vector.broadcast %c1_i32_61 : i32 to vector<1x256xi32>
    %132 = arith.cmpi sge, %0, %131 : vector<1x256xi32>
    %cst_62 = arith.constant 0.000000e+00 : f32
    %133 = vector.shape_cast %132 : vector<1x256xi1> to vector<1x256xi1>
    %134 = vector.broadcast %133 : vector<1x256xi1> to vector<8x256xi1>
    %135 = vector.broadcast %cst_62 : f32 to vector<8x256xf32>
    %136 = arith.select %134, %130, %135 : vector<8x256xi1>, vector<8x256xf32>
    %c1_i32_63 = arith.constant 1 : i32
    %137 = tpu.dynamic_rotate %67 by %c1_i32_63 dim 1 : vector<8x256xf32>, i32 -> vector<8x256xf32>
    %c1_i32_64 = arith.constant 1 : i32
    %138 = vector.broadcast %c1_i32_64 : i32 to vector<1x256xi32>
    %139 = arith.cmpi sge, %0, %138 : vector<1x256xi32>
    %cst_65 = arith.constant 0.000000e+00 : f32
    %140 = vector.shape_cast %139 : vector<1x256xi1> to vector<1x256xi1>
    %141 = vector.broadcast %140 : vector<1x256xi1> to vector<8x256xi1>
    %142 = vector.broadcast %cst_65 : f32 to vector<8x256xf32>
    %143 = arith.select %141, %137, %142 : vector<8x256xi1>, vector<8x256xf32>
    %c255_i32_66 = arith.constant 255 : i32
    %144 = tpu.dynamic_rotate %56 by %c255_i32_66 dim 1 : vector<8x256xf32>, i32 -> vector<8x256xf32>
    %c127_i32_67 = arith.constant 127 : i32
    %145 = vector.broadcast %c127_i32_67 : i32 to vector<1x256xi32>
    %146 = arith.cmpi slt, %0, %145 : vector<1x256xi32>
    %cst_68 = arith.constant 0.000000e+00 : f32
    %147 = vector.shape_cast %146 : vector<1x256xi1> to vector<1x256xi1>
    %148 = vector.broadcast %147 : vector<1x256xi1> to vector<8x256xi1>
    %149 = vector.broadcast %cst_68 : f32 to vector<8x256xf32>
    %150 = arith.select %148, %144, %149 : vector<8x256xi1>, vector<8x256xf32>
    %c255_i32_69 = arith.constant 255 : i32
    %151 = tpu.dynamic_rotate %67 by %c255_i32_69 dim 1 : vector<8x256xf32>, i32 -> vector<8x256xf32>
    %c127_i32_70 = arith.constant 127 : i32
    %152 = vector.broadcast %c127_i32_70 : i32 to vector<1x256xi32>
    %153 = arith.cmpi slt, %0, %152 : vector<1x256xi32>
    %cst_71 = arith.constant 0.000000e+00 : f32
    %154 = vector.shape_cast %153 : vector<1x256xi1> to vector<1x256xi1>
    %155 = vector.broadcast %154 : vector<1x256xi1> to vector<8x256xi1>
    %156 = vector.broadcast %cst_71 : f32 to vector<8x256xf32>
    %157 = arith.select %155, %151, %156 : vector<8x256xi1>, vector<8x256xf32>
    %c254_i32 = arith.constant 254 : i32
    %158 = tpu.dynamic_rotate %56 by %c254_i32 dim 1 : vector<8x256xf32>, i32 -> vector<8x256xf32>
    %c126_i32 = arith.constant 126 : i32
    %159 = vector.broadcast %c126_i32 : i32 to vector<1x256xi32>
    %160 = arith.cmpi slt, %0, %159 : vector<1x256xi32>
    %cst_72 = arith.constant 0.000000e+00 : f32
    %161 = vector.shape_cast %160 : vector<1x256xi1> to vector<1x256xi1>
    %162 = vector.broadcast %161 : vector<1x256xi1> to vector<8x256xi1>
    %163 = vector.broadcast %cst_72 : f32 to vector<8x256xf32>
    %164 = arith.select %162, %158, %163 : vector<8x256xi1>, vector<8x256xf32>
    %165 = tpu.concatenate %136, %143, %56, %67, %150, %157, %164 in 0 : vector<8x256xf32>, vector<8x256xf32>, vector<8x256xf32>, vector<8x256xf32>, vector<8x256xf32>, vector<8x256xf32>, vector<8x256xf32> -> vector<56x256xf32>
    %cst_73 = arith.constant dense<0.000000e+00> : vector<8x256xf32>
    %166 = tpu.matmul %69, %165, %cst_73 {dimension_numbers = #tpu.dot_dimension_numbers<[1], [0], [0], [1], [0, 0, 1, 1], [], []>} : vector<8x56xf32>, vector<56x256xf32>, vector<8x256xf32> -> vector<8x256xf32>
    %167 = vector.extract_strided_slice %44 {offsets = [0, 0, 0], sizes = [1, 8, 1], strides = [1, 1, 1]} : vector<3x8x1xf32> to vector<1x8x1xf32>
    %168 = vector.shape_cast %167 : vector<1x8x1xf32> to vector<8x1xf32>
    %169 = vector.broadcast %168 : vector<8x1xf32> to vector<8x256xf32>
    %170 = arith.addf %166, %169 : vector<8x256xf32>
    %171 = vector.extract_strided_slice %42 {offsets = [0, 0, 0], sizes = [1, 8, 1], strides = [1, 1, 1]} : vector<3x8x1xf32> to vector<1x8x1xf32>
    %172 = vector.shape_cast %171 : vector<1x8x1xf32> to vector<8x1xf32>
    %173 = vector.extract_strided_slice %43 {offsets = [0, 0, 0], sizes = [1, 8, 1], strides = [1, 1, 1]} : vector<3x8x1xf32> to vector<1x8x1xf32>
    %174 = vector.shape_cast %173 : vector<1x8x1xf32> to vector<8x1xf32>
    %175 = vector.broadcast %172 : vector<8x1xf32> to vector<8x256xf32>
    %176 = arith.mulf %175, %170 : vector<8x256xf32>
    %177 = math.sin %176 : vector<8x256xf32>
    %178 = arith.mulf %177, %177 : vector<8x256xf32>
    %179 = vector.broadcast %174 : vector<8x1xf32> to vector<8x256xf32>
    %180 = arith.mulf %179, %178 : vector<8x256xf32>
    %181 = arith.addf %170, %180 : vector<8x256xf32>
    %cst_74 = arith.constant dense<0.000000e+00> : vector<8x256xf32>
    %182 = tpu.matmul %71, %181, %cst_74 {dimension_numbers = #tpu.dot_dimension_numbers<[1], [0], [0], [1], [0, 0, 1, 1], [], []>} : vector<8x8xf32>, vector<8x256xf32>, vector<8x256xf32> -> vector<8x256xf32>
    %183 = vector.extract_strided_slice %45 {offsets = [0, 0, 0], sizes = [1, 8, 1], strides = [1, 1, 1]} : vector<3x8x1xf32> to vector<1x8x1xf32>
    %184 = vector.shape_cast %183 : vector<1x8x1xf32> to vector<8x1xf32>
    %185 = vector.broadcast %184 : vector<8x1xf32> to vector<8x256xf32>
    %186 = arith.addf %182, %185 : vector<8x256xf32>
    %187 = arith.addf %39, %186 : vector<8x256xf32>
    %188 = vector.extract_strided_slice %40 {offsets = [1, 0, 0], sizes = [1, 8, 1], strides = [1, 1, 1]} : vector<3x8x1xf32> to vector<1x8x1xf32>
    %189 = vector.shape_cast %188 : vector<1x8x1xf32> to vector<8x1xf32>
    %190 = vector.extract_strided_slice %41 {offsets = [1, 0, 0], sizes = [1, 8, 1], strides = [1, 1, 1]} : vector<3x8x1xf32> to vector<1x8x1xf32>
    %191 = vector.shape_cast %190 : vector<1x8x1xf32> to vector<8x1xf32>
    %192 = vector.broadcast %189 : vector<8x1xf32> to vector<8x256xf32>
    %193 = arith.mulf %192, %129 : vector<8x256xf32>
    %194 = math.sin %193 : vector<8x256xf32>
    %195 = arith.mulf %194, %194 : vector<8x256xf32>
    %196 = vector.broadcast %191 : vector<8x1xf32> to vector<8x256xf32>
    %197 = arith.mulf %196, %195 : vector<8x256xf32>
    %198 = arith.addf %129, %197 : vector<8x256xf32>
    %199 = vector.extract_strided_slice %40 {offsets = [1, 0, 0], sizes = [1, 8, 1], strides = [1, 1, 1]} : vector<3x8x1xf32> to vector<1x8x1xf32>
    %200 = vector.shape_cast %199 : vector<1x8x1xf32> to vector<8x1xf32>
    %201 = vector.extract_strided_slice %41 {offsets = [1, 0, 0], sizes = [1, 8, 1], strides = [1, 1, 1]} : vector<3x8x1xf32> to vector<1x8x1xf32>
    %202 = vector.shape_cast %201 : vector<1x8x1xf32> to vector<8x1xf32>
    %203 = vector.broadcast %200 : vector<8x1xf32> to vector<8x256xf32>
    %204 = arith.mulf %203, %187 : vector<8x256xf32>
    %205 = math.sin %204 : vector<8x256xf32>
    %206 = arith.mulf %205, %205 : vector<8x256xf32>
    %207 = vector.broadcast %202 : vector<8x1xf32> to vector<8x256xf32>
    %208 = arith.mulf %207, %206 : vector<8x256xf32>
    %209 = arith.addf %187, %208 : vector<8x256xf32>
    %c1 = arith.constant 1 : index
    %c0_75 = arith.constant 0 : index
    %c0_76 = arith.constant 0 : index
    %210 = vector.load %arg11[%c1, %c0_75, %c0_76] : memref<3x8x56xf32, #tpu.memory_space<vmem>>, vector<1x8x56xf32>
    %211 = vector.shape_cast %210 : vector<1x8x56xf32> to vector<8x56xf32>
    %c1_77 = arith.constant 1 : index
    %c0_78 = arith.constant 0 : index
    %c0_79 = arith.constant 0 : index
    %212 = vector.load %arg15[%c1_77, %c0_78, %c0_79] : memref<3x8x8xf32, #tpu.memory_space<vmem>>, vector<1x8x8xf32>
    %213 = vector.shape_cast %212 : vector<1x8x8xf32> to vector<8x8xf32>
    %c5_i32 = arith.constant 5 : i32
    %214 = tpu.dynamic_rotate %209 by %c5_i32 dim 1 : vector<8x256xf32>, i32 -> vector<8x256xf32>
    %c5_i32_80 = arith.constant 5 : i32
    %215 = vector.broadcast %c5_i32_80 : i32 to vector<1x256xi32>
    %216 = arith.cmpi sge, %0, %215 : vector<1x256xi32>
    %cst_81 = arith.constant 0.000000e+00 : f32
    %217 = vector.shape_cast %216 : vector<1x256xi1> to vector<1x256xi1>
    %218 = vector.broadcast %217 : vector<1x256xi1> to vector<8x256xi1>
    %219 = vector.broadcast %cst_81 : f32 to vector<8x256xf32>
    %220 = arith.select %218, %214, %219 : vector<8x256xi1>, vector<8x256xf32>
    %c3_i32 = arith.constant 3 : i32
    %221 = tpu.dynamic_rotate %198 by %c3_i32 dim 1 : vector<8x256xf32>, i32 -> vector<8x256xf32>
    %c3_i32_82 = arith.constant 3 : i32
    %222 = vector.broadcast %c3_i32_82 : i32 to vector<1x256xi32>
    %223 = arith.cmpi sge, %0, %222 : vector<1x256xi32>
    %cst_83 = arith.constant 0.000000e+00 : f32
    %224 = vector.shape_cast %223 : vector<1x256xi1> to vector<1x256xi1>
    %225 = vector.broadcast %224 : vector<1x256xi1> to vector<8x256xi1>
    %226 = vector.broadcast %cst_83 : f32 to vector<8x256xf32>
    %227 = arith.select %225, %221, %226 : vector<8x256xi1>, vector<8x256xf32>
    %c2_i32_84 = arith.constant 2 : i32
    %228 = tpu.dynamic_rotate %209 by %c2_i32_84 dim 1 : vector<8x256xf32>, i32 -> vector<8x256xf32>
    %c2_i32_85 = arith.constant 2 : i32
    %229 = vector.broadcast %c2_i32_85 : i32 to vector<1x256xi32>
    %230 = arith.cmpi sge, %0, %229 : vector<1x256xi32>
    %cst_86 = arith.constant 0.000000e+00 : f32
    %231 = vector.shape_cast %230 : vector<1x256xi1> to vector<1x256xi1>
    %232 = vector.broadcast %231 : vector<1x256xi1> to vector<8x256xi1>
    %233 = vector.broadcast %cst_86 : f32 to vector<8x256xf32>
    %234 = arith.select %232, %228, %233 : vector<8x256xi1>, vector<8x256xf32>
    %c255_i32_87 = arith.constant 255 : i32
    %235 = tpu.dynamic_rotate %209 by %c255_i32_87 dim 1 : vector<8x256xf32>, i32 -> vector<8x256xf32>
    %c127_i32_88 = arith.constant 127 : i32
    %236 = vector.broadcast %c127_i32_88 : i32 to vector<1x256xi32>
    %237 = arith.cmpi slt, %0, %236 : vector<1x256xi32>
    %cst_89 = arith.constant 0.000000e+00 : f32
    %238 = vector.shape_cast %237 : vector<1x256xi1> to vector<1x256xi1>
    %239 = vector.broadcast %238 : vector<1x256xi1> to vector<8x256xi1>
    %240 = vector.broadcast %cst_89 : f32 to vector<8x256xf32>
    %241 = arith.select %239, %235, %240 : vector<8x256xi1>, vector<8x256xf32>
    %c253_i32 = arith.constant 253 : i32
    %242 = tpu.dynamic_rotate %198 by %c253_i32 dim 1 : vector<8x256xf32>, i32 -> vector<8x256xf32>
    %c125_i32 = arith.constant 125 : i32
    %243 = vector.broadcast %c125_i32 : i32 to vector<1x256xi32>
    %244 = arith.cmpi slt, %0, %243 : vector<1x256xi32>
    %cst_90 = arith.constant 0.000000e+00 : f32
    %245 = vector.shape_cast %244 : vector<1x256xi1> to vector<1x256xi1>
    %246 = vector.broadcast %245 : vector<1x256xi1> to vector<8x256xi1>
    %247 = vector.broadcast %cst_90 : f32 to vector<8x256xf32>
    %248 = arith.select %246, %242, %247 : vector<8x256xi1>, vector<8x256xf32>
    %c252_i32 = arith.constant 252 : i32
    %249 = tpu.dynamic_rotate %209 by %c252_i32 dim 1 : vector<8x256xf32>, i32 -> vector<8x256xf32>
    %c124_i32 = arith.constant 124 : i32
    %250 = vector.broadcast %c124_i32 : i32 to vector<1x256xi32>
    %251 = arith.cmpi slt, %0, %250 : vector<1x256xi32>
    %cst_91 = arith.constant 0.000000e+00 : f32
    %252 = vector.shape_cast %251 : vector<1x256xi1> to vector<1x256xi1>
    %253 = vector.broadcast %252 : vector<1x256xi1> to vector<8x256xi1>
    %254 = vector.broadcast %cst_91 : f32 to vector<8x256xf32>
    %255 = arith.select %253, %249, %254 : vector<8x256xi1>, vector<8x256xf32>
    %256 = tpu.concatenate %220, %227, %234, %198, %241, %248, %255 in 0 : vector<8x256xf32>, vector<8x256xf32>, vector<8x256xf32>, vector<8x256xf32>, vector<8x256xf32>, vector<8x256xf32>, vector<8x256xf32> -> vector<56x256xf32>
    %cst_92 = arith.constant dense<0.000000e+00> : vector<8x256xf32>
    %257 = tpu.matmul %211, %256, %cst_92 {dimension_numbers = #tpu.dot_dimension_numbers<[1], [0], [0], [1], [0, 0, 1, 1], [], []>} : vector<8x56xf32>, vector<56x256xf32>, vector<8x256xf32> -> vector<8x256xf32>
    %258 = vector.extract_strided_slice %44 {offsets = [1, 0, 0], sizes = [1, 8, 1], strides = [1, 1, 1]} : vector<3x8x1xf32> to vector<1x8x1xf32>
    %259 = vector.shape_cast %258 : vector<1x8x1xf32> to vector<8x1xf32>
    %260 = vector.broadcast %259 : vector<8x1xf32> to vector<8x256xf32>
    %261 = arith.addf %257, %260 : vector<8x256xf32>
    %262 = vector.extract_strided_slice %42 {offsets = [1, 0, 0], sizes = [1, 8, 1], strides = [1, 1, 1]} : vector<3x8x1xf32> to vector<1x8x1xf32>
    %263 = vector.shape_cast %262 : vector<1x8x1xf32> to vector<8x1xf32>
    %264 = vector.extract_strided_slice %43 {offsets = [1, 0, 0], sizes = [1, 8, 1], strides = [1, 1, 1]} : vector<3x8x1xf32> to vector<1x8x1xf32>
    %265 = vector.shape_cast %264 : vector<1x8x1xf32> to vector<8x1xf32>
    %266 = vector.broadcast %263 : vector<8x1xf32> to vector<8x256xf32>
    %267 = arith.mulf %266, %261 : vector<8x256xf32>
    %268 = math.sin %267 : vector<8x256xf32>
    %269 = arith.mulf %268, %268 : vector<8x256xf32>
    %270 = vector.broadcast %265 : vector<8x1xf32> to vector<8x256xf32>
    %271 = arith.mulf %270, %269 : vector<8x256xf32>
    %272 = arith.addf %261, %271 : vector<8x256xf32>
    %cst_93 = arith.constant dense<0.000000e+00> : vector<8x256xf32>
    %273 = tpu.matmul %213, %272, %cst_93 {dimension_numbers = #tpu.dot_dimension_numbers<[1], [0], [0], [1], [0, 0, 1, 1], [], []>} : vector<8x8xf32>, vector<8x256xf32>, vector<8x256xf32> -> vector<8x256xf32>
    %274 = vector.extract_strided_slice %45 {offsets = [1, 0, 0], sizes = [1, 8, 1], strides = [1, 1, 1]} : vector<3x8x1xf32> to vector<1x8x1xf32>
    %275 = vector.shape_cast %274 : vector<1x8x1xf32> to vector<8x1xf32>
    %276 = vector.broadcast %275 : vector<8x1xf32> to vector<8x256xf32>
    %277 = arith.addf %273, %276 : vector<8x256xf32>
    %278 = arith.addf %129, %277 : vector<8x256xf32>
    %c4_i32 = arith.constant 4 : i32
    %279 = tpu.dynamic_rotate %198 by %c4_i32 dim 1 : vector<8x256xf32>, i32 -> vector<8x256xf32>
    %c4_i32_94 = arith.constant 4 : i32
    %280 = vector.broadcast %c4_i32_94 : i32 to vector<1x256xi32>
    %281 = arith.cmpi sge, %0, %280 : vector<1x256xi32>
    %cst_95 = arith.constant 0.000000e+00 : f32
    %282 = vector.shape_cast %281 : vector<1x256xi1> to vector<1x256xi1>
    %283 = vector.broadcast %282 : vector<1x256xi1> to vector<8x256xi1>
    %284 = vector.broadcast %cst_95 : f32 to vector<8x256xf32>
    %285 = arith.select %283, %279, %284 : vector<8x256xi1>, vector<8x256xf32>
    %c3_i32_96 = arith.constant 3 : i32
    %286 = tpu.dynamic_rotate %209 by %c3_i32_96 dim 1 : vector<8x256xf32>, i32 -> vector<8x256xf32>
    %c3_i32_97 = arith.constant 3 : i32
    %287 = vector.broadcast %c3_i32_97 : i32 to vector<1x256xi32>
    %288 = arith.cmpi sge, %0, %287 : vector<1x256xi32>
    %cst_98 = arith.constant 0.000000e+00 : f32
    %289 = vector.shape_cast %288 : vector<1x256xi1> to vector<1x256xi1>
    %290 = vector.broadcast %289 : vector<1x256xi1> to vector<8x256xi1>
    %291 = vector.broadcast %cst_98 : f32 to vector<8x256xf32>
    %292 = arith.select %290, %286, %291 : vector<8x256xi1>, vector<8x256xf32>
    %c1_i32_99 = arith.constant 1 : i32
    %293 = tpu.dynamic_rotate %198 by %c1_i32_99 dim 1 : vector<8x256xf32>, i32 -> vector<8x256xf32>
    %c1_i32_100 = arith.constant 1 : i32
    %294 = vector.broadcast %c1_i32_100 : i32 to vector<1x256xi32>
    %295 = arith.cmpi sge, %0, %294 : vector<1x256xi32>
    %cst_101 = arith.constant 0.000000e+00 : f32
    %296 = vector.shape_cast %295 : vector<1x256xi1> to vector<1x256xi1>
    %297 = vector.broadcast %296 : vector<1x256xi1> to vector<8x256xi1>
    %298 = vector.broadcast %cst_101 : f32 to vector<8x256xf32>
    %299 = arith.select %297, %293, %298 : vector<8x256xi1>, vector<8x256xf32>
    %c254_i32_102 = arith.constant 254 : i32
    %300 = tpu.dynamic_rotate %198 by %c254_i32_102 dim 1 : vector<8x256xf32>, i32 -> vector<8x256xf32>
    %c126_i32_103 = arith.constant 126 : i32
    %301 = vector.broadcast %c126_i32_103 : i32 to vector<1x256xi32>
    %302 = arith.cmpi slt, %0, %301 : vector<1x256xi32>
    %cst_104 = arith.constant 0.000000e+00 : f32
    %303 = vector.shape_cast %302 : vector<1x256xi1> to vector<1x256xi1>
    %304 = vector.broadcast %303 : vector<1x256xi1> to vector<8x256xi1>
    %305 = vector.broadcast %cst_104 : f32 to vector<8x256xf32>
    %306 = arith.select %304, %300, %305 : vector<8x256xi1>, vector<8x256xf32>
    %c253_i32_105 = arith.constant 253 : i32
    %307 = tpu.dynamic_rotate %209 by %c253_i32_105 dim 1 : vector<8x256xf32>, i32 -> vector<8x256xf32>
    %c125_i32_106 = arith.constant 125 : i32
    %308 = vector.broadcast %c125_i32_106 : i32 to vector<1x256xi32>
    %309 = arith.cmpi slt, %0, %308 : vector<1x256xi32>
    %cst_107 = arith.constant 0.000000e+00 : f32
    %310 = vector.shape_cast %309 : vector<1x256xi1> to vector<1x256xi1>
    %311 = vector.broadcast %310 : vector<1x256xi1> to vector<8x256xi1>
    %312 = vector.broadcast %cst_107 : f32 to vector<8x256xf32>
    %313 = arith.select %311, %307, %312 : vector<8x256xi1>, vector<8x256xf32>
    %c251_i32 = arith.constant 251 : i32
    %314 = tpu.dynamic_rotate %198 by %c251_i32 dim 1 : vector<8x256xf32>, i32 -> vector<8x256xf32>
    %c123_i32 = arith.constant 123 : i32
    %315 = vector.broadcast %c123_i32 : i32 to vector<1x256xi32>
    %316 = arith.cmpi slt, %0, %315 : vector<1x256xi32>
    %cst_108 = arith.constant 0.000000e+00 : f32
    %317 = vector.shape_cast %316 : vector<1x256xi1> to vector<1x256xi1>
    %318 = vector.broadcast %317 : vector<1x256xi1> to vector<8x256xi1>
    %319 = vector.broadcast %cst_108 : f32 to vector<8x256xf32>
    %320 = arith.select %318, %314, %319 : vector<8x256xi1>, vector<8x256xf32>
    %321 = tpu.concatenate %285, %292, %299, %209, %306, %313, %320 in 0 : vector<8x256xf32>, vector<8x256xf32>, vector<8x256xf32>, vector<8x256xf32>, vector<8x256xf32>, vector<8x256xf32>, vector<8x256xf32> -> vector<56x256xf32>
    %cst_109 = arith.constant dense<0.000000e+00> : vector<8x256xf32>
    %322 = tpu.matmul %211, %321, %cst_109 {dimension_numbers = #tpu.dot_dimension_numbers<[1], [0], [0], [1], [0, 0, 1, 1], [], []>} : vector<8x56xf32>, vector<56x256xf32>, vector<8x256xf32> -> vector<8x256xf32>
    %323 = vector.extract_strided_slice %44 {offsets = [1, 0, 0], sizes = [1, 8, 1], strides = [1, 1, 1]} : vector<3x8x1xf32> to vector<1x8x1xf32>
    %324 = vector.shape_cast %323 : vector<1x8x1xf32> to vector<8x1xf32>
    %325 = vector.broadcast %324 : vector<8x1xf32> to vector<8x256xf32>
    %326 = arith.addf %322, %325 : vector<8x256xf32>
    %327 = vector.extract_strided_slice %42 {offsets = [1, 0, 0], sizes = [1, 8, 1], strides = [1, 1, 1]} : vector<3x8x1xf32> to vector<1x8x1xf32>
    %328 = vector.shape_cast %327 : vector<1x8x1xf32> to vector<8x1xf32>
    %329 = vector.extract_strided_slice %43 {offsets = [1, 0, 0], sizes = [1, 8, 1], strides = [1, 1, 1]} : vector<3x8x1xf32> to vector<1x8x1xf32>
    %330 = vector.shape_cast %329 : vector<1x8x1xf32> to vector<8x1xf32>
    %331 = vector.broadcast %328 : vector<8x1xf32> to vector<8x256xf32>
    %332 = arith.mulf %331, %326 : vector<8x256xf32>
    %333 = math.sin %332 : vector<8x256xf32>
    %334 = arith.mulf %333, %333 : vector<8x256xf32>
    %335 = vector.broadcast %330 : vector<8x1xf32> to vector<8x256xf32>
    %336 = arith.mulf %335, %334 : vector<8x256xf32>
    %337 = arith.addf %326, %336 : vector<8x256xf32>
    %cst_110 = arith.constant dense<0.000000e+00> : vector<8x256xf32>
    %338 = tpu.matmul %213, %337, %cst_110 {dimension_numbers = #tpu.dot_dimension_numbers<[1], [0], [0], [1], [0, 0, 1, 1], [], []>} : vector<8x8xf32>, vector<8x256xf32>, vector<8x256xf32> -> vector<8x256xf32>
    %339 = vector.extract_strided_slice %45 {offsets = [1, 0, 0], sizes = [1, 8, 1], strides = [1, 1, 1]} : vector<3x8x1xf32> to vector<1x8x1xf32>
    %340 = vector.shape_cast %339 : vector<1x8x1xf32> to vector<8x1xf32>
    %341 = vector.broadcast %340 : vector<8x1xf32> to vector<8x256xf32>
    %342 = arith.addf %338, %341 : vector<8x256xf32>
    %343 = arith.addf %187, %342 : vector<8x256xf32>
    %344 = vector.extract_strided_slice %40 {offsets = [2, 0, 0], sizes = [1, 8, 1], strides = [1, 1, 1]} : vector<3x8x1xf32> to vector<1x8x1xf32>
    %345 = vector.shape_cast %344 : vector<1x8x1xf32> to vector<8x1xf32>
    %346 = vector.extract_strided_slice %41 {offsets = [2, 0, 0], sizes = [1, 8, 1], strides = [1, 1, 1]} : vector<3x8x1xf32> to vector<1x8x1xf32>
    %347 = vector.shape_cast %346 : vector<1x8x1xf32> to vector<8x1xf32>
    %348 = vector.broadcast %345 : vector<8x1xf32> to vector<8x256xf32>
    %349 = arith.mulf %348, %278 : vector<8x256xf32>
    %350 = math.sin %349 : vector<8x256xf32>
    %351 = arith.mulf %350, %350 : vector<8x256xf32>
    %352 = vector.broadcast %347 : vector<8x1xf32> to vector<8x256xf32>
    %353 = arith.mulf %352, %351 : vector<8x256xf32>
    %354 = arith.addf %278, %353 : vector<8x256xf32>
    %355 = vector.extract_strided_slice %40 {offsets = [2, 0, 0], sizes = [1, 8, 1], strides = [1, 1, 1]} : vector<3x8x1xf32> to vector<1x8x1xf32>
    %356 = vector.shape_cast %355 : vector<1x8x1xf32> to vector<8x1xf32>
    %357 = vector.extract_strided_slice %41 {offsets = [2, 0, 0], sizes = [1, 8, 1], strides = [1, 1, 1]} : vector<3x8x1xf32> to vector<1x8x1xf32>
    %358 = vector.shape_cast %357 : vector<1x8x1xf32> to vector<8x1xf32>
    %359 = vector.broadcast %356 : vector<8x1xf32> to vector<8x256xf32>
    %360 = arith.mulf %359, %343 : vector<8x256xf32>
    %361 = math.sin %360 : vector<8x256xf32>
    %362 = arith.mulf %361, %361 : vector<8x256xf32>
    %363 = vector.broadcast %358 : vector<8x1xf32> to vector<8x256xf32>
    %364 = arith.mulf %363, %362 : vector<8x256xf32>
    %365 = arith.addf %343, %364 : vector<8x256xf32>
    %c2 = arith.constant 2 : index
    %c0_111 = arith.constant 0 : index
    %c0_112 = arith.constant 0 : index
    %366 = vector.load %arg11[%c2, %c0_111, %c0_112] : memref<3x8x56xf32, #tpu.memory_space<vmem>>, vector<1x8x56xf32>
    %367 = vector.shape_cast %366 : vector<1x8x56xf32> to vector<8x56xf32>
    %c2_113 = arith.constant 2 : index
    %c0_114 = arith.constant 0 : index
    %c0_115 = arith.constant 0 : index
    %368 = vector.load %arg15[%c2_113, %c0_114, %c0_115] : memref<3x8x8xf32, #tpu.memory_space<vmem>>, vector<1x8x8xf32>
    %369 = vector.shape_cast %368 : vector<1x8x8xf32> to vector<8x8xf32>
    %c14_i32 = arith.constant 14 : i32
    %370 = tpu.dynamic_rotate %365 by %c14_i32 dim 1 : vector<8x256xf32>, i32 -> vector<8x256xf32>
    %c14_i32_116 = arith.constant 14 : i32
    %371 = vector.broadcast %c14_i32_116 : i32 to vector<1x256xi32>
    %372 = arith.cmpi sge, %0, %371 : vector<1x256xi32>
    %cst_117 = arith.constant 0.000000e+00 : f32
    %373 = vector.shape_cast %372 : vector<1x256xi1> to vector<1x256xi1>
    %374 = vector.broadcast %373 : vector<1x256xi1> to vector<8x256xi1>
    %375 = vector.broadcast %cst_117 : f32 to vector<8x256xf32>
    %376 = arith.select %374, %370, %375 : vector<8x256xi1>, vector<8x256xf32>
    %c9_i32 = arith.constant 9 : i32
    %377 = tpu.dynamic_rotate %354 by %c9_i32 dim 1 : vector<8x256xf32>, i32 -> vector<8x256xf32>
    %c9_i32_118 = arith.constant 9 : i32
    %378 = vector.broadcast %c9_i32_118 : i32 to vector<1x256xi32>
    %379 = arith.cmpi sge, %0, %378 : vector<1x256xi32>
    %cst_119 = arith.constant 0.000000e+00 : f32
    %380 = vector.shape_cast %379 : vector<1x256xi1> to vector<1x256xi1>
    %381 = vector.broadcast %380 : vector<1x256xi1> to vector<8x256xi1>
    %382 = vector.broadcast %cst_119 : f32 to vector<8x256xf32>
    %383 = arith.select %381, %377, %382 : vector<8x256xi1>, vector<8x256xf32>
    %c5_i32_120 = arith.constant 5 : i32
    %384 = tpu.dynamic_rotate %365 by %c5_i32_120 dim 1 : vector<8x256xf32>, i32 -> vector<8x256xf32>
    %c5_i32_121 = arith.constant 5 : i32
    %385 = vector.broadcast %c5_i32_121 : i32 to vector<1x256xi32>
    %386 = arith.cmpi sge, %0, %385 : vector<1x256xi32>
    %cst_122 = arith.constant 0.000000e+00 : f32
    %387 = vector.shape_cast %386 : vector<1x256xi1> to vector<1x256xi1>
    %388 = vector.broadcast %387 : vector<1x256xi1> to vector<8x256xi1>
    %389 = vector.broadcast %cst_122 : f32 to vector<8x256xf32>
    %390 = arith.select %388, %384, %389 : vector<8x256xi1>, vector<8x256xf32>
    %c252_i32_123 = arith.constant 252 : i32
    %391 = tpu.dynamic_rotate %365 by %c252_i32_123 dim 1 : vector<8x256xf32>, i32 -> vector<8x256xf32>
    %c124_i32_124 = arith.constant 124 : i32
    %392 = vector.broadcast %c124_i32_124 : i32 to vector<1x256xi32>
    %393 = arith.cmpi slt, %0, %392 : vector<1x256xi32>
    %cst_125 = arith.constant 0.000000e+00 : f32
    %394 = vector.shape_cast %393 : vector<1x256xi1> to vector<1x256xi1>
    %395 = vector.broadcast %394 : vector<1x256xi1> to vector<8x256xi1>
    %396 = vector.broadcast %cst_125 : f32 to vector<8x256xf32>
    %397 = arith.select %395, %391, %396 : vector<8x256xi1>, vector<8x256xf32>
    %c247_i32 = arith.constant 247 : i32
    %398 = tpu.dynamic_rotate %354 by %c247_i32 dim 1 : vector<8x256xf32>, i32 -> vector<8x256xf32>
    %c119_i32 = arith.constant 119 : i32
    %399 = vector.broadcast %c119_i32 : i32 to vector<1x256xi32>
    %400 = arith.cmpi slt, %0, %399 : vector<1x256xi32>
    %cst_126 = arith.constant 0.000000e+00 : f32
    %401 = vector.shape_cast %400 : vector<1x256xi1> to vector<1x256xi1>
    %402 = vector.broadcast %401 : vector<1x256xi1> to vector<8x256xi1>
    %403 = vector.broadcast %cst_126 : f32 to vector<8x256xf32>
    %404 = arith.select %402, %398, %403 : vector<8x256xi1>, vector<8x256xf32>
    %c243_i32 = arith.constant 243 : i32
    %405 = tpu.dynamic_rotate %365 by %c243_i32 dim 1 : vector<8x256xf32>, i32 -> vector<8x256xf32>
    %c115_i32 = arith.constant 115 : i32
    %406 = vector.broadcast %c115_i32 : i32 to vector<1x256xi32>
    %407 = arith.cmpi slt, %0, %406 : vector<1x256xi32>
    %cst_127 = arith.constant 0.000000e+00 : f32
    %408 = vector.shape_cast %407 : vector<1x256xi1> to vector<1x256xi1>
    %409 = vector.broadcast %408 : vector<1x256xi1> to vector<8x256xi1>
    %410 = vector.broadcast %cst_127 : f32 to vector<8x256xf32>
    %411 = arith.select %409, %405, %410 : vector<8x256xi1>, vector<8x256xf32>
    %412 = tpu.concatenate %376, %383, %390, %354, %397, %404, %411 in 0 : vector<8x256xf32>, vector<8x256xf32>, vector<8x256xf32>, vector<8x256xf32>, vector<8x256xf32>, vector<8x256xf32>, vector<8x256xf32> -> vector<56x256xf32>
    %cst_128 = arith.constant dense<0.000000e+00> : vector<8x256xf32>
    %413 = tpu.matmul %367, %412, %cst_128 {dimension_numbers = #tpu.dot_dimension_numbers<[1], [0], [0], [1], [0, 0, 1, 1], [], []>} : vector<8x56xf32>, vector<56x256xf32>, vector<8x256xf32> -> vector<8x256xf32>
    %414 = vector.extract_strided_slice %44 {offsets = [2, 0, 0], sizes = [1, 8, 1], strides = [1, 1, 1]} : vector<3x8x1xf32> to vector<1x8x1xf32>
    %415 = vector.shape_cast %414 : vector<1x8x1xf32> to vector<8x1xf32>
    %416 = vector.broadcast %415 : vector<8x1xf32> to vector<8x256xf32>
    %417 = arith.addf %413, %416 : vector<8x256xf32>
    %418 = vector.extract_strided_slice %42 {offsets = [2, 0, 0], sizes = [1, 8, 1], strides = [1, 1, 1]} : vector<3x8x1xf32> to vector<1x8x1xf32>
    %419 = vector.shape_cast %418 : vector<1x8x1xf32> to vector<8x1xf32>
    %420 = vector.extract_strided_slice %43 {offsets = [2, 0, 0], sizes = [1, 8, 1], strides = [1, 1, 1]} : vector<3x8x1xf32> to vector<1x8x1xf32>
    %421 = vector.shape_cast %420 : vector<1x8x1xf32> to vector<8x1xf32>
    %422 = vector.broadcast %419 : vector<8x1xf32> to vector<8x256xf32>
    %423 = arith.mulf %422, %417 : vector<8x256xf32>
    %424 = math.sin %423 : vector<8x256xf32>
    %425 = arith.mulf %424, %424 : vector<8x256xf32>
    %426 = vector.broadcast %421 : vector<8x1xf32> to vector<8x256xf32>
    %427 = arith.mulf %426, %425 : vector<8x256xf32>
    %428 = arith.addf %417, %427 : vector<8x256xf32>
    %cst_129 = arith.constant dense<0.000000e+00> : vector<8x256xf32>
    %429 = tpu.matmul %369, %428, %cst_129 {dimension_numbers = #tpu.dot_dimension_numbers<[1], [0], [0], [1], [0, 0, 1, 1], [], []>} : vector<8x8xf32>, vector<8x256xf32>, vector<8x256xf32> -> vector<8x256xf32>
    %430 = vector.extract_strided_slice %45 {offsets = [2, 0, 0], sizes = [1, 8, 1], strides = [1, 1, 1]} : vector<3x8x1xf32> to vector<1x8x1xf32>
    %431 = vector.shape_cast %430 : vector<1x8x1xf32> to vector<8x1xf32>
    %432 = vector.broadcast %431 : vector<8x1xf32> to vector<8x256xf32>
    %433 = arith.addf %429, %432 : vector<8x256xf32>
    %434 = arith.addf %278, %433 : vector<8x256xf32>
    %c13_i32 = arith.constant 13 : i32
    %435 = tpu.dynamic_rotate %354 by %c13_i32 dim 1 : vector<8x256xf32>, i32 -> vector<8x256xf32>
    %c13_i32_130 = arith.constant 13 : i32
    %436 = vector.broadcast %c13_i32_130 : i32 to vector<1x256xi32>
    %437 = arith.cmpi sge, %0, %436 : vector<1x256xi32>
    %cst_131 = arith.constant 0.000000e+00 : f32
    %438 = vector.shape_cast %437 : vector<1x256xi1> to vector<1x256xi1>
    %439 = vector.broadcast %438 : vector<1x256xi1> to vector<8x256xi1>
    %440 = vector.broadcast %cst_131 : f32 to vector<8x256xf32>
    %441 = arith.select %439, %435, %440 : vector<8x256xi1>, vector<8x256xf32>
    %c9_i32_132 = arith.constant 9 : i32
    %442 = tpu.dynamic_rotate %365 by %c9_i32_132 dim 1 : vector<8x256xf32>, i32 -> vector<8x256xf32>
    %c9_i32_133 = arith.constant 9 : i32
    %443 = vector.broadcast %c9_i32_133 : i32 to vector<1x256xi32>
    %444 = arith.cmpi sge, %0, %443 : vector<1x256xi32>
    %cst_134 = arith.constant 0.000000e+00 : f32
    %445 = vector.shape_cast %444 : vector<1x256xi1> to vector<1x256xi1>
    %446 = vector.broadcast %445 : vector<1x256xi1> to vector<8x256xi1>
    %447 = vector.broadcast %cst_134 : f32 to vector<8x256xf32>
    %448 = arith.select %446, %442, %447 : vector<8x256xi1>, vector<8x256xf32>
    %c4_i32_135 = arith.constant 4 : i32
    %449 = tpu.dynamic_rotate %354 by %c4_i32_135 dim 1 : vector<8x256xf32>, i32 -> vector<8x256xf32>
    %c4_i32_136 = arith.constant 4 : i32
    %450 = vector.broadcast %c4_i32_136 : i32 to vector<1x256xi32>
    %451 = arith.cmpi sge, %0, %450 : vector<1x256xi32>
    %cst_137 = arith.constant 0.000000e+00 : f32
    %452 = vector.shape_cast %451 : vector<1x256xi1> to vector<1x256xi1>
    %453 = vector.broadcast %452 : vector<1x256xi1> to vector<8x256xi1>
    %454 = vector.broadcast %cst_137 : f32 to vector<8x256xf32>
    %455 = arith.select %453, %449, %454 : vector<8x256xi1>, vector<8x256xf32>
    %c251_i32_138 = arith.constant 251 : i32
    %456 = tpu.dynamic_rotate %354 by %c251_i32_138 dim 1 : vector<8x256xf32>, i32 -> vector<8x256xf32>
    %c123_i32_139 = arith.constant 123 : i32
    %457 = vector.broadcast %c123_i32_139 : i32 to vector<1x256xi32>
    %458 = arith.cmpi slt, %0, %457 : vector<1x256xi32>
    %cst_140 = arith.constant 0.000000e+00 : f32
    %459 = vector.shape_cast %458 : vector<1x256xi1> to vector<1x256xi1>
    %460 = vector.broadcast %459 : vector<1x256xi1> to vector<8x256xi1>
    %461 = vector.broadcast %cst_140 : f32 to vector<8x256xf32>
    %462 = arith.select %460, %456, %461 : vector<8x256xi1>, vector<8x256xf32>
    %c247_i32_141 = arith.constant 247 : i32
    %463 = tpu.dynamic_rotate %365 by %c247_i32_141 dim 1 : vector<8x256xf32>, i32 -> vector<8x256xf32>
    %c119_i32_142 = arith.constant 119 : i32
    %464 = vector.broadcast %c119_i32_142 : i32 to vector<1x256xi32>
    %465 = arith.cmpi slt, %0, %464 : vector<1x256xi32>
    %cst_143 = arith.constant 0.000000e+00 : f32
    %466 = vector.shape_cast %465 : vector<1x256xi1> to vector<1x256xi1>
    %467 = vector.broadcast %466 : vector<1x256xi1> to vector<8x256xi1>
    %468 = vector.broadcast %cst_143 : f32 to vector<8x256xf32>
    %469 = arith.select %467, %463, %468 : vector<8x256xi1>, vector<8x256xf32>
    %c242_i32 = arith.constant 242 : i32
    %470 = tpu.dynamic_rotate %354 by %c242_i32 dim 1 : vector<8x256xf32>, i32 -> vector<8x256xf32>
    %c114_i32 = arith.constant 114 : i32
    %471 = vector.broadcast %c114_i32 : i32 to vector<1x256xi32>
    %472 = arith.cmpi slt, %0, %471 : vector<1x256xi32>
    %cst_144 = arith.constant 0.000000e+00 : f32
    %473 = vector.shape_cast %472 : vector<1x256xi1> to vector<1x256xi1>
    %474 = vector.broadcast %473 : vector<1x256xi1> to vector<8x256xi1>
    %475 = vector.broadcast %cst_144 : f32 to vector<8x256xf32>
    %476 = arith.select %474, %470, %475 : vector<8x256xi1>, vector<8x256xf32>
    %477 = tpu.concatenate %441, %448, %455, %365, %462, %469, %476 in 0 : vector<8x256xf32>, vector<8x256xf32>, vector<8x256xf32>, vector<8x256xf32>, vector<8x256xf32>, vector<8x256xf32>, vector<8x256xf32> -> vector<56x256xf32>
    %cst_145 = arith.constant dense<0.000000e+00> : vector<8x256xf32>
    %478 = tpu.matmul %367, %477, %cst_145 {dimension_numbers = #tpu.dot_dimension_numbers<[1], [0], [0], [1], [0, 0, 1, 1], [], []>} : vector<8x56xf32>, vector<56x256xf32>, vector<8x256xf32> -> vector<8x256xf32>
    %479 = vector.extract_strided_slice %44 {offsets = [2, 0, 0], sizes = [1, 8, 1], strides = [1, 1, 1]} : vector<3x8x1xf32> to vector<1x8x1xf32>
    %480 = vector.shape_cast %479 : vector<1x8x1xf32> to vector<8x1xf32>
    %481 = vector.broadcast %480 : vector<8x1xf32> to vector<8x256xf32>
    %482 = arith.addf %478, %481 : vector<8x256xf32>
    %483 = vector.extract_strided_slice %42 {offsets = [2, 0, 0], sizes = [1, 8, 1], strides = [1, 1, 1]} : vector<3x8x1xf32> to vector<1x8x1xf32>
    %484 = vector.shape_cast %483 : vector<1x8x1xf32> to vector<8x1xf32>
    %485 = vector.extract_strided_slice %43 {offsets = [2, 0, 0], sizes = [1, 8, 1], strides = [1, 1, 1]} : vector<3x8x1xf32> to vector<1x8x1xf32>
    %486 = vector.shape_cast %485 : vector<1x8x1xf32> to vector<8x1xf32>
    %487 = vector.broadcast %484 : vector<8x1xf32> to vector<8x256xf32>
    %488 = arith.mulf %487, %482 : vector<8x256xf32>
    %489 = math.sin %488 : vector<8x256xf32>
    %490 = arith.mulf %489, %489 : vector<8x256xf32>
    %491 = vector.broadcast %486 : vector<8x1xf32> to vector<8x256xf32>
    %492 = arith.mulf %491, %490 : vector<8x256xf32>
    %493 = arith.addf %482, %492 : vector<8x256xf32>
    %cst_146 = arith.constant dense<0.000000e+00> : vector<8x256xf32>
    %494 = tpu.matmul %369, %493, %cst_146 {dimension_numbers = #tpu.dot_dimension_numbers<[1], [0], [0], [1], [0, 0, 1, 1], [], []>} : vector<8x8xf32>, vector<8x256xf32>, vector<8x256xf32> -> vector<8x256xf32>
    %495 = vector.extract_strided_slice %45 {offsets = [2, 0, 0], sizes = [1, 8, 1], strides = [1, 1, 1]} : vector<3x8x1xf32> to vector<1x8x1xf32>
    %496 = vector.shape_cast %495 : vector<1x8x1xf32> to vector<8x1xf32>
    %497 = vector.broadcast %496 : vector<8x1xf32> to vector<8x256xf32>
    %498 = arith.addf %494, %497 : vector<8x256xf32>
    %499 = arith.addf %343, %498 : vector<8x256xf32>
    %c0_147 = arith.constant 0 : index
    %c0_148 = arith.constant 0 : index
    %c0_149 = arith.constant 0 : index
    %500 = vector.load %arg17[%c0_147, %c0_148, %c0_149] : memref<2x8x256xf32, #tpu.memory_space<vmem>>, vector<1x8x256xf32>
    %501 = vector.shape_cast %500 : vector<1x8x256xf32> to vector<8x256xf32>
    %502 = vector.shape_cast %434 : vector<8x256xf32> to vector<1x8x256xf32>
    tpu.vector_store %arg17[%c0_147, %c0_148, %c0_149], %502 {strides = array<i32>} : memref<2x8x256xf32, #tpu.memory_space<vmem>>, vector<1x8x256xf32>,
    %c1_150 = arith.constant 1 : index
    %c0_151 = arith.constant 0 : index
    %c0_152 = arith.constant 0 : index
    %503 = vector.load %arg17[%c1_150, %c0_151, %c0_152] : memref<2x8x256xf32, #tpu.memory_space<vmem>>, vector<1x8x256xf32>
    %504 = vector.shape_cast %503 : vector<1x8x256xf32> to vector<8x256xf32>
    %505 = vector.shape_cast %499 : vector<8x256xf32> to vector<1x8x256xf32>
    tpu.vector_store %arg17[%c1_150, %c0_151, %c0_152], %505 {strides = array<i32>} : memref<2x8x256xf32, #tpu.memory_space<vmem>>, vector<1x8x256xf32>,
    return
  }
  func.func @transform_0(%arg0: i32) -> (i32, i32) {
    %c0_i32 = arith.constant 0 : i32
    %c0_i32_0 = arith.constant 0 : i32
    return %c0_i32, %arg0 : i32, i32
  }
  func.func @transform_1(%arg0: i32) -> (i32, i32) {
    %c0_i32 = arith.constant 0 : i32
    %c0_i32_0 = arith.constant 0 : i32
    return %c0_i32, %arg0 : i32, i32
  }
  func.func @transform_2(%arg0: i32) -> (i32, i32) {
    %c0_i32 = arith.constant 0 : i32
    %c0_i32_0 = arith.constant 0 : i32
    %c0_i32_1 = arith.constant 0 : i32
    return %c0_i32, %c0_i32_0 : i32, i32
  }
  func.func @transform_3(%arg0: i32) -> (i32, i32) {
    %c0_i32 = arith.constant 0 : i32
    %c0_i32_0 = arith.constant 0 : i32
    %c0_i32_1 = arith.constant 0 : i32
    return %c0_i32, %c0_i32_0 : i32, i32
  }
  func.func @transform_4(%arg0: i32) -> (i32, i32) {
    %c0_i32 = arith.constant 0 : i32
    %c0_i32_0 = arith.constant 0 : i32
    %c0_i32_1 = arith.constant 0 : i32
    return %c0_i32, %c0_i32_0 : i32, i32
  }
  func.func @transform_5(%arg0: i32) -> (i32, i32) {
    %c0_i32 = arith.constant 0 : i32
    %c0_i32_0 = arith.constant 0 : i32
    %c0_i32_1 = arith.constant 0 : i32
    return %c0_i32, %c0_i32_0 : i32, i32
  }
  func.func @transform_6(%arg0: i32) -> (i32, i32) {
    %c0_i32 = arith.constant 0 : i32
    %c0_i32_0 = arith.constant 0 : i32
    %c0_i32_1 = arith.constant 0 : i32
    return %c0_i32, %c0_i32_0 : i32, i32
  }
  func.func @transform_7(%arg0: i32) -> (i32, i32) {
    %c0_i32 = arith.constant 0 : i32
    %c0_i32_0 = arith.constant 0 : i32
    %c0_i32_1 = arith.constant 0 : i32
    return %c0_i32, %c0_i32_0 : i32, i32
  }
  func.func @transform_8(%arg0: i32) -> (i32, i32, i32) {
    %c0_i32 = arith.constant 0 : i32
    %c0_i32_0 = arith.constant 0 : i32
    %c0_i32_1 = arith.constant 0 : i32
    %c0_i32_2 = arith.constant 0 : i32
    return %c0_i32, %c0_i32_0, %c0_i32_1 : i32, i32, i32
  }
  func.func @transform_9(%arg0: i32) -> (i32, i32, i32) {
    %c0_i32 = arith.constant 0 : i32
    %c0_i32_0 = arith.constant 0 : i32
    %c0_i32_1 = arith.constant 0 : i32
    %c0_i32_2 = arith.constant 0 : i32
    return %c0_i32, %c0_i32_0, %c0_i32_1 : i32, i32, i32
  }
  func.func @transform_10(%arg0: i32) -> (i32, i32, i32) {
    %c0_i32 = arith.constant 0 : i32
    %c0_i32_0 = arith.constant 0 : i32
    %c0_i32_1 = arith.constant 0 : i32
    %c0_i32_2 = arith.constant 0 : i32
    return %c0_i32, %c0_i32_0, %c0_i32_1 : i32, i32, i32
  }
  func.func @transform_11(%arg0: i32) -> (i32, i32, i32) {
    %c0_i32 = arith.constant 0 : i32
    %c0_i32_0 = arith.constant 0 : i32
    %c0_i32_1 = arith.constant 0 : i32
    %c0_i32_2 = arith.constant 0 : i32
    return %c0_i32, %c0_i32_0, %c0_i32_1 : i32, i32, i32
  }
  func.func @transform_12(%arg0: i32) -> (i32, i32, i32) {
    %c0_i32 = arith.constant 0 : i32
    %c0_i32_0 = arith.constant 0 : i32
    %c0_i32_1 = arith.constant 0 : i32
    %c0_i32_2 = arith.constant 0 : i32
    return %c0_i32, %c0_i32_0, %c0_i32_1 : i32, i32, i32
  }
  func.func @transform_13(%arg0: i32) -> (i32, i32, i32) {
    %c0_i32 = arith.constant 0 : i32
    %c0_i32_0 = arith.constant 0 : i32
    %c0_i32_1 = arith.constant 0 : i32
    %c0_i32_2 = arith.constant 0 : i32
    return %c0_i32, %c0_i32_0, %c0_i32_1 : i32, i32, i32
  }
  func.func @transform_14(%arg0: i32) -> (i32, i32, i32) {
    %c0_i32 = arith.constant 0 : i32
    %c0_i32_0 = arith.constant 0 : i32
    %c0_i32_1 = arith.constant 0 : i32
    %c0_i32_2 = arith.constant 0 : i32
    return %c0_i32, %c0_i32_0, %c0_i32_1 : i32, i32, i32
  }
  func.func @transform_15(%arg0: i32) -> (i32, i32, i32) {
    %c0_i32 = arith.constant 0 : i32
    %c0_i32_0 = arith.constant 0 : i32
    %c0_i32_1 = arith.constant 0 : i32
    %c0_i32_2 = arith.constant 0 : i32
    return %c0_i32, %c0_i32_0, %c0_i32_1 : i32, i32, i32
  }
  func.func @transform_16(%arg0: i32) -> (i32, i32, i32) {
    %c0_i32 = arith.constant 0 : i32
    %c0_i32_0 = arith.constant 0 : i32
    %c0_i32_1 = arith.constant 0 : i32
    return %c0_i32, %c0_i32_0, %arg0 : i32, i32, i32
  }
}

</mosaic_0001>

<bundles_post_ra>
// kernel: tpu_custom_call.1
= control target key start
LH: loop header
LB: loop body
LE: loop exit
PB: predicated region body
PF: predicated region fallthrough
CT: control target
= control target key end

     0   :  { %s10084_s0 = inlined_call_operand.vmem [shape: f32[16,256], index: 0, kind: input, shape index: {}]   ;;  %s10085_s1 = inlined_call_operand.vmem [shape: s32[1,256], index: 1, kind: input, shape index: {}]   ;;  %s10086_s2 = inlined_call_operand.vmem [shape: f32[16,1], index: 2, kind: input, shape index: {}]   ;;  %s10087_s3 = inlined_call_operand.vmem [shape: f32[16,1], index: 3, kind: input, shape index: {}]   ;;  %s10088_s4 = inlined_call_operand.vmem [shape: f32[16,16], index: 4, kind: input, shape index: {}]   ;;  %s10089_s5 = inlined_call_operand.vmem [shape: f32[8,16], index: 5, kind: input, shape index: {}]   ;;  %s10090_s6 = inlined_call_operand.vmem [shape: f32[8,16], index: 6, kind: input, shape index: {}]   ;;  %s10091_s7 = inlined_call_operand.vmem [shape: f32[8,1], index: 7, kind: input, shape index: {}]   ;;  %s10092_s8 = inlined_call_operand.vmem [shape: f32[3,8,1], index: 8, kind: input, shape index: {}]   ;;  %s10093_s9 = inlined_call_operand.vmem [shape: f32[3,8,1], index: 9, kind: input, shape index: {}]   ;;  %s10094_s10 = inlined_call_operand.vmem [shape: f32[3,8,56], index: 10, kind: input, shape index: {}]   ;;  %s10095_s11 = inlined_call_operand.vmem [shape: f32[3,8,1], index: 11, kind: input, shape index: {}]   ;;  %s10096_s12 = inlined_call_operand.vmem [shape: f32[3,8,1], index: 12, kind: input, shape index: {}]   ;;  %s10097_s13 = inlined_call_operand.vmem [shape: f32[3,8,1], index: 13, kind: input, shape index: {}]   ;;  %s10098_s14 = inlined_call_operand.vmem [shape: f32[3,8,8], index: 14, kind: input, shape index: {}]   ;;  %s10099_s15 = inlined_call_operand.vmem [shape: f32[3,8,1], index: 15, kind: input, shape index: {}]   ;;  %s10100_s16 = inlined_call_operand.hbm [shape: f32[2,8,256], index: 16, kind: output, shape index: {}]  }
   0x1   :  { %10176 = sst [smem:[#allocation11_spill]] %s10084_s0 }
   0x2   :  { %v60_v0 = vld [vmem:[%s10086_s2 + $0x8] sm:$0xff]  ;;  %v10109_v2 = vmov 0  }
   0x3   :  { %v62_v1 = vld [vmem:[%s10087_s3 + $0x8] sm:$0xff]  ;;  %5953 = vset.pattern.permute.xlu0 %v10109_v2  ;;  %5954 = vset.pattern.permute.xlu1 %v10109_v2 }
   0x4   :  { %70 = vperm.xlu0 %5953, %v60_v0   ;;  %708 = vperm.xlu1 %5954, %v62_v1  }
   0x5   :  { %5955 = vset.pattern.permute.xlu2 %v10109_v2 }
   0x6   :  { %21 = vsyncpa [#allocation3], 0  ;;  %v59_v3 = vld [vmem:[%s10086_s2] sm:$0xff]  ;;  %s10177_s0 = sld [smem:[#allocation11_spill]]  ;;  %v10106_v26 = vmov 1326507024  }
   0x7   :  { %v61_v4 = vld [vmem:[%s10087_s3] sm:$0xff]  ;;  %v10118_v29 = vmov 2102212464   ;;  %v10114_v31 = vmov 920167782   ;;  %s5997_s23 = smov 1  }
   0x8   :  { %v10116_v36 = vmov 2131351028   ;;  %v10120_v44 = vmov 2475754826   ;;  %v10111_v51 = vmov 683565275  }
   0x9   :  { %s5998_s28 = smov 127   ;;  %s5999_s27 = smov 126  }
   0xa   :  { %s6000_s18 = smov 2   ;;  %s6001_s30 = smov 125  }
   0xb   :  { %s6002_s17 = smov 3   ;;  %s6004_s19 = smov 123  }
   0xc   :  { %65 = vperm.xlu0 %5953, %v59_v3   ;;  %703 = vperm.xlu1 %5954, %v61_v4   ;;  %v57_v5 = vld [vmem:[%s10177_s0 + $0x10] sm:$0xff]  ;;  %v58_v6 = vld [vmem:[%s10177_s0 + $0x18] sm:$0xff]  ;;  %v55_v34 = vld [vmem:[%s10177_s0] sm:$0xff]  ;;  %s6006_s25 = smov 4   ;;  %s6008_s2 = smov 9  }
   0xd   :  { %v56_v48 = vld [vmem:[%s10177_s0 + $0x8] sm:$0xff]  ;;  %s6009_s20 = smov 115   ;;  %s6010_s22 = smov 114  }
  0x76   :  { %v71_v7 = vpop.permute.xlu0 %70 }
  0x77   :  { %v6122_v8 = vmul.f32 %v71_v7, %v57_v5  ;;  %v6124_v9 = vmul.f32 %v71_v7, %v58_v6 }
  0x79   :  { %v390_v10 = vand.u32 2139095040, %v6122_v8  ;;  %v545_v11 = vand.u32 2139095040, %v6124_v9  ;;  %v10105_v17 = vand.u32 2147483647, %v6122_v8  ;;  %v10104_v21 = vand.u32 2147483647, %v6124_v9 }
  0x7b   :  { %v391_v12 = vshrl.u32 %v390_v10, 23  ;;  %v546_v13 = vshrl.u32 %v545_v11, 23  ;;  %v394_v22 = vand.u32 8388607, %v10105_v17  ;;  %v549_v24 = vand.u32 8388607, %v10104_v21 }
  0x7d   :  { %v5737_v14 = vadd.s32 4294967169, %v391_v12  ;;  %v5740_v15 = vadd.s32 4294967169, %v546_v13  ;;  %v395_v25 = vor.u32 8388608, %v394_v22  ;;  %v550_v39 = vor.u32 8388608, %v549_v24 }
  0x7e   :  { %v66_v33 = vpop.permute.xlu0 %65 }
  0x7f   :  { %v397_v16 = vadd.s32 1, %v5737_v14  ;;  %v552_v19 = vadd.s32 1, %v5740_v15  ;;  %v6143_v42 = vshll.u32 %v395_v25, 8  ;;  %v6151_v49 = vmul.f32 %v66_v33, %v55_v34 }
  0x80   :  { %v6154_v57 = vshll.u32 %v550_v39, 8  ;;  %v6156_v58 = vmul.f32 %v66_v33, %v56_v48 }
  0x81   :  { %vm398_vm0 = vcmp.gt.s32.totalorder %v397_v16, 0  ;;  %vm553_vm1 = vcmp.gt.s32.totalorder %v552_v19, 0  ;;  %v6159_v60 = vand.u32 65535, %v6143_v42  ;;  %v6162_v61 = vshrl.u32 %v6143_v42, 16 }
  0x82   :  { %v399_v18 = vsel %vm398_vm0, %v397_v16, 0  ;;  %v554_v28 = vsel %vm553_vm1, %v552_v19, 0  ;;  %v10103_v62 = vand.u32 2147483647, %v6151_v49  ;;  %v80_v0 = vand.u32 2139095040, %v6151_v49 }
  0x83   :  { %v401_v20 = vand.u32 31, %v399_v18  ;;  %v400_v35 = vshrl.u32 %v399_v18, 5  ;;  %v556_v43 = vand.u32 31, %v554_v28  ;;  %v6167_v6 = vshrl.u32 %v554_v28, 5 }
  0x84   :  { %v6171_v10 = vand.u32 65535, %v6154_v57  ;;  %v6174_v11 = vshrl.u32 %v6154_v57, 16  ;;  %v6185_v24 = vand.u32 8388607, %v10103_v62 }
  0x85   :  { %v402_v23 = vsub.s32 32, %v401_v20  ;;  %v416_v32 = vshll.u32 %v10114_v31, %v401_v20  ;;  %v410_v40 = vshll.u32 %v10116_v36, %v401_v20  ;;  %v407_v46 = vshll.u32 %v10120_v44, %v401_v20 }
  0x86   :  { %v413_v47 = vshll.u32 %v10118_v29, %v401_v20  ;;  %v404_v52 = vshll.u32 %v10111_v51, %v401_v20  ;;  %vm422_vm2 = vcmp.lt.s32.totalorder %v400_v35, 4  ;;  %v557_v56 = vsub.s32 32, %v556_v43 }
  0x87   :  { %v417_v27 = vshrl.u32 %v10106_v26, %v402_v23  ;;  %v411_v30 = vshrl.u32 %v10118_v29, %v402_v23  ;;  %v408_v37 = vshrl.u32 %v10116_v36, %v402_v23  ;;  %v414_v38 = vshrl.u32 %v10114_v31, %v402_v23 }
  0x88   :  { %v405_v45 = vshrl.u32 %v10120_v44, %v402_v23  ;;  %vm419_vm3 = vcmp.lt.s32.totalorder %v400_v35, 1  ;;  %vm421_vm4 = vcmp.lt.s32.totalorder %v400_v35, 3  ;;  %v403_v1 = vshrl.u32 %v10111_v51, %v402_v23 }
  0x89   :  { %v418_v41 = vor.u32 %v417_v27, %v416_v32  ;;  %v412_v50 = vor.u32 %v411_v30, %v410_v40  ;;  %v409_v53 = vor.u32 %v408_v37, %v407_v46  ;;  %v415_v54 = vor.u32 %v414_v38, %v413_v47 }
  0x8a   :  { %v406_v59 = vor.u32 %v405_v45, %v404_v52  ;;  %v572_v7 = vshrl.u32 %v10106_v26, %v557_v56  ;;  %vm420_vm5 = vcmp.lt.s32.totalorder %v400_v35, 2  ;;  %v569_v18 = vshrl.u32 %v10114_v31, %v557_v56 }
  0x8b   :  { %v432_v55 = vsel %vm422_vm2, %v418_v41, 1326507024  ;;  %v424_v63 = vsel %vm422_vm2, %v412_v50, 2102212464  ;;  %v428_v3 = vsel %vm422_vm2, %v415_v54, 920167782  ;;  %v431_v4 = vsel %vm419_vm3, %v409_v53, %v412_v50 }
  0x8c   :  { %v433_v5 = vsel %vm421_vm4, %v415_v54, %v432_v55  ;;  %v423_v12 = vsel %vm419_vm3, %v403_v1, %v406_v59  ;;  %v425_v13 = vsel %vm421_vm4, %v409_v53, %v424_v63  ;;  %v427_v14 = vsel %vm419_vm3, %v406_v59, %v409_v53 }
  0x8d   :  { %v429_v15 = vsel %vm421_vm4, %v412_v50, %v428_v3  ;;  %v6177_v16 = vsel %vm420_vm5, %v431_v4, %v433_v5  ;;  %v571_v19 = vshll.u32 %v10114_v31, %v556_v43  ;;  %v563_v20 = vshrl.u32 %v10116_v36, %v557_v56 }
  0x8e   :  { %v566_v22 = vshrl.u32 %v10118_v29, %v557_v56  ;;  %v81_v23 = vshrl.u32 %v80_v0, 23  ;;  %v6188_v25 = vsel %vm420_vm5, %v423_v12, %v425_v13  ;;  %v562_v27 = vshll.u32 %v10120_v44, %v556_v43 }
  0x8f   :  { %v568_v28 = vshll.u32 %v10118_v29, %v556_v43  ;;  %v573_v30 = vor.u32 %v572_v7, %v571_v19  ;;  %v6193_v32 = vsel %vm420_vm5, %v427_v14, %v429_v15  ;;  %v439_v33 = vshrl.u32 %v6177_v16, 16 }
  0x90   :  { %v560_v34 = vshrl.u32 %v10120_v44, %v557_v56  ;;  %v565_v37 = vshll.u32 %v10116_v36, %v556_v43  ;;  %v558_v38 = vshrl.u32 %v10111_v51, %v557_v56  ;;  %v559_v39 = vshll.u32 %v10111_v51, %v556_v43 }
  0x91   :  { %v570_v40 = vor.u32 %v569_v18, %v568_v28  ;;  %v5731_v41 = vadd.s32 4294967169, %v81_v23  ;;  %v564_v46 = vor.u32 %v563_v20, %v562_v27  ;;  %vm577_vm6 = vcmp.lt.s32.totalorder %v6167_v6, 4 }
  0x92   :  { %v567_v47 = vor.u32 %v566_v22, %v565_v37  ;;  %v438_v35 = vand.u32 65535, %v6177_v16  ;;  %v460_v48 = vand.u32 65535, %v6193_v32  ;;  %v587_v50 = vsel %vm577_vm6, %v573_v30, 1326507024 }
  0x93   :  { %v87_v52 = vadd.s32 1, %v5731_v41  ;;  %v6208_v53 = vmul.u32 %v439_v33, %v6159_v60  ;;  %v461_v43 = vshrl.u32 %v6193_v32, 16  ;;  %v561_v54 = vor.u32 %v560_v34, %v559_v39 }
  0x94   :  { %v235_v55 = vand.u32 2139095040, %v6156_v58  ;;  %vm574_vm7 = vcmp.lt.s32.totalorder %v6167_v6, 1  ;;  %vm576_vm8 = vcmp.lt.s32.totalorder %v6167_v6, 3  ;;  %v583_v56 = vsel %vm577_vm6, %v570_v40, 920167782 }
  0x95   :  { %vm88_vm9 = vcmp.gt.s32.totalorder %v87_v52, 0  ;;  %v586_v59 = vsel %vm574_vm7, %v564_v46, %v567_v47  ;;  %v588_v63 = vsel %vm576_vm8, %v570_v40, %v587_v50  ;;  %v440_v3 = vmul.u32 %v438_v35, %v6159_v60 }
  0x96   :  { %v89_v0 = vsel %vm88_vm9, %v87_v52, 0  ;;  %v236_v1 = vshrl.u32 %v235_v55, 23  ;;  %v6224_v4 = vmul.u32 %v439_v33, %v6162_v61  ;;  %v579_v5 = vsel %vm577_vm6, %v567_v47, 2102212464 }
  0x97   :  { %v91_v7 = vand.u32 31, %v89_v0  ;;  %v6229_v12 = vmul.u32 %v461_v43, %v6159_v60  ;;  %vm575_vm10 = vcmp.lt.s32.totalorder %v6167_v6, 2  ;;  %v582_v13 = vsel %vm574_vm7, %v561_v54, %v564_v46 }
  0x98   :  { %v584_v14 = vsel %vm576_vm8, %v567_v47, %v583_v56  ;;  %v6237_v15 = vmul.u32 %v461_v43, %v6162_v61  ;;  %v6241_v18 = vsel %vm575_vm10, %v586_v59, %v588_v63  ;;  %v5734_v20 = vadd.s32 4294967169, %v236_v1 }
  0x99   :  { %v6243_v19 = vsub.s32 32, %v91_v7  ;;  %v444_v22 = vshll.u32 %v6208_v53, 16  ;;  %v578_v23 = vsel %vm574_vm7, %v558_v38, %v561_v54  ;;  %v580_v27 = vsel %vm576_vm8, %v564_v46, %v579_v5 }
  0x9a   :  { %v10102_v28 = vand.u32 2147483647, %v6156_v58  ;;  %v6253_v30 = vsel %vm575_vm10, %v582_v13, %v584_v14  ;;  %v6255_v33 = vshrl.u32 %v89_v0, 5  ;;  %v594_v39 = vshrl.u32 %v6241_v18, 16 }
  0x9b   :  { %v98_v34 = vshrl.u32 %v10116_v36, %v6243_v19  ;;  %v101_v37 = vshrl.u32 %v10118_v29, %v6243_v19  ;;  %v104_v38 = vshrl.u32 %v10114_v31, %v6243_v19  ;;  %v106_v40 = vshll.u32 %v10114_v31, %v91_v7 }
  0x9c   :  { %v107_v41 = vshrl.u32 %v10106_v26, %v6243_v19  ;;  %v97_v46 = vshll.u32 %v10120_v44, %v91_v7  ;;  %v100_v47 = vshll.u32 %v10116_v36, %v91_v7  ;;  %v103_v50 = vshll.u32 %v10118_v29, %v91_v7 }
  0x9d   :  { %v242_v52 = vadd.s32 1, %v5734_v20  ;;  %v85_v43 = vor.u32 8388608, %v6185_v24  ;;  %v95_v54 = vshrl.u32 %v10120_v44, %v6243_v19  ;;  %v239_v56 = vand.u32 8388607, %v10102_v28 }
  0x9e   :  { %v108_v55 = vor.u32 %v107_v41, %v106_v40  ;;  %v99_v59 = vor.u32 %v98_v34, %v97_v46  ;;  %v102_v63 = vor.u32 %v101_v37, %v100_v47  ;;  %v105_v0 = vor.u32 %v104_v38, %v103_v50 }
  0x9f   :  { %vm112_vm11 = vcmp.lt.s32.totalorder %v6255_v33, 4  ;;  %vm6276_vm12 = vc.u32 %v440_v3, %v444_v22  ;;  %v6282_v5 = vsel %vm575_vm10, %v578_v23, %v580_v27  ;;  %v94_v24 = vshll.u32 %v10111_v51, %v91_v7 }
  0xa0   :  { %v122_v13 = vsel %vm112_vm11, %v108_v55, 1326507024  ;;  %vm243_vm13 = vcmp.gt.s32.totalorder %v242_v52, 0  ;;  %v10108_v14 = vand.u32 65535, %v6241_v18  ;;  %v6289_v20 = vmul.u32 %v594_v39, %v6171_v10 }
  0xa1   :  { %v616_v34 = vshrl.u32 %v6253_v30, 16  ;;  %v244_v37 = vsel %vm243_vm13, %v242_v52, 0  ;;  %v96_v38 = vor.u32 %v95_v54, %v94_v24  ;;  %vm109_vm14 = vcmp.lt.s32.totalorder %v6255_v33, 1 }
  0xa2   :  { %vm111_vm15 = vcmp.lt.s32.totalorder %v6255_v33, 3  ;;  %v240_v6 = vor.u32 8388608, %v239_v56  ;;  %v118_v7 = vsel %vm112_vm11, %v105_v0, 920167782  ;;  %v121_v23 = vsel %vm109_vm14, %v99_v59, %v102_v63 }
  0xa3   :  { %v123_v27 = vsel %vm111_vm15, %v105_v0, %v122_v13  ;;  %v6300_v40 = vshll.u32 %v85_v43, 8  ;;  %v450_v41 = vadd.s32 %v444_v22, %v440_v3  ;;  %v246_v47 = vand.u32 31, %v244_v37 }
  0xa4   :  { %v6306_v50 = vmul.u32 %v438_v35, %v6162_v61  ;;  %v599_v52 = vshll.u32 %v6289_v20, 16  ;;  %v6310_v54 = vmul.u32 %v616_v34, %v6171_v10  ;;  %vm110_vm0 = vcmp.lt.s32.totalorder %v6255_v33, 2 }
  0xa5   :  { %v117_v3 = vsel %vm109_vm14, %v96_v38, %v99_v59  ;;  %v119_v22 = vsel %vm111_vm15, %v102_v63, %v118_v7  ;;  %v6321_v16 = vsel %vm110_vm0, %v121_v23, %v123_v27  ;;  %v6323_v35 = vshll.u32 %v240_v6, 8 }
  0xa6   :  { %v595_v43 = vmul.u32 %v10108_v14, %v6171_v10  ;;  %v6329_v56 = vmul.u32 %v594_v39, %v6174_v11  ;;  %v6332_v0 = vmul.u32 %v616_v34, %v6174_v11  ;;  %v6335_v24 = vand.u32 65535, %v6300_v40 }
  0xa7   :  { %v6338_v13 = vshrl.u32 %v6300_v40, 16  ;;  %v6340_v7 = vsub.s32 32, %v246_v47  ;;  %v445_v6 = vshrl.u32 %v6208_v53, 16  ;;  %v446_v23 = vshll.u32 %v6306_v50, 16 }
  0xa8   :  { %v114_v27 = vsel %vm112_vm11, %v102_v63, 2102212464  ;;  %v6348_v39 = vsel %vm110_vm0, %v117_v3, %v119_v22  ;;  %v129_v34 = vshrl.u32 %v6321_v16, 16  ;;  %v6351_v28 = vshrl.u32 %v244_v37, 5 }
  0xa9   :  { %v6353_v62 = vadd.s32 %v599_v52, %v595_v43  ;;  %v93_v21 = vshrl.u32 %v10111_v51, %v6243_v19  ;;  %v6358_v53 = vand.u32 65535, %v6323_v35  ;;  %v447_v17 = vshrl.u32 %v6306_v50, 16 }
  0xaa   :  { %v10113_v63 = vand.u32 65535, %v6321_v16  ;;  %v6363_v55 = vshrl.u32 %v6323_v35, 16  ;;  %v449_v37 = vsel %vm6276_vm12, 1, %v10109_v2  ;;  %vm452_vm1 = vc.u32 %v450_v41, %v446_v23 }
  0xab   :  { %v6370_v3 = vsel %vm109_vm14, %v93_v21, %v96_v38  ;;  %v6374_v19 = vsel %vm111_vm15, %v99_v59, %v114_v27  ;;  %v151_v50 = vshrl.u32 %v6348_v39, 16  ;;  %v262_v22 = vshrl.u32 %v10106_v26, %v6340_v7 }
  0xac   :  { %vm6379_vm2 = vc.u32 %v595_v43, %v599_v52  ;;  %v6384_v1 = vmul.u32 %v129_v34, %v6335_v24  ;;  %vm264_vm3 = vcmp.lt.s32.totalorder %v6351_v28, 1  ;;  %v451_v21 = vadd.s32 %v449_v37, %v6224_v4 }
  0xad   :  { %v253_v59 = vshrl.u32 %v10116_v36, %v6340_v7  ;;  %v256_v38 = vshrl.u32 %v10118_v29, %v6340_v7  ;;  %v261_v52 = vshll.u32 %v10114_v31, %v246_v47  ;;  %vm266_vm4 = vcmp.lt.s32.totalorder %v6351_v28, 3 }
  0xae   :  { %v453_v43 = vsel %vm452_vm1, 1, %v10109_v2  ;;  %v130_v23 = vmul.u32 %v10113_v63, %v6335_v24  ;;  %v6400_v27 = vmul.u32 %v129_v34, %v6338_v13  ;;  %v259_v4 = vshrl.u32 %v10114_v31, %v6340_v7 }
  0xaf   :  { %v455_v37 = vadd.s32 %v453_v43, %v451_v21  ;;  %v6405_v26 = vmul.u32 %v151_v50, %v6335_v24  ;;  %v252_v41 = vshll.u32 %v10120_v44, %v246_v47  ;;  %v255_v46 = vshll.u32 %v10116_v36, %v246_v47 }
  0xb0   :  { %v263_v14 = vor.u32 %v262_v22, %v261_v52  ;;  %v134_v2 = vshll.u32 %v6384_v1, 16  ;;  %v258_v51 = vshll.u32 %v10118_v29, %v246_v47  ;;  %v464_v34 = vmul.u32 %v460_v48, %v6162_v61 }
  0xb1   :  { %v466_v63 = vshll.u32 %v6229_v12, 16  ;;  %v6416_v21 = vmul.u32 %v151_v50, %v6338_v13  ;;  %v6418_v43 = vor.u32 %v253_v59, %v252_v41  ;;  %v6420_v31 = vor.u32 %v256_v38, %v255_v46 }
  0xb2   :  { %vm265_vm5 = vcmp.lt.s32.totalorder %v6351_v28, 2  ;;  %v462_v22 = vmul.u32 %v460_v48, %v6159_v60  ;;  %v10182_v52 = vmov 683565275   ;;  %v260_v29 = vor.u32 %v259_v4, %v258_v51 }
  0xb3   :  { %v249_v36 = vshll.u32 %v10182_v52, %v246_v47  ;;  %vm267_vm6 = vcmp.lt.s32.totalorder %v6351_v28, 4  ;;  %v456_v61 = vadd.s32 %v455_v37, %v445_v6  ;;  %v468_v44 = vshll.u32 %v464_v34, 16 }
  0xb4   :  { %v277_v50 = vsel %vm267_vm6, %v263_v14, 1326507024  ;;  %vm470_vm7 = vc.u32 %v462_v22, %v466_v63  ;;  %v472_v41 = vadd.s32 %v466_v63, %v462_v22  ;;  %vm6430_vm8 = vc.u32 %v130_v23, %v134_v2 }
  0xb5   :  { %v10185_v59 = vmov 2475754826   ;;  %v10186_v60 = vmov 0   ;;  %v10187_v51 = vand.u32 65535, %v6241_v18  ;;  %v140_v6 = vadd.s32 %v134_v2, %v130_v23 }
  0xb6   :  { %v250_v32 = vshrl.u32 %v10185_v59, %v6340_v7  ;;  %v471_v48 = vsel %vm470_vm7, 1, %v10186_v60  ;;  %v276_v14 = vsel %vm264_vm3, %v6418_v43, %v6420_v31  ;;  %vm474_vm9 = vc.u32 %v472_v41, %v468_v44 }
  0xb7   :  { %v597_v47 = vmul.u32 %v10187_v51, %v6174_v11  ;;  %v473_v63 = vadd.s32 %v471_v48, %v6237_v15  ;;  %v278_v38 = vsel %vm266_vm4, %v260_v29, %v277_v50  ;;  %v6447_v4 = vadd.s32 %v456_v61, %v447_v17 }
  0xb8   :  { %v475_v37 = vsel %vm474_vm9, 1, %v10186_v60  ;;  %v467_v18 = vshrl.u32 %v6229_v12, 16  ;;  %v469_v51 = vshrl.u32 %v464_v34, 16  ;;  %v604_v23 = vsel %vm6379_vm2, 1, %v10186_v60 }
  0xb9   :  { %v601_v22 = vshll.u32 %v597_v47, 16  ;;  %v477_v2 = vadd.s32 %v475_v37, %v473_v63  ;;  %v6454_v59 = vadd.s32 %v472_v41, %v468_v44  ;;  %v606_v15 = vadd.s32 %v604_v23, %v6329_v56 }
  0xba   :  { %v10188_v17 = vand.u32 65535, %v6253_v30  ;;  %v621_v45 = vshll.u32 %v6310_v54, 16  ;;  %v6466_v63 = vor.u32 %v250_v32, %v249_v36  ;;  %v6470_v44 = vsel %vm265_vm5, %v276_v14, %v278_v38 }
  0xbb   :  { %vm607_vm10 = vc.u32 %v6353_v62, %v601_v22  ;;  %v478_v50 = vadd.s32 %v477_v2, %v467_v18  ;;  %v600_v62 = vshrl.u32 %v6289_v20, 16  ;;  %vm482_vm11 = vc.u32 %v6447_v4, %v6454_v59 }
  0xbc   :  { %v617_v61 = vmul.u32 %v10188_v17, %v6171_v10  ;;  %v608_v48 = vsel %vm607_vm10, 1, %v10186_v60  ;;  %v10189_v12 = vmov %v10188_v17  ;;  %v10190_v36 = vand.u32 65535, %v6321_v16 }
  0xbd   :  { %v619_v34 = vmul.u32 %v10189_v12, %v6174_v11  ;;  %v610_v56 = vadd.s32 %v608_v48, %v606_v15  ;;  %v479_v41 = vadd.s32 %v478_v50, %v469_v51  ;;  %v273_v14 = vsel %vm267_vm6, %v260_v29, 920167782 }
  0xbe   :  { %vm625_vm12 = vc.u32 %v617_v61, %v621_v45  ;;  %v627_v30 = vadd.s32 %v621_v45, %v617_v61  ;;  %v132_v32 = vmul.u32 %v10190_v36, %v6338_v13  ;;  %v284_v20 = vshrl.u32 %v6470_v44, 16 }
  0xbf   :  { %v623_v10 = vshll.u32 %v619_v34, 16  ;;  %v611_v37 = vadd.s32 %v610_v56, %v600_v62  ;;  %v626_v11 = vsel %vm625_vm12, 1, %v10186_v60  ;;  %v483_v38 = vadd.s32 1, %v479_v41 }
  0xc0   :  { %v628_v22 = vadd.s32 %v626_v11, %v6332_v0  ;;  %v602_v18 = vshrl.u32 %v597_v47, 16  ;;  %v622_v51 = vshrl.u32 %v6310_v54, 16  ;;  %v624_v2 = vshrl.u32 %v619_v34, 16 }
  0xc1   :  { %vm629_vm13 = vc.u32 %v627_v30, %v623_v10  ;;  %v484_v23 = vsel %vm482_vm11, %v483_v38, %v479_v41  ;;  %v136_v17 = vshll.u32 %v132_v32, 16  ;;  %v139_v16 = vsel %vm6430_vm8, 1, %v10186_v60 }
  0xc2   :  { %v630_v15 = vsel %vm629_vm13, 1, %v10186_v60  ;;  %v10191_v29 = vmul.u32 %v6143_v42, %v6188_v25  ;;  %v6491_v50 = vadd.s32 %v611_v37, %v602_v18  ;;  %v10192_v54 = vand.u32 65535, %v6348_v39 }
  0xc3   :  { %v632_v0 = vadd.s32 %v630_v15, %v628_v22  ;;  %v141_v48 = vadd.s32 %v139_v16, %v6400_v27  ;;  %vm142_vm14 = vc.u32 %v140_v6, %v136_v17  ;;  %v156_v46 = vshll.u32 %v6405_v26, 16 }
  0xc4   :  { %v485_v61 = vadd.s32 %v484_v23, %v10191_v29  ;;  %v152_v47 = vmul.u32 %v10192_v54, %v6335_v24  ;;  %v10193_v12 = vmov %v10192_v54  ;;  %v135_v42 = vshrl.u32 %v6384_v1, 16 }
  0xc5   :  { %v154_v34 = vmul.u32 %v10193_v12, %v6338_v13  ;;  %v633_v62 = vadd.s32 %v632_v0, %v622_v51  ;;  %v143_v25 = vsel %vm142_vm14, 1, %v10186_v60  ;;  %v6503_v56 = vadd.s32 %v627_v30, %v623_v10 }
  0xc6   :  { %v486_v45 = vadd.s32 536870912, %v485_v61  ;;  %v145_v41 = vadd.s32 %v143_v25, %v141_v48  ;;  %vm160_vm15 = vc.u32 %v152_v47, %v156_v46  ;;  %v162_v39 = vadd.s32 %v156_v46, %v152_v47 }
  0xc7   :  { %v158_v37 = vshll.u32 %v154_v34, 16  ;;  %v634_v27 = vadd.s32 %v633_v62, %v624_v2  ;;  %v161_v6 = vsel %vm160_vm15, 1, %v10186_v60  ;;  %v248_v13 = vshrl.u32 %v10182_v52, %v6340_v7 }
  0xc8   :  { %v6505_v24 = vshrl.u32 %v486_v45, 30  ;;  %vm637_vm1 = vc.u32 %v6491_v50, %v6503_v56  ;;  %v146_v1 = vadd.s32 %v145_v41, %v135_v42  ;;  %v163_v11 = vadd.s32 %v161_v6, %v6416_v21 }
  0xc9   :  { %v272_v10 = vsel %vm264_vm3, %v6466_v63, %v6418_v43  ;;  %v638_v36 = vadd.s32 1, %v634_v27  ;;  %vm164_vm2 = vc.u32 %v162_v39, %v158_v37  ;;  %v274_v38 = vsel %vm266_vm4, %v6420_v31, %v273_v14 }
  0xca   :  { %v488_v30 = vshll.u32 %v6505_v24, 30  ;;  %v6524_v7 = vmul.u32 %v284_v20, %v6358_v53  ;;  %v137_v22 = vshrl.u32 %v132_v32, 16  ;;  %v165_v21 = vsel %vm164_vm2, 1, %v10186_v60 }
  0xcb   :  { %v639_v51 = vsel %vm637_vm1, %v638_v36, %v634_v27  ;;  %v157_v2 = vshrl.u32 %v6405_v26, 16  ;;  %v167_v23 = vadd.s32 %v165_v21, %v163_v11  ;;  %v269_v15 = vsel %vm267_vm6, %v6420_v31, 2102212464 }
  0xcc   :  { %v489_v18 = vsub.s32 %v485_v61, %v488_v30  ;;  %v283_v17 = vand.u32 65535, %v6470_v44  ;;  %v10194_v14 = vmul.u32 %v6154_v57, %v6282_v5  ;;  %v6535_v29 = vadd.s32 %v146_v1, %v137_v22 }
  0xcd   :  { %v159_v0 = vshrl.u32 %v154_v34, 16  ;;  %v168_v61 = vadd.s32 %v167_v23, %v157_v2  ;;  %v116_v26 = vsel %vm110_vm0, %v6370_v3, %v6374_v19  ;;  %v275_v31 = vsel %vm265_vm5, %v272_v10, %v274_v38 }
  0xce   :  { %v640_v16 = vadd.s32 %v639_v51, %v10194_v14  ;;  %vm490_vm7 = vcmp.lt.s32.totalorder %v489_v18, 0  ;;  %v491_v32 = vsub.s32 0, %v489_v18  ;;  %v6543_v47 = vadd.s32 %v162_v39, %v158_v37 }
  0xcf   :  { %v268_v57 = vsel %vm264_vm3, %v248_v13, %v6466_v63  ;;  %v289_v5 = vshll.u32 %v6524_v7, 16  ;;  %v169_v12 = vadd.s32 %v168_v61, %v159_v0  ;;  %v270_v34 = vsel %vm266_vm4, %v6418_v43, %v269_v15 }
  0xd0   :  { %v641_v54 = vadd.s32 536870912, %v640_v16  ;;  %v492_v48 = vsel %vm490_vm7, %v491_v32, %v489_v18  ;;  %vm172_vm0 = vc.u32 %v6535_v29, %v6543_v47  ;;  %vm389_vm6 = vcmp.lt.s32.totalorder %v6122_v8, 0 }
  0xd1   :  { %v493_v33 = vclz %v492_v48  ;;  %v285_v19 = vmul.u32 %v283_v17, %v6358_v53  ;;  %v306_v46 = vshrl.u32 %v275_v31, 16  ;;  %v173_v63 = vadd.s32 1, %v169_v12 }
  0xd2   :  { %v6552_v3 = vshrl.u32 %v641_v54, 30  ;;  %v170_v45 = vmul.u32 %v6300_v40, %v116_v26  ;;  %v6561_v25 = vmul.u32 %v283_v17, %v6363_v55  ;;  %v6565_v43 = vsel %vm265_vm5, %v268_v57, %v270_v34 }
  0xd3   :  { %v5738_v62 = vadd.s32 4294967294, %v493_v33  ;;  %vm6567_vm3 = vc.u32 %v285_v19, %v289_v5  ;;  %v305_v37 = vand.u32 65535, %v275_v31  ;;  %v174_v27 = vsel %vm172_vm0, %v173_v63, %v169_v12 }
  0xd4   :  { %v643_v42 = vshll.u32 %v6552_v3, 30  ;;  %v295_v6 = vadd.s32 %v289_v5, %v285_v19  ;;  %v10197_v39 = vand.u32 2147483647, %v6122_v8  ;;  %v175_v1 = vadd.s32 %v174_v27, %v170_v45 }
  0xd5   :  { %vm5739_vm8 = vcmp.lt.s32.totalorder %v5738_v62, 0  ;;  %v6580_v28 = vmul.u32 %v306_v46, %v6358_v53  ;;  %v481_v11 = vadd.s32 %v6454_v59, %v6447_v4  ;;  %v511_v30 = vsub.s32 4, %v6505_v24 }
  0xd6   :  { %vm6573_vm4 = vcmp.le.f32.partialorder %v10197_v39, 0.7853982  ;;  %v6577_v13 = vsub.s32 %v640_v16, %v643_v42  ;;  %v496_v10 = vsel %vm5739_vm8, 0, %v5738_v62  ;;  %v291_v22 = vshll.u32 %v6561_v25, 16 }
  0xd7   :  { %v497_v36 = vsub.s32 32, %v496_v10  ;;  %v501_v38 = vsub.s32 4294967266, %v496_v10  ;;  %v288_v21 = vmul.u32 %v284_v20, %v6363_v55  ;;  %v176_v2 = vadd.s32 536870912, %v175_v1 }
  0xd8   :  { %vm645_vm5 = vcmp.lt.s32.totalorder %v6577_v13, 0  ;;  %v646_v51 = vsub.s32 0, %v6577_v13  ;;  %v294_v59 = vsel %vm6567_vm3, 1, %v10186_v60  ;;  %v498_v4 = vshll.u32 %v489_v18, %v496_v10 }
  0xd9   :  { %v499_v23 = vshrl.u32 %v481_v11, %v497_v36  ;;  %v502_v15 = vadd.s32 127, %v501_v38  ;;  %vm297_vm9 = vc.u32 %v295_v6, %v291_v22  ;;  %v512_v17 = vsel %vm389_vm6, %v511_v30, %v6505_v24 }
  0xda   :  { %v647_v14 = vsel %vm645_vm5, %v646_v51, %v6577_v13  ;;  %v6598_v16 = vshrl.u32 %v176_v2, 30  ;;  %v311_v44 = vshll.u32 %v6580_v28, 16  ;;  %v296_v61 = vadd.s32 %v294_v59, %v288_v21 }
  0xdb   :  { %v500_v20 = vor.u32 %v499_v23, %v498_v4  ;;  %v503_v32 = vshll.u32 %v502_v15, 23  ;;  %v648_v0 = vclz %v647_v14  ;;  %v298_v18 = vsel %vm297_vm9, 1, %v10186_v60 }
  0xdc   :  { %v178_v26 = vshll.u32 %v6598_v16, 30  ;;  %v307_v31 = vmul.u32 %v305_v37, %v6358_v53  ;;  %v6605_v54 = vmul.u32 %v305_v37, %v6363_v55  ;;  %v310_v24 = vmul.u32 %v306_v46, %v6363_v55 }
  0xdd   :  { %v504_v57 = vor.u32 4788187, %v503_v32  ;;  %v636_v5 = vadd.s32 %v6503_v56, %v6491_v50  ;;  %v5741_v48 = vadd.s32 4294967294, %v648_v0  ;;  %v514_v12 = vsel %vm6573_vm4, 0, %v512_v17 }
  0xde   :  { %v6612_v34 = vsub.s32 %v175_v1, %v178_v26  ;;  %vm315_vm10 = vc.u32 %v307_v31, %v311_v44  ;;  %v317_v33 = vadd.s32 %v311_v44, %v307_v31  ;;  %v507_v63 = vcvt.s32.f32 %v500_v20 }
  0xdf   :  { %v505_v19 = vand.u32 2147483647, %v504_v57  ;;  %vm5742_vm11 = vcmp.lt.s32.totalorder %v5741_v48, 0  ;;  %v300_v53 = vadd.s32 %v298_v18, %v296_v61  ;;  %v313_v46 = vshll.u32 %v6605_v54, 16 }
  0xe0   :  { %v651_v45 = vsel %vm5742_vm11, 0, %v5741_v48  ;;  %vm180_vm12 = vcmp.lt.s32.totalorder %v6612_v34, 0  ;;  %v181_v55 = vsub.s32 0, %v6612_v34  ;;  %v316_v42 = vsel %vm315_vm10, 1, %v10186_v60 }
  0xe1   :  { %v508_v50 = vmul.f32 %v507_v63, %v505_v19  ;;  %v652_v56 = vsub.s32 32, %v651_v45  ;;  %v656_v62 = vsub.s32 4294967266, %v651_v45  ;;  %v653_v41 = vshll.u32 %v6577_v13, %v651_v45 }
  0xe2   :  { %v182_v37 = vsel %vm180_vm12, %v181_v55, %v6612_v34  ;;  %v290_v27 = vshrl.u32 %v6524_v7, 16  ;;  %vm319_vm13 = vc.u32 %v317_v33, %v313_v46  ;;  %v325_v10 = vmul.u32 %v6323_v35, %v6565_v43 }
  0xe3   :  { %v509_v6 = vxor.u32 2147483648, %v508_v50  ;;  %v654_v39 = vshrl.u32 %v636_v5, %v652_v56  ;;  %v657_v1 = vadd.s32 127, %v656_v62  ;;  %v183_v11 = vclz %v182_v37 }
  0xe4   :  { %v301_v30 = vadd.s32 %v300_v53, %v290_v27  ;;  %v318_v36 = vadd.s32 %v316_v42, %v310_v24  ;;  %v320_v38 = vsel %vm319_vm13, 1, %v10186_v60  ;;  %vm544_vm14 = vcmp.lt.s32.totalorder %v6124_v9, 0 }
  0xe5   :  { %v510_v22 = vsel %vm389_vm6, %v509_v6, %v508_v50  ;;  %v655_v13 = vor.u32 %v654_v39, %v653_v41  ;;  %v658_v21 = vshll.u32 %v657_v1, 23  ;;  %v5732_v51 = vadd.s32 4294967294, %v183_v11 }
  0xe6   :  { %v513_v7 = vsel %vm6573_vm4, %v6122_v8, %v510_v22  ;;  %v531_v2 = vadd.s32 3, %v514_v12  ;;  %v171_v35 = vadd.s32 %v6543_v47, %v6535_v29  ;;  %v292_v43 = vshrl.u32 %v6561_v25, 16 }
  0xe7   :  { %v515_v59 = vmul.f32 %v513_v7, %v513_v7  ;;  %v659_v4 = vor.u32 4788187, %v658_v21  ;;  %v666_v23 = vsub.s32 4, %v6552_v3  ;;  %vm5733_vm15 = vcmp.lt.s32.totalorder %v5732_v51, 0 }
  0xe8   :  { %v186_v15 = vsel %vm5733_vm15, 0, %v5732_v51  ;;  %v6634_v17 = vadd.s32 %v301_v30, %v292_v43  ;;  %v312_v14 = vshrl.u32 %v6580_v28, 16  ;;  %v322_v44 = vadd.s32 %v320_v38, %v318_v36 }
  0xe9   :  { %v516_v20 = vmul.f32 -0.001358992, %v515_v59  ;;  %v523_v40 = vmul.f32 -0.00019511016, %v515_v59  ;;  %v660_v32 = vand.u32 2147483647, %v659_v4  ;;  %v662_v0 = vcvt.s32.f32 %v655_v13 }
  0xea   :  { %v187_v61 = vsub.s32 32, %v186_v15  ;;  %v191_v26 = vsub.s32 4294967266, %v186_v15  ;;  %v314_v29 = vshrl.u32 %v6605_v54, 16  ;;  %v323_v47 = vadd.s32 %v322_v44, %v312_v14  ;;  %v709_v54 = vpop.permute.xlu1 %708 }
  0xeb   :  { %v517_v25 = vadd.f32 0.041655596, %v516_v20  ;;  %v524_v18 = vadd.f32 0.008332121, %v523_v40  ;;  %v663_v31 = vmul.f32 %v662_v0, %v660_v32  ;;  %v6638_v24 = vadd.s32 %v317_v33, %v313_v46 }
  0xec   :  { %v188_v57 = vshll.u32 %v6612_v34, %v186_v15  ;;  %v189_v5 = vshrl.u32 %v171_v35, %v187_v61  ;;  %v192_v48 = vadd.s32 127, %v191_v26  ;;  %v324_v28 = vadd.s32 %v323_v47, %v314_v29 }
  0xed   :  { %v518_v12 = vmul.f32 %v517_v25, %v515_v59  ;;  %v525_v19 = vmul.f32 %v524_v18, %v515_v59  ;;  %v664_v63 = vxor.u32 2147483648, %v663_v31  ;;  %vm327_vm1 = vc.u32 %v6634_v17, %v6638_v24 }
  0xee   :  { %v10200_v53 = vand.u32 2147483647, %v6124_v9  ;;  %v190_v45 = vor.u32 %v189_v5, %v188_v57  ;;  %v193_v33 = vshll.u32 %v192_v48, 23  ;;  %v328_v55 = vadd.s32 1, %v324_v28 }
  0xef   :  { %v519_v46 = vadd.f32 -0.4999988, %v518_v12  ;;  %v526_v34 = vadd.f32 -0.16666654, %v525_v19  ;;  %v532_v50 = vand.u32 3, %v531_v2  ;;  %v665_v56 = vsel %vm544_vm14, %v664_v63, %v663_v31 }
  0xf0   :  { %vm6645_vm2 = vcmp.le.f32.partialorder %v10200_v53, 0.7853982  ;;  %v667_v62 = vsel %vm544_vm14, %v666_v23, %v6552_v3  ;;  %v194_v41 = vor.u32 4788187, %v193_v33  ;;  %v329_v37 = vsel %vm327_vm1, %v328_v55, %v324_v28 }
  0xf1   :  { %v668_v42 = vsel %vm6645_vm2, %v6124_v9, %v665_v56  ;;  %v520_v27 = vmul.f32 %v519_v46, %v515_v59  ;;  %v527_v6 = vmul.f32 %v526_v34, %v515_v59  ;;  %v330_v1 = vadd.s32 %v329_v37, %v325_v10  ;;  %v5956_v37 = vld [vmem:[%s10177_s0 + $0x10] sm:$0xff] }
  0xf2   :  { %v670_v39 = vmul.f32 %v668_v42, %v668_v42  ;;  %vm79_vm7 = vcmp.lt.s32.totalorder %v6151_v49, 0  ;;  %v10203_v11 = vand.u32 2147483647, %v6151_v49  ;;  %v195_v36 = vand.u32 2147483647, %v194_v41 }
  0xf3   :  { %v197_v3 = vcvt.s32.f32 %v190_v45  ;;  %v521_v38 = vadd.f32 1.0, %v520_v27  ;;  %v528_v22 = vadd.f32 1.0, %v527_v6  ;;  %vm533_vm6 = vcmp.lt.s32.totalorder %v532_v50, 2 }
  0xf4   :  { %vm6660_vm0 = vcmp.le.f32.partialorder %v10203_v11, 0.7853982  ;;  %v671_v13 = vmul.f32 -0.001358992, %v670_v39  ;;  %v678_v21 = vmul.f32 -0.00019511016, %v670_v39  ;;  %vm530_vm8 = vweird.f32 %v6122_v8 }
  0xf5   :  { %v669_v51 = vsel %vm6645_vm2, 0, %v667_v62  ;;  %v198_v2 = vmul.f32 %v197_v3, %v195_v36  ;;  %v331_v10 = vadd.s32 536870912, %v330_v1  ;;  %v529_v35 = vmul.f32 %v528_v22, %v513_v7 }
  0xf6   :  { %v538_v43 = vxor.u32 2147483648, %v521_v38  ;;  %v672_v59 = vadd.f32 0.041655596, %v671_v13  ;;  %v679_v4 = vadd.f32 0.008332121, %v678_v21  ;;  %vm534_vm3 = vcmp.eq.s32.totalorder %v532_v50, 0 }
  0xf7   :  { %vm537_vm4 = vcmp.eq.s32.totalorder %v532_v50, 2  ;;  %v199_v23 = vxor.u32 2147483648, %v198_v2  ;;  %v6666_v15 = vshrl.u32 %v331_v10, 30  ;;  %v535_v14 = vxor.u32 2147483648, %v529_v35 }
  0xf8   :  { %v673_v44 = vmul.f32 %v672_v59, %v670_v39  ;;  %v680_v20 = vmul.f32 %v679_v4, %v670_v39  ;;  %v201_v40 = vsub.s32 4, %v6598_v16  ;;  %v539_v32 = vsel %vm537_vm4, %v538_v43, %v529_v35 }
  0xf9   :  { %v686_v0 = vadd.s32 3, %v669_v51  ;;  %v200_v61 = vsel %vm79_vm7, %v199_v23, %v198_v2  ;;  %v333_v7 = vshll.u32 %v6666_v15, 30  ;;  %v536_v26 = vsel %vm534_vm3, %v521_v38, %v535_v14 }
  0xfa   :  { %v674_v29 = vadd.f32 -0.4999988, %v673_v44  ;;  %v681_v47 = vadd.f32 -0.16666654, %v680_v20  ;;  %v203_v25 = vsel %vm6660_vm0, %v6151_v49, %v200_v61  ;;  %v540_v18 = vsel %vm533_vm6, %v536_v26, %v539_v32 }
  0xfb   :  { %v205_v31 = vmul.f32 %v203_v25, %v203_v25  ;;  %v6677_v57 = vsub.s32 %v330_v1, %v333_v7  ;;  %v541_v5 = vsel %vm530_vm8, nan, %v540_v18  ;;  %v202_v12 = vsel %vm79_vm7, %v201_v40, %v6598_v16 }
  0xfc   :  { %v675_v48 = vmul.f32 %v674_v29, %v670_v39  ;;  %v682_v28 = vmul.f32 %v681_v47, %v670_v39  ;;  %v699_v19 = vmul.f32 %v541_v5, %v541_v5  ;;  %v687_v33 = vand.u32 3, %v686_v0 }
  0xfd   :  { %v206_v63 = vmul.f32 -0.001358992, %v205_v31  ;;  %v213_v53 = vmul.f32 -0.00019511016, %v205_v31  ;;  %vm335_vm5 = vcmp.lt.s32.totalorder %v6677_v57, 0  ;;  %v336_v55 = vsub.s32 0, %v6677_v57 }
  0xfe   :  { %v676_v45 = vadd.f32 1.0, %v675_v48  ;;  %v683_v8 = vadd.f32 1.0, %v682_v28  ;;  %v713_v46 = vmul.f32 %v709_v54, %v699_v19  ;;  %v204_v41 = vsel %vm6660_vm0, 0, %v202_v12  ;;  %v704_v12 = vpop.permute.xlu1 %703 }
  0xff   :  { %v207_v34 = vadd.f32 0.041655596, %v206_v63  ;;  %v214_v50 = vadd.f32 0.008332121, %v213_v53  ;;  %v337_v16 = vsel %vm335_vm5, %v336_v55, %v6677_v57  ;;  %vm685_vm9 = vweird.f32 %v6124_v9  ;;  %v5957_v9 = vld [vmem:[%s10177_s0 + $0x18] sm:$0xff] }
 0x100   :  { %v684_v56 = vmul.f32 %v683_v8, %v668_v42  ;;  %v693_v62 = vxor.u32 2147483648, %v676_v45  ;;  %v6690_v27 = vadd.f32 %v5956_v37, %v713_v46  ;;  %v338_v1 = vclz %v337_v16 }
 0x101   :  { %v208_v6 = vmul.f32 %v207_v34, %v205_v31  ;;  %v215_v39 = vmul.f32 %v214_v50, %v205_v31  ;;  %vm689_vm10 = vcmp.eq.s32.totalorder %v687_v33, 0  ;;  %vm692_vm11 = vcmp.eq.s32.totalorder %v687_v33, 2 }
 0x102   :  { %v690_v11 = vxor.u32 2147483648, %v684_v56  ;;  %v5735_v30 = vadd.s32 4294967294, %v338_v1  ;;  %721 = vrot.lane.b32.xlu2 %v6690_v27, %s5997_s23  ;;  %790 = vmatpush.msra.mxu0 %v6690_v27  ;;  %vm688_vm12 = vcmp.lt.s32.totalorder %v687_v33, 2  ;;  %v694_v38 = vsel %vm692_vm11, %v693_v62, %v684_v56 }
 0x103   :  { %v209_v42 = vadd.f32 -0.4999988, %v208_v6  ;;  %v216_v36 = vadd.f32 -0.16666654, %v215_v39  ;;  %v221_v22 = vadd.s32 3, %v204_v41  ;;  %v326_v10 = vadd.s32 %v6638_v24, %v6634_v17 }
 0x104   :  { %v691_v3 = vsel %vm689_vm10, %v676_v45, %v690_v11  ;;  %vm5736_vm13 = vcmp.lt.s32.totalorder %v5735_v30, 0  ;;  %vm220_vm2 = vweird.f32 %v6151_v49  ;;  %vm234_vm7 = vcmp.lt.s32.totalorder %v6156_v58, 0 }
 0x105   :  { %v695_v13 = vsel %vm688_vm12, %v691_v3, %v694_v38  ;;  %v210_v21 = vmul.f32 %v209_v42, %v205_v31  ;;  %v217_v51 = vmul.f32 %v216_v36, %v205_v31  ;;  %v341_v35 = vsel %vm5736_vm13, 0, %v5735_v30  ;;  %v910_v30 = vld [vmem:[%s10091_s7] sm:$0xff]  ;;  %s6003_s7 = smov 124  }
 0x106   :  { %v696_v2 = vsel %vm685_vm9, nan, %v695_v13  ;;  %v342_v23 = vsub.s32 32, %v341_v35  ;;  %v222_v14 = vand.u32 3, %v221_v22  ;;  %v346_v44 = vsub.s32 4294967266, %v341_v35 }
 0x107   :  { %v700_v43 = vmul.f32 %v696_v2, %v696_v2  ;;  %v211_v59 = vadd.f32 1.0, %v210_v21  ;;  %v218_v4 = vadd.f32 1.0, %v217_v51  ;;  %v343_v61 = vshll.u32 %v6677_v57, %v341_v35 }
 0x108   :  { %v344_v0 = vshrl.u32 %v326_v10, %v342_v23  ;;  %v347_v7 = vadd.s32 127, %v346_v44  ;;  %vm224_vm14 = vcmp.eq.s32.totalorder %v222_v14, 0  ;;  %vm227_vm15 = vcmp.eq.s32.totalorder %v222_v14, 2 }
 0x109   :  { %v714_v20 = vmul.f32 %v709_v54, %v700_v43  ;;  %v219_v40 = vmul.f32 %v218_v4, %v203_v25  ;;  %v228_v32 = vxor.u32 2147483648, %v211_v59  ;;  %vm223_vm1 = vcmp.lt.s32.totalorder %v222_v14, 2  ;;  %v5958_v54 = vld [vmem:[%s10177_s0] sm:$0xff]  ;;  %v5959_v4 = vld [vmem:[%s10177_s0 + $0x8] sm:$0xff]  ;;  %s6005_s0 = smov 5  }
 0x10a   :  { %v345_v24 = vor.u32 %v344_v0, %v343_v61  ;;  %v348_v29 = vshll.u32 %v347_v7, 23  ;;  %v10206_v49 = vand.u32 2147483647, %v6156_v58  ;;  %v356_v55 = vsub.s32 4, %v6666_v15  ;;  %v54_v14 = vld [vmem:[%s10085_s1] sm:$0x3] }
 0x10b   :  { %v718_v26 = vadd.f32 %v5957_v9, %v714_v20  ;;  %v225_v17 = vxor.u32 2147483648, %v219_v40  ;;  %v229_v18 = vsel %vm227_vm15, %v228_v32, %v219_v40  ;;  %vm375_vm8 = vweird.f32 %v6156_v58 }
 0x10c   :  { %v349_v31 = vor.u32 4788187, %v348_v29  ;;  %v352_v48 = vcvt.s32.f32 %v345_v24  ;;  %vm6714_vm0 = vcmp.le.f32.partialorder %v10206_v49, 0.7853982  ;;  %v357_v62 = vsel %vm234_vm7, %v356_v55, %v6666_v15  ;;  %v767_v29 = vld [vmem:[%s10088_s4] sm:$0xff] }
 0x10d   :  { %v226_v47 = vsel %vm224_vm14, %v211_v59, %v225_v17  ;;  %813 = vmatpush.msra.mxu1 %v718_v26  ;;  %725 = vrot.lane.b32.xlu2 %v718_v26, %s5997_s23  ;;  %v359_v37 = vsel %vm6714_vm0, 0, %v357_v62  ;;  %vm734_vm5 = vcmp.ge.s32.totalorder %v54_v14, 1  ;;  %v727_v20 = vlaneseq  ;;  %v866_v55 = vld [vmem:[%s10090_s6] sm:$0xff] }
 0x10e   :  { %v230_v25 = vsel %vm223_vm1, %v226_v47, %v229_v18  ;;  %v350_v5 = vand.u32 2147483647, %v349_v31  ;;  %v376_v11 = vadd.s32 3, %v359_v37  ;;  %v735_v40 = vsel %vm734_vm5, 1, %v10186_v60  ;;  %v768_v47 = vld [vmem:[%s10088_s4 + $0x8] sm:$0xff]  ;;  %v927_v62 = vld [vmem:[%s10093_s9] sm:$0xff] }
 0x10f   :  { %v231_v57 = vsel %vm220_vm2, nan, %v230_v25  ;;  %v6744_v32 = vand.u32 127, %v727_v20  ;;  %v736_v0 = vperm.slane %v735_v40, 0  ;;  %v737_v61 = vperm.slane %v735_v40, 1 }
 0x110   :  { %v697_v28 = vmul.f32 %v231_v57, %v231_v57  ;;  %v353_v19 = vmul.f32 %v352_v48, %v350_v5  ;;  %v377_v38 = vand.u32 3, %v376_v11  ;;  %v10210_v7 = vmov 0 }
 0x111   :  { %10209 = vst [vmem:[#allocation5_spill] sm:$0xff] %v6744_v32  ;;  %vm10136_vm9 = vcmp.lt.s32.totalorder %v6744_v32, 1  ;;  %vm6747_vm10 = vcmp.eq.s32.totalorder %v736_v0, 1  ;;  %vm6751_vm11 = vcmp.eq.s32.totalorder %v737_v61, 1  ;;  %v10213_v9 = vmov 0 }
 0x112   :  { %v711_v63 = vmul.f32 %v704_v12, %v697_v28  ;;  %v354_v53 = vxor.u32 2147483648, %v353_v19  ;;  %vm379_vm6 = vcmp.eq.s32.totalorder %v377_v38, 0  ;;  %vm382_vm3 = vcmp.eq.s32.totalorder %v377_v38, 2 }
 0x113   :  { %vm378_vm4 = vcmp.lt.s32.totalorder %v377_v38, 2  ;;  %v10211_v7 = vsel %vm6747_vm10, 4294967295, %v10210_v7  ;;  %v10214_v9 = vsel %vm6751_vm11, 4294967295, %v10213_v9  ;;  %vm769_vm12 = vcmask 130048  }
 0x114   :  { %v715_v45 = vadd.f32 %v5958_v54, %v711_v63  ;;  %v355_v33 = vsel %vm234_vm7, %v354_v53, %v353_v19  ;;  %10212 = vst [vmem:[#allocation6_spill] sm:$0xff] %v10211_v7  ;;  %vm757_vm13 = vcmp.lt.s32.totalorder %v54_v14, 127  ;;  %vm10141_vm14 = vcmp.lt.s32.totalorder %v6744_v32, 127 }
 0x115   :  { %746 = vrot.lane.b32.xlu2 %v6690_v27, %s5998_s28  ;;  %v358_v46 = vsel %vm6714_vm0, %v6156_v58, %v355_v33  ;;  %v924_v58 = vld [vmem:[%s10092_s8] sm:$0xff]  ;;  %10215 = vst [vmem:[#allocation7_spill] sm:$0xff] %v10214_v9  ;;  %v758_v25 = vsel %vm757_vm13, 1, %v10186_v60  ;;  %v10216_v63 = vmov 0  ;;  %v10219_v49 = vmov 0 }
 0x116   :  { %719 = vrot.lane.b32.xlu0 %v715_v45, %s5997_s23  ;;  %791 = vmatpush.msra.mxu0 %v715_v45  ;;  %v360_v34 = vmul.f32 %v358_v46, %v358_v46  ;;  %v759_v31 = vperm.slane %v758_v25, 0  ;;  %v760_v5 = vperm.slane %v758_v25, 1 }
 0x117   :  { %5743 = vmatmul.msk.f32.vlgmr.msra.gmra.mxu0 %vm769_vm12, %v767_v29 }
 0x118   :  { %v361_v50 = vmul.f32 -0.001358992, %v360_v34  ;;  %v368_v56 = vmul.f32 -0.00019511016, %v360_v34  ;;  %vm6780_vm15 = vcmp.eq.s32.totalorder %v759_v31, 1  ;;  %vm6790_vm1 = vcmp.eq.s32.totalorder %v760_v5, 1 }
 0x119   :  { %v10217_v63 = vsel %vm6780_vm15, 4294967295, %v10216_v63  ;;  %v10220_v49 = vsel %vm6790_vm1, 4294967295, %v10219_v49 }
 0x11a   :  { %v362_v41 = vadd.f32 0.041655596, %v361_v50  ;;  %v369_v16 = vadd.f32 0.008332121, %v368_v56  ;;  %10218 = vst [vmem:[#allocation8_spill] sm:$0xff] %v10217_v63 }
 0x11b   :  { %10221 = vst [vmem:[#allocation9_spill] sm:$0xff] %v10220_v49 }
 0x11c   :  { %v363_v27 = vmul.f32 %v362_v41, %v360_v34  ;;  %v370_v6 = vmul.f32 %v369_v16, %v360_v34 }
 0x11e   :  { %750 = vrot.lane.b32.xlu0 %v718_v26, %s5998_s28  ;;  %v364_v39 = vadd.f32 -0.4999988, %v363_v27  ;;  %v371_v1 = vadd.f32 -0.16666654, %v370_v6 }
 0x11f   :  { %5744 = vmatmul.msk.f32.gmra.mxu0 %vm769_vm12, %v768_v47 }
 0x120   :  { %v365_v42 = vmul.f32 %v364_v39, %v360_v34  ;;  %v372_v36 = vmul.f32 %v371_v1, %v360_v34 }
 0x122   :  { %v366_v3 = vadd.f32 1.0, %v365_v42  ;;  %v373_v15 = vadd.f32 1.0, %v372_v36 }
 0x124   :  { %v374_v22 = vmul.f32 %v373_v15, %v358_v46  ;;  %v383_v13 = vxor.u32 2147483648, %v366_v3 }
 0x126   :  { %915 = vperm.xlu0 %5953, %v910_v30   ;;  %v380_v21 = vxor.u32 2147483648, %v374_v22  ;;  %v384_v2 = vsel %vm382_vm3, %v383_v13, %v374_v22 }
 0x128   :  { %v381_v51 = vsel %vm379_vm6, %v366_v3, %v380_v21 }
 0x129   :  { %v385_v10 = vsel %vm378_vm4, %v381_v51, %v384_v2 }
 0x12a   :  { %v386_v35 = vsel %vm375_vm8, nan, %v385_v10 }
 0x12b   :  { %v698_v43 = vmul.f32 %v386_v35, %v386_v35 }
 0x12d   :  { %v712_v59 = vmul.f32 %v704_v12, %v698_v43  ;;  %v822_v12 = vld [vmem:[%s10089_s5] sm:$0xff] }
 0x12f   :  { %v716_v23 = vadd.f32 %v5959_v4, %v712_v59 }
 0x131   :  { %723 = vrot.lane.b32.xlu1 %v716_v23, %s5997_s23  ;;  %814 = vmatpush.msra.mxu1 %v716_v23 }
 0x132   :  { %748 = vrot.lane.b32.xlu2 %v716_v23, %s5998_s28  ;;  %5745 = vmatmul.msk.f32.vlgmr.msra.gmra.mxu1 %vm769_vm12, %v767_v29 }
 0x139   :  { %744 = vrot.lane.b32.xlu1 %v715_v45, %s5998_s28 }
 0x13a   :  { %5746 = vmatmul.msk.f32.gmra.mxu1 %vm769_vm12, %v768_v47  ;;  %1263 = vperm.xlu2 %5955, %v927_v62  }
 0x141   :  { %944 = vperm.xlu1 %5954, %v924_v58  }
 0x15c   :  { %v722_v44 = vpop.permute.xlu2 %721 }
 0x167   :  { %v726_v26 = vpop.permute.xlu2 %725 }
 0x168   :  { %v733_v17 = vsel %vm10136_vm9, %v726_v26, %v722_v44  ;;  %v731_v24 = vsel %vm10136_vm9, %v722_v44, %v726_v26 }
 0x169   :  { %5747 = vmatpush.msk.msra.mxu2 %vm6747_vm10, %v733_v17  ;;  %5750 = vmatpush.msk.msra.mxu3 %vm6751_vm11, %v731_v24 }
 0x16f   :  { %v747_v48 = vpop.permute.xlu2 %746 }
 0x188   :  { %v720_v18 = vpop.permute.xlu0 %719 }
 0x18c   :  { %v749_v8 = vpop.permute.xlu2 %748 }
 0x190   :  { %v751_v57 = vpop.permute.xlu0 %750 }
 0x191   :  { %v754_v19 = vsel %vm10141_vm14, %v747_v48, %v751_v57  ;;  %v756_v45 = vsel %vm10141_vm14, %v751_v57, %v747_v48 }
 0x194   :  { %v793_v50 = vpop.f32.mrf.mxu0 }
 0x198   :  { %v916_v6 = vpop.permute.xlu0 %915 }
 0x19c   :  { %v796_v30 = vpop.f32.mrf.mxu0 }
 0x1a3   :  { %v724_v28 = vpop.permute.xlu1 %723 }
 0x1a4   :  { %v732_v53 = vsel %vm10136_vm9, %v724_v28, %v720_v18  ;;  %v730_v54 = vsel %vm10136_vm9, %v720_v18, %v724_v28 }
 0x1a5   :  { %5748 = vmatpush.msk.msra.mxu2 %vm6747_vm10, %v732_v53  ;;  %5751 = vmatpush.msk.msra.mxu3 %vm6751_vm11, %v730_v54 }
 0x1a6   :  { %5749 = vmatmul.msk.f32.vlgmr.msra.gmra.mxu2 %vm769_vm12, %v822_v12  ;;  %5752 = vmatmul.msk.f32.vlgmr.msra.gmra.mxu3 %vm769_vm12, %v822_v12  ;;  %v10223_v12 = vmov 920167782  }
 0x1a7   :  { %5753 = vmatpush.msk.msrb.mxu2 %vm6780_vm15, %v754_v19  ;;  %5756 = vmatpush.msk.msrb.mxu3 %vm6790_vm1, %v756_v45 }
 0x1ab   :  { %v745_v33 = vpop.permute.xlu1 %744 }
 0x1ac   :  { %v753_v46 = vsel %vm10141_vm14, %v745_v33, %v749_v8  ;;  %v755_v34 = vsel %vm10141_vm14, %v749_v8, %v745_v33  ;;  %v10224_v33 = vmov 1326507024  }
 0x1ad   :  { %5754 = vmatpush.msk.msrb.mxu2 %vm6780_vm15, %v753_v46  ;;  %5757 = vmatpush.msk.msrb.mxu3 %vm6790_vm1, %v755_v34 }
 0x1ae   :  { %5755 = vmatmul.msk.f32.vlgmr.msrb.gmra.mxu2 %vm769_vm12, %v866_v55  ;;  %5758 = vmatmul.msk.f32.vlgmr.msrb.gmra.mxu3 %vm769_vm12, %v866_v55 }
 0x1af   :  { %v816_v56 = vpop.f32.mrf.mxu1 }
 0x1b3   :  { %v945_v11 = vpop.permute.xlu1 %944 }
 0x1b7   :  { %v819_v3 = vpop.f32.mrf.mxu1 }
 0x229   :  { %v843_v41 = vpop.f32.mrf.mxu2  ;;  %v863_v16 = vpop.f32.mrf.mxu3 }
 0x22a   :  { %v911_v37 = vadd.f32 %v843_v41, %v793_v50  ;;  %v912_v27 = vadd.f32 %v863_v16, %v816_v56  ;;  %v10225_v50 = vmov 2102212464  }
 0x22c   :  { %v6820_v39 = vadd.f32 %v916_v6, %v911_v37  ;;  %v6822_v1 = vadd.f32 %v916_v6, %v912_v27  ;;  %v10226_v27 = vmov 2475754826  }
 0x22e   :  { %v6825_v42 = vmul.f32 %v945_v11, %v6820_v39  ;;  %v6828_v36 = vmul.f32 %v945_v11, %v6822_v1 }
 0x230   :  { %v952_v15 = vand.u32 2139095040, %v6825_v42  ;;  %v1107_v38 = vand.u32 2139095040, %v6828_v36  ;;  %v10123_v23 = vand.u32 2147483647, %v6825_v42  ;;  %v10122_v31 = vand.u32 2147483647, %v6828_v36 }
 0x231   :  { %v887_v22 = vpop.f32.mrf.mxu2  ;;  %v907_v13 = vpop.f32.mrf.mxu3 }
 0x232   :  { %v953_v21 = vshrl.u32 %v952_v15, 23  ;;  %v1108_v51 = vshrl.u32 %v1107_v38, 23  ;;  %v920_v2 = vadd.f32 %v887_v22, %v796_v30  ;;  %v921_v10 = vadd.f32 %v907_v13, %v819_v3 }
 0x233   :  { %v956_v17 = vand.u32 8388607, %v10123_v23  ;;  %v6856_v45 = vand.u32 8388607, %v10122_v31  ;;  %v10227_v13 = vmov 2131351028  }
 0x234   :  { %v5759_v35 = vadd.s32 4294967169, %v953_v21  ;;  %v5762_v43 = vadd.s32 4294967169, %v1108_v51  ;;  %v6832_v59 = vadd.f32 %v920_v2, %v916_v6  ;;  %v6834_v4 = vadd.f32 %v921_v10, %v916_v6 }
 0x235   :  { %v957_v5 = vor.u32 8388608, %v956_v17 }
 0x236   :  { %10222 = vst [vmem:[#allocation10_spill] sm:$0xff] %v6834_v4  ;;  %v959_v58 = vadd.s32 1, %v5759_v35  ;;  %v1114_v14 = vadd.s32 1, %v5762_v43  ;;  %v6838_v44 = vmul.f32 %v945_v11, %v6832_v59  ;;  %v6841_v20 = vmul.f32 %v945_v11, %v6834_v4 }
 0x237   :  { %v6863_v34 = vshll.u32 %v957_v5, 8 }
 0x238   :  { %vm960_vm2 = vcmp.gt.s32.totalorder %v959_v58, 0  ;;  %vm1115_vm7 = vcmp.gt.s32.totalorder %v1114_v14, 0  ;;  %v1275_v40 = vand.u32 2139095040, %v6838_v44  ;;  %v1430_v26 = vand.u32 2139095040, %v6841_v20 }
 0x239   :  { %v961_v0 = vsel %vm960_vm2, %v959_v58, 0  ;;  %v1116_v61 = vsel %vm1115_vm7, %v1114_v14, 0  ;;  %v999_v17 = vshrl.u32 %v6863_v34, 16 }
 0x23a   :  { %v963_v24 = vand.u32 31, %v961_v0  ;;  %v6847_v29 = vand.u32 31, %v1116_v61  ;;  %v1276_v47 = vshrl.u32 %v1275_v40, 23  ;;  %v1431_v18 = vshrl.u32 %v1430_v26, 23 }
 0x23b   :  { %v6858_v8 = vshrl.u32 %v961_v0, 5  ;;  %v6866_v62 = vshrl.u32 %v1116_v61, 5  ;;  %v998_v40 = vand.u32 65535, %v6863_v34 }
 0x23c   :  { %v964_v25 = vsub.s32 32, %v963_v24  ;;  %v6851_v57 = vsub.s32 32, %v6847_v29  ;;  %v5765_v48 = vadd.s32 4294967169, %v1276_v47  ;;  %v5768_v28 = vadd.s32 4294967169, %v1431_v18 }
 0x23d   :  { %v975_v56 = vshll.u32 %v10225_v50, %v963_v24  ;;  %v978_v16 = vshll.u32 %v10223_v12, %v963_v24  ;;  %v1130_v37 = vshll.u32 %v10225_v50, %v6847_v29  ;;  %v1133_v30 = vshll.u32 %v10223_v12, %v6847_v29 }
 0x23e   :  { %v976_v19 = vshrl.u32 %v10223_v12, %v964_v25  ;;  %v1282_v53 = vadd.s32 1, %v5765_v48  ;;  %v1437_v54 = vadd.s32 1, %v5768_v28  ;;  %v979_v55 = vshrl.u32 %v10224_v33, %v964_v25 }
 0x23f   :  { %v1131_v46 = vshrl.u32 %v10223_v12, %v6851_v57  ;;  %v1134_v41 = vshrl.u32 %v10224_v33, %v6851_v57  ;;  %v967_v6 = vshrl.u32 %v10226_v27, %v964_v25  ;;  %v966_v15 = vshll.u32 %v10182_v52, %v963_v24 }
 0x240   :  { %vm1283_vm0 = vcmp.gt.s32.totalorder %v1282_v53, 0  ;;  %vm1438_vm6 = vcmp.gt.s32.totalorder %v1437_v54, 0  ;;  %v977_v11 = vor.u32 %v976_v19, %v975_v56  ;;  %v980_v38 = vor.u32 %v979_v55, %v978_v16 }
 0x241   :  { %v1284_v3 = vsel %vm1283_vm0, %v1282_v53, 0  ;;  %v6877_v22 = vor.u32 %v1131_v46, %v1130_v37  ;;  %v970_v21 = vshrl.u32 %v10227_v13, %v964_v25  ;;  %v973_v51 = vshrl.u32 %v10225_v50, %v964_v25 }
 0x242   :  { %v1135_v2 = vor.u32 %v1134_v41, %v1133_v30  ;;  %v1439_v10 = vsel %vm1438_vm6, %v1437_v54, 0  ;;  %v969_v35 = vshll.u32 %v10226_v27, %v963_v24  ;;  %v972_v43 = vshll.u32 %v10227_v13, %v963_v24 }
 0x243   :  { %v6883_v58 = vand.u32 31, %v1284_v3  ;;  %v968_v14 = vor.u32 %v967_v6, %v966_v15  ;;  %vm984_vm3 = vcmp.lt.s32.totalorder %v6858_v8, 4  ;;  %vm1139_vm4 = vcmp.lt.s32.totalorder %v6866_v62, 4 }
 0x244   :  { %v971_v61 = vor.u32 %v970_v21, %v969_v35  ;;  %v974_v26 = vor.u32 %v973_v51, %v972_v43  ;;  %v990_v47 = vsel %vm984_vm3, %v977_v11, 920167782  ;;  %v994_v18 = vsel %vm984_vm3, %v980_v38, 1326507024 }
 0x245   :  { %v6894_v24 = vand.u32 31, %v1439_v10  ;;  %v6899_v5 = vsel %vm1139_vm4, %v6877_v22, 920167782  ;;  %v6903_v48 = vsel %vm1139_vm4, %v1135_v2, 1326507024  ;;  %v965_v28 = vshrl.u32 %v10182_v52, %v964_v25 }
 0x246   :  { %vm981_vm8 = vcmp.lt.s32.totalorder %v6858_v8, 1  ;;  %v6907_v19 = vshrl.u32 %v1284_v3, 5  ;;  %v6910_v53 = vsub.s32 32, %v6883_v58  ;;  %vm983_vm5 = vcmp.lt.s32.totalorder %v6858_v8, 3 }
 0x247   :  { %v989_v54 = vsel %vm981_vm8, %v968_v14, %v971_v61  ;;  %v6917_v55 = vshll.u32 %v10225_v50, %v6883_v58  ;;  %v6919_v46 = vshrl.u32 %v1439_v10, 5  ;;  %vm982_vm12 = vcmp.lt.s32.totalorder %v6858_v8, 2 }
 0x248   :  { %v991_v25 = vsel %vm983_vm5, %v974_v26, %v990_v47  ;;  %v6926_v56 = vshll.u32 %v10223_v12, %v6883_v58  ;;  %v6929_v41 = vsub.s32 32, %v6894_v24  ;;  %v986_v16 = vsel %vm984_vm3, %v974_v26, 2102212464 }
 0x249   :  { %v992_v37 = vsel %vm982_vm12, %v989_v54, %v991_v25  ;;  %v993_v6 = vsel %vm981_vm8, %v971_v61, %v974_v26  ;;  %v995_v30 = vsel %vm983_vm5, %v977_v11, %v994_v18  ;;  %v6941_v38 = vshrl.u32 %v10223_v12, %v6910_v53 }
 0x24a   :  { %v1022_v3 = vand.u32 65535, %v992_v37  ;;  %v1023_v15 = vshrl.u32 %v992_v37, 16  ;;  %v6945_v21 = vshll.u32 %v10225_v50, %v6894_v24  ;;  %v6949_v51 = vshll.u32 %v10223_v12, %v6894_v24 }
 0x24b   :  { %v996_v2 = vsel %vm982_vm12, %v993_v6, %v995_v30  ;;  %v6955_v11 = vshrl.u32 %v10224_v33, %v6910_v53  ;;  %v985_v26 = vsel %vm981_vm8, %v965_v28, %v968_v14  ;;  %v987_v47 = vsel %vm983_vm5, %v971_v61, %v986_v16 }
 0x24c   :  { %v1000_v10 = vand.u32 65535, %v996_v2  ;;  %v1001_v35 = vshrl.u32 %v996_v2, 16  ;;  %v1025_v43 = vmul.u32 %v1023_v15, %v998_v40  ;;  %v1026_v18 = vmul.u32 %v1022_v3, %v999_v17 }
 0x24d   :  { %v1121_v54 = vshll.u32 %v10182_v52, %v6847_v29  ;;  %v1024_v6 = vmul.u32 %v1022_v3, %v998_v40  ;;  %v1027_v30 = vmul.u32 %v1023_v15, %v999_v17  ;;  %v1122_v2 = vshrl.u32 %v10226_v27, %v6851_v57 }
 0x24e   :  { %v1003_v25 = vmul.u32 %v1001_v35, %v998_v40  ;;  %v1004_v37 = vmul.u32 %v1000_v10, %v999_v17  ;;  %v1002_v31 = vmul.u32 %v1000_v10, %v998_v40  ;;  %v1028_v23 = vshll.u32 %v1025_v43, 16 }
 0x24f   :  { %v1124_v0 = vshll.u32 %v10226_v27, %v6847_v29  ;;  %v1005_v14 = vmul.u32 %v1001_v35, %v999_v17  ;;  %v1029_v9 = vshrl.u32 %v1025_v43, 16  ;;  %v1030_v61 = vshll.u32 %v1026_v18, 16 }
 0x250   :  { %v1006_v28 = vshll.u32 %v1003_v25, 16  ;;  %v1031_v16 = vshrl.u32 %v1026_v18, 16  ;;  %vm1032_vm13 = vc.u32 %v1024_v6, %v1028_v23  ;;  %v1034_v7 = vadd.s32 %v1028_v23, %v1024_v6 }
 0x251   :  { %v1125_v49 = vshrl.u32 %v10227_v13, %v6851_v57  ;;  %v1008_v3 = vshll.u32 %v1004_v37, 16  ;;  %v1033_v15 = vsel %vm1032_vm13, 1, %v10186_v60  ;;  %v1123_v32 = vor.u32 %v1122_v2, %v1121_v54 }
 0x252   :  { %vm1010_vm2 = vc.u32 %v1002_v31, %v1006_v28  ;;  %v1012_v40 = vadd.s32 %v1006_v28, %v1002_v31  ;;  %v1035_v63 = vadd.s32 %v1033_v15, %v1027_v30  ;;  %vm1036_vm7 = vc.u32 %v1034_v7, %v1030_v61 }
 0x253   :  { %v1011_v10 = vsel %vm1010_vm2, 1, %v10186_v60  ;;  %v1037_v35 = vsel %vm1036_vm7, 1, %v10186_v60  ;;  %v6972_v43 = vor.u32 %v1125_v49, %v1124_v0  ;;  %v1127_v6 = vshll.u32 %v10227_v13, %v6847_v29 }
 0x254   :  { %v1013_v17 = vadd.s32 %v1011_v10, %v1005_v14  ;;  %vm1014_vm0 = vc.u32 %v1012_v40, %v1008_v3  ;;  %v1039_v18 = vadd.s32 %v1037_v35, %v1035_v63  ;;  %v1128_v31 = vshrl.u32 %v10225_v50, %v6851_v57 }
 0x255   :  { %v1015_v23 = vsel %vm1014_vm0, 1, %v10186_v60  ;;  %v1007_v28 = vshrl.u32 %v1003_v25, 16  ;;  %vm1136_vm6 = vcmp.lt.s32.totalorder %v6866_v62, 1  ;;  %vm1138_vm3 = vcmp.lt.s32.totalorder %v6866_v62, 3 }
 0x256   :  { %v1017_v4 = vadd.s32 %v1015_v23, %v1013_v17  ;;  %v1040_v54 = vadd.s32 %v1039_v18, %v1029_v9  ;;  %v1129_v30 = vor.u32 %v1128_v31, %v1127_v6  ;;  %v1144_v49 = vsel %vm1136_vm6, %v1123_v32, %v6972_v43 }
 0x257   :  { %v1150_v63 = vsel %vm1138_vm3, %v6877_v22, %v6903_v48  ;;  %v988_v29 = vsel %vm982_vm12, %v985_v26, %v987_v47  ;;  %v1009_v0 = vshrl.u32 %v1004_v37, 16  ;;  %v10228_v2 = vor.u32 8388608, %v6856_v45 }
 0x258   :  { %v1018_v25 = vadd.s32 %v1017_v4, %v1007_v28  ;;  %v1041_v9 = vadd.s32 %v1040_v54, %v1031_v16  ;;  %vm1137_vm8 = vcmp.lt.s32.totalorder %v6866_v62, 2  ;;  %v1146_v3 = vsel %vm1138_vm3, %v1129_v30, %v6899_v5 }
 0x259   :  { %v6992_v14 = vshll.u32 %v10228_v2, 8  ;;  %v1148_v22 = vsel %vm1136_vm6, %v6972_v43, %v1129_v30  ;;  %v7003_v8 = vadd.s32 %v1034_v7, %v1030_v61  ;;  %v1147_v4 = vsel %vm1137_vm8, %v1144_v49, %v1146_v3 }
 0x25a   :  { %v7001_v48 = vadd.s32 %v1018_v25, %v1009_v0  ;;  %v1151_v45 = vsel %vm1137_vm8, %v1148_v22, %v1150_v63  ;;  %v1454_v26 = vshrl.u32 %v10223_v12, %v6929_v41  ;;  %v1042_v47 = vmul.u32 %v6863_v34, %v988_v29 }
 0x25b   :  { %v1045_v5 = vadd.s32 1, %v1041_v9  ;;  %v1153_v37 = vand.u32 65535, %v6992_v14  ;;  %v1154_v7 = vshrl.u32 %v6992_v14, 16  ;;  %v1155_v61 = vand.u32 65535, %v1151_v45 }
 0x25c   :  { %vm1044_vm5 = vc.u32 %v7001_v48, %v7003_v8  ;;  %v1156_v16 = vshrl.u32 %v1151_v45, 16  ;;  %v1120_v15 = vshrl.u32 %v10182_v52, %v6851_v57  ;;  %v1177_v10 = vand.u32 65535, %v1147_v4 }
 0x25d   :  { %v1046_v40 = vsel %vm1044_vm5, %v1045_v5, %v1041_v9  ;;  %v1178_v17 = vshrl.u32 %v1147_v4, 16  ;;  %vm1307_vm12 = vcmp.lt.s32.totalorder %v6907_v19, 4  ;;  %v7021_v34 = vshrl.u32 %v10224_v33, %v6929_v41 }
 0x25e   :  { %v1047_v35 = vadd.s32 %v1046_v40, %v1042_v47  ;;  %v1158_v23 = vmul.u32 %v1156_v16, %v1153_v37  ;;  %v1159_v18 = vmul.u32 %v1155_v61, %v1154_v7  ;;  %v7025_v6 = vor.u32 %v6941_v38, %v6917_v55 }
 0x25f   :  { %v1140_v31 = vsel %vm1136_vm6, %v1120_v15, %v1123_v32  ;;  %v1180_v28 = vmul.u32 %v1178_v17, %v1153_v37  ;;  %v1181_v57 = vmul.u32 %v1177_v10, %v1154_v7  ;;  %v1157_v49 = vmul.u32 %v1155_v61, %v1153_v37 }
 0x260   :  { %v1048_v54 = vadd.s32 536870912, %v1047_v35  ;;  %v1161_v63 = vshll.u32 %v1158_v23, 16  ;;  %v1272_v29 = vand.u32 2147483647, %v6838_v44  ;;  %v1141_v0 = vsel %vm1139_vm4, %v1129_v30, 2102212464 }
 0x261   :  { %v1160_v25 = vmul.u32 %v1156_v16, %v1154_v7  ;;  %v1179_v2 = vmul.u32 %v1177_v10, %v1153_v37  ;;  %v1183_v9 = vshll.u32 %v1180_v28, 16  ;;  %v1163_v55 = vshll.u32 %v1159_v18, 16 }
 0x262   :  { %v7032_v3 = vshrl.u32 %v1048_v54, 30  ;;  %vm1165_vm13 = vc.u32 %v1157_v49, %v1161_v63  ;;  %v1167_v38 = vadd.s32 %v1161_v63, %v1157_v49  ;;  %v1185_v22 = vshll.u32 %v1181_v57, 16 }
 0x263   :  { %v1166_v32 = vsel %vm1165_vm13, 1, %v10186_v60  ;;  %vm1187_vm2 = vc.u32 %v1179_v2, %v1183_v9  ;;  %v1189_v4 = vadd.s32 %v1183_v9, %v1179_v2  ;;  %v1182_v5 = vmul.u32 %v1178_v17, %v1154_v7 }
 0x264   :  { %v1050_v45 = vshll.u32 %v7032_v3, 30  ;;  %v1168_v47 = vadd.s32 %v1166_v32, %v1160_v25  ;;  %vm1169_vm7 = vc.u32 %v1167_v38, %v1163_v55  ;;  %v1142_v30 = vsel %vm1138_vm3, %v6972_v43, %v1141_v0 }
 0x265   :  { %v1170_v37 = vsel %vm1169_vm7, 1, %v10186_v60  ;;  %v1188_v61 = vsel %vm1187_vm2, 1, %v10186_v60  ;;  %vm1191_vm4 = vc.u32 %v1189_v4, %v1185_v22  ;;  %v1162_v40 = vshrl.u32 %v1158_v23, 16 }
 0x266   :  { %v7041_v16 = vsub.s32 %v1047_v35, %v1050_v45  ;;  %v1172_v15 = vadd.s32 %v1170_v37, %v1168_v47  ;;  %v1190_v10 = vadd.s32 %v1188_v61, %v1182_v5  ;;  %v1303_v54 = vor.u32 %v6955_v11, %v6926_v56 }
 0x267   :  { %v1313_v7 = vsel %vm1307_vm12, %v7025_v6, 920167782  ;;  %v7049_v17 = vor.u32 %v1454_v26, %v6945_v21  ;;  %v1192_v43 = vsel %vm1191_vm4, 1, %v10186_v60  ;;  %v1164_v49 = vshrl.u32 %v1159_v18, 16 }
 0x268   :  { %vm1052_vm0 = vcmp.lt.s32.totalorder %v7041_v16, 0  ;;  %v1053_v35 = vsub.s32 0, %v7041_v16  ;;  %v1173_v23 = vadd.s32 %v1172_v15, %v1162_v40  ;;  %v1143_v63 = vsel %vm1137_vm8, %v1140_v31, %v1142_v30 }
 0x269   :  { %v1184_v0 = vshrl.u32 %v1180_v28, 16  ;;  %v1194_v56 = vadd.s32 %v1192_v43, %v1190_v10  ;;  %v1290_v11 = vshrl.u32 %v10226_v27, %v6910_v53  ;;  %v1186_v26 = vshrl.u32 %v1181_v57, 16 }
 0x26a   :  { %v1054_v25 = vsel %vm1052_vm0, %v1053_v35, %v7041_v16  ;;  %v7059_v21 = vadd.s32 %v1173_v23, %v1164_v49  ;;  %v1279_v2 = vand.u32 8388607, %v1272_v29  ;;  %vm951_vm6 = vcmp.lt.s32.totalorder %v6825_v42, 0 }
 0x26b   :  { %v1055_v18 = vclz %v1054_v25  ;;  %v1195_v9 = vadd.s32 %v1194_v56, %v1184_v0  ;;  %v1289_v62 = vshll.u32 %v10182_v52, %v6883_v58  ;;  %v1293_v31 = vshrl.u32 %v10227_v13, %v6910_v53 }
 0x26c   :  { %v1317_v28 = vsel %vm1307_vm12, %v1303_v54, 1326507024  ;;  %v1043_v55 = vadd.s32 %v7003_v8, %v7001_v48  ;;  %v7072_v57 = vadd.s32 %v1189_v4, %v1185_v22  ;;  %v1292_v38 = vshll.u32 %v10226_v27, %v6883_v58 }
 0x26d   :  { %v5760_v32 = vadd.s32 4294967294, %v1055_v18  ;;  %v1196_v45 = vadd.s32 %v1195_v9, %v1186_v26  ;;  %v1197_v47 = vmul.u32 %v6992_v14, %v1143_v63  ;;  %v7077_v5 = vor.u32 %v1290_v11, %v1289_v62 }
 0x26e   :  { %v10229_v30 = vand.u32 2147483647, %v6825_v42  ;;  %vm1199_vm8 = vc.u32 %v7059_v21, %v7072_v57  ;;  %v7087_v48 = vor.u32 %v1293_v31, %v1292_v38  ;;  %v1295_v8 = vshll.u32 %v10227_v13, %v6883_v58 }
 0x26f   :  { %v1296_v22 = vshrl.u32 %v10225_v50, %v6910_v53  ;;  %vm5761_vm5 = vcmp.lt.s32.totalorder %v5760_v32, 0  ;;  %v1073_v14 = vsub.s32 4, %v7032_v3  ;;  %v1200_v4 = vadd.s32 1, %v1196_v45 }
 0x270   :  { %vm7081_vm3 = vcmp.le.f32.partialorder %v10229_v30, 0.7853982  ;;  %v1280_v61 = vor.u32 8388608, %v1279_v2  ;;  %v1058_v40 = vsel %vm5761_vm5, 0, %v5760_v32  ;;  %vm1304_vm13 = vcmp.lt.s32.totalorder %v6907_v19, 1 }
 0x271   :  { %v1297_v15 = vor.u32 %v1296_v22, %v1295_v8  ;;  %vm1306_vm2 = vcmp.lt.s32.totalorder %v6907_v19, 3  ;;  %v1059_v10 = vsub.s32 32, %v1058_v40  ;;  %v1063_v54 = vsub.s32 4294967266, %v1058_v40 }
 0x272   :  { %v1201_v43 = vsel %vm1199_vm8, %v1200_v4, %v1196_v45  ;;  %v1318_v58 = vsel %vm1306_vm2, %v7025_v6, %v1317_v28  ;;  %vm1305_vm7 = vcmp.lt.s32.totalorder %v6907_v19, 2  ;;  %v1312_v49 = vsel %vm1304_vm13, %v7077_v5, %v7087_v48 }
 0x273   :  { %v1202_v35 = vadd.s32 %v1201_v43, %v1197_v47  ;;  %v1316_v23 = vsel %vm1304_vm13, %v7087_v48, %v1297_v15  ;;  %v1060_v63 = vshll.u32 %v7041_v16, %v1058_v40  ;;  %v1061_v0 = vshrl.u32 %v1043_v55, %v1059_v10 }
 0x274   :  { %v1064_v56 = vadd.s32 127, %v1063_v54  ;;  %v1314_v11 = vsel %vm1306_vm2, %v1297_v15, %v1313_v7  ;;  %v1074_v6 = vsel %vm951_vm6, %v1073_v14, %v7032_v3  ;;  %v1319_v26 = vsel %vm1305_vm7, %v1316_v23, %v1318_v58 }
 0x275   :  { %v1203_v25 = vadd.s32 536870912, %v1202_v35  ;;  %v7115_v2 = vshll.u32 %v1280_v61, 8  ;;  %v1062_v18 = vor.u32 %v1061_v0, %v1060_v63  ;;  %v1323_v62 = vand.u32 65535, %v1319_v26 }
 0x276   :  { %v1065_v9 = vshll.u32 %v1064_v56, 23  ;;  %v1324_v31 = vshrl.u32 %v1319_v26, 16  ;;  %vm1462_vm4 = vcmp.lt.s32.totalorder %v6919_v46, 4  ;;  %v1315_v7 = vsel %vm1305_vm7, %v1312_v49, %v1314_v11 }
 0x277   :  { %v7118_v16 = vshrl.u32 %v1203_v25, 30  ;;  %v1321_v28 = vand.u32 65535, %v7115_v2  ;;  %v1458_v3 = vor.u32 %v7021_v34, %v6949_v51  ;;  %v1076_v38 = vsel %vm7081_vm3, 0, %v1074_v6 }
 0x278   :  { %v1066_v55 = vor.u32 4788187, %v1065_v9  ;;  %v1322_v32 = vshrl.u32 %v7115_v2, 16  ;;  %v7131_v45 = vsel %vm1462_vm4, %v7049_v17, 920167782  ;;  %v1288_v30 = vshrl.u32 %v10182_v52, %v6910_v53 }
 0x279   :  { %v1205_v47 = vshll.u32 %v7118_v16, 30  ;;  %v1326_v8 = vmul.u32 %v1324_v31, %v1321_v28  ;;  %v1069_v14 = vcvt.s32.f32 %v1062_v18  ;;  %v1346_v61 = vshrl.u32 %v1315_v7, 16 }
 0x27a   :  { %v1067_v22 = vand.u32 2147483647, %v1066_v55  ;;  %v7136_v4 = vmul.u32 %v1323_v62, %v1322_v32  ;;  %v1093_v40 = vadd.s32 3, %v1076_v38  ;;  %v1325_v54 = vmul.u32 %v1323_v62, %v1321_v28 }
 0x27b   :  { %v7138_v10 = vsub.s32 %v1202_v35, %v1205_v47  ;;  %v1329_v43 = vshll.u32 %v1326_v8, 16  ;;  %v1309_v49 = vsel %vm1307_vm12, %v1297_v15, 2102212464  ;;  %v1328_v23 = vmul.u32 %v1324_v31, %v1322_v32 }
 0x27c   :  { %v1070_v58 = vmul.f32 %v1069_v14, %v1067_v22  ;;  %v1345_v63 = vand.u32 65535, %v1315_v7  ;;  %v1331_v0 = vshll.u32 %v7136_v4, 16  ;;  %v1348_v6 = vmul.u32 %v1346_v61, %v1321_v28 }
 0x27d   :  { %vm1207_vm0 = vcmp.lt.s32.totalorder %v7138_v10, 0  ;;  %v1208_v53 = vsub.s32 0, %v7138_v10  ;;  %vm1333_vm8 = vc.u32 %v1325_v54, %v1329_v43  ;;  %v1335_v35 = vadd.s32 %v1329_v43, %v1325_v54 }
 0x27e   :  { %v1071_v56 = vxor.u32 2147483648, %v1070_v58  ;;  %v1334_v11 = vsel %vm1333_vm8, 1, %v10186_v60  ;;  %v7146_v25 = vand.u32 3, %v1093_v40  ;;  %v1308_v15 = vsel %vm1304_vm13, %v1288_v30, %v7077_v5 }
 0x27f   :  { %v1209_v26 = vsel %vm1207_vm0, %v1208_v53, %v7138_v10  ;;  %v1336_v18 = vadd.s32 %v1334_v11, %v1328_v23  ;;  %v1310_v31 = vsel %vm1306_vm2, %v7087_v48, %v1309_v49  ;;  %vm1337_vm12 = vc.u32 %v1335_v35, %v1331_v0 }
 0x280   :  { %v1072_v9 = vsel %vm951_vm6, %v1071_v56, %v1070_v58  ;;  %v1210_v62 = vclz %v1209_v26  ;;  %v1198_v55 = vadd.s32 %v7072_v57, %v7059_v21  ;;  %v1347_v38 = vmul.u32 %v1345_v63, %v1321_v28 }
 0x281   :  { %v7160_v7 = vsel %vm7081_vm3, %v6825_v42, %v1072_v9  ;;  %v1349_v5 = vmul.u32 %v1345_v63, %v1322_v32  ;;  %v1338_v22 = vsel %vm1337_vm12, 1, %v10186_v60  ;;  %v1351_v14 = vshll.u32 %v1348_v6, 16 }
 0x282   :  { %v1077_v47 = vmul.f32 %v7160_v7, %v7160_v7  ;;  %v5763_v30 = vadd.s32 4294967294, %v1210_v62  ;;  %v7169_v48 = vsel %vm1305_vm7, %v1308_v15, %v1310_v31  ;;  %v1330_v40 = vshrl.u32 %v1326_v8, 16 }
 0x283   :  { %v1340_v37 = vadd.s32 %v1338_v22, %v1336_v18  ;;  %v1350_v54 = vmul.u32 %v1346_v61, %v1322_v32  ;;  %vm1355_vm3 = vc.u32 %v1347_v38, %v1351_v14  ;;  %v1353_v57 = vshll.u32 %v1349_v5, 16 }
 0x284   :  { %v1078_v43 = vmul.f32 -0.001358992, %v1077_v47  ;;  %v1085_v58 = vmul.f32 -0.00019511016, %v1077_v47  ;;  %vm5764_vm6 = vcmp.lt.s32.totalorder %v5763_v30, 0  ;;  %v1356_v28 = vsel %vm1355_vm3, 1, %v10186_v60 }
 0x285   :  { %v1213_v21 = vsel %vm5764_vm6, 0, %v5763_v30  ;;  %v1357_v49 = vadd.s32 %v1351_v14, %v1347_v38  ;;  %vm1106_vm5 = vcmp.lt.s32.totalorder %v6828_v36, 0  ;;  %v1341_v19 = vadd.s32 %v1340_v37, %v1330_v40 }
 0x286   :  { %v1079_v23 = vadd.f32 0.041655596, %v1078_v43  ;;  %v1086_v63 = vadd.f32 0.008332121, %v1085_v58  ;;  %v1214_v53 = vsub.s32 32, %v1213_v21  ;;  %v1218_v0 = vsub.s32 4294967266, %v1213_v21 }
 0x287   :  { %v1332_v8 = vshrl.u32 %v7136_v4, 16  ;;  %v1358_v56 = vadd.s32 %v1356_v28, %v1350_v54  ;;  %vm1359_vm13 = vc.u32 %v1357_v49, %v1353_v57  ;;  %v1215_v26 = vshll.u32 %v7138_v10, %v1213_v21 }
 0x288   :  { %v1080_v32 = vmul.f32 %v1079_v23, %v1077_v47  ;;  %v1087_v61 = vmul.f32 %v1086_v63, %v1077_v47  ;;  %v1216_v11 = vshrl.u32 %v1198_v55, %v1214_v53  ;;  %v1360_v35 = vsel %vm1359_vm13, 1, %v10186_v60 }
 0x289   :  { %v1219_v15 = vadd.s32 127, %v1218_v0  ;;  %v1352_v18 = vshrl.u32 %v1348_v6, 16  ;;  %v1362_v9 = vadd.s32 %v1360_v35, %v1358_v56  ;;  %v10232_v38 = vand.u32 2147483647, %v6828_v36 }
 0x28a   :  { %v1081_v62 = vadd.f32 -0.4999988, %v1080_v32  ;;  %v1088_v31 = vadd.f32 -0.16666654, %v1087_v61  ;;  %v1228_v4 = vsub.s32 4, %v7118_v16  ;;  %v7183_v22 = vadd.s32 %v1341_v19, %v1332_v8 }
 0x28b   :  { %vm7178_vm2 = vcmp.le.f32.partialorder %v10232_v38, 0.7853982  ;;  %v1217_v55 = vor.u32 %v1216_v11, %v1215_v26  ;;  %v1220_v14 = vshll.u32 %v1219_v15, 23  ;;  %v1354_v40 = vshrl.u32 %v1349_v5, 16 }
 0x28c   :  { %v1363_v37 = vadd.s32 %v1362_v9, %v1352_v18  ;;  %v1082_v10 = vmul.f32 %v1081_v62, %v1077_v47  ;;  %v1089_v54 = vmul.f32 %v1088_v31, %v1077_v47  ;;  %vm1095_vm7 = vcmp.lt.s32.totalorder %v7146_v25, 2 }
 0x28d   :  { %v7186_v6 = vadd.s32 %v1357_v49, %v1353_v57  ;;  %v1427_v43 = vand.u32 2147483647, %v6841_v20  ;;  %vm1092_vm0 = vweird.f32 %v6825_v42  ;;  %vm1096_vm8 = vcmp.eq.s32.totalorder %v7146_v25, 0 }
 0x28e   :  { %vm1099_vm12 = vcmp.eq.s32.totalorder %v7146_v25, 2  ;;  %v1221_v58 = vor.u32 4788187, %v1220_v14  ;;  %v1364_v21 = vadd.s32 %v1363_v37, %v1354_v40  ;;  %v1083_v28 = vadd.f32 1.0, %v1082_v10  ;;  %v7233_v40 = vpop.permute.xlu2 %1263 }
 0x28f   :  { %v1090_v23 = vadd.f32 1.0, %v1089_v54  ;;  %v1365_v5 = vmul.u32 %v7115_v2, %v7169_v48  ;;  %vm1367_vm6 = vc.u32 %v7183_v22, %v7186_v6  ;;  %v1224_v57 = vcvt.s32.f32 %v1217_v55 }
 0x290   :  { %v1222_v47 = vand.u32 2147483647, %v1221_v58  ;;  %v1229_v49 = vsel %vm1106_vm5, %v1228_v4, %v7118_v16  ;;  %v1368_v63 = vadd.s32 1, %v1364_v21  ;;  %v1100_v19 = vxor.u32 2147483648, %v1083_v28 }
 0x291   :  { %v1091_v53 = vmul.f32 %v1090_v23, %v7160_v7  ;;  %v1434_v0 = vand.u32 8388607, %v1427_v43  ;;  %v1448_v8 = vshrl.u32 %v10227_v13, %v6929_v41  ;;  %v1445_v56 = vshrl.u32 %v10226_v27, %v6929_v41 }
 0x292   :  { %v1225_v2 = vmul.f32 %v1224_v57, %v1222_v47  ;;  %v1369_v48 = vsel %vm1367_vm6, %v1368_v63, %v1364_v21  ;;  %v1451_v32 = vshrl.u32 %v10225_v50, %v6929_v41  ;;  %v1447_v7 = vshll.u32 %v10226_v27, %v6894_v24 }
 0x293   :  { %v1097_v61 = vxor.u32 2147483648, %v1091_v53  ;;  %v1370_v16 = vadd.s32 %v1369_v48, %v1365_v5  ;;  %v1450_v11 = vshll.u32 %v10227_v13, %v6894_v24  ;;  %v1101_v35 = vsel %vm1099_vm12, %v1100_v19, %v1091_v53 }
 0x294   :  { %v1226_v26 = vxor.u32 2147483648, %v1225_v2  ;;  %v1231_v15 = vsel %vm7178_vm2, 0, %v1229_v49  ;;  %v1444_v18 = vshll.u32 %v10182_v52, %v6894_v24  ;;  %v7220_v31 = vor.u32 %v1448_v8, %v1447_v7 }
 0x295   :  { %v1098_v9 = vsel %vm1096_vm8, %v1083_v28, %v1097_v61  ;;  %v1371_v62 = vadd.s32 536870912, %v1370_v16  ;;  %v7222_v38 = vor.u32 %v1451_v32, %v1450_v11  ;;  %v1472_v4 = vsel %vm1462_vm4, %v1458_v3, 1326507024 }
 0x296   :  { %v1102_v55 = vsel %vm1095_vm7, %v1098_v9, %v1101_v35  ;;  %v1227_v24 = vsel %vm1106_vm5, %v1226_v26, %v1225_v2  ;;  %v1435_v14 = vor.u32 8388608, %v1434_v0  ;;  %v7242_v34 = vor.u32 %v1445_v56, %v1444_v18 }
 0x297   :  { %v1103_v37 = vsel %vm1092_vm0, nan, %v1102_v55  ;;  %v1230_v10 = vsel %vm7178_vm2, %v6828_v36, %v1227_v24  ;;  %v7240_v51 = vshrl.u32 %v1371_v62, 30  ;;  %v1248_v25 = vadd.s32 3, %v1231_v15 }
 0x298   :  { %v1232_v3 = vmul.f32 %v1230_v10, %v1230_v10  ;;  %v1259_v54 = vmul.f32 %v1103_v37, %v1103_v37  ;;  %vm1459_vm3 = vcmp.lt.s32.totalorder %v6919_v46, 1  ;;  %vm1460_vm5 = vcmp.lt.s32.totalorder %v6919_v46, 2 }
 0x299   :  { %v1373_v58 = vshll.u32 %v7240_v51, 30  ;;  %vm1461_vm13 = vcmp.lt.s32.totalorder %v6919_v46, 3  ;;  %v1471_v42 = vsel %vm1459_vm3, %v7220_v31, %v7222_v38  ;;  %v1467_v47 = vsel %vm1459_vm3, %v7242_v34, %v7220_v31 }
 0x29a   :  { %v1233_v30 = vmul.f32 -0.001358992, %v1232_v3  ;;  %v1240_v21 = vmul.f32 -0.00019511016, %v1232_v3  ;;  %v1266_v28 = vmul.f32 %v7233_v40, %v1259_v54  ;;  %v1473_v23 = vsel %vm1461_vm13, %v7049_v17, %v1472_v4 }
 0x29b   :  { %v7256_v5 = vsub.s32 %v1370_v16, %v1373_v58  ;;  %v1474_v57 = vsel %vm1460_vm5, %v1471_v42, %v1473_v23  ;;  %v7264_v49 = vshll.u32 %v1435_v14, 8  ;;  %v1469_v17 = vsel %vm1461_vm13, %v7222_v38, %v7131_v45 }
 0x29c   :  { %v1234_v63 = vadd.f32 0.041655596, %v1233_v30  ;;  %v1241_v53 = vadd.f32 0.008332121, %v1240_v21  ;;  %v7267_v19 = vadd.f32 %v1266_v28, %v6820_v39  ;;  %v1249_v0 = vand.u32 3, %v1248_v25 }
 0x29d   :  { %vm1375_vm2 = vcmp.lt.s32.totalorder %v7256_v5, 0  ;;  %v1376_v8 = vsub.s32 0, %v7256_v5  ;;  %v1478_v56 = vand.u32 65535, %v1474_v57  ;;  %v1470_v61 = vsel %vm1460_vm5, %v1467_v47, %v1469_v17 }
 0x29e   :  { %v1235_v2 = vmul.f32 %v1234_v63, %v1232_v3  ;;  %v1242_v48 = vmul.f32 %v1241_v53, %v1232_v3  ;;  %1621 = vrot.lane.b32.xlu2 %v7267_v19, %s5998_s28  ;;  %v1476_v16 = vand.u32 65535, %v7264_v49  ;;  %v1479_v7 = vshrl.u32 %v1474_v57, 16 }
 0x29f   :  { %v1377_v32 = vsel %vm1375_vm2, %v1376_v8, %v7256_v5  ;;  %v1477_v26 = vshrl.u32 %v7264_v49, 16  ;;  %vm1251_vm7 = vcmp.eq.s32.totalorder %v1249_v0, 0  ;;  %vm1250_vm0 = vcmp.lt.s32.totalorder %v1249_v0, 2 }
 0x2a0   :  { %v1236_v45 = vadd.f32 -0.4999988, %v1235_v2  ;;  %v1243_v11 = vadd.f32 -0.16666654, %v1242_v48  ;;  %v1378_v35 = vclz %v1377_v32  ;;  %v1481_v15 = vmul.u32 %v1479_v7, %v1476_v16 }
 0x2a1   :  { %v7282_v4 = vmul.u32 %v1478_v56, %v1477_v26  ;;  %vm1247_vm8 = vweird.f32 %v6828_v36  ;;  %v1366_v55 = vadd.s32 %v7186_v6, %v7183_v22  ;;  %v1480_v24 = vmul.u32 %v1478_v56, %v1476_v16 }
 0x2a2   :  { %v1237_v18 = vmul.f32 %v1236_v45, %v1232_v3  ;;  %v1244_v9 = vmul.f32 %v1243_v11, %v1232_v3  ;;  %v5766_v62 = vadd.s32 4294967294, %v1378_v35  ;;  %v1484_v14 = vshll.u32 %v1481_v15, 16 }
 0x2a3   :  { %v1500_v37 = vand.u32 65535, %v1470_v61  ;;  %v1501_v58 = vshrl.u32 %v1470_v61, 16  ;;  %v1486_v30 = vshll.u32 %v7282_v4, 16  ;;  %v1483_v47 = vmul.u32 %v1479_v7, %v1477_v26 }
 0x2a4   :  { %v1238_v25 = vadd.f32 1.0, %v1237_v18  ;;  %v1245_v54 = vadd.f32 1.0, %v1244_v9  ;;  %vm5767_vm12 = vcmp.lt.s32.totalorder %v5766_v62, 0  ;;  %vm1488_vm6 = vc.u32 %v1480_v24, %v1484_v14 }
 0x2a5   :  { %v1381_v42 = vsel %vm5767_vm12, 0, %v5766_v62  ;;  %v1490_v3 = vadd.s32 %v1484_v14, %v1480_v24  ;;  %vm1254_vm2 = vcmp.eq.s32.totalorder %v1249_v0, 2  ;;  %v1489_v6 = vsel %vm1488_vm6, 1, %v10186_v60 }
 0x2a6   :  { %v1246_v21 = vmul.f32 %v1245_v54, %v1230_v10  ;;  %v1255_v28 = vxor.u32 2147483648, %v1238_v25  ;;  %v1382_v23 = vsub.s32 32, %v1381_v42  ;;  %1605 = vrot.lane.b32.xlu2 %v7267_v19, %s5997_s23  ;;  %v1386_v22 = vsub.s32 4294967266, %v1381_v42 }
 0x2a7   :  { %vm1492_vm9 = vc.u32 %v1490_v3, %v1486_v30  ;;  %v1383_v63 = vshll.u32 %v7256_v5, %v1381_v42  ;;  %v1491_v17 = vadd.s32 %v1489_v6, %v1483_v47  ;;  %v1502_v10 = vmul.u32 %v1500_v37, %v1476_v16 }
 0x2a8   :  { %v1252_v57 = vxor.u32 2147483648, %v1246_v21  ;;  %v1384_v53 = vshrl.u32 %v1366_v55, %v1382_v23  ;;  %v1387_v8 = vadd.s32 127, %v1386_v22  ;;  %v1493_v2 = vsel %vm1492_vm9, 1, %v10186_v60 }
 0x2a9   :  { %v1503_v48 = vmul.u32 %v1501_v58, %v1476_v16  ;;  %v1256_v32 = vsel %vm1254_vm2, %v1255_v28, %v1246_v21  ;;  %v1504_v7 = vmul.u32 %v1500_v37, %v1477_v26  ;;  %v1495_v35 = vadd.s32 %v1493_v2, %v1491_v17 }
 0x2aa   :  { %v1253_v56 = vsel %vm1251_vm7, %v1238_v25, %v1252_v57  ;;  %v1385_v61 = vor.u32 %v1384_v53, %v1383_v63  ;;  %v1388_v11 = vshll.u32 %v1387_v8, 23  ;;  %v1485_v9 = vshrl.u32 %v1481_v15, 16 }
 0x2ab   :  { %v1257_v45 = vsel %vm1250_vm0, %v1253_v56, %v1256_v32  ;;  %v1506_v18 = vshll.u32 %v1503_v48, 16  ;;  %v1505_v24 = vmul.u32 %v1501_v58, %v1477_v26  ;;  %v1508_v16 = vshll.u32 %v1504_v7, 16 }
 0x2ac   :  { %v1258_v5 = vsel %vm1247_vm8, nan, %v1257_v45  ;;  %v1389_v55 = vor.u32 4788187, %v1388_v11  ;;  %v1392_v14 = vcvt.s32.f32 %v1385_v61  ;;  %v1496_v42 = vadd.s32 %v1495_v35, %v1485_v9 }
 0x2ad   :  { %v1260_v62 = vmul.f32 %v1258_v5, %v1258_v5  ;;  %vm1510_vm9 = vc.u32 %v1502_v10, %v1506_v18  ;;  %v1512_v54 = vadd.s32 %v1506_v18, %v1502_v10  ;;  %v1443_v3 = vshrl.u32 %v10182_v52, %v6929_v41 }
 0x2ae   :  { %v1511_v25 = vsel %vm1510_vm9, 1, %v10186_v60  ;;  %v1390_v0 = vand.u32 2147483647, %v1389_v55  ;;  %v1464_v36 = vsel %vm1462_vm4, %v7222_v38, 2102212464  ;;  %v1487_v58 = vshrl.u32 %v7282_v4, 16 }
 0x2af   :  { %v1267_v37 = vmul.f32 %v7233_v40, %v1260_v62  ;;  %v1513_v30 = vadd.s32 %v1511_v25, %v1505_v24  ;;  %vm1514_vm7 = vc.u32 %v1512_v54, %v1508_v16  ;;  %v1507_v28 = vshrl.u32 %v1503_v48, 16 }
 0x2b0   :  { %v1393_v15 = vmul.f32 %v1392_v14, %v1390_v0  ;;  %v1515_v21 = vsel %vm1514_vm7, 1, %v10186_v60  ;;  %v1463_v41 = vsel %vm1459_vm3, %v1443_v3, %v7242_v34  ;;  %v1465_v38 = vsel %vm1461_vm13, %v7220_v31, %v1464_v36 }
 0x2b1   :  { %v7305_v26 = vadd.f32 %v1267_v37, %v6822_v1  ;;  %v1517_v23 = vadd.s32 %v1515_v21, %v1513_v30  ;;  %v1497_v22 = vadd.s32 %v1496_v42, %v1487_v58  ;;  %vm1274_vm4 = vcmp.lt.s32.totalorder %v6838_v44, 0 }
 0x2b2   :  { %v1394_v47 = vxor.u32 2147483648, %v1393_v15  ;;  %v1509_v4 = vshrl.u32 %v1504_v7, 16  ;;  %vm7322_vm0 = vcmp.le.f32.partialorder %v1272_v29, 0.7853982  ;;  %v1516_v57 = vadd.s32 %v1512_v54, %v1508_v16 }
 0x2b3   :  { %2067 = vrot.lane.b32.xlu1 %v7305_v26, %s5999_s27  ;;  %1623 = vrot.lane.b32.xlu0 %v7305_v26, %s5998_s28  ;;  %v1518_v6 = vadd.s32 %v1517_v23, %v1507_v28  ;;  %v1396_v63 = vsub.s32 4, %v7240_v51  ;;  %v1466_v17 = vsel %vm1460_vm5, %v1463_v41, %v1465_v38  ;;  %vm1415_vm2 = vweird.f32 %v6838_v44 }
 0x2b4   :  { %v1395_v31 = vsel %vm1274_vm4, %v1394_v47, %v1393_v15  ;;  %vm1522_vm3 = vc.u32 %v1497_v22, %v1516_v57  ;;  %v1520_v56 = vmul.u32 %v7264_v49, %v1466_v17  ;;  %v1521_v41 = vadd.s32 %v1516_v57, %v1497_v22 }
 0x2b5   :  { %v1398_v53 = vsel %vm7322_vm0, %v6838_v44, %v1395_v31  ;;  %v1519_v8 = vadd.s32 %v1518_v6, %v1509_v4  ;;  %v1397_v32 = vsel %vm1274_vm4, %v1396_v63, %v7240_v51  ;;  %vm1429_vm9 = vcmp.lt.s32.totalorder %v6841_v20, 0 }
 0x2b6   :  { %v1400_v2 = vmul.f32 %v1398_v53, %v1398_v53  ;;  %v1399_v46 = vsel %vm7322_vm0, 0, %v1397_v32  ;;  %vm7350_vm7 = vcmp.le.f32.partialorder %v1427_v43, 0.7853982 }
 0x2b7   :  { %v1523_v29 = vadd.s32 1, %v1519_v8  ;;  %v1416_v24 = vadd.s32 3, %v1399_v46 }
 0x2b8   :  { %v1401_v10 = vmul.f32 -0.001358992, %v1400_v2  ;;  %v1408_v48 = vmul.f32 -0.00019511016, %v1400_v2 }
 0x2b9   :  { %v1524_v61 = vsel %vm1522_vm3, %v1523_v29, %v1519_v8  ;;  %v1417_v37 = vand.u32 3, %v1416_v24 }
 0x2ba   :  { %v1402_v7 = vadd.f32 0.041655596, %v1401_v10  ;;  %v1409_v45 = vadd.f32 0.008332121, %v1408_v48  ;;  %v1525_v11 = vadd.s32 %v1524_v61, %v1520_v56 }
 0x2bb   :  { %vm1419_vm13 = vcmp.eq.s32.totalorder %v1417_v37, 0  ;;  %vm1422_vm8 = vcmp.eq.s32.totalorder %v1417_v37, 2  ;;  %vm1418_vm12 = vcmp.lt.s32.totalorder %v1417_v37, 2 }
 0x2bc   :  { %v1403_v35 = vmul.f32 %v1402_v7, %v1400_v2  ;;  %v1410_v18 = vmul.f32 %v1409_v45, %v1400_v2  ;;  %v1526_v5 = vadd.s32 536870912, %v1525_v11 }
 0x2be   :  { %v1404_v9 = vadd.f32 -0.4999988, %v1403_v35  ;;  %v1411_v62 = vadd.f32 -0.16666654, %v1410_v18  ;;  %v1527_v55 = vshrl.u32 %v1526_v5, 30 }
 0x2c0   :  { %v1405_v14 = vmul.f32 %v1404_v9, %v1400_v2  ;;  %v1412_v49 = vmul.f32 %v1411_v62, %v1400_v2  ;;  %v1528_v16 = vshll.u32 %v1527_v55, 30  ;;  %v1551_v61 = vsub.s32 4, %v1527_v55 }
 0x2c2   :  { %v1406_v25 = vadd.f32 1.0, %v1405_v14  ;;  %v1413_v54 = vadd.f32 1.0, %v1412_v49  ;;  %v1529_v51 = vsub.s32 %v1525_v11, %v1528_v16  ;;  %v1552_v35 = vsel %vm1429_vm9, %v1551_v61, %v1527_v55 }
 0x2c3   :  { %v1554_v43 = vsel %vm7350_vm7, 0, %v1552_v35 }
 0x2c4   :  { %v1414_v0 = vmul.f32 %v1413_v54, %v1398_v53  ;;  %vm1530_vm5 = vcmp.lt.s32.totalorder %v1529_v51, 0  ;;  %v1531_v42 = vsub.s32 0, %v1529_v51  ;;  %v1423_v3 = vxor.u32 2147483648, %v1406_v25 }
 0x2c5   :  { %v1571_v49 = vadd.s32 3, %v1554_v43 }
 0x2c6   :  { %v1420_v30 = vxor.u32 2147483648, %v1414_v0  ;;  %v1532_v36 = vsel %vm1530_vm5, %v1531_v42, %v1529_v51  ;;  %v1424_v28 = vsel %vm1422_vm8, %v1423_v3, %v1414_v0  ;;  %vm1570_vm5 = vweird.f32 %v6841_v20 }
 0x2c7   :  { %v1533_v15 = vclz %v1532_v36  ;;  %v1572_v37 = vand.u32 3, %v1571_v49 }
 0x2c8   :  { %v1421_v58 = vsel %vm1419_vm13, %v1406_v25, %v1420_v30 }
 0x2c9   :  { %v5769_v21 = vadd.s32 4294967294, %v1533_v15  ;;  %v1425_v23 = vsel %vm1418_vm12, %v1421_v58, %v1424_v28  ;;  %vm1574_vm4 = vcmp.eq.s32.totalorder %v1572_v37, 0  ;;  %vm1577_vm0 = vcmp.eq.s32.totalorder %v1572_v37, 2  ;;  %v936_v15 = vld [vmem:[%s10095_s11] sm:$0xff] }
 0x2ca   :  { %v1426_v6 = vsel %vm1415_vm2, nan, %v1425_v23  ;;  %vm1573_vm3 = vcmp.lt.s32.totalorder %v1572_v37, 2  ;;  %v10239_v23 = vld [vmem:[#allocation10_spill] sm:$0xff] }
 0x2cb   :  { %vm5770_vm6 = vcmp.lt.s32.totalorder %v5769_v21, 0  ;;  %v1582_v8 = vmul.f32 %v1426_v6, %v1426_v6 }
 0x2cc   :  { %v1536_v47 = vsel %vm5770_vm6, 0, %v5769_v21 }
 0x2cd   :  { %v1537_v38 = vsub.s32 32, %v1536_v47  ;;  %v1541_v4 = vsub.s32 4294967266, %v1536_v47  ;;  %v1538_v34 = vshll.u32 %v1529_v51, %v1536_v47  ;;  %v1584_v29 = vmul.f32 %v1582_v8, %v7233_v40 }
 0x2cf   :  { %v1539_v31 = vshrl.u32 %v1521_v41, %v1537_v38  ;;  %v1542_v63 = vadd.s32 127, %v1541_v4  ;;  %v7343_v56 = vadd.f32 %v1584_v29, %v6832_v59  ;;  %v930_v41 = vld [vmem:[%s10096_s12] sm:$0xff]  ;;  %v928_v38 = vld [vmem:[%s10093_s9 + $0x8] sm:$0xff] }
 0x2d0   :  { %v925_v4 = vld [vmem:[%s10092_s8 + $0x8] sm:$0xff] }
 0x2d1   :  { %v1540_v53 = vor.u32 %v1539_v31, %v1538_v34  ;;  %v1543_v17 = vshll.u32 %v1542_v63, 23  ;;  %1629 = vrot.lane.b32.xlu0 %v7343_v56, %s5998_s28 }
 0x2d3   :  { %v1544_v2 = vor.u32 4788187, %v1543_v17  ;;  %v1547_v48 = vcvt.s32.f32 %v1540_v53 }
 0x2d5   :  { %v1545_v10 = vand.u32 2147483647, %v1544_v2  ;;  %v10240_v2 = vld [vmem:[#allocation5_spill] sm:$0xff] }
 0x2d6   :  { %vm10243_vm12 = vcmp.lt.s32.totalorder %v10240_v2, 1 }
 0x2d7   :  { %v1548_v32 = vmul.f32 %v1547_v48, %v1545_v10  ;;  %vm10244_vm6 = vmmov %vm10243_vm12 }
 0x2d8   :  { %vm10245_vm2 = vmmov %vm10244_vm6 }
 0x2d9   :  { %v1549_v44 = vxor.u32 2147483648, %v1548_v32  ;;  %2065 = vrot.lane.b32.xlu0 %v7267_v19, %s5999_s27 }
 0x2db   :  { %v1550_v57 = vsel %vm1429_vm9, %v1549_v44, %v1548_v32  ;;  %vm10246_vm9 = vmmov %vm10245_vm2 }
 0x2dc   :  { %v1553_v7 = vsel %vm7350_vm7, %v6841_v20, %v1550_v57  ;;  %v939_v20 = vld [vmem:[%s10099_s15] sm:$0xff]  ;;  %vm10140_vm7 = vcmp.lt.s32.totalorder %v10240_v2, 2 }
 0x2dd   :  { %v1555_v45 = vmul.f32 %v1553_v7, %v1553_v7  ;;  %v5960_v57 = vld [vmem:[%s10085_s1] sm:$0x3] }
 0x2de   :  { %vm1597_vm13 = vcmp.ge.s32.totalorder %v5960_v57, 2  ;;  %vm2072_vm8 = vcmp.lt.s32.totalorder %v5960_v57, 126 }
 0x2df   :  { %v1556_v11 = vmul.f32 -0.001358992, %v1555_v45  ;;  %v1563_v46 = vmul.f32 -0.00019511016, %v1555_v45 }
 0x2e1   :  { %v1557_v18 = vadd.f32 0.041655596, %v1556_v11  ;;  %v1564_v5 = vadd.f32 0.008332121, %v1563_v46  ;;  %1607 = vrot.lane.b32.xlu0 %v7305_v26, %s5997_s23  ;;  %v1598_v11 = vsel %vm1597_vm13, 1, %v10186_v60 }
 0x2e3   :  { %v1558_v9 = vmul.f32 %v1557_v18, %v1555_v45  ;;  %v1565_v62 = vmul.f32 %v1564_v5, %v1555_v45 }
 0x2e5   :  { %v1559_v24 = vadd.f32 -0.4999988, %v1558_v9  ;;  %v1566_v14 = vadd.f32 -0.16666654, %v1565_v62  ;;  %v2073_v62 = vsel %vm2072_vm8, 1, %v10186_v60 }
 0x2e6   :  { %v2074_v49 = vperm.slane %v2073_v62, 0 }
 0x2e7   :  { %v1560_v16 = vmul.f32 %v1559_v24, %v1555_v45  ;;  %v1567_v25 = vmul.f32 %v1566_v14, %v1555_v45  ;;  %v1599_v24 = vperm.slane %v1598_v11, 0  ;;  %v1600_v14 = vperm.slane %v1598_v11, 1 }
 0x2e8   :  { %vm7454_vm13 = vcmp.eq.s32.totalorder %v2074_v49, 1 }
 0x2e9   :  { %v1561_v54 = vadd.f32 1.0, %v1560_v16  ;;  %v1568_v51 = vadd.f32 1.0, %v1567_v25  ;;  %1639 = vperm.xlu0 %5953, %v936_v15   ;;  %v2075_v16 = vperm.slane %v2073_v62, 1  ;;  %v10298_v25 = vmov 0 }
 0x2eb   :  { %v1569_v0 = vmul.f32 %v1568_v51, %v1553_v7  ;;  %v1578_v55 = vxor.u32 2147483648, %v1561_v54  ;;  %vm7458_vm8 = vcmp.eq.s32.totalorder %v2075_v16, 1 }
 0x2ed   :  { %v1575_v42 = vxor.u32 2147483648, %v1569_v0  ;;  %v1579_v3 = vsel %vm1577_vm0, %v1578_v55, %v1569_v0  ;;  %vm7442_vm0 = vcmp.eq.s32.totalorder %v1600_v14, 1  ;;  %v1588_v0 = vld [vmem:[%s10094_s10] sm:$0xff] }
 0x2ef   :  { %v1576_v30 = vsel %vm1574_vm4, %v1561_v54, %v1575_v42  ;;  %vm7438_vm4 = vcmp.eq.s32.totalorder %v1599_v24, 1  ;;  %v10301_v54 = vmov 0 }
 0x2f0   :  { %v1580_v36 = vsel %vm1573_vm3, %v1576_v30, %v1579_v3  ;;  %vm10138_vm3 = vcmp.lt.s32.totalorder %v10240_v2, 126 }
 0x2f1   :  { %v1581_v58 = vsel %vm1570_vm5, nan, %v1580_v36  ;;  %2016 = vperm.xlu0 %5953, %v939_v20   ;;  %vm10139_vm5 = vcmask 457728  }
 0x2f2   :  { %v1583_v21 = vmul.f32 %v1581_v58, %v1581_v58 }
 0x2f4   :  { %v1585_v28 = vmul.f32 %v1583_v21, %v7233_v40  ;;  %v933_v40 = vld [vmem:[%s10097_s13] sm:$0xff] }
 0x2f6   :  { %v7369_v47 = vadd.f32 %v1585_v28, %v10239_v23 }
 0x2f8   :  { %1631 = vrot.lane.b32.xlu1 %v7369_v47, %s5998_s28  ;;  %1615 = vrot.lane.b32.xlu2 %v7369_v47, %s5997_s23  ;;  %v1622_v34 = vpop.permute.xlu2 %1621 }
 0x300   :  { %1613 = vrot.lane.b32.xlu1 %v7343_v56, %s5997_s23  ;;  %1592 = vrot.lane.b32.xlu2 %v7369_v47, %s6000_s18  ;;  %v1606_v53 = vpop.permute.xlu2 %1605 }
 0x308   :  { %1590 = vrot.lane.b32.xlu1 %v7343_v56, %s6000_s18  ;;  %2007 = vperm.xlu2 %5955, %v933_v40  }
 0x310   :  { %1688 = vperm.xlu1 %5954, %v930_v41   ;;  %2801 = vperm.xlu2 %5955, %v928_v38  }
 0x318   :  { %2482 = vperm.xlu1 %5954, %v925_v4  }
 0x325   :  { %v1624_v6 = vpop.permute.xlu0 %1623  ;;  %v2068_v63 = vpop.permute.xlu1 %2067 }
 0x326   :  { %v1625_v44 = vsel %vm10141_vm14, %v1622_v34, %v1624_v6  ;;  %v1626_v22 = vsel %vm10141_vm14, %v1624_v6, %v1622_v34 }
 0x343   :  { %v1630_v31 = vpop.permute.xlu0 %1629 }
 0x34b   :  { %v2066_v17 = vpop.permute.xlu0 %2065 }
 0x34c   :  { %v2070_v36 = vsel %vm10138_vm3, %v2066_v17, %v2068_v63  ;;  %v2071_v15 = vsel %vm10138_vm3, %v2068_v63, %v2066_v17 }
 0x352   :  { %v1616_v61 = vpop.permute.xlu2 %1615 }
 0x353   :  { %v1608_v7 = vpop.permute.xlu0 %1607 }
 0x354   :  { %v1610_v18 = vsel %vm10245_vm2, %v1608_v7, %v1606_v53  ;;  %v1609_v5 = vsel %vm10246_vm9, %v1606_v53, %v1608_v7 }
 0x35a   :  { %v1593_v51 = vpop.permute.xlu2 %1592 }
 0x36a   :  { %v1632_v8 = vpop.permute.xlu1 %1631 }
 0x36b   :  { %v1633_v29 = vsel %vm10141_vm14, %v1630_v31, %v1632_v8  ;;  %v1634_v10 = vsel %vm10141_vm14, %v1632_v8, %v1630_v31 }
 0x36c   :  { %5771 = vmatpush.msk.msrb.mxu0 %vm6780_vm15, %v1633_v29  ;;  %5777 = vmatpush.msk.msrb.mxu1 %vm6790_vm1, %v1634_v10 }
 0x36e   :  { %5772 = vmatpush.msk.msrb.mxu0 %vm6780_vm15, %v1625_v44  ;;  %5778 = vmatpush.msk.msrb.mxu1 %vm6790_vm1, %v1626_v22 }
 0x370   :  { %1657 = vmatpush.msrb.mxu0 %v7343_v56  ;;  %1677 = vmatpush.msrb.mxu1 %v7369_v47 }
 0x372   :  { %v1614_v45 = vpop.permute.xlu1 %1613  ;;  %1658 = vmatpush.msrb.mxu0 %v7267_v19  ;;  %1678 = vmatpush.msrb.mxu1 %v7305_v26 }
 0x373   :  { %v1618_v46 = vsel %vm10243_vm12, %v1616_v61, %v1614_v45  ;;  %v1617_v35 = vsel %vm10244_vm6, %v1614_v45, %v1616_v61 }
 0x374   :  { %5773 = vmatpush.msk.msrb.mxu0 %vm6747_vm10, %v1618_v46  ;;  %5779 = vmatpush.msk.msrb.mxu1 %vm6751_vm11, %v1617_v35 }
 0x376   :  { %5774 = vmatpush.msk.msrb.mxu0 %vm6747_vm10, %v1610_v18  ;;  %5780 = vmatpush.msk.msrb.mxu1 %vm6751_vm11, %v1609_v5 }
 0x37a   :  { %v1591_v37 = vpop.permute.xlu1 %1590 }
 0x37b   :  { %v1596_v55 = vsel %vm10140_vm7, %v1593_v51, %v1591_v37  ;;  %v1595_v42 = vsel %vm10140_vm7, %v1591_v37, %v1593_v51 }
 0x37c   :  { %5775 = vmatpush.msk.msrb.mxu0 %vm7438_vm4, %v1596_v55  ;;  %5781 = vmatpush.msk.msrb.mxu1 %vm7442_vm0, %v1595_v42 }
 0x37d   :  { %5776 = vmatmul.msk.f32.vlgmr.msrb.gmra.mxu0 %vm10139_vm5, %v1588_v0  ;;  %5782 = vmatmul.msk.f32.vlgmr.msrb.gmra.mxu1 %vm10139_vm5, %v1588_v0 }
 0x37e   :  { %5791 = vmatpush.msk.msra.mxu0 %vm7454_vm13, %v2070_v36  ;;  %5797 = vmatpush.msk.msra.mxu1 %vm7458_vm8, %v2071_v15 }
 0x380   :  { %5792 = vmatpush.msk.msra.mxu0 %vm6780_vm15, %v1633_v29  ;;  %5798 = vmatpush.msk.msra.mxu1 %vm6790_vm1, %v1634_v10 }
 0x382   :  { %5793 = vmatpush.msk.msra.mxu0 %vm6780_vm15, %v1625_v44  ;;  %5799 = vmatpush.msk.msra.mxu1 %vm6790_vm1, %v1626_v22  ;;  %v7506_v28 = vpop.permute.xlu1 %1688 }
 0x384   :  { %2092 = vmatpush.msra.mxu0 %v7343_v56  ;;  %2112 = vmatpush.msra.mxu1 %v7369_v47  ;;  %v7498_v56 = vpop.permute.xlu0 %1639 }
 0x386   :  { %2093 = vmatpush.msra.mxu0 %v7267_v19  ;;  %2113 = vmatpush.msra.mxu1 %v7305_v26 }
 0x388   :  { %5794 = vmatpush.msk.msra.mxu0 %vm6747_vm10, %v1618_v46  ;;  %5800 = vmatpush.msk.msra.mxu1 %vm6751_vm11, %v1617_v35 }
 0x38a   :  { %5795 = vmatpush.msk.msra.mxu0 %vm6747_vm10, %v1610_v18  ;;  %5801 = vmatpush.msk.msra.mxu1 %vm6751_vm11, %v1609_v5 }
 0x38b   :  { %5796 = vmatmul.msk.f32.vlgmr.msra.gmra.mxu0 %vm10139_vm5, %v1588_v0  ;;  %5802 = vmatmul.msk.f32.vlgmr.msra.gmra.mxu1 %vm10139_vm5, %v1588_v0 }
 0x3fa   :  { %v1663_v19 = vpop.f32.mrf.mxu0  ;;  %v1683_v26 = vpop.f32.mrf.mxu1 }
 0x3fb   :  { %v7501_v58 = vadd.f32 %v1663_v19, %v7498_v56  ;;  %v7504_v21 = vadd.f32 %v1683_v26, %v7498_v56 }
 0x3fd   :  { %v7510_v47 = vmul.f32 %v7506_v28, %v7501_v58  ;;  %v7514_v20 = vmul.f32 %v7506_v28, %v7504_v21 }
 0x3ff   :  { %v1693_v40 = vand.u32 2147483647, %v7510_v47  ;;  %v1696_v41 = vand.u32 2139095040, %v7510_v47  ;;  %v10137_v38 = vand.u32 2147483647, %v7514_v20  ;;  %v1851_v4 = vand.u32 2139095040, %v7514_v20 }
 0x401   :  { %v1697_v6 = vshrl.u32 %v1696_v41, 23  ;;  %v1700_v34 = vand.u32 8388607, %v1693_v40  ;;  %v1852_v31 = vshrl.u32 %v1851_v4, 23  ;;  %v1855_v63 = vand.u32 8388607, %v10137_v38 }
 0x402   :  { %vm7653_vm14 = vcmp.le.f32.partialorder %v1693_v40, 0.7853982 }
 0x403   :  { %v5783_v53 = vadd.s32 4294967169, %v1697_v6  ;;  %v1701_v17 = vor.u32 8388608, %v1700_v34  ;;  %v5786_v8 = vadd.s32 4294967169, %v1852_v31  ;;  %v1856_v29 = vor.u32 8388608, %v1855_v63 }
 0x405   :  { %v1703_v10 = vadd.s32 1, %v5783_v53  ;;  %v1858_v44 = vadd.s32 1, %v5786_v8  ;;  %v7524_v22 = vshll.u32 %v1701_v17, 8  ;;  %v7526_v61 = vshll.u32 %v1856_v29, 8 }
 0x407   :  { %vm1704_vm12 = vcmp.gt.s32.totalorder %v1703_v10, 0  ;;  %vm1859_vm6 = vcmp.gt.s32.totalorder %v1858_v44, 0  ;;  %v1742_v46 = vand.u32 65535, %v7524_v22  ;;  %v1743_v35 = vshrl.u32 %v7524_v22, 16 }
 0x408   :  { %v1705_v57 = vsel %vm1704_vm12, %v1703_v10, 0  ;;  %v1860_v45 = vsel %vm1859_vm6, %v1858_v44, 0  ;;  %v7537_v14 = vand.u32 65535, %v7526_v61 }
 0x409   :  { %v1707_v7 = vand.u32 31, %v1705_v57  ;;  %v7530_v18 = vand.u32 31, %v1860_v45  ;;  %v7532_v5 = vshrl.u32 %v1705_v57, 5 }
 0x40b   :  { %v1708_v11 = vsub.s32 32, %v1707_v7  ;;  %v1710_v62 = vshll.u32 %v10182_v52, %v1707_v7  ;;  %v1713_v24 = vshll.u32 %v10226_v27, %v1707_v7  ;;  %v1716_v51 = vshll.u32 %v10227_v13, %v1707_v7 }
 0x40c   :  { %v1719_v0 = vshll.u32 %v10225_v50, %v1707_v7  ;;  %v1722_v42 = vshll.u32 %v10223_v12, %v1707_v7  ;;  %v7548_v41 = vsub.s32 32, %v7530_v18  ;;  %vm1725_vm2 = vcmp.lt.s32.totalorder %v7532_v5, 1 }
 0x40d   :  { %v1711_v49 = vshrl.u32 %v10226_v27, %v1708_v11  ;;  %v1714_v16 = vshrl.u32 %v10227_v13, %v1708_v11  ;;  %v1717_v37 = vshrl.u32 %v10225_v50, %v1708_v11  ;;  %v1720_v55 = vshrl.u32 %v10223_v12, %v1708_v11 }
 0x40e   :  { %v1723_v36 = vshrl.u32 %v10224_v33, %v1708_v11  ;;  %vm1726_vm9 = vcmp.lt.s32.totalorder %v7532_v5, 2  ;;  %v1709_v34 = vshrl.u32 %v10182_v52, %v1708_v11  ;;  %vm1728_vm12 = vcmp.lt.s32.totalorder %v7532_v5, 4 }
 0x40f   :  { %v1712_v15 = vor.u32 %v1711_v49, %v1710_v62  ;;  %v1715_v19 = vor.u32 %v1714_v16, %v1713_v24  ;;  %v1718_v26 = vor.u32 %v1717_v37, %v1716_v51  ;;  %v1721_v4 = vor.u32 %v1720_v55, %v1719_v0 }
 0x410   :  { %v1724_v6 = vor.u32 %v1723_v36, %v1722_v42  ;;  %vm1727_vm6 = vcmp.lt.s32.totalorder %v7532_v5, 3  ;;  %v1865_v8 = vshll.u32 %v10182_v52, %v7530_v18  ;;  %v1866_v57 = vshrl.u32 %v10226_v27, %v7548_v41 }
 0x411   :  { %v1733_v31 = vsel %vm1725_vm2, %v1712_v15, %v1715_v19  ;;  %v1737_v63 = vsel %vm1725_vm2, %v1715_v19, %v1718_v26  ;;  %v1734_v53 = vsel %vm1728_vm12, %v1721_v4, 920167782  ;;  %v1730_v29 = vsel %vm1728_vm12, %v1718_v26, 2102212464 }
 0x412   :  { %v1738_v17 = vsel %vm1728_vm12, %v1724_v6, 1326507024  ;;  %v1735_v10 = vsel %vm1727_vm6, %v1718_v26, %v1734_v53  ;;  %v1868_v62 = vshll.u32 %v10226_v27, %v7530_v18  ;;  %v1869_v24 = vshrl.u32 %v10227_v13, %v7548_v41 }
 0x413   :  { %v1739_v44 = vsel %vm1727_vm6, %v1721_v4, %v1738_v17  ;;  %v1736_v7 = vsel %vm1726_vm9, %v1733_v31, %v1735_v10  ;;  %v1729_v0 = vsel %vm1725_vm2, %v1709_v34, %v1712_v15  ;;  %v1731_v55 = vsel %vm1727_vm6, %v1715_v19, %v1730_v29 }
 0x414   :  { %v1740_v11 = vsel %vm1726_vm9, %v1737_v63, %v1739_v44  ;;  %v1766_v51 = vand.u32 65535, %v1736_v7  ;;  %v1767_v37 = vshrl.u32 %v1736_v7, 16  ;;  %v7579_v42 = vshrl.u32 %v1860_v45, 5 }
 0x415   :  { %v1744_v49 = vand.u32 65535, %v1740_v11  ;;  %v1745_v16 = vshrl.u32 %v1740_v11, 16  ;;  %v7581_v36 = vor.u32 %v1866_v57, %v1865_v8  ;;  %v7583_v6 = vor.u32 %v1869_v24, %v1868_v62 }
 0x416   :  { %v1872_v31 = vshrl.u32 %v10225_v50, %v7548_v41  ;;  %v1769_v53 = vmul.u32 %v1767_v37, %v1742_v46  ;;  %v1770_v17 = vmul.u32 %v1766_v51, %v1743_v35  ;;  %v1871_v15 = vshll.u32 %v10227_v13, %v7530_v18 }
 0x417   :  { %v1747_v26 = vmul.u32 %v1745_v16, %v1742_v46  ;;  %v1748_v4 = vmul.u32 %v1744_v49, %v1743_v35  ;;  %v1746_v63 = vmul.u32 %v1744_v49, %v1742_v46  ;;  %v1749_v34 = vmul.u32 %v1745_v16, %v1743_v35 }
 0x418   :  { %v1768_v19 = vmul.u32 %v1766_v51, %v1742_v46  ;;  %v1771_v45 = vmul.u32 %v1767_v37, %v1743_v35  ;;  %v1772_v57 = vshll.u32 %v1769_v53, 16  ;;  %v1774_v11 = vshll.u32 %v1770_v17, 16 }
 0x419   :  { %v1750_v10 = vshll.u32 %v1747_v26, 16  ;;  %v1751_v29 = vshrl.u32 %v1747_v26, 16  ;;  %v1752_v8 = vshll.u32 %v1748_v4, 16  ;;  %v1753_v44 = vshrl.u32 %v1748_v4, 16 }
 0x41a   :  { %v7589_v62 = vor.u32 %v1872_v31, %v1871_v15  ;;  %vm1776_vm12 = vc.u32 %v1768_v19, %v1772_v57  ;;  %v1778_v49 = vadd.s32 %v1772_v57, %v1768_v19  ;;  %v1875_v38 = vshrl.u32 %v10223_v12, %v7548_v41 }
 0x41b   :  { %vm1754_vm2 = vc.u32 %v1746_v63, %v1750_v10  ;;  %v1756_v7 = vadd.s32 %v1750_v10, %v1746_v63  ;;  %v1777_v46 = vsel %vm1776_vm12, 1, %v10186_v60  ;;  %v1874_v35 = vshll.u32 %v10225_v50, %v7530_v18 }
 0x41c   :  { %v1755_v24 = vsel %vm1754_vm2, 1, %v10186_v60  ;;  %v1779_v37 = vadd.s32 %v1777_v46, %v1771_v45  ;;  %vm1780_vm3 = vc.u32 %v1778_v49, %v1774_v11  ;;  %v1877_v26 = vshll.u32 %v10223_v12, %v7530_v18 }
 0x41d   :  { %v1757_v16 = vadd.s32 %v1755_v24, %v1749_v34  ;;  %vm1758_vm6 = vc.u32 %v1756_v7, %v1752_v8  ;;  %v1781_v31 = vsel %vm1780_vm3, 1, %v10186_v60  ;;  %v1876_v63 = vor.u32 %v1875_v38, %v1874_v35 }
 0x41e   :  { %v1759_v51 = vsel %vm1758_vm6, 1, %v10186_v60  ;;  %v1878_v15 = vshrl.u32 %v10224_v33, %v7548_v41  ;;  %v1773_v34 = vshrl.u32 %v1769_v53, 16  ;;  %v1775_v10 = vshrl.u32 %v1770_v17, 16 }
 0x41f   :  { %v1761_v4 = vadd.s32 %v1759_v51, %v1757_v16  ;;  %v7603_v19 = vadd.s32 %v1778_v49, %v1774_v11  ;;  %v1783_v8 = vadd.s32 %v1781_v31, %v1779_v37  ;;  %vm1880_vm2 = vcmp.lt.s32.totalorder %v7579_v42, 1  ;;  %v2097_v11 = vpop.f32.mrf.mxu0 }
 0x420   :  { %v1879_v7 = vor.u32 %v1878_v15, %v1877_v26  ;;  %vm1883_vm12 = vcmp.lt.s32.totalorder %v7579_v42, 4  ;;  %vm1882_vm6 = vcmp.lt.s32.totalorder %v7579_v42, 3  ;;  %v1888_v38 = vsel %vm1880_vm2, %v7581_v36, %v7583_v6 }
 0x421   :  { %v1762_v57 = vadd.s32 %v1761_v4, %v1751_v29  ;;  %v1784_v45 = vadd.s32 %v1783_v8, %v1773_v34  ;;  %v1889_v18 = vsel %vm1883_vm12, %v1876_v63, 920167782  ;;  %vm10142_vm3 = vcmp.lt.s32.totalorder %v7579_v42, 2 }
 0x422   :  { %v1890_v17 = vsel %vm1882_vm6, %v7589_v62, %v1889_v18  ;;  %v1892_v29 = vsel %vm1880_vm2, %v7583_v6, %v7589_v62  ;;  %v1732_v24 = vsel %vm1726_vm9, %v1729_v0, %v1731_v55  ;;  %v1893_v16 = vsel %vm1883_vm12, %v1879_v7, 1326507024 }
 0x423   :  { %v7614_v53 = vadd.s32 %v1762_v57, %v1753_v44  ;;  %v1785_v49 = vadd.s32 %v1784_v45, %v1775_v10  ;;  %v1891_v44 = vsel %vm10142_vm3, %v1888_v38, %v1890_v17  ;;  %v1894_v46 = vsel %vm1882_vm6, %v1876_v63, %v1893_v16 }
 0x424   :  { %v1898_v35 = vshrl.u32 %v7526_v61, 16  ;;  %v1921_v51 = vand.u32 65535, %v1891_v44  ;;  %v1895_v5 = vsel %vm10142_vm3, %v1892_v29, %v1894_v46  ;;  %v1922_v0 = vshrl.u32 %v1891_v44, 16 }
 0x425   :  { %vm1788_vm5 = vc.u32 %v7614_v53, %v7603_v19  ;;  %v1789_v37 = vadd.s32 1, %v1785_v49  ;;  %v7638_v55 = vadd.f32 %v2097_v11, %v7498_v56  ;;  %v1786_v26 = vmul.u32 %v7524_v22, %v1732_v24 }
 0x426   :  { %v1899_v4 = vand.u32 65535, %v1895_v5  ;;  %v1900_v31 = vshrl.u32 %v1895_v5, 16  ;;  %v1924_v34 = vmul.u32 %v1922_v0, %v7537_v14  ;;  %v1925_v10 = vmul.u32 %v1921_v51, %v1898_v35 }
 0x427   :  { %v1790_v15 = vsel %vm1788_vm5, %v1789_v37, %v1785_v49  ;;  %v1923_v7 = vmul.u32 %v1921_v51, %v7537_v14  ;;  %v1926_v45 = vmul.u32 %v1922_v0, %v1898_v35  ;;  %v7646_v18 = vmul.f32 %v7638_v55, %v7506_v28 }
 0x428   :  { %v1791_v63 = vadd.s32 %v1790_v15, %v1786_v26  ;;  %v1902_v8 = vmul.u32 %v1900_v31, %v7537_v14  ;;  %v1903_v57 = vmul.u32 %v1899_v4, %v1898_v35  ;;  %v1927_v38 = vshll.u32 %v1924_v34, 16 }
 0x429   :  { %vm1695_vm9 = vcmp.lt.s32.totalorder %v7510_v47, 0  ;;  %v1901_v17 = vmul.u32 %v1899_v4, %v7537_v14  ;;  %v1904_v29 = vmul.u32 %v1900_v31, %v1898_v35  ;;  %v1929_v49 = vshll.u32 %v1925_v10, 16 }
 0x42a   :  { %v1792_v22 = vadd.s32 536870912, %v1791_v63  ;;  %v1905_v11 = vshll.u32 %v1902_v8, 16  ;;  %v1907_v24 = vshll.u32 %v1903_v57, 16  ;;  %vm1931_vm5 = vc.u32 %v1923_v7, %v1927_v38 }
 0x42b   :  { %v1933_v44 = vadd.s32 %v1927_v38, %v1923_v7  ;;  %v1932_v51 = vsel %vm1931_vm5, 1, %v10186_v60  ;;  %v1864_v14 = vshrl.u32 %v10182_v52, %v7548_v41  ;;  %v1885_v26 = vsel %vm1883_vm12, %v7589_v62, 2102212464 }
 0x42c   :  { %v1793_v16 = vshrl.u32 %v1792_v22, 30  ;;  %vm1909_vm7 = vc.u32 %v1901_v17, %v1905_v11  ;;  %v1911_v46 = vadd.s32 %v1905_v11, %v1901_v17  ;;  %v1934_v5 = vadd.s32 %v1932_v51, %v1926_v45 }
 0x42d   :  { %v1910_v35 = vsel %vm1909_vm7, 1, %v10186_v60  ;;  %vm1935_vm3 = vc.u32 %v1933_v44, %v1929_v49  ;;  %v1906_v15 = vshrl.u32 %v1902_v8, 16  ;;  %v10143_v17 = vand.u32 2147483647, %v7646_v18 }
 0x42e   :  { %v1794_v0 = vshll.u32 %v1793_v16, 30  ;;  %v1912_v4 = vadd.s32 %v1910_v35, %v1904_v29  ;;  %vm1913_vm5 = vc.u32 %v1911_v46, %v1907_v24  ;;  %v1817_v31 = vsub.s32 4, %v1793_v16 }
 0x42f   :  { %v1914_v40 = vsel %vm1913_vm5, 1, %v10186_v60  ;;  %v1936_v7 = vsel %vm1935_vm3, 1, %v10186_v60  ;;  %v1884_v45 = vsel %vm1880_vm2, %v1864_v14, %v7581_v36  ;;  %v1886_v62 = vsel %vm1882_vm6, %v7583_v6, %v1885_v26 }
 0x430   :  { %v1795_v38 = vsub.s32 %v1791_v63, %v1794_v0  ;;  %v1916_v22 = vadd.s32 %v1914_v40, %v1912_v4  ;;  %v1938_v41 = vadd.s32 %v1936_v7, %v1934_v5  ;;  %v1928_v29 = vshrl.u32 %v1924_v34, 16 }
 0x431   :  { %v2125_v8 = vand.u32 2139095040, %v7646_v18  ;;  %v1908_v24 = vshrl.u32 %v1903_v57, 16  ;;  %v1818_v63 = vsel %vm1695_vm9, %v1817_v31, %v1793_v16  ;;  %v1930_v51 = vshrl.u32 %v1925_v10, 16 }
 0x432   :  { %vm1796_vm7 = vcmp.lt.s32.totalorder %v1795_v38, 0  ;;  %v1797_v11 = vsub.s32 0, %v1795_v38  ;;  %v1917_v46 = vadd.s32 %v1916_v22, %v1906_v15  ;;  %v1939_v35 = vadd.s32 %v1938_v41, %v1928_v29 }
 0x433   :  { %v2126_v5 = vshrl.u32 %v2125_v8, 23  ;;  %vm10259_vm2 = vcmp.lt.s32.totalorder %v7579_v42, 2  ;;  %v2129_v6 = vand.u32 8388607, %v10143_v17  ;;  %v1937_v26 = vadd.s32 %v1933_v44, %v1929_v49 }
 0x434   :  { %v1798_v0 = vsel %vm1796_vm7, %v1797_v11, %v1795_v38  ;;  %v1887_v36 = vsel %vm10259_vm2, %v1884_v45, %v1886_v62  ;;  %v1918_v14 = vadd.s32 %v1917_v46, %v1908_v24  ;;  %v1940_v4 = vadd.s32 %v1939_v35, %v1930_v51  ;;  %v2117_v46 = vpop.f32.mrf.mxu1 }
 0x435   :  { %v1799_v34 = vclz %v1798_v0  ;;  %v5803_v40 = vadd.s32 4294967169, %v2126_v5  ;;  %v1820_v57 = vsel %vm7653_vm14, 0, %v1818_v63  ;;  %v1941_v31 = vmul.u32 %v7526_v61, %v1887_v36 }
 0x436   :  { %vm1943_vm12 = vc.u32 %v1918_v14, %v1937_v26  ;;  %v1944_v10 = vadd.s32 1, %v1940_v4  ;;  %v2130_v7 = vor.u32 8388608, %v2129_v6  ;;  %v1837_v41 = vadd.s32 3, %v1820_v57 }
 0x437   :  { %v5784_v15 = vadd.s32 4294967294, %v1799_v34  ;;  %v2132_v16 = vadd.s32 1, %v5803_v40  ;;  %v1787_v49 = vadd.s32 %v7603_v19, %v7614_v53  ;;  %vm1850_vm5 = vcmp.lt.s32.totalorder %v7514_v20, 0 }
 0x438   :  { %v1945_v42 = vsel %vm1943_vm12, %v1944_v10, %v1940_v4  ;;  %v7684_v24 = vshll.u32 %v2130_v7, 8  ;;  %v7686_v35 = vand.u32 3, %v1837_v41  ;;  %v7689_v34 = vadd.s32 %v1937_v26, %v1918_v14 }
 0x439   :  { %vm5785_vm6 = vcmp.lt.s32.totalorder %v5784_v15, 0  ;;  %vm2133_vm3 = vcmp.gt.s32.totalorder %v2132_v16, 0  ;;  %v1946_v45 = vadd.s32 %v1945_v42, %v1941_v31  ;;  %v7692_v19 = vadd.f32 %v2117_v46, %v7498_v56 }
 0x43a   :  { %v1802_v22 = vsel %vm5785_vm6, 0, %v5784_v15  ;;  %v2134_v62 = vsel %vm2133_vm3, %v2132_v16, 0  ;;  %v7699_v40 = vshrl.u32 %v7684_v24, 16 }
 0x43b   :  { %v1803_v44 = vsub.s32 32, %v1802_v22  ;;  %v1807_v29 = vsub.s32 4294967266, %v1802_v22  ;;  %v1947_v8 = vadd.s32 536870912, %v1946_v45  ;;  %v2136_v11 = vand.u32 31, %v2134_v62 }
 0x43c   :  { %v1804_v63 = vshll.u32 %v1795_v38, %v1802_v22  ;;  %v7696_v38 = vand.u32 65535, %v7684_v24  ;;  %v7701_v15 = vshrl.u32 %v2134_v62, 5  ;;  %v10260_v22 = vand.u32 2147483647, %v7514_v20 }
 0x43d   :  { %v1805_v61 = vshrl.u32 %v1787_v49, %v1803_v44  ;;  %v1808_v51 = vadd.s32 127, %v1807_v29  ;;  %v1948_v5 = vshrl.u32 %v1947_v8, 30  ;;  %v2137_v0 = vsub.s32 32, %v2136_v11 }
 0x43e   :  { %v2139_v10 = vshll.u32 %v10182_v52, %v2136_v11  ;;  %v2142_v56 = vshll.u32 %v10226_v27, %v2136_v11  ;;  %vm7712_vm7 = vcmp.le.f32.partialorder %v10260_v22, 0.7853982  ;;  %v2145_v62 = vshll.u32 %v10227_v13, %v2136_v11 }
 0x43f   :  { %v1806_v36 = vor.u32 %v1805_v61, %v1804_v63  ;;  %v1809_v6 = vshll.u32 %v1808_v51, 23  ;;  %v1949_v53 = vshll.u32 %v1948_v5, 30  ;;  %v2140_v4 = vshrl.u32 %v10226_v27, %v2137_v0 }
 0x440   :  { %v2143_v14 = vshrl.u32 %v10227_v13, %v2137_v0  ;;  %v2146_v16 = vshrl.u32 %v10225_v50, %v2137_v0  ;;  %v2149_v31 = vshrl.u32 %v10223_v12, %v2137_v0  ;;  %v2148_v49 = vshll.u32 %v10225_v50, %v2136_v11 }
 0x441   :  { %v1810_v57 = vor.u32 4788187, %v1809_v6  ;;  %v7705_v26 = vsub.s32 %v1946_v45, %v1949_v53  ;;  %v1813_v42 = vcvt.s32.f32 %v1806_v36  ;;  %v1972_v44 = vsub.s32 4, %v1948_v5 }
 0x442   :  { %v2141_v29 = vor.u32 %v2140_v4, %v2139_v10  ;;  %v2144_v46 = vor.u32 %v2143_v14, %v2142_v56  ;;  %v2151_v63 = vshll.u32 %v10223_v12, %v2136_v11  ;;  %v2152_v61 = vshrl.u32 %v10224_v33, %v2137_v0 }
 0x443   :  { %v1811_v7 = vand.u32 2147483647, %v1810_v57  ;;  %vm1951_vm2 = vcmp.lt.s32.totalorder %v7705_v26, 0  ;;  %v1952_v45 = vsub.s32 0, %v7705_v26  ;;  %v2147_v36 = vor.u32 %v2146_v16, %v2145_v62 }
 0x444   :  { %v2150_v6 = vor.u32 %v2149_v31, %v2148_v49  ;;  %v7725_v53 = vmul.f32 %v7692_v19, %v7506_v28  ;;  %v2153_v17 = vor.u32 %v2152_v61, %v2151_v63  ;;  %vm2154_vm12 = vcmp.lt.s32.totalorder %v7701_v15, 1 }
 0x445   :  { %v1814_v8 = vmul.f32 %v1813_v42, %v1811_v7  ;;  %v1953_v51 = vsel %vm1951_vm2, %v1952_v45, %v7705_v26  ;;  %v7730_v4 = vsel %vm1850_vm5, %v1972_v44, %v1948_v5  ;;  %v2138_v11 = vshrl.u32 %v10182_v52, %v2137_v0 }
 0x446   :  { %v1954_v22 = vclz %v1953_v51  ;;  %vm10144_vm6 = vcmp.lt.s32.totalorder %v7701_v15, 2  ;;  %vm2156_vm3 = vcmp.lt.s32.totalorder %v7701_v15, 3  ;;  %vm2157_vm2 = vcmp.lt.s32.totalorder %v7701_v15, 4 }
 0x447   :  { %v1815_v57 = vxor.u32 2147483648, %v1814_v8  ;;  %v2162_v14 = vsel %vm2154_vm12, %v2141_v29, %v2144_v46  ;;  %v2163_v56 = vsel %vm2157_vm2, %v2150_v6, 920167782  ;;  %v2166_v0 = vsel %vm2154_vm12, %v2144_v46, %v2147_v36 }
 0x448   :  { %v5787_v28 = vadd.s32 4294967294, %v1954_v22  ;;  %v2167_v16 = vsel %vm2157_vm2, %v2153_v17, 1326507024  ;;  %v2164_v7 = vsel %vm2156_vm3, %v2147_v36, %v2163_v56  ;;  %v2159_v49 = vsel %vm2157_vm2, %v2147_v36, 2102212464 }
 0x449   :  { %v1816_v10 = vsel %vm1695_vm9, %v1815_v57, %v1814_v8  ;;  %v2168_v42 = vsel %vm2156_vm3, %v2150_v6, %v2167_v16  ;;  %v7760_v63 = vsel %vm2154_vm12, %v2138_v11, %v2141_v29  ;;  %v2165_v51 = vsel %vm10144_vm6, %v2162_v14, %v2164_v7 }
 0x44a   :  { %v7743_v5 = vsel %vm7653_vm14, %v7510_v47, %v1816_v10  ;;  %vm5788_vm9 = vcmp.lt.s32.totalorder %v5787_v28, 0  ;;  %v2169_v45 = vsel %vm10144_vm6, %v2166_v0, %v2168_v42  ;;  %v7768_v0 = vsel %vm2156_vm3, %v2144_v46, %v2159_v49 }
 0x44b   :  { %v1821_v31 = vmul.f32 %v7743_v5, %v7743_v5  ;;  %v1957_v62 = vsel %vm5788_vm9, 0, %v5787_v28  ;;  %v2173_v6 = vand.u32 65535, %v2169_v45  ;;  %v2174_v57 = vshrl.u32 %v2169_v45, 16 }
 0x44c   :  { %v1958_v8 = vsub.s32 32, %v1957_v62  ;;  %v1962_v61 = vsub.s32 4294967266, %v1957_v62  ;;  %v1959_v36 = vshll.u32 %v7705_v26, %v1957_v62  ;;  %v2196_v42 = vshrl.u32 %v2165_v51, 16 }
 0x44d   :  { %v1822_v17 = vmul.f32 -0.001358992, %v1821_v31  ;;  %v1829_v44 = vmul.f32 -0.00019511016, %v1821_v31  ;;  %v2176_v29 = vmul.u32 %v2174_v57, %v7696_v38  ;;  %v7772_v11 = vmul.u32 %v2173_v6, %v7699_v40 }
 0x44e   :  { %v1960_v28 = vshrl.u32 %v7689_v34, %v1958_v8  ;;  %v1963_v56 = vadd.s32 127, %v1962_v61  ;;  %v2195_v62 = vand.u32 65535, %v2165_v51  ;;  %v2178_v8 = vmul.u32 %v2174_v57, %v7699_v40 }
 0x44f   :  { %v1823_v22 = vadd.f32 0.041655596, %v1822_v17  ;;  %v1830_v10 = vadd.f32 0.008332121, %v1829_v44  ;;  %v2175_v17 = vmul.u32 %v2173_v6, %v7696_v38  ;;  %v2179_v26 = vshll.u32 %v2176_v29, 16 }
 0x450   :  { %v1961_v7 = vor.u32 %v1960_v28, %v1959_v36  ;;  %v1964_v45 = vshll.u32 %v1963_v56, 23  ;;  %v2181_v46 = vshll.u32 %v7772_v11, 16  ;;  %vm1840_vm14 = vcmp.eq.s32.totalorder %v7686_v35, 0 }
 0x451   :  { %v1824_v16 = vmul.f32 %v1823_v22, %v1821_v31  ;;  %v1831_v14 = vmul.f32 %v1830_v10, %v1821_v31  ;;  %vm1843_vm12 = vcmp.eq.s32.totalorder %v7686_v35, 2  ;;  %vm2183_vm3 = vc.u32 %v2175_v17, %v2179_v26 }
 0x452   :  { %v1965_v49 = vor.u32 4788187, %v1964_v45  ;;  %v1968_v61 = vcvt.s32.f32 %v1961_v7  ;;  %v2185_v22 = vadd.s32 %v2179_v26, %v2175_v17  ;;  %vm1839_vm2 = vcmp.lt.s32.totalorder %v7686_v35, 2 }
 0x453   :  { %v1825_v34 = vadd.f32 -0.4999988, %v1824_v16  ;;  %v1832_v44 = vadd.f32 -0.16666654, %v1831_v14  ;;  %v2184_v51 = vsel %vm2183_vm3, 1, %v10186_v60  ;;  %v2198_v6 = vmul.u32 %v2196_v42, %v7696_v38 }
 0x454   :  { %vm1836_vm9 = vweird.f32 %v7510_v47  ;;  %v1966_v57 = vand.u32 2147483647, %v1965_v49  ;;  %v2186_v28 = vadd.s32 %v2184_v51, %v2178_v8  ;;  %vm2187_vm6 = vc.u32 %v2185_v22, %v2181_v46 }
 0x455   :  { %v1826_v10 = vmul.f32 %v1825_v34, %v1821_v31  ;;  %v1833_v36 = vmul.f32 %v1832_v44, %v1821_v31  ;;  %v2199_v56 = vmul.u32 %v2195_v62, %v7699_v40  ;;  %v2180_v7 = vshrl.u32 %v2176_v29, 16 }
 0x456   :  { %v2188_v45 = vsel %vm2187_vm6, 1, %v10186_v60  ;;  %v1969_v17 = vmul.f32 %v1968_v61, %v1966_v57  ;;  %v2197_v26 = vmul.u32 %v2195_v62, %v7696_v38  ;;  %v2201_v34 = vshll.u32 %v2198_v6, 16 }
 0x457   :  { %v1827_v16 = vadd.f32 1.0, %v1826_v10  ;;  %v1834_v14 = vadd.f32 1.0, %v1833_v36  ;;  %v2190_v31 = vadd.s32 %v2188_v45, %v2186_v28  ;;  %v2182_v9 = vshrl.u32 %v7772_v11, 16 }
 0x458   :  { %v2200_v8 = vmul.u32 %v2196_v42, %v7699_v40  ;;  %v1970_v46 = vxor.u32 2147483648, %v1969_v17  ;;  %v2203_v49 = vshll.u32 %v2199_v56, 16  ;;  %vm2205_vm3 = vc.u32 %v2197_v26, %v2201_v34 }
 0x459   :  { %v1835_v44 = vmul.f32 %v1834_v14, %v7743_v5  ;;  %v1844_v37 = vxor.u32 2147483648, %v1827_v16  ;;  %v2207_v22 = vadd.s32 %v2201_v34, %v2197_v26  ;;  %v2191_v29 = vadd.s32 %v2190_v31, %v2180_v7  ;;  %v7807_v34 = vpop.permute.xlu2 %2007 }
 0x45a   :  { %v2206_v36 = vsel %vm2205_vm3, 1, %v10186_v60  ;;  %v2280_v61 = vand.u32 2139095040, %v7725_v53  ;;  %v1971_v38 = vsel %vm1850_vm5, %v1970_v46, %v1969_v17  ;;  %v2202_v62 = vshrl.u32 %v2198_v6, 16 }
 0x45b   :  { %v1841_v10 = vxor.u32 2147483648, %v1835_v44  ;;  %v2208_v5 = vadd.s32 %v2206_v36, %v2200_v8  ;;  %vm2209_vm6 = vc.u32 %v2207_v22, %v2203_v49  ;;  %v1845_v40 = vsel %vm1843_vm12, %v1844_v37, %v1835_v44 }
 0x45c   :  { %v1974_v42 = vsel %vm7712_vm7, %v7514_v20, %v1971_v38  ;;  %v2210_v51 = vsel %vm2209_vm6, 1, %v10186_v60  ;;  %v2281_v6 = vshrl.u32 %v2280_v61, 23  ;;  %v7805_v45 = vadd.s32 %v2191_v29, %v2182_v9 }
 0x45d   :  { %v1842_v11 = vsel %vm1840_vm14, %v1827_v16, %v1841_v10  ;;  %v1976_v28 = vmul.f32 %v1974_v42, %v1974_v42  ;;  %v2212_v14 = vadd.s32 %v2210_v51, %v2208_v5  ;;  %v2204_v16 = vshrl.u32 %v2199_v56, 16 }
 0x45e   :  { %v1846_v57 = vsel %vm1839_vm2, %v1842_v11, %v1845_v40  ;;  %v10263_v35 = vsel %vm7712_vm7, 0, %v7730_v4  ;;  %vm10264_vm5 = vcmp.lt.s32.totalorder %v7701_v15, 2  ;;  %v7817_v8 = vadd.s32 %v2207_v22, %v2203_v49 }
 0x45f   :  { %v1847_v7 = vsel %vm1836_vm9, nan, %v1846_v57  ;;  %v1977_v37 = vmul.f32 -0.001358992, %v1976_v28  ;;  %v1984_v31 = vmul.f32 -0.00019511016, %v1976_v28  ;;  %v2213_v26 = vadd.s32 %v2212_v14, %v2202_v62 }
 0x460   :  { %v2003_v17 = vmul.f32 %v1847_v7, %v1847_v7  ;;  %v1992_v44 = vadd.s32 3, %v10263_v35  ;;  %v2161_v47 = vsel %vm10264_vm5, %v7760_v63, %v7768_v0  ;;  %v5806_v9 = vadd.s32 4294967169, %v2281_v6 }
 0x461   :  { %v1978_v46 = vadd.f32 0.041655596, %v1977_v37  ;;  %v1985_v10 = vadd.f32 0.008332121, %v1984_v31  ;;  %v2214_v29 = vadd.s32 %v2213_v26, %v2204_v16  ;;  %vm2217_vm14 = vc.u32 %v7805_v45, %v7817_v8 }
 0x462   :  { %v2010_v56 = vmul.f32 %v7807_v34, %v2003_v17  ;;  %v2287_v41 = vadd.s32 1, %v5806_v9  ;;  %v1993_v62 = vand.u32 3, %v1992_v44  ;;  %v2215_v15 = vmul.u32 %v7684_v24, %v2161_v47 }
 0x463   :  { %v1979_v36 = vmul.f32 %v1978_v46, %v1976_v28  ;;  %v1986_v61 = vmul.f32 %v1985_v10, %v1976_v28  ;;  %v2218_v38 = vadd.s32 1, %v2214_v29  ;;  %v2277_v63 = vand.u32 2147483647, %v7725_v53 }
 0x464   :  { %v2012_v4 = vadd.f32 %v2010_v56, %v7501_v58  ;;  %vm2288_vm7 = vcmp.gt.s32.totalorder %v2287_v41, 0  ;;  %vm1991_vm12 = vweird.f32 %v7514_v20  ;;  %vm1994_vm2 = vcmp.lt.s32.totalorder %v1993_v62, 2 }
 0x465   :  { %v1980_v0 = vadd.f32 -0.4999988, %v1979_v36  ;;  %v1987_v49 = vadd.f32 -0.16666654, %v1986_v61  ;;  %v2219_v22 = vsel %vm2217_vm14, %v2218_v38, %v2214_v29  ;;  %v2289_v5 = vsel %vm2288_vm7, %v2287_v41, 0 }
 0x466   :  { %2038 = vmatpush.msra.mxu2 %v2012_v4  ;;  %v2220_v11 = vadd.s32 %v2219_v22, %v2215_v15  ;;  %v2291_v40 = vand.u32 31, %v2289_v5  ;;  %v2284_v58 = vand.u32 8388607, %v2277_v63  ;;  %vm1995_vm9 = vcmp.eq.s32.totalorder %v1993_v62, 0 }
 0x467   :  { %v1981_v51 = vmul.f32 %v1980_v0, %v1976_v28  ;;  %v1988_v57 = vmul.f32 %v1987_v49, %v1976_v28  ;;  %vm1998_vm3 = vcmp.eq.s32.totalorder %v1993_v62, 2  ;;  %v7839_v47 = vshrl.u32 %v2289_v5, 5 }
 0x468   :  { %v2221_v14 = vadd.s32 536870912, %v2220_v11  ;;  %v7827_v6 = vsub.s32 32, %v2291_v40  ;;  %v2285_v44 = vor.u32 8388608, %v2284_v58  ;;  %v2294_v9 = vshll.u32 %v10182_v52, %v2291_v40 }
 0x469   :  { %v1982_v7 = vadd.f32 1.0, %v1981_v51  ;;  %v1989_v24 = vadd.f32 1.0, %v1988_v57  ;;  %v2297_v46 = vshll.u32 %v10226_v27, %v2291_v40  ;;  %v2303_v10 = vshll.u32 %v10225_v50, %v2291_v40 }
 0x46a   :  { %v7830_v16 = vshrl.u32 %v2221_v14, 30  ;;  %v2295_v17 = vshrl.u32 %v10226_v27, %v7827_v6  ;;  %v2298_v31 = vshrl.u32 %v10227_v13, %v7827_v6  ;;  %v2304_v26 = vshrl.u32 %v10223_v12, %v7827_v6 }
 0x46b   :  { %v1990_v37 = vmul.f32 %v1989_v24, %v1974_v42  ;;  %v1999_v28 = vxor.u32 2147483648, %v1982_v7  ;;  %v2301_v42 = vshrl.u32 %v10225_v50, %v7827_v6  ;;  %v2300_v4 = vshll.u32 %v10227_v13, %v2291_v40 }
 0x46c   :  { %v2223_v35 = vshll.u32 %v7830_v16, 30  ;;  %v7846_v41 = vor.u32 %v2295_v17, %v2294_v9  ;;  %v2307_v36 = vshrl.u32 %v10224_v33, %v7827_v6  ;;  %v7853_v15 = vor.u32 %v2298_v31, %v2297_v46 }
 0x46d   :  { %v1996_v56 = vxor.u32 2147483648, %v1990_v37  ;;  %v2000_v38 = vsel %vm1998_vm3, %v1999_v28, %v1990_v37  ;;  %v2305_v0 = vor.u32 %v2304_v26, %v2303_v10  ;;  %v2306_v5 = vshll.u32 %v10223_v12, %v2291_v40 }
 0x46e   :  { %v2224_v29 = vsub.s32 %v2220_v11, %v2223_v35  ;;  %v2302_v51 = vor.u32 %v2301_v42, %v2300_v4  ;;  %vm2309_vm5 = vcmp.lt.s32.totalorder %v7839_v47, 1  ;;  %vm2312_vm14 = vcmp.lt.s32.totalorder %v7839_v47, 4 }
 0x46f   :  { %v1997_v61 = vsel %vm1995_vm9, %v1982_v7, %v1996_v56  ;;  %v2308_v58 = vor.u32 %v2307_v36, %v2306_v5  ;;  %v2317_v62 = vsel %vm2309_vm5, %v7846_v41, %v7853_v15  ;;  %v2318_v40 = vsel %vm2312_vm14, %v2305_v0, 920167782 }
 0x470   :  { %v2001_v49 = vsel %vm1994_vm2, %v1997_v61, %v2000_v38  ;;  %vm2225_vm6 = vcmp.lt.s32.totalorder %v2224_v29, 0  ;;  %v2226_v22 = vsub.s32 0, %v2224_v29  ;;  %vm2311_vm7 = vcmp.lt.s32.totalorder %v7839_v47, 3 }
 0x471   :  { %v2002_v11 = vsel %vm1991_vm12, nan, %v2001_v49  ;;  %v7869_v24 = vshll.u32 %v2285_v44, 8  ;;  %vm2310_vm12 = vcmp.lt.s32.totalorder %v7839_v47, 2  ;;  %v2319_v37 = vsel %vm2311_vm7, %v2302_v51, %v2318_v40 }
 0x472   :  { %v2004_v57 = vmul.f32 %v2002_v11, %v2002_v11  ;;  %v2227_v14 = vsel %vm2225_vm6, %v2226_v22, %v2224_v29  ;;  %v2321_v28 = vsel %vm2309_vm5, %v7853_v15, %v2302_v51  ;;  %v2320_v26 = vsel %vm2310_vm12, %v2317_v62, %v2319_v37 }
 0x473   :  { %v2228_v7 = vclz %v2227_v14  ;;  %v2322_v35 = vsel %vm2312_vm14, %v2308_v58, 1326507024  ;;  %v2350_v9 = vand.u32 65535, %v2320_v26  ;;  %v2351_v56 = vshrl.u32 %v2320_v26, 16 }
 0x474   :  { %v2011_v20 = vmul.f32 %v7807_v34, %v2004_v57  ;;  %v2323_v44 = vsel %vm2311_vm7, %v2305_v0, %v2322_v35  ;;  %v2216_v46 = vadd.s32 %v7817_v8, %v7805_v45  ;;  %v2327_v61 = vshrl.u32 %v7869_v24, 16 }
 0x475   :  { %v5804_v17 = vadd.s32 4294967294, %v2228_v7  ;;  %v2324_v10 = vsel %vm2310_vm12, %v2321_v28, %v2323_v44  ;;  %v2293_v45 = vshrl.u32 %v10182_v52, %v7827_v6  ;;  %v2314_v40 = vsel %vm2312_vm14, %v2302_v51, 2102212464 }
 0x476   :  { %v2013_v31 = vadd.f32 %v2011_v20, %v7504_v21  ;;  %v2326_v21 = vand.u32 65535, %v7869_v24  ;;  %v2328_v38 = vand.u32 65535, %v2324_v10  ;;  %v2329_v22 = vshrl.u32 %v2324_v10, 16 }
 0x477   :  { %vm5805_vm2 = vcmp.lt.s32.totalorder %v5804_v17, 0  ;;  %v2354_v14 = vmul.u32 %v2350_v9, %v2327_v61  ;;  %v2355_v28 = vmul.u32 %v2351_v56, %v2327_v61  ;;  %v2313_v51 = vsel %vm2309_vm5, %v2293_v45, %v7846_v41 }
 0x478   :  { %v2231_v42 = vsel %vm5805_vm2, 0, %v5804_v17  ;;  %2058 = vmatpush.msra.mxu3 %v2013_v31  ;;  %v2353_v0 = vmul.u32 %v2351_v56, %v2326_v21  ;;  %v2332_v57 = vmul.u32 %v2328_v38, %v2327_v61  ;;  %v2331_v8 = vmul.u32 %v2329_v22, %v2326_v21 }
 0x479   :  { %v2232_v4 = vsub.s32 32, %v2231_v42  ;;  %v2236_v36 = vsub.s32 4294967266, %v2231_v42  ;;  %v2233_v49 = vshll.u32 %v2224_v29, %v2231_v42  ;;  %v2352_v20 = vmul.u32 %v2350_v9, %v2326_v21 }
 0x47a   :  { %v2356_v58 = vshll.u32 %v2353_v0, 16  ;;  %v2330_v17 = vmul.u32 %v2328_v38, %v2326_v21  ;;  %v2333_v37 = vmul.u32 %v2329_v22, %v2327_v61  ;;  %v2334_v29 = vshll.u32 %v2331_v8, 16 }
 0x47b   :  { %v2234_v5 = vshrl.u32 %v2216_v46, %v2232_v4  ;;  %v2237_v11 = vadd.s32 127, %v2236_v36  ;;  %v2336_v26 = vshll.u32 %v2332_v57, 16  ;;  %v2358_v35 = vshll.u32 %v2354_v14, 16 }
 0x47c   :  { %vm2360_vm9 = vc.u32 %v2352_v20, %v2356_v58  ;;  %vm2338_vm3 = vc.u32 %v2330_v17, %v2334_v29  ;;  %v2340_v44 = vadd.s32 %v2334_v29, %v2330_v17  ;;  %v2362_v46 = vadd.s32 %v2356_v58, %v2352_v20 }
 0x47d   :  { %v2235_v7 = vor.u32 %v2234_v5, %v2233_v49  ;;  %v2238_v62 = vshll.u32 %v2237_v11, 23  ;;  %v2361_v6 = vsel %vm2360_vm9, 1, %v10186_v60  ;;  %v2339_v4 = vsel %vm2338_vm3, 1, %v10186_v60 }
 0x47e   :  { %v2363_v36 = vadd.s32 %v2361_v6, %v2355_v28  ;;  %v2341_v9 = vadd.s32 %v2339_v4, %v2333_v37  ;;  %vm2342_vm6 = vc.u32 %v2340_v44, %v2336_v26  ;;  %vm2364_vm14 = vc.u32 %v2362_v46, %v2358_v35 }
 0x47f   :  { %v2239_v31 = vor.u32 4788187, %v2238_v62  ;;  %v2242_v10 = vcvt.s32.f32 %v2235_v7  ;;  %v2315_v21 = vsel %vm2311_vm7, %v7853_v15, %v2314_v40  ;;  %v2343_v61 = vsel %vm2342_vm6, 1, %v10186_v60 }
 0x480   :  { %v2365_v38 = vsel %vm2364_vm14, 1, %v10186_v60  ;;  %v2335_v49 = vshrl.u32 %v2331_v8, 16  ;;  %v2345_v22 = vadd.s32 %v2343_v61, %v2341_v9  ;;  %v2357_v5 = vshrl.u32 %v2353_v0, 16 }
 0x481   :  { %v2240_v42 = vand.u32 2147483647, %v2239_v31  ;;  %v2367_v11 = vadd.s32 %v2365_v38, %v2363_v36  ;;  %vm2124_vm2 = vcmp.lt.s32.totalorder %v7646_v18, 0  ;;  %v2337_v41 = vshrl.u32 %v2332_v57, 16 }
 0x482   :  { %v2346_v45 = vadd.s32 %v2345_v22, %v2335_v49  ;;  %v2359_v7 = vshrl.u32 %v2354_v14, 16  ;;  %v10265_v20 = vand.u32 2147483647, %v7646_v18  ;;  %v2246_v8 = vsub.s32 4, %v7830_v16 }
 0x483   :  { %v2243_v56 = vmul.f32 %v2242_v10, %v2240_v42  ;;  %v2368_v62 = vadd.s32 %v2367_v11, %v2357_v5  ;;  %v2316_v0 = vsel %vm2310_vm12, %v2313_v51, %v2315_v21  ;;  %v2366_v40 = vadd.s32 %v2362_v46, %v2358_v35 }
 0x484   :  { %vm7907_vm5 = vcmp.le.f32.partialorder %v10265_v20, 0.7853982  ;;  %v2347_v14 = vadd.s32 %v2346_v45, %v2337_v41  ;;  %v2370_v44 = vmul.u32 %v7869_v24, %v2316_v0  ;;  %v2247_v6 = vsel %vm2124_vm2, %v2246_v8, %v7830_v16 }
 0x485   :  { %v2244_v58 = vxor.u32 2147483648, %v2243_v56  ;;  %v2369_v37 = vadd.s32 %v2368_v62, %v2359_v7  ;;  %v2249_v36 = vsel %vm7907_vm5, 0, %v2247_v6  ;;  %vm2265_vm14 = vweird.f32 %v7646_v18  ;;  %v1589_v6 = vld [vmem:[%s10098_s14] sm:$0xff] }
 0x486   :  { %vm2372_vm7 = vc.u32 %v2347_v14, %v2366_v40  ;;  %v2266_v61 = vadd.s32 3, %v2249_v36 }
 0x487   :  { %v2245_v15 = vsel %vm2124_vm2, %v2244_v58, %v2243_v56  ;;  %v2373_v28 = vadd.s32 1, %v2369_v37 }
 0x488   :  { %v2248_v57 = vsel %vm7907_vm5, %v7646_v18, %v2245_v15  ;;  %v2267_v11 = vand.u32 3, %v2266_v61  ;;  %vm10146_vm5 = vcmask 64512  }
 0x489   :  { %v2250_v29 = vmul.f32 %v2248_v57, %v2248_v57  ;;  %v2374_v47 = vsel %vm2372_vm7, %v2373_v28, %v2369_v37  ;;  %5789 = vmatmul.msk.f32.vlgmr.msra.gmra.mxu2 %vm10146_vm5, %v1589_v6  ;;  %5790 = vmatmul.msk.f32.vlgmr.msra.gmra.mxu3 %vm10146_vm5, %v1589_v6  ;;  %vm2279_vm7 = vcmp.lt.s32.totalorder %v7725_v53, 0 }
 0x48a   :  { %v2375_v4 = vadd.s32 %v2374_v47, %v2370_v44  ;;  %vm2269_vm9 = vcmp.eq.s32.totalorder %v2267_v11, 0  ;;  %vm2272_vm3 = vcmp.eq.s32.totalorder %v2267_v11, 2  ;;  %vm2268_vm6 = vcmp.lt.s32.totalorder %v2267_v11, 2 }
 0x48b   :  { %v2251_v31 = vmul.f32 -0.001358992, %v2250_v29  ;;  %v2258_v26 = vmul.f32 -0.00019511016, %v2250_v29 }
 0x48c   :  { %v2376_v51 = vadd.s32 536870912, %v2375_v4 }
 0x48d   :  { %v2252_v42 = vadd.f32 0.041655596, %v2251_v31  ;;  %v2259_v10 = vadd.f32 0.008332121, %v2258_v26  ;;  %v2371_v31 = vadd.s32 %v2366_v40, %v2347_v14 }
 0x48e   :  { %v2377_v21 = vshrl.u32 %v2376_v51, 30 }
 0x48f   :  { %v2253_v35 = vmul.f32 %v2252_v42, %v2250_v29  ;;  %v2260_v46 = vmul.f32 %v2259_v10, %v2250_v29 }
 0x490   :  { %v2378_v49 = vshll.u32 %v2377_v21, 30 }
 0x491   :  { %v2254_v9 = vadd.f32 -0.4999988, %v2253_v35  ;;  %v2261_v56 = vadd.f32 -0.16666654, %v2260_v46 }
 0x492   :  { %v2379_v16 = vsub.s32 %v2375_v4, %v2378_v49 }
 0x493   :  { %v2255_v38 = vmul.f32 %v2254_v9, %v2250_v29  ;;  %v2262_v24 = vmul.f32 %v2261_v56, %v2250_v29  ;;  %v2401_v9 = vsub.s32 4, %v2377_v21 }
 0x494   :  { %vm2380_vm12 = vcmp.lt.s32.totalorder %v2379_v16, 0  ;;  %v2381_v45 = vsub.s32 0, %v2379_v16 }
 0x495   :  { %v2256_v22 = vadd.f32 1.0, %v2255_v38  ;;  %v2263_v5 = vadd.f32 1.0, %v2262_v24  ;;  %v2402_v49 = vsel %vm2279_vm7, %v2401_v9, %v2377_v21 }
 0x496   :  { %v2382_v62 = vsel %vm2380_vm12, %v2381_v45, %v2379_v16  ;;  %vm2278_vm12 = vcmp.le.f32.partialorder %v2277_v63, 0.7853982 }
 0x497   :  { %v2264_v58 = vmul.f32 %v2263_v5, %v2248_v57  ;;  %v2273_v41 = vxor.u32 2147483648, %v2256_v22  ;;  %v2383_v20 = vclz %v2382_v62 }
 0x499   :  { %v2270_v7 = vxor.u32 2147483648, %v2264_v58  ;;  %v2274_v15 = vsel %vm2272_vm3, %v2273_v41, %v2264_v58  ;;  %v5807_v0 = vadd.s32 4294967294, %v2383_v20 }
 0x49b   :  { %v2271_v17 = vsel %vm2269_vm9, %v2256_v22, %v2270_v7  ;;  %vm5808_vm2 = vcmp.lt.s32.totalorder %v5807_v0, 0 }
 0x49c   :  { %v2275_v8 = vsel %vm2268_vm6, %v2271_v17, %v2274_v15  ;;  %v2386_v28 = vsel %vm5808_vm2, 0, %v5807_v0 }
 0x49d   :  { %v2276_v37 = vsel %vm2265_vm14, nan, %v2275_v8  ;;  %v2387_v26 = vsub.s32 32, %v2386_v28  ;;  %v2391_v44 = vsub.s32 4294967266, %v2386_v28  ;;  %v2388_v42 = vshll.u32 %v2379_v16, %v2386_v28 }
 0x49e   :  { %v2432_v29 = vmul.f32 %v2276_v37, %v2276_v37  ;;  %v2404_v16 = vsel %vm2278_vm12, 0, %v2402_v49  ;;  %vm2420_vm14 = vweird.f32 %v7725_v53 }
 0x49f   :  { %v2389_v18 = vshrl.u32 %v2371_v31, %v2387_v26  ;;  %v2392_v10 = vadd.s32 127, %v2391_v44  ;;  %v2421_v7 = vadd.s32 3, %v2404_v16 }
 0x4a0   :  { %v2434_v57 = vmul.f32 %v2432_v29, %v7807_v34 }
 0x4a1   :  { %v2390_v4 = vor.u32 %v2389_v18, %v2388_v42  ;;  %v2393_v36 = vshll.u32 %v2392_v10, 23  ;;  %v2422_v15 = vand.u32 3, %v2421_v7 }
 0x4a2   :  { %v2436_v47 = vadd.f32 %v2434_v57, %v7638_v55 }
 0x4a3   :  { %v2394_v14 = vor.u32 4788187, %v2393_v36  ;;  %v2397_v35 = vcvt.s32.f32 %v2390_v4  ;;  %vm2424_vm9 = vcmp.eq.s32.totalorder %v2422_v15, 0  ;;  %vm2427_vm3 = vcmp.eq.s32.totalorder %v2422_v15, 2 }
 0x4a4   :  { %2453 = vmatpush.msrb.mxu2 %v2436_v47  ;;  %vm2423_vm6 = vcmp.lt.s32.totalorder %v2422_v15, 2  ;;  %v7942_v47 = vpop.permute.xlu0 %2016 }
 0x4a5   :  { %v2395_v40 = vand.u32 2147483647, %v2394_v14  ;;  %5809 = vmatmul.msk.f32.vlgmr.msrb.gmra.mxu2 %vm10146_vm5, %v1589_v6 }
 0x4a7   :  { %v2398_v46 = vmul.f32 %v2397_v35, %v2395_v40 }
 0x4a9   :  { %v2399_v51 = vxor.u32 2147483648, %v2398_v46 }
 0x4ab   :  { %v2400_v55 = vsel %vm2279_vm7, %v2399_v51, %v2398_v46 }
 0x4ac   :  { %v2403_v56 = vsel %vm2278_vm12, %v7725_v53, %v2400_v55 }
 0x4ad   :  { %v2405_v61 = vmul.f32 %v2403_v56, %v2403_v56 }
 0x4af   :  { %v2406_v38 = vmul.f32 -0.001358992, %v2405_v61  ;;  %v2413_v24 = vmul.f32 -0.00019511016, %v2405_v61 }
 0x4b1   :  { %v2407_v22 = vadd.f32 0.041655596, %v2406_v38  ;;  %v2414_v5 = vadd.f32 0.008332121, %v2413_v24 }
 0x4b3   :  { %v2408_v11 = vmul.f32 %v2407_v22, %v2405_v61  ;;  %v2415_v58 = vmul.f32 %v2414_v5, %v2405_v61 }
 0x4b5   :  { %v2409_v41 = vadd.f32 -0.4999988, %v2408_v11  ;;  %v2416_v45 = vadd.f32 -0.16666654, %v2415_v58 }
 0x4b7   :  { %v2410_v62 = vmul.f32 %v2409_v41, %v2405_v61  ;;  %v2417_v20 = vmul.f32 %v2416_v45, %v2405_v61 }
 0x4b9   :  { %v2411_v17 = vadd.f32 1.0, %v2410_v62  ;;  %v2418_v63 = vadd.f32 1.0, %v2417_v20 }
 0x4bb   :  { %v2419_v8 = vmul.f32 %v2418_v63, %v2403_v56  ;;  %v2428_v0 = vxor.u32 2147483648, %v2411_v17 }
 0x4bd   :  { %v2425_v37 = vxor.u32 2147483648, %v2419_v8  ;;  %v2429_v29 = vsel %vm2427_vm3, %v2428_v0, %v2419_v8 }
 0x4bf   :  { %v2426_v21 = vsel %vm2424_vm9, %v2411_v17, %v2425_v37 }
 0x4c0   :  { %v2430_v28 = vsel %vm2423_vm6, %v2426_v21, %v2429_v29 }
 0x4c1   :  { %v2431_v57 = vsel %vm2420_vm14, nan, %v2430_v28 }
 0x4c2   :  { %v2433_v31 = vmul.f32 %v2431_v57, %v2431_v57 }
 0x4c4   :  { %v2435_v26 = vmul.f32 %v2433_v31, %v7807_v34  ;;  %v7952_v34 = vpop.permute.xlu1 %2482 }
 0x4c6   :  { %v2437_v44 = vadd.f32 %v2435_v26, %v7692_v19 }
 0x4c8   :  { %2473 = vmatpush.msrb.mxu3 %v2437_v44 }
 0x4c9   :  { %5810 = vmatmul.msk.f32.vlgmr.msrb.gmra.mxu3 %vm10146_vm5, %v1589_v6 }
 0x50c   :  { %v2040_v42 = vpop.f32.mrf.mxu2  ;;  %v2060_v18 = vpop.f32.mrf.mxu3 }
 0x50d   :  { %v2041_v10 = vadd.f32 %v2040_v42, %v7942_v47  ;;  %v2061_v4 = vadd.f32 %v2060_v18, %v7942_v47 }
 0x50f   :  { %v7947_v53 = vadd.f32 %v2041_v10, %v6820_v39  ;;  %v7950_v36 = vadd.f32 %v2061_v4, %v6822_v1 }
 0x511   :  { %v7956_v19 = vmul.f32 %v7952_v34, %v7947_v53  ;;  %v7960_v6 = vmul.f32 %v7952_v34, %v7950_v36 }
 0x513   :  { %v2487_v14 = vand.u32 2147483647, %v7956_v19  ;;  %v2490_v40 = vand.u32 2139095040, %v7956_v19  ;;  %v2642_v39 = vand.u32 2147483647, %v7960_v6  ;;  %v2645_v35 = vand.u32 2139095040, %v7960_v6 }
 0x515   :  { %v2491_v1 = vshrl.u32 %v2490_v40, 23  ;;  %v2494_v46 = vand.u32 8388607, %v2487_v14  ;;  %v2646_v51 = vshrl.u32 %v2645_v35, 23  ;;  %v2649_v55 = vand.u32 8388607, %v2642_v39 }
 0x517   :  { %v5811_v9 = vadd.s32 4294967169, %v2491_v1  ;;  %v2495_v56 = vor.u32 8388608, %v2494_v46  ;;  %v5814_v61 = vadd.s32 4294967169, %v2646_v51  ;;  %v2650_v49 = vor.u32 8388608, %v2649_v55 }
 0x519   :  { %v2497_v38 = vadd.s32 1, %v5811_v9  ;;  %v2652_v22 = vadd.s32 1, %v5814_v61  ;;  %v7970_v5 = vshll.u32 %v2495_v56, 8  ;;  %v7973_v45 = vshll.u32 %v2650_v49, 8 }
 0x51b   :  { %vm2498_vm2 = vcmp.gt.s32.totalorder %v2497_v38, 0  ;;  %vm2653_vm7 = vcmp.gt.s32.totalorder %v2652_v22, 0  ;;  %v2536_v62 = vand.u32 65535, %v7970_v5  ;;  %v2537_v20 = vshrl.u32 %v7970_v5, 16 }
 0x51c   :  { %v2499_v16 = vsel %vm2498_vm2, %v2497_v38, 0  ;;  %v2654_v41 = vsel %vm2653_vm7, %v2652_v22, 0 }
 0x51d   :  { %v2501_v58 = vand.u32 31, %v2499_v16  ;;  %v7977_v17 = vand.u32 31, %v2654_v41  ;;  %v7979_v63 = vshrl.u32 %v2499_v16, 5 }
 0x51f   :  { %v2502_v7 = vsub.s32 32, %v2501_v58  ;;  %v2504_v15 = vshll.u32 %v10182_v52, %v2501_v58  ;;  %v2507_v8 = vshll.u32 %v10226_v27, %v2501_v58  ;;  %v2510_v29 = vshll.u32 %v10227_v13, %v2501_v58 }
 0x520   :  { %v2513_v57 = vshll.u32 %v10225_v50, %v2501_v58  ;;  %v2516_v26 = vshll.u32 %v10223_v12, %v2501_v58  ;;  %v7995_v10 = vsub.s32 32, %v7977_v17  ;;  %vm2519_vm12 = vcmp.lt.s32.totalorder %v7979_v63, 1 }
 0x521   :  { %v2505_v37 = vshrl.u32 %v10226_v27, %v2502_v7  ;;  %v2508_v21 = vshrl.u32 %v10227_v13, %v2502_v7  ;;  %v2511_v28 = vshrl.u32 %v10225_v50, %v2502_v7  ;;  %v2514_v31 = vshrl.u32 %v10223_v12, %v2502_v7 }
 0x522   :  { %v2517_v44 = vshrl.u32 %v10224_v33, %v2502_v7  ;;  %vm2520_vm9 = vcmp.lt.s32.totalorder %v7979_v63, 2  ;;  %v2503_v35 = vshrl.u32 %v10182_v52, %v2502_v7  ;;  %vm2522_vm3 = vcmp.lt.s32.totalorder %v7979_v63, 4 }
 0x523   :  { %v2506_v42 = vor.u32 %v2505_v37, %v2504_v15  ;;  %v2509_v18 = vor.u32 %v2508_v21, %v2507_v8  ;;  %v2515_v4 = vor.u32 %v2514_v31, %v2513_v57  ;;  %vm2521_vm6 = vcmp.lt.s32.totalorder %v7979_v63, 3 }
 0x524   :  { %v2518_v40 = vor.u32 %v2517_v44, %v2516_v26  ;;  %v2659_v9 = vshll.u32 %v10182_v52, %v7977_v17  ;;  %v2662_v16 = vshll.u32 %v10226_v27, %v7977_v17  ;;  %v2666_v44 = vshrl.u32 %v10225_v50, %v7995_v10 }
 0x525   :  { %v2527_v1 = vsel %vm2519_vm12, %v2506_v42, %v2509_v18  ;;  %v2528_v51 = vsel %vm2522_vm3, %v2515_v4, 920167782  ;;  %v2523_v37 = vsel %vm2519_vm12, %v2503_v35, %v2506_v42  ;;  %v2665_v42 = vshll.u32 %v10227_v13, %v7977_v17 }
 0x526   :  { %v2532_v55 = vsel %vm2522_vm3, %v2518_v40, 1326507024 }
 0x527   :  { %v2533_v38 = vsel %vm2521_vm6, %v2515_v4, %v2532_v55 }
 0x528   :  { %v2455_v24 = vpop.f32.mrf.mxu2 }
 0x529   :  { %v2456_v11 = vadd.f32 %v2455_v24, %v7942_v47  ;;  %v2660_v24 = vshrl.u32 %v10226_v27, %v7995_v10 }
 0x52b   :  { %v7984_v0 = vadd.f32 %v2456_v11, %v6832_v59  ;;  %v2512_v59 = vor.u32 %v2511_v28, %v2510_v29  ;;  %v2663_v11 = vshrl.u32 %v10227_v13, %v7995_v10  ;;  %v8026_v29 = vshrl.u32 %v2654_v41, 5 }
 0x52c   :  { %v8028_v28 = vor.u32 %v2660_v24, %v2659_v9 }
 0x52d   :  { %v2531_v46 = vsel %vm2519_vm12, %v2509_v18, %v2512_v59  ;;  %v2524_v56 = vsel %vm2522_vm3, %v2512_v59, 2102212464  ;;  %v2529_v61 = vsel %vm2521_vm6, %v2512_v59, %v2528_v51  ;;  %v8030_v26 = vor.u32 %v2663_v11, %v2662_v16 }
 0x52e   :  { %v2530_v49 = vsel %vm2520_vm9, %v2527_v1, %v2529_v61  ;;  %v2534_v22 = vsel %vm2520_vm9, %v2531_v46, %v2533_v38  ;;  %v2525_v21 = vsel %vm2521_vm6, %v2509_v18, %v2524_v56  ;;  %v2667_v38 = vor.u32 %v2666_v44, %v2665_v42 }
 0x52f   :  { %v2538_v58 = vand.u32 65535, %v2534_v22  ;;  %v2539_v7 = vshrl.u32 %v2534_v22, 16  ;;  %v2560_v15 = vand.u32 65535, %v2530_v49  ;;  %v2561_v8 = vshrl.u32 %v2530_v49, 16 }
 0x530   :  { %v2669_v22 = vshrl.u32 %v10223_v12, %v7995_v10  ;;  %vm2674_vm3 = vcmp.lt.s32.totalorder %v8026_v29, 1  ;;  %vm2677_vm6 = vcmp.lt.s32.totalorder %v8026_v29, 4 }
 0x531   :  { %v2541_v57 = vmul.u32 %v2539_v7, %v2536_v62  ;;  %v2542_v31 = vmul.u32 %v2538_v58, %v2537_v20  ;;  %v2540_v59 = vmul.u32 %v2538_v58, %v2536_v62  ;;  %v2563_v4 = vmul.u32 %v2561_v8, %v2536_v62 }
 0x532   :  { %v2564_v40 = vmul.u32 %v2560_v15, %v2537_v20  ;;  %v2543_v35 = vmul.u32 %v2539_v7, %v2537_v20  ;;  %v2562_v18 = vmul.u32 %v2560_v15, %v2536_v62  ;;  %v2565_v41 = vmul.u32 %v2561_v8, %v2537_v20 }
 0x533   :  { %v2544_v1 = vshll.u32 %v2541_v57, 16  ;;  %v2545_v46 = vshrl.u32 %v2541_v57, 16  ;;  %v2546_v51 = vshll.u32 %v2542_v31, 16  ;;  %v2547_v55 = vshrl.u32 %v2542_v31, 16 }
 0x534   :  { %v2566_v9 = vshll.u32 %v2563_v4, 16  ;;  %v2568_v61 = vshll.u32 %v2564_v40, 16  ;;  %v2668_v20 = vshll.u32 %v10225_v50, %v7977_v17  ;;  %v2671_v7 = vshll.u32 %v10223_v12, %v7977_v17 }
 0x535   :  { %vm2548_vm14 = vc.u32 %v2540_v59, %v2544_v1  ;;  %v2550_v56 = vadd.s32 %v2544_v1, %v2540_v59  ;;  %v2672_v31 = vshrl.u32 %v10224_v33, %v7995_v10  ;;  %v2567_v44 = vshrl.u32 %v2563_v4, 16 }
 0x536   :  { %v2549_v24 = vsel %vm2548_vm14, 1, %v10186_v60  ;;  %vm2570_vm2 = vc.u32 %v2562_v18, %v2566_v9  ;;  %v2572_v49 = vadd.s32 %v2566_v9, %v2562_v18  ;;  %v2670_v57 = vor.u32 %v2669_v22, %v2668_v20 }
 0x537   :  { %v2551_v16 = vadd.s32 %v2549_v24, %v2543_v35  ;;  %vm2552_vm7 = vc.u32 %v2550_v56, %v2546_v51  ;;  %v2571_v62 = vsel %vm2570_vm2, 1, %v10186_v60  ;;  %v2569_v59 = vshrl.u32 %v2564_v40, 16 }
 0x538   :  { %v2553_v11 = vsel %vm2552_vm7, 1, %v10186_v60  ;;  %v2573_v58 = vadd.s32 %v2571_v62, %v2565_v41  ;;  %vm2574_vm12 = vc.u32 %v2572_v49, %v2568_v61  ;;  %v8048_v42 = vadd.s32 %v2572_v49, %v2568_v61 }
 0x539   :  { %v2555_v15 = vadd.s32 %v2553_v11, %v2551_v16  ;;  %v2575_v8 = vsel %vm2574_vm12, 1, %v10186_v60  ;;  %v2673_v18 = vor.u32 %v2672_v31, %v2671_v7  ;;  %vm2676_vm14 = vcmp.lt.s32.totalorder %v8026_v29, 3 }
 0x53a   :  { %v2577_v35 = vadd.s32 %v2575_v8, %v2573_v58  ;;  %v2682_v17 = vsel %vm2674_vm3, %v8028_v28, %v8030_v26  ;;  %v2683_v4 = vsel %vm2677_vm6, %v2670_v57, 920167782  ;;  %vm2675_vm2 = vcmp.lt.s32.totalorder %v8026_v29, 2 }
 0x53b   :  { %v2556_v1 = vadd.s32 %v2555_v15, %v2545_v46  ;;  %v2684_v46 = vsel %vm2676_vm14, %v2667_v38, %v2683_v4  ;;  %v2686_v51 = vsel %vm2674_vm3, %v8030_v26, %v2667_v38  ;;  %v2526_v9 = vsel %vm2520_vm9, %v2523_v37, %v2525_v21 }
 0x53c   :  { %v2578_v41 = vadd.s32 %v2577_v35, %v2567_v44  ;;  %v2685_v61 = vsel %vm2675_vm2, %v2682_v17, %v2684_v46  ;;  %v2691_v49 = vand.u32 65535, %v7973_v45  ;;  %v2692_v37 = vshrl.u32 %v7973_v45, 16 }
 0x53d   :  { %v8059_v40 = vadd.s32 %v2556_v1, %v2547_v55  ;;  %v2687_v55 = vsel %vm2677_vm6, %v2673_v18, 1326507024  ;;  %v2715_v22 = vand.u32 65535, %v2685_v61  ;;  %v2716_v21 = vshrl.u32 %v2685_v61, 16 }
 0x53e   :  { %v2579_v56 = vadd.s32 %v2578_v41, %v2569_v59  ;;  %v2688_v24 = vsel %vm2676_vm14, %v2670_v57, %v2687_v55  ;;  %v2580_v62 = vmul.u32 %v7970_v5, %v2526_v9  ;;  %v8084_v8 = vmul.f32 %v7952_v34, %v7984_v0 }
 0x53f   :  { %vm2582_vm7 = vc.u32 %v8059_v40, %v8048_v42  ;;  %v2689_v63 = vsel %vm2675_vm2, %v2686_v51, %v2688_v24  ;;  %v2718_v7 = vmul.u32 %v2716_v21, %v2691_v49  ;;  %v2719_v15 = vmul.u32 %v2715_v22, %v2692_v37 }
 0x540   :  { %v2583_v16 = vadd.s32 1, %v2579_v56  ;;  %v2693_v20 = vand.u32 65535, %v2689_v63  ;;  %v2694_v11 = vshrl.u32 %v2689_v63, 16  ;;  %v2658_v31 = vshrl.u32 %v10182_v52, %v7995_v10 }
 0x541   :  { %v2679_v35 = vsel %vm2677_vm6, %v2667_v38, 2102212464  ;;  %v2717_v1 = vmul.u32 %v2715_v22, %v2691_v49  ;;  %v2720_v5 = vmul.u32 %v2716_v21, %v2692_v37  ;;  %v2721_v18 = vshll.u32 %v2718_v7, 16 }
 0x542   :  { %v2584_v58 = vsel %vm2582_vm7, %v2583_v16, %v2579_v56  ;;  %v2696_v44 = vmul.u32 %v2694_v11, %v2691_v49  ;;  %v2697_v59 = vmul.u32 %v2693_v20, %v2692_v37  ;;  %v2695_v17 = vmul.u32 %v2693_v20, %v2691_v49 }
 0x543   :  { %v2585_v57 = vadd.s32 %v2584_v58, %v2580_v62  ;;  %v2698_v4 = vmul.u32 %v2694_v11, %v2692_v37  ;;  %v2723_v9 = vshll.u32 %v2719_v15, 16  ;;  %vm2725_vm9 = vc.u32 %v2717_v1, %v2721_v18 }
 0x544   :  { %v2699_v46 = vshll.u32 %v2696_v44, 16  ;;  %v2701_v51 = vshll.u32 %v2697_v59, 16  ;;  %v2727_v56 = vadd.s32 %v2721_v18, %v2717_v1  ;;  %v2726_v10 = vsel %vm2725_vm9, 1, %v10186_v60 }
 0x545   :  { %v2586_v41 = vadd.s32 536870912, %v2585_v57  ;;  %v2728_v16 = vadd.s32 %v2726_v10, %v2720_v5  ;;  %v2678_v49 = vsel %vm2674_vm3, %v2658_v31, %v8028_v28  ;;  %v2680_v63 = vsel %vm2676_vm14, %v8030_v26, %v2679_v35 }
 0x546   :  { %vm2703_vm12 = vc.u32 %v2695_v17, %v2699_v46  ;;  %v2705_v55 = vadd.s32 %v2699_v46, %v2695_v17  ;;  %vm2729_vm6 = vc.u32 %v2727_v56, %v2723_v9  ;;  %v2810_v62 = vand.u32 2147483647, %v8084_v8 }
 0x547   :  { %v2587_v61 = vshrl.u32 %v2586_v41, 30  ;;  %v2704_v24 = vsel %vm2703_vm12, 1, %v10186_v60  ;;  %v2730_v21 = vsel %vm2729_vm6, 1, %v10186_v60  ;;  %v2700_v11 = vshrl.u32 %v2696_v44, 16 }
 0x548   :  { %v2706_v22 = vadd.s32 %v2704_v24, %v2698_v4  ;;  %vm2707_vm7 = vc.u32 %v2705_v55, %v2701_v51  ;;  %v2732_v1 = vadd.s32 %v2730_v21, %v2728_v16  ;;  %vm2489_vm9 = vcmp.lt.s32.totalorder %v7956_v19, 0 }
 0x549   :  { %v2588_v38 = vshll.u32 %v2587_v61, 30  ;;  %v2708_v37 = vsel %vm2707_vm7, 1, %v10186_v60  ;;  %v2611_v5 = vsub.s32 4, %v2587_v61  ;;  %v2722_v28 = vshrl.u32 %v2718_v7, 16 }
 0x54a   :  { %v2710_v58 = vadd.s32 %v2708_v37, %v2706_v22  ;;  %v2813_v31 = vand.u32 2139095040, %v8084_v8  ;;  %v2702_v41 = vshrl.u32 %v2697_v59, 16  ;;  %v2681_v35 = vsel %vm2675_vm2, %v2678_v49, %v2680_v63 }
 0x54b   :  { %v2589_v20 = vsub.s32 %v2585_v57, %v2588_v38  ;;  %v2724_v17 = vshrl.u32 %v2719_v15, 16  ;;  %v2733_v4 = vadd.s32 %v2732_v1, %v2722_v28  ;;  %v2731_v51 = vadd.s32 %v2727_v56, %v2723_v9 }
 0x54c   :  { %v2711_v26 = vadd.s32 %v2710_v58, %v2700_v11  ;;  %v2814_v46 = vshrl.u32 %v2813_v31, 23  ;;  %v2817_v55 = vand.u32 8388607, %v2810_v62  ;;  %v2612_v7 = vsel %vm2489_vm9, %v2611_v5, %v2587_v61  ;;  %v2475_v31 = vpop.f32.mrf.mxu3 }
 0x54d   :  { %vm2590_vm3 = vcmp.lt.s32.totalorder %v2589_v20, 0  ;;  %v2591_v18 = vsub.s32 0, %v2589_v20  ;;  %v2734_v24 = vadd.s32 %v2733_v4, %v2724_v17  ;;  %vm8111_vm14 = vcmp.le.f32.partialorder %v2487_v14, 0.7853982 }
 0x54e   :  { %v2712_v44 = vadd.s32 %v2711_v26, %v2702_v41  ;;  %v5817_v16 = vadd.s32 4294967169, %v2814_v46  ;;  %v2614_v9 = vsel %vm8111_vm14, 0, %v2612_v7  ;;  %v2735_v56 = vmul.u32 %v7973_v45, %v2681_v35 }
 0x54f   :  { %v2592_v57 = vsel %vm2590_vm3, %v2591_v18, %v2589_v20  ;;  %v2738_v59 = vadd.s32 1, %v2734_v24  ;;  %v2818_v49 = vor.u32 8388608, %v2817_v55  ;;  %v2581_v14 = vadd.s32 %v8048_v42, %v8059_v40 }
 0x550   :  { %v2593_v10 = vclz %v2592_v57  ;;  %vm2737_vm2 = vc.u32 %v2712_v44, %v2731_v51  ;;  %v2820_v38 = vadd.s32 1, %v5817_v16  ;;  %v2631_v58 = vadd.s32 3, %v2614_v9 }
 0x551   :  { %v2739_v61 = vsel %vm2737_vm2, %v2738_v59, %v2734_v24  ;;  %v8120_v28 = vshll.u32 %v2818_v49, 8  ;;  %v2476_v57 = vadd.f32 %v2475_v31, %v7942_v47  ;;  %v8125_v42 = vadd.s32 %v2731_v51, %v2712_v44 }
 0x552   :  { %v5812_v15 = vadd.s32 4294967294, %v2593_v10  ;;  %vm2821_vm6 = vcmp.gt.s32.totalorder %v2820_v38, 0  ;;  %v2740_v63 = vadd.s32 %v2739_v61, %v2735_v56  ;;  %v8122_v46 = vand.u32 3, %v2631_v58 }
 0x553   :  { %v2822_v37 = vsel %vm2821_vm6, %v2820_v38, 0  ;;  %v8129_v10 = vand.u32 65535, %v8120_v28  ;;  %v8135_v16 = vshrl.u32 %v8120_v28, 16  ;;  %vm2644_vm7 = vcmp.lt.s32.totalorder %v7960_v6, 0 }
 0x554   :  { %vm5813_vm12 = vcmp.lt.s32.totalorder %v5812_v15, 0  ;;  %v2741_v1 = vadd.s32 536870912, %v2740_v63  ;;  %v2824_v5 = vand.u32 31, %v2822_v37  ;;  %v8154_v31 = vadd.f32 %v2476_v57, %v10239_v23 }
 0x555   :  { %v2596_v22 = vsel %vm5813_vm12, 0, %v5812_v15  ;;  %vm2633_vm5 = vcmp.lt.s32.totalorder %v8122_v46, 2 }
 0x556   :  { %v2597_v21 = vsub.s32 32, %v2596_v22  ;;  %v2601_v11 = vsub.s32 4294967266, %v2596_v22  ;;  %v2598_v18 = vshll.u32 %v2589_v20, %v2596_v22  ;;  %v2742_v26 = vshrl.u32 %v2741_v1, 30  ;;  %10270 = vst [vmem:[#allocation10_spill] sm:$0xff] %v8154_v31 }
 0x557   :  { %v2825_v35 = vsub.s32 32, %v2824_v5  ;;  %v8131_v20 = vshrl.u32 %v2822_v37, 5  ;;  %v2827_v47 = vshll.u32 %v10182_v52, %v2824_v5  ;;  %v2830_v9 = vshll.u32 %v10226_v27, %v2824_v5 }
 0x558   :  { %v2599_v45 = vshrl.u32 %v2581_v14, %v2597_v21  ;;  %v2602_v41 = vadd.s32 127, %v2601_v11  ;;  %v2743_v40 = vshll.u32 %v2742_v26, 30  ;;  %v2833_v56 = vshll.u32 %v10227_v13, %v2824_v5 }
 0x559   :  { %v2828_v55 = vshrl.u32 %v10226_v27, %v2825_v35  ;;  %v2831_v24 = vshrl.u32 %v10227_v13, %v2825_v35  ;;  %v2834_v44 = vshrl.u32 %v10225_v50, %v2825_v35  ;;  %v2837_v51 = vshrl.u32 %v10223_v12, %v2825_v35 }
 0x55a   :  { %v2600_v17 = vor.u32 %v2599_v45, %v2598_v18  ;;  %v2603_v4 = vshll.u32 %v2602_v41, 23  ;;  %v8137_v15 = vsub.s32 %v2740_v63, %v2743_v40  ;;  %v2836_v22 = vshll.u32 %v10225_v50, %v2824_v5 }
 0x55b   :  { %v2829_v61 = vor.u32 %v2828_v55, %v2827_v47  ;;  %v8148_v37 = vor.u32 %v2831_v24, %v2830_v9  ;;  %v2839_v14 = vshll.u32 %v10223_v12, %v2824_v5  ;;  %v2840_v21 = vshrl.u32 %v10224_v33, %v2825_v35 }
 0x55c   :  { %v2604_v7 = vor.u32 4788187, %v2603_v4  ;;  %v2607_v38 = vcvt.s32.f32 %v2600_v17  ;;  %vm2745_vm3 = vcmp.lt.s32.totalorder %v8137_v15, 0  ;;  %v2746_v49 = vsub.s32 0, %v8137_v15 }
 0x55d   :  { %v2835_v58 = vor.u32 %v2834_v44, %v2833_v56  ;;  %v2838_v1 = vor.u32 %v2837_v51, %v2836_v22  ;;  %v2841_v41 = vor.u32 %v2840_v21, %v2839_v14  ;;  %vm2842_vm2 = vcmp.lt.s32.totalorder %v8131_v20, 1 }
 0x55e   :  { %v2605_v59 = vand.u32 2147483647, %v2604_v7  ;;  %v2747_v11 = vsel %vm2745_vm3, %v2746_v49, %v8137_v15  ;;  %v2766_v17 = vsub.s32 4, %v2742_v26  ;;  %v2826_v4 = vshrl.u32 %v10182_v52, %v2825_v35 }
 0x55f   :  { %v2748_v45 = vclz %v2747_v11  ;;  %vm10147_vm12 = vcmp.lt.s32.totalorder %v8131_v20, 2  ;;  %vm2844_vm6 = vcmp.lt.s32.totalorder %v8131_v20, 3  ;;  %vm2845_vm3 = vcmp.lt.s32.totalorder %v8131_v20, 4 }
 0x560   :  { %v2608_v63 = vmul.f32 %v2607_v38, %v2605_v59  ;;  %v2850_v23 = vsel %vm2842_vm2, %v2829_v61, %v8148_v37  ;;  %v2851_v35 = vsel %vm2845_vm3, %v2838_v1, 920167782  ;;  %v2854_v55 = vsel %vm2842_vm2, %v8148_v37, %v2835_v58 }
 0x561   :  { %v5815_v40 = vadd.s32 4294967294, %v2748_v45  ;;  %v2855_v7 = vsel %vm2845_vm3, %v2841_v41, 1326507024  ;;  %v2852_v47 = vsel %vm2844_vm6, %v2835_v58, %v2851_v35  ;;  %v8186_v51 = vsel %vm2644_vm7, %v2766_v17, %v2742_v26 }
 0x562   :  { %v2609_v18 = vxor.u32 2147483648, %v2608_v63  ;;  %v2856_v29 = vsel %vm2844_vm6, %v2838_v1, %v2855_v7  ;;  %v8192_v38 = vmul.f32 %v7952_v34, %v8154_v31  ;;  %v8196_v22 = vsel %vm2842_vm2, %v2826_v4, %v2829_v61 }
 0x563   :  { %v2857_v59 = vsel %vm10147_vm12, %v2854_v55, %v2856_v29  ;;  %v2853_v14 = vsel %vm10147_vm12, %v2850_v23, %v2852_v47  ;;  %v2847_v41 = vsel %vm2845_vm3, %v2835_v58, 2102212464  ;;  %vm8215_vm3 = vcmp.le.f32.partialorder %v2642_v39, 0.7853982 }
 0x564   :  { %v2610_v5 = vsel %vm2489_vm9, %v2609_v18, %v2608_v63  ;;  %vm5816_vm9 = vcmp.lt.s32.totalorder %v5815_v40, 0  ;;  %v2861_v26 = vand.u32 65535, %v2857_v59  ;;  %v2862_v21 = vshrl.u32 %v2857_v59, 16 }
 0x565   :  { %v8169_v57 = vsel %vm8111_vm14, %v7956_v19, %v2610_v5  ;;  %v2751_v44 = vsel %vm5816_vm9, 0, %v5815_v40  ;;  %v2884_v23 = vshrl.u32 %v2853_v14, 16  ;;  %vm2634_vm14 = vcmp.eq.s32.totalorder %v8122_v46, 0 }
 0x566   :  { %v2615_v24 = vmul.f32 %v8169_v57, %v8169_v57  ;;  %v2752_v49 = vsub.s32 32, %v2751_v44  ;;  %v2756_v63 = vsub.s32 4294967266, %v2751_v44  ;;  %v2753_v18 = vshll.u32 %v8137_v15, %v2751_v44 }
 0x567   :  { %v2864_v17 = vmul.u32 %v2862_v21, %v8129_v10  ;;  %v8206_v61 = vmul.u32 %v2861_v26, %v8135_v16  ;;  %v2863_v55 = vmul.u32 %v2861_v26, %v8129_v10  ;;  %v2883_v15 = vand.u32 65535, %v2853_v14 }
 0x568   :  { %v2616_v9 = vmul.f32 -0.001358992, %v2615_v24  ;;  %v2623_v56 = vmul.f32 -0.00019511016, %v2615_v24  ;;  %v2754_v34 = vshrl.u32 %v8125_v42, %v2752_v49  ;;  %v2757_v45 = vadd.s32 127, %v2756_v63 }
 0x569   :  { %v2867_v7 = vshll.u32 %v2864_v17, 16  ;;  %v2866_v29 = vmul.u32 %v2862_v21, %v8135_v16  ;;  %v2869_v58 = vshll.u32 %v8206_v61, 16  ;;  %v2886_v26 = vmul.u32 %v2884_v23, %v8129_v10 }
 0x56a   :  { %v2617_v11 = vadd.f32 0.041655596, %v2616_v9  ;;  %v2624_v1 = vadd.f32 0.008332121, %v2623_v56  ;;  %v2755_v40 = vor.u32 %v2754_v34, %v2753_v18  ;;  %v2758_v35 = vshll.u32 %v2757_v45, 23 }
 0x56b   :  { %vm2871_vm9 = vc.u32 %v2863_v55, %v2867_v7  ;;  %v2873_v56 = vadd.s32 %v2867_v7, %v2863_v55  ;;  %vm2630_vm12 = vweird.f32 %v7956_v19  ;;  %v2887_v39 = vmul.u32 %v2883_v15, %v8135_v16 }
 0x56c   :  { %v2618_v4 = vmul.f32 %v2617_v11, %v2615_v24  ;;  %v2625_v5 = vmul.f32 %v2624_v1, %v2615_v24  ;;  %v2759_v59 = vor.u32 4788187, %v2758_v35  ;;  %v2762_v9 = vcvt.s32.f32 %v2755_v40 }
 0x56d   :  { %v2872_v14 = vsel %vm2871_vm9, 1, %v10186_v60  ;;  %vm2875_vm2 = vc.u32 %v2873_v56, %v2869_v58  ;;  %v2848_v34 = vsel %vm2844_vm6, %v8148_v37, %v2847_v41  ;;  %v2889_v40 = vshll.u32 %v2886_v26, 16 }
 0x56e   :  { %v2619_v47 = vadd.f32 -0.4999988, %v2618_v4  ;;  %v2626_v42 = vadd.f32 -0.16666654, %v2625_v5  ;;  %v2760_v21 = vand.u32 2147483647, %v2759_v59  ;;  %v2874_v11 = vadd.s32 %v2872_v14, %v2866_v29 }
 0x56f   :  { %v2885_v5 = vmul.u32 %v2883_v15, %v8129_v10  ;;  %v2868_v7 = vshrl.u32 %v2864_v17, 16  ;;  %v2891_v29 = vshll.u32 %v2887_v39, 16  ;;  %v2870_v37 = vshrl.u32 %v8206_v61, 16 }
 0x570   :  { %v2620_v49 = vmul.f32 %v2619_v47, %v2615_v24  ;;  %v2627_v63 = vmul.f32 %v2626_v42, %v2615_v24  ;;  %v2876_v24 = vsel %vm2875_vm2, 1, %v10186_v60  ;;  %v2763_v45 = vmul.f32 %v2762_v9, %v2760_v21 }
 0x571   :  { %v2878_v4 = vadd.s32 %v2876_v24, %v2874_v11  ;;  %v2888_v47 = vmul.u32 %v2884_v23, %v8135_v16  ;;  %vm2893_vm9 = vc.u32 %v2885_v5, %v2889_v40  ;;  %v2895_v58 = vadd.s32 %v2889_v40, %v2885_v5 }
 0x572   :  { %v2621_v1 = vadd.f32 1.0, %v2620_v49  ;;  %v2628_v18 = vadd.f32 1.0, %v2627_v63  ;;  %v2764_v42 = vxor.u32 2147483648, %v2763_v45  ;;  %v2894_v9 = vsel %vm2893_vm9, 1, %v10186_v60 }
 0x573   :  { %v2879_v41 = vadd.s32 %v2878_v4, %v2868_v7  ;;  %v2890_v15 = vshrl.u32 %v2886_v26, 16  ;;  %v2896_v56 = vadd.s32 %v2894_v9, %v2888_v47  ;;  %vm2897_vm6 = vc.u32 %v2895_v58, %v2891_v29 }
 0x574   :  { %v2629_v35 = vmul.f32 %v2628_v18, %v8169_v57  ;;  %v2638_v55 = vxor.u32 2147483648, %v2621_v1  ;;  %v2765_v10 = vsel %vm2644_vm7, %v2764_v42, %v2763_v45  ;;  %vm10273_vm2 = vcmp.eq.s32.totalorder %v8122_v46, 2  ;;  %v8253_v46 = vpop.permute.xlu2 %2801 }
 0x575   :  { %v2768_v17 = vsel %vm8215_vm3, %v7960_v6, %v2765_v10  ;;  %v2898_v61 = vsel %vm2897_vm6, 1, %v10186_v60  ;;  %v2968_v14 = vand.u32 2139095040, %v8192_v38  ;;  %v2769_v21 = vsel %vm8215_vm3, 0, %v8186_v51 }
 0x576   :  { %v2635_v59 = vxor.u32 2147483648, %v2629_v35  ;;  %v2639_v16 = vsel %vm10273_vm2, %v2638_v55, %v2629_v35  ;;  %v2770_v49 = vmul.f32 %v2768_v17, %v2768_v17  ;;  %v2900_v63 = vadd.s32 %v2898_v61, %v2896_v56 }
 0x577   :  { %v8251_v11 = vadd.s32 %v2879_v41, %v2870_v37  ;;  %v8258_v40 = vadd.s32 %v2895_v58, %v2891_v29  ;;  %v2969_v19 = vshrl.u32 %v2968_v14, 23  ;;  %v2786_v7 = vadd.s32 3, %v2769_v21 }
 0x578   :  { %v2636_v57 = vsel %vm2634_vm14, %v2621_v1, %v2635_v59  ;;  %v2892_v1 = vshrl.u32 %v2887_v39, 16  ;;  %v2771_v24 = vmul.f32 -0.001358992, %v2770_v49  ;;  %v2778_v45 = vmul.f32 -0.00019511016, %v2770_v49 }
 0x579   :  { %v2640_v23 = vsel %vm2633_vm5, %v2636_v57, %v2639_v16  ;;  %v2901_v4 = vadd.s32 %v2900_v63, %v2890_v15  ;;  %vm10274_vm5 = vcmp.lt.s32.totalorder %v8131_v20, 2  ;;  %vm2905_vm7 = vc.u32 %v8251_v11, %v8258_v40 }
 0x57a   :  { %v2641_v26 = vsel %vm2630_vm12, nan, %v2640_v23  ;;  %v2849_v5 = vsel %vm10274_vm5, %v8196_v22, %v2848_v34  ;;  %v2772_v44 = vadd.f32 0.041655596, %v2771_v24  ;;  %v2779_v51 = vadd.f32 0.008332121, %v2778_v45 }
 0x57b   :  { %v2797_v18 = vmul.f32 %v2641_v26, %v2641_v26  ;;  %v2902_v55 = vadd.s32 %v2901_v4, %v2892_v1  ;;  %v5820_v39 = vadd.s32 4294967169, %v2969_v19  ;;  %v2903_v22 = vmul.u32 %v8120_v28, %v2849_v5 }
 0x57c   :  { %v2773_v42 = vmul.f32 %v2772_v44, %v2770_v49  ;;  %v2780_v59 = vmul.f32 %v2779_v51, %v2770_v49  ;;  %v2965_v34 = vand.u32 2147483647, %v8192_v38  ;;  %v2787_v56 = vand.u32 3, %v2786_v7 }
 0x57d   :  { %v2804_v35 = vmul.f32 %v8253_v46, %v2797_v18  ;;  %v2906_v20 = vadd.s32 1, %v2902_v55  ;;  %v2975_v29 = vadd.s32 1, %v5820_v39  ;;  %vm2785_vm14 = vweird.f32 %v7960_v6 }
 0x57e   :  { %v2774_v58 = vadd.f32 -0.4999988, %v2773_v42  ;;  %v2781_v37 = vadd.f32 -0.16666654, %v2780_v59  ;;  %v2972_v28 = vand.u32 8388607, %v2965_v34 }
 0x57f   :  { %v8264_v47 = vadd.f32 %v2804_v35, %v7947_v53  ;;  %v2907_v41 = vsel %vm2905_vm7, %v2906_v20, %v2902_v55  ;;  %vm2976_vm12 = vcmp.gt.s32.totalorder %v2975_v29, 0  ;;  %vm2788_vm3 = vcmp.lt.s32.totalorder %v2787_v56, 2 }
 0x580   :  { %v2908_v9 = vadd.s32 %v2907_v41, %v2903_v22  ;;  %v2775_v10 = vmul.f32 %v2774_v58, %v2770_v49  ;;  %v2782_v15 = vmul.f32 %v2781_v37, %v2770_v49  ;;  %v2977_v57 = vsel %vm2976_vm12, %v2975_v29, 0 }
 0x581   :  { %3176 = vrot.lane.b32.xlu2 %v8264_v47, %s6001_s30  ;;  %v2979_v61 = vand.u32 31, %v2977_v57  ;;  %vm2789_vm9 = vcmp.eq.s32.totalorder %v2787_v56, 0  ;;  %vm2792_vm6 = vcmp.eq.s32.totalorder %v2787_v56, 2  ;;  %v2973_v18 = vor.u32 8388608, %v2972_v28 }
 0x582   :  { %v2909_v16 = vadd.s32 536870912, %v2908_v9  ;;  %v2776_v23 = vadd.f32 1.0, %v2775_v10  ;;  %v2783_v63 = vadd.f32 1.0, %v2782_v15  ;;  %v8280_v4 = vshrl.u32 %v2977_v57, 5 }
 0x583   :  { %v8275_v26 = vsub.s32 32, %v2979_v61  ;;  %v2982_v5 = vshll.u32 %v10182_v52, %v2979_v61  ;;  %v2985_v35 = vshll.u32 %v10226_v27, %v2979_v61  ;;  %v2988_v39 = vshll.u32 %v10227_v13, %v2979_v61 }
 0x584   :  { %v8273_v14 = vshrl.u32 %v2909_v16, 30  ;;  %v2784_v21 = vmul.f32 %v2783_v63, %v2768_v17  ;;  %v2793_v1 = vxor.u32 2147483648, %v2776_v23  ;;  %v2991_v42 = vshll.u32 %v10225_v50, %v2979_v61 }
 0x585   :  { %v2983_v24 = vshrl.u32 %v10226_v27, %v8275_v26  ;;  %v2986_v19 = vshrl.u32 %v10227_v13, %v8275_v26  ;;  %v2989_v44 = vshrl.u32 %v10225_v50, %v8275_v26  ;;  %v2992_v51 = vshrl.u32 %v10223_v12, %v8275_v26 }
 0x586   :  { %v2911_v49 = vshll.u32 %v8273_v14, 30  ;;  %v2790_v45 = vxor.u32 2147483648, %v2784_v21  ;;  %v2794_v7 = vsel %vm2792_vm6, %v2793_v1, %v2784_v21  ;;  %v2994_v37 = vshll.u32 %v10223_v12, %v2979_v61 }
 0x587   :  { %v8296_v22 = vor.u32 %v2983_v24, %v2982_v5  ;;  %v8300_v58 = vor.u32 %v2986_v19, %v2985_v35  ;;  %v2995_v41 = vshrl.u32 %v10224_v33, %v8275_v26  ;;  %v2990_v15 = vor.u32 %v2989_v44, %v2988_v39 }
 0x588   :  { %v2912_v17 = vsub.s32 %v2908_v9, %v2911_v49  ;;  %v2791_v55 = vsel %vm2789_vm9, %v2776_v23, %v2790_v45  ;;  %v2993_v57 = vor.u32 %v2992_v51, %v2991_v42  ;;  %vm2997_vm5 = vcmp.lt.s32.totalorder %v8280_v4, 1 }
 0x589   :  { %3145 = vrot.lane.b32.xlu2 %v8264_v47, %s6002_s17  ;;  %v2795_v59 = vsel %vm2788_vm3, %v2791_v55, %v2794_v7  ;;  %v2996_v16 = vor.u32 %v2995_v41, %v2994_v37  ;;  %vm3000_vm7 = vcmp.lt.s32.totalorder %v8280_v4, 4  ;;  %v3005_v6 = vsel %vm2997_vm5, %v8296_v22, %v8300_v58 }
 0x58a   :  { %vm2913_vm2 = vcmp.lt.s32.totalorder %v2912_v17, 0  ;;  %v2914_v20 = vsub.s32 0, %v2912_v17  ;;  %v2796_v29 = vsel %vm2785_vm14, nan, %v2795_v59  ;;  %v8312_v61 = vshll.u32 %v2973_v18, 8 }
 0x58b   :  { %v2798_v9 = vmul.f32 %v2796_v29, %v2796_v29  ;;  %vm2999_vm12 = vcmp.lt.s32.totalorder %v8280_v4, 3  ;;  %v3006_v21 = vsel %vm3000_vm7, %v2993_v57, 920167782  ;;  %v3009_v1 = vsel %vm2997_vm5, %v8300_v58, %v2990_v15 }
 0x58c   :  { %v2915_v10 = vsel %vm2913_vm2, %v2914_v20, %v2912_v17  ;;  %vm10148_vm3 = vcmp.lt.s32.totalorder %v8280_v4, 2  ;;  %v3007_v49 = vsel %vm2999_vm12, %v2990_v15, %v3006_v21  ;;  %v3010_v18 = vsel %vm3000_vm7, %v2996_v16, 1326507024 }
 0x58d   :  { %v2916_v56 = vclz %v2915_v10  ;;  %v2805_v28 = vmul.f32 %v8253_v46, %v2798_v9  ;;  %v2904_v24 = vadd.s32 %v8258_v40, %v8251_v11  ;;  %v3008_v5 = vsel %vm10148_vm3, %v3005_v6, %v3007_v49 }
 0x58e   :  { %v3011_v19 = vsel %vm2999_vm12, %v2993_v57, %v3010_v18  ;;  %v3014_v55 = vand.u32 65535, %v8312_v61  ;;  %v3015_v7 = vshrl.u32 %v8312_v61, 16  ;;  %v3039_v39 = vshrl.u32 %v3008_v5, 16 }
 0x58f   :  { %v5818_v23 = vadd.s32 4294967294, %v2916_v56  ;;  %v8315_v63 = vadd.f32 %v2805_v28, %v7950_v36  ;;  %v3012_v51 = vsel %vm10148_vm3, %v3009_v1, %v3011_v19  ;;  %v3038_v29 = vand.u32 65535, %v3008_v5 }
 0x590   :  { %v3016_v11 = vand.u32 65535, %v3012_v51  ;;  %v3017_v40 = vshrl.u32 %v3012_v51, 16  ;;  %v3041_v57 = vmul.u32 %v3039_v39, %v3014_v55  ;;  %vm8342_vm9 = vcmp.le.f32.partialorder %v2810_v62, 0.7853982 }
 0x591   :  { %vm5819_vm14 = vcmp.lt.s32.totalorder %v5818_v23, 0  ;;  %3178 = vrot.lane.b32.xlu0 %v8315_v63, %s6001_s30  ;;  %v3042_v1 = vmul.u32 %v3038_v29, %v3015_v7  ;;  %v3043_v19 = vmul.u32 %v3039_v39, %v3015_v7  ;;  %v2981_v39 = vshrl.u32 %v10182_v52, %v8275_v26 }
 0x592   :  { %v2919_v45 = vsel %vm5819_vm14, 0, %v5818_v23  ;;  %v3019_v37 = vmul.u32 %v3017_v40, %v3014_v55  ;;  %v3020_v41 = vmul.u32 %v3016_v11, %v3015_v7  ;;  %v3018_v56 = vmul.u32 %v3016_v11, %v3014_v55 }
 0x593   :  { %v2920_v35 = vsub.s32 32, %v2919_v45  ;;  %v2924_v44 = vsub.s32 4294967266, %v2919_v45  ;;  %v2921_v42 = vshll.u32 %v2912_v17, %v2919_v45  ;;  %v3021_v16 = vmul.u32 %v3017_v40, %v3015_v7 }
 0x594   :  { %v3022_v28 = vshll.u32 %v3019_v37, 16  ;;  %v3024_v21 = vshll.u32 %v3020_v41, 16  ;;  %v3040_v17 = vmul.u32 %v3038_v29, %v3014_v55  ;;  %v3002_v11 = vsel %vm3000_vm7, %v2990_v15, 2102212464 }
 0x595   :  { %v2922_v59 = vshrl.u32 %v2904_v24, %v2920_v35  ;;  %v2925_v20 = vadd.s32 127, %v2924_v44  ;;  %v3044_v24 = vshll.u32 %v3041_v57, 16  ;;  %v3046_v35 = vshll.u32 %v3042_v1, 16 }
 0x596   :  { %vm3026_vm6 = vc.u32 %v3018_v56, %v3022_v28  ;;  %v3028_v18 = vadd.s32 %v3022_v28, %v3018_v56  ;;  %v3045_v56 = vshrl.u32 %v3041_v57, 16  ;;  %v3001_v28 = vsel %vm2997_vm5, %v2981_v39, %v8296_v22 }
 0x597   :  { %v2923_v9 = vor.u32 %v2922_v59, %v2921_v42  ;;  %v2926_v10 = vshll.u32 %v2925_v20, 23  ;;  %v3027_v5 = vsel %vm3026_vm6, 1, %v10186_v60  ;;  %vm3048_vm14 = vc.u32 %v3040_v17, %v3044_v24 }
 0x598   :  { %v3029_v44 = vadd.s32 %v3027_v5, %v3021_v16  ;;  %vm3030_vm2 = vc.u32 %v3028_v18, %v3024_v21  ;;  %v3050_v62 = vadd.s32 %v3044_v24, %v3040_v17  ;;  %v3049_v40 = vsel %vm3048_vm14, 1, %v10186_v60 }
 0x599   :  { %v2927_v6 = vor.u32 4788187, %v2926_v10  ;;  %v2930_v49 = vcvt.s32.f32 %v2923_v9  ;;  %v3031_v55 = vsel %vm3030_vm2, 1, %v10186_v60  ;;  %v3023_v42 = vshrl.u32 %v3019_v37, 16 }
 0x59a   :  { %v3033_v59 = vadd.s32 %v3031_v55, %v3029_v44  ;;  %v3051_v20 = vadd.s32 %v3049_v40, %v3043_v19  ;;  %vm3052_vm3 = vc.u32 %v3050_v62, %v3046_v35  ;;  %vm2812_vm6 = vcmp.lt.s32.totalorder %v8084_v8, 0 }
 0x59b   :  { %v2928_v45 = vand.u32 2147483647, %v2927_v6  ;;  %v3053_v29 = vsel %vm3052_vm3, 1, %v10186_v60  ;;  %v3025_v9 = vshrl.u32 %v3020_v41, 16  ;;  %v2934_v37 = vsub.s32 4, %v8273_v14 }
 0x59c   :  { %v3034_v10 = vadd.s32 %v3033_v59, %v3023_v42  ;;  %v3055_v15 = vadd.s32 %v3053_v29, %v3051_v20  ;;  %v3003_v6 = vsel %vm2999_vm12, %v8300_v58, %v3002_v11  ;;  %v3047_v57 = vshrl.u32 %v3042_v1, 16 }
 0x59d   :  { %v2931_v51 = vmul.f32 %v2930_v49, %v2928_v45  ;;  %v3054_v49 = vadd.s32 %v3050_v62, %v3046_v35  ;;  %vm10277_vm7 = vcmp.lt.s32.totalorder %v8280_v4, 2  ;;  %v2935_v22 = vsel %vm2812_vm6, %v2934_v37, %v8273_v14 }
 0x59e   :  { %v3035_v41 = vadd.s32 %v3034_v10, %v3025_v9  ;;  %v3056_v21 = vadd.s32 %v3055_v15, %v3045_v56  ;;  %v3004_v18 = vsel %vm10277_vm7, %v3001_v28, %v3003_v6  ;;  %v2937_v35 = vsel %vm8342_vm9, 0, %v2935_v22 }
 0x59f   :  { %v2932_v7 = vxor.u32 2147483648, %v2931_v51  ;;  %v2954_v59 = vadd.s32 3, %v2937_v35  ;;  %vm2953_vm14 = vweird.f32 %v8084_v8  ;;  %vm2967_vm7 = vcmp.lt.s32.totalorder %v8192_v38, 0 }
 0x5a0   :  { %v3057_v24 = vadd.s32 %v3056_v21, %v3047_v57  ;;  %vm3060_vm5 = vc.u32 %v3035_v41, %v3054_v49  ;;  %v3059_v22 = vadd.s32 %v3054_v49, %v3035_v41 }
 0x5a1   :  { %v2933_v16 = vsel %vm2812_vm6, %v2932_v7, %v2931_v51  ;;  %v3058_v51 = vmul.u32 %v8312_v61, %v3004_v18  ;;  %v2955_v10 = vand.u32 3, %v2954_v59 }
 0x5a2   :  { %v2936_v26 = vsel %vm8342_vm9, %v8084_v8, %v2933_v16  ;;  %v3061_v58 = vadd.s32 1, %v3057_v24 }
 0x5a3   :  { %v2938_v17 = vmul.f32 %v2936_v26, %v2936_v26  ;;  %vm2957_vm3 = vcmp.eq.s32.totalorder %v2955_v10, 0  ;;  %vm2960_vm9 = vcmp.eq.s32.totalorder %v2955_v10, 2  ;;  %vm2956_vm2 = vcmp.lt.s32.totalorder %v2955_v10, 2 }
 0x5a4   :  { %v3062_v1 = vsel %vm3060_vm5, %v3061_v58, %v3057_v24  ;;  %vm8387_vm5 = vcmp.le.f32.partialorder %v2965_v34, 0.7853982 }
 0x5a5   :  { %v2939_v45 = vmul.f32 -0.001358992, %v2938_v17  ;;  %v2946_v5 = vmul.f32 -0.00019511016, %v2938_v17  ;;  %v3063_v11 = vadd.s32 %v3062_v1, %v3058_v51 }
 0x5a7   :  { %v2940_v19 = vadd.f32 0.041655596, %v2939_v45  ;;  %v2947_v44 = vadd.f32 0.008332121, %v2946_v5  ;;  %v3064_v42 = vadd.s32 536870912, %v3063_v11 }
 0x5a9   :  { %v2941_v62 = vmul.f32 %v2940_v19, %v2938_v17  ;;  %v2948_v4 = vmul.f32 %v2947_v44, %v2938_v17  ;;  %v3065_v39 = vshrl.u32 %v3064_v42, 30 }
 0x5ab   :  { %v2942_v55 = vadd.f32 -0.4999988, %v2941_v62  ;;  %v2949_v40 = vadd.f32 -0.16666654, %v2948_v4  ;;  %v3066_v9 = vshll.u32 %v3065_v39, 30  ;;  %v3089_v42 = vsub.s32 4, %v3065_v39 }
 0x5ad   :  { %v2943_v20 = vmul.f32 %v2942_v55, %v2938_v17  ;;  %v2950_v7 = vmul.f32 %v2949_v40, %v2938_v17  ;;  %v3067_v15 = vsub.s32 %v3063_v11, %v3066_v9 }
 0x5af   :  { %v2944_v14 = vadd.f32 1.0, %v2943_v20  ;;  %v2951_v29 = vadd.f32 1.0, %v2950_v7  ;;  %vm3068_vm12 = vcmp.lt.s32.totalorder %v3067_v15, 0  ;;  %v3069_v23 = vsub.s32 0, %v3067_v15 }
 0x5b1   :  { %v2952_v56 = vmul.f32 %v2951_v29, %v2936_v26  ;;  %v2961_v61 = vxor.u32 2147483648, %v2944_v14  ;;  %v3070_v6 = vsel %vm3068_vm12, %v3069_v23, %v3067_v15  ;;  %v3090_v29 = vsel %vm2967_vm7, %v3089_v42, %v3065_v39 }
 0x5b2   :  { %v3071_v21 = vclz %v3070_v6  ;;  %v3092_v34 = vsel %vm8387_vm5, 0, %v3090_v29  ;;  %v10283_v29 = vmov 0 }
 0x5b3   :  { %v2958_v16 = vxor.u32 2147483648, %v2952_v56  ;;  %v2962_v28 = vsel %vm2960_vm9, %v2961_v61, %v2952_v56  ;;  %v3109_v23 = vadd.s32 3, %v3092_v34 }
 0x5b4   :  { %v5821_v24 = vadd.s32 4294967294, %v3071_v21 }
 0x5b5   :  { %v2959_v37 = vsel %vm2957_vm3, %v2944_v14, %v2958_v16  ;;  %v3110_v21 = vand.u32 3, %v3109_v23 }
 0x5b6   :  { %v2963_v57 = vsel %vm2956_vm2, %v2959_v37, %v2962_v28  ;;  %vm5822_vm6 = vcmp.lt.s32.totalorder %v5821_v24, 0  ;;  %vm3108_vm2 = vweird.f32 %v8192_v38 }
 0x5b7   :  { %v2964_v17 = vsel %vm2953_vm14, nan, %v2963_v57  ;;  %v3074_v45 = vsel %vm5822_vm6, 0, %v5821_v24  ;;  %vm3112_vm12 = vcmp.eq.s32.totalorder %v3110_v21, 0  ;;  %vm3115_vm3 = vcmp.eq.s32.totalorder %v3110_v21, 2 }
 0x5b8   :  { %v3120_v18 = vmul.f32 %v2964_v17, %v2964_v17  ;;  %v3075_v58 = vsub.s32 32, %v3074_v45  ;;  %v3079_v19 = vsub.s32 4294967266, %v3074_v45  ;;  %v3076_v44 = vshll.u32 %v3067_v15, %v3074_v45 }
 0x5b9   :  { %vm3111_vm9 = vcmp.lt.s32.totalorder %v3110_v21, 2 }
 0x5ba   :  { %v3122_v26 = vmul.f32 %v3120_v18, %v8253_v46  ;;  %v3077_v51 = vshrl.u32 %v3059_v22, %v3075_v58  ;;  %v3080_v1 = vadd.s32 127, %v3079_v19  ;;  %v937_v22 = vld [vmem:[%s10095_s11 + $0x8] sm:$0xff] }
 0x5bc   :  { %v8378_v5 = vadd.f32 %v3122_v26, %v7984_v0  ;;  %v3078_v8 = vor.u32 %v3077_v51, %v3076_v44  ;;  %v3081_v35 = vshll.u32 %v3080_v1, 23  ;;  %v934_v1 = vld [vmem:[%s10097_s13 + $0x8] sm:$0xff] }
 0x5be   :  { %3191 = vrot.lane.b32.xlu0 %v8378_v5, %s6003_s7  ;;  %v3082_v62 = vor.u32 4788187, %v3081_v35  ;;  %v3085_v11 = vcvt.s32.f32 %v3078_v8  ;;  %v929_v8 = vld [vmem:[%s10093_s9 + $0x10] sm:$0xff]  ;;  %s6014_s9 = smov 256  }
 0x5bf   :  { %v926_v35 = vld [vmem:[%s10092_s8 + $0x10] sm:$0xff]  ;;  %s5719_s8 = sshll.u32 %s10100_s16, 4  ;;  %s5720_s8 = int_to_ptr.hbm [resolvable:$true] %s5719_s8 }
 0x5c0   :  { %v3083_v4 = vand.u32 2147483647, %v3082_v62 }
 0x5c2   :  { %v3086_v55 = vmul.f32 %v3085_v11, %v3083_v4  ;;  %v8460_v11 = vld [vmem:[%s10085_s1] sm:$0x3] }
 0x5c3   :  { %vm3198_vm14 = vcmp.lt.s32.totalorder %v8460_v11, 124  ;;  %vm3183_vm6 = vcmp.lt.s32.totalorder %v8460_v11, 125 }
 0x5c4   :  { %v3087_v40 = vxor.u32 2147483648, %v3086_v55 }
 0x5c6   :  { %3160 = vrot.lane.b32.xlu0 %v8378_v5, %s6000_s18  ;;  %v3088_v49 = vsel %vm2967_vm7, %v3087_v40, %v3086_v55  ;;  %v3199_v55 = vsel %vm3198_vm14, 1, %v10186_v60  ;;  %v3184_v40 = vsel %vm3183_vm6, 1, %v10186_v60  ;;  %vm10149_vm7 = vcmp.lt.s32.totalorder %v10240_v2, 124 }
 0x5c7   :  { %v3091_v59 = vsel %vm8387_vm5, %v8192_v38, %v3088_v49  ;;  %v931_v38 = vld [vmem:[%s10096_s12 + $0x8] sm:$0xff]  ;;  %v3200_v41 = vperm.slane %v3199_v55, 0  ;;  %v3201_v49 = vperm.slane %v3199_v55, 1  ;;  %vm3152_vm14 = vcmp.ge.s32.totalorder %v8460_v11, 3 }
 0x5c8   :  { %v3093_v20 = vmul.f32 %v3091_v59, %v3091_v59  ;;  %vm10290_vm6 = vcmp.lt.s32.totalorder %v10240_v2, 127  ;;  %v3153_v21 = vsel %vm3152_vm14, 1, %v10186_v60 }
 0x5c9   :  { %vm8467_vm5 = vcmp.eq.s32.totalorder %v3200_v41, 1 }
 0x5ca   :  { %v3094_v7 = vmul.f32 -0.001358992, %v3093_v20  ;;  %v3101_v14 = vmul.f32 -0.00019511016, %v3093_v20 }
 0x5cc   :  { %v3095_v9 = vadd.f32 0.041655596, %v3094_v7  ;;  %v3102_v10 = vadd.f32 0.008332121, %v3101_v14  ;;  %v10280_v14 = vmov 0 }
 0x5cd   :  { %v10281_v14 = vsel %vm8467_vm5, 4294967295, %v10280_v14 }
 0x5ce   :  { %3147 = vrot.lane.b32.xlu0 %v8315_v63, %s6002_s17  ;;  %v3096_v56 = vmul.f32 %v3095_v9, %v3093_v20  ;;  %v3103_v61 = vmul.f32 %v3102_v10, %v3093_v20  ;;  %10282 = vst [vmem:[#allocation5_spill] sm:$0xff] %v10281_v14 }
 0x5d0   :  { %v3097_v15 = vadd.f32 -0.4999988, %v3096_v56  ;;  %v3104_v16 = vadd.f32 -0.16666654, %v3103_v61 }
 0x5d2   :  { %v3098_v37 = vmul.f32 %v3097_v15, %v3093_v20  ;;  %v3105_v28 = vmul.f32 %v3104_v16, %v3093_v20  ;;  %v3186_v20 = vperm.slane %v3184_v40, 1 }
 0x5d4   :  { %v3099_v6 = vadd.f32 1.0, %v3098_v37  ;;  %v3106_v57 = vadd.f32 1.0, %v3105_v28 }
 0x5d6   :  { %v3107_v17 = vmul.f32 %v3106_v57, %v3091_v59  ;;  %v3116_v18 = vxor.u32 2147483648, %v3099_v6  ;;  %3208 = vperm.xlu0 %5953, %v937_v22   ;;  %v3185_v59 = vperm.slane %v3184_v40, 0 }
 0x5d8   :  { %v3113_v24 = vxor.u32 2147483648, %v3107_v17  ;;  %v3117_v26 = vsel %vm3115_vm3, %v3116_v18, %v3107_v17  ;;  %vm10150_vm3 = vcmp.lt.s32.totalorder %v10240_v2, 125  ;;  %v3154_v17 = vperm.slane %v3153_v21, 0 }
 0x5d9   :  { %v3155_v18 = vperm.slane %v3153_v21, 1 }
 0x5da   :  { %v3114_v39 = vsel %vm3112_vm12, %v3099_v6, %v3113_v24  ;;  %vm8471_vm12 = vcmp.eq.s32.totalorder %v3201_v49, 1 }
 0x5db   :  { %v3118_v45 = vsel %vm3111_vm9, %v3114_v39, %v3117_v26  ;;  %v3177_v62 = vpop.permute.xlu2 %3176  ;;  %v10284_v29 = vsel %vm8471_vm12, 4294967295, %v10283_v29  ;;  %vm8480_vm9 = vcmp.eq.s32.totalorder %v3185_v59, 1  ;;  %vm8523_vm14 = vcmp.eq.s32.totalorder %v3155_v18, 1 }
 0x5dc   :  { %v3119_v58 = vsel %vm3108_vm2, nan, %v3118_v45  ;;  %10285 = vst [vmem:[#allocation8_spill] sm:$0xff] %v10284_v29  ;;  %vm8484_vm2 = vcmp.eq.s32.totalorder %v3186_v20, 1 }
 0x5dd   :  { %v3121_v19 = vmul.f32 %v3119_v58, %v3119_v58 }
 0x5de   :  { %3681 = vrot.lane.b32.xlu0 %v8315_v63, %s6004_s19 }
 0x5df   :  { %v3123_v44 = vmul.f32 %v3121_v19, %v8253_v46  ;;  %v940_v46 = vld [vmem:[%s10099_s15 + $0x8] sm:$0xff] }
 0x5e1   :  { %v8404_v51 = vadd.f32 %v3123_v44, %v8154_v31 }
 0x5e3   :  { %3193 = vrot.lane.b32.xlu1 %v8404_v51, %s6003_s7  ;;  %3170 = vrot.lane.b32.xlu2 %v8404_v51, %s5998_s28  ;;  %v3146_v7 = vpop.permute.xlu2 %3145 }
 0x5e6   :  { %3655 = vrot.lane.b32.xlu0 %v8264_v47, %s5997_s23 }
 0x5eb   :  { %3168 = vrot.lane.b32.xlu1 %v8378_v5, %s5998_s28  ;;  %3132 = vrot.lane.b32.xlu2 %v8404_v51, %s6005_s0 }
 0x5ee   :  { %3673 = vrot.lane.b32.xlu0 %v8404_v51, %s6001_s30 }
 0x5f3   :  { %3162 = vrot.lane.b32.xlu1 %v8404_v51, %s6000_s18  ;;  %3679 = vrot.lane.b32.xlu2 %v8264_v47, %s6004_s19 }
 0x5f6   :  { %3649 = vrot.lane.b32.xlu0 %v8404_v51, %s6002_s17 }
 0x5fb   :  { %3130 = vrot.lane.b32.xlu1 %v8378_v5, %s6005_s0  ;;  %3665 = vrot.lane.b32.xlu2 %v8315_v63, %s5999_s27 }
 0x5fe   :  { %3584 = vperm.xlu0 %5953, %v940_v46   ;;  %v8551_v46 = vld [vmem:[%s10094_s10 + $0x8] sm:$0xff] }
 0x603   :  { %3256 = vperm.xlu1 %5954, %v931_v38   ;;  %3671 = vrot.lane.b32.xlu2 %v8378_v5, %s6001_s30  ;;  %v3179_v4 = vpop.permute.xlu0 %3178 }
 0x604   :  { %v3181_v15 = vsel %vm10150_vm3, %v3177_v62, %v3179_v4  ;;  %v3182_v16 = vsel %vm10150_vm3, %v3179_v4, %v3177_v62  ;;  %vm3137_vm3 = vcmp.ge.s32.totalorder %v8460_v11, 5 }
 0x605   :  { %v3138_v48 = vsel %vm3137_vm3, 1, %v10186_v60  ;;  %vm10151_vm3 = vcmp.lt.s32.totalorder %v10240_v2, 5 }
 0x606   :  { %v3139_v58 = vperm.slane %v3138_v48, 0  ;;  %v3140_v19 = vperm.slane %v3138_v48, 1 }
 0x60b   :  { %3575 = vperm.xlu1 %5954, %v934_v1   ;;  %3647 = vrot.lane.b32.xlu2 %v8378_v5, %s6002_s17  ;;  %s6007_s17 = smov 119  }
 0x613   :  { %3663 = vrot.lane.b32.xlu1 %v8264_v47, %s5999_s27  ;;  %3634 = vrot.lane.b32.xlu2 %v8315_v63, %s6006_s25 }
 0x61b   :  { %3657 = vrot.lane.b32.xlu1 %v8315_v63, %s5997_s23  ;;  %4415 = vperm.xlu2 %5955, %v929_v8   ;;  %s6015_s23 = smov 16  }
 0x623   :  { %3632 = vrot.lane.b32.xlu1 %v8264_v47, %s6006_s25 }
 0x62b   :  { %4096 = vperm.xlu1 %5954, %v926_v35  }
 0x630   :  { %v3192_v42 = vpop.permute.xlu0 %3191 }
 0x638   :  { %v3161_v23 = vpop.permute.xlu0 %3160 }
 0x63d   :  { %v3171_v37 = vpop.permute.xlu2 %3170 }
 0x640   :  { %v3148_v39 = vpop.permute.xlu0 %3147 }
 0x645   :  { %v3133_v44 = vpop.permute.xlu2 %3132 }
 0x648   :  { %v8565_v35 = vpop.permute.xlu0 %3208 }
 0x655   :  { %v3194_v9 = vpop.permute.xlu1 %3193 }
 0x656   :  { %v3196_v10 = vsel %vm10149_vm7, %v3192_v42, %v3194_v9  ;;  %v3197_v34 = vsel %vm10149_vm7, %v3194_v9, %v3192_v42  ;;  %vm10291_vm7 = vmmov %vm10290_vm6 }
 0x657   :  { %5825 = vmatpush.msk.msra.mxu2 %vm8467_vm5, %v3196_v10  ;;  %5832 = vmatpush.msk.msra.mxu3 %vm8471_vm12, %v3197_v34 }
 0x659   :  { %5826 = vmatpush.msk.msra.mxu2 %vm8480_vm9, %v3181_v15  ;;  %5833 = vmatpush.msk.msra.mxu3 %vm8484_vm2, %v3182_v16 }
 0x65d   :  { %v3169_v28 = vpop.permute.xlu1 %3168 }
 0x65e   :  { %v3172_v6 = vsel %vm10290_vm6, %v3169_v28, %v3171_v37  ;;  %v3173_v57 = vsel %vm10291_vm7, %v3171_v37, %v3169_v28  ;;  %vm10152_vm6 = vcmp.lt.s32.totalorder %v10240_v2, 3  ;;  %vm8519_vm7 = vcmp.eq.s32.totalorder %v3154_v17, 1 }
 0x65f   :  { %5827 = vmatpush.msk.msra.mxu2 %vm6780_vm15, %v3172_v6  ;;  %5834 = vmatpush.msk.msra.mxu3 %vm6790_vm1, %v3173_v57  ;;  %vm10292_vm15 = vcmp.lt.s32.totalorder %v10240_v2, 2  ;;  %v3150_v45 = vsel %vm10152_vm6, %v3146_v7, %v3148_v39  ;;  %v3151_v22 = vsel %vm10152_vm6, %v3148_v39, %v3146_v7 }
 0x660   :  { %vm10293_vm1 = vmmov %vm10292_vm15 }
 0x661   :  { %3226 = vmatpush.msra.mxu2 %v8264_v47  ;;  %3246 = vmatpush.msra.mxu3 %v8315_v63 }
 0x665   :  { %v3163_v24 = vpop.permute.xlu1 %3162 }
 0x666   :  { %v3164_v32 = vsel %vm10292_vm15, %v3161_v23, %v3163_v24  ;;  %v3165_v26 = vsel %vm10293_vm1, %v3163_v24, %v3161_v23  ;;  %vm10304_vm15 = vcmask 457728  }
 0x667   :  { %5828 = vmatpush.msk.msra.mxu2 %vm7438_vm4, %v3165_v26  ;;  %5835 = vmatpush.msk.msra.mxu3 %vm7442_vm0, %v3164_v32  ;;  %vm8540_vm4 = vcmp.eq.s32.totalorder %v3139_v58, 1  ;;  %vm8544_vm0 = vcmp.eq.s32.totalorder %v3140_v19, 1  ;;  %vm10305_vm1 = vmmov %vm10304_vm15 }
 0x668   :  { %v10299_v25 = vsel %vm8540_vm4, 4294967295, %v10298_v25  ;;  %v10302_v54 = vsel %vm8544_vm0, 4294967295, %v10301_v54 }
 0x669   :  { %5829 = vmatpush.msk.msra.mxu2 %vm8519_vm7, %v3151_v22  ;;  %5836 = vmatpush.msk.msra.mxu3 %vm8523_vm14, %v3150_v45  ;;  %10300 = vst [vmem:[#allocation9_spill] sm:$0xff] %v10299_v25 }
 0x66a   :  { %10303 = vst [vmem:[#allocation6_spill] sm:$0xff] %v10302_v54 }
 0x66d   :  { %v3131_v38 = vpop.permute.xlu1 %3130 }
 0x66e   :  { %v3135_v1 = vsel %vm10151_vm3, %v3131_v38, %v3133_v44  ;;  %v3136_v8 = vsel %vm10151_vm3, %v3133_v44, %v3131_v38 }
 0x66f   :  { %5830 = vmatpush.msk.msra.mxu2 %vm8540_vm4, %v3136_v8  ;;  %5837 = vmatpush.msk.msra.mxu3 %vm8544_vm0, %v3135_v1 }
 0x670   :  { %5831 = vmatmul.msk.f32.vlgmr.msra.gmra.mxu2 %vm10304_vm15, %v8551_v46  ;;  %5838 = vmatmul.msk.f32.vlgmr.msra.gmra.mxu3 %vm10305_vm1, %v8551_v46 }
 0x675   :  { %v8573_v41 = vpop.permute.xlu1 %3256 }
 0x6f3   :  { %v3231_v62 = vpop.f32.mrf.mxu2  ;;  %v3251_v4 = vpop.f32.mrf.mxu3 }
 0x6f4   :  { %v8568_v55 = vadd.f32 %v3231_v62, %v8565_v35  ;;  %v8571_v40 = vadd.f32 %v3251_v4, %v8565_v35 }
 0x6f6   :  { %v8577_v49 = vmul.f32 %v8573_v41, %v8568_v55  ;;  %v8581_v42 = vmul.f32 %v8573_v41, %v8571_v40 }
 0x6f8   :  { %v10154_v59 = vand.u32 2147483647, %v8577_v49  ;;  %v3264_v20 = vand.u32 2139095040, %v8577_v49  ;;  %v10153_v7 = vand.u32 2147483647, %v8581_v42  ;;  %v3419_v9 = vand.u32 2139095040, %v8581_v42 }
 0x6f9   :  { %vm3404_vm12 = vweird.f32 %v8577_v49 }
 0x6fa   :  { %v3265_v10 = vshrl.u32 %v3264_v20, 23  ;;  %v3268_v34 = vand.u32 8388607, %v10154_v59  ;;  %v3420_v15 = vshrl.u32 %v3419_v9, 23  ;;  %v3423_v37 = vand.u32 8388607, %v10153_v7 }
 0x6fc   :  { %v5839_v16 = vadd.s32 4294967169, %v3265_v10  ;;  %v3269_v23 = vor.u32 8388608, %v3268_v34  ;;  %v5842_v28 = vadd.s32 4294967169, %v3420_v15  ;;  %v3424_v17 = vor.u32 8388608, %v3423_v37 }
 0x6fe   :  { %v3271_v6 = vadd.s32 1, %v5839_v16  ;;  %v3426_v57 = vadd.s32 1, %v5842_v28  ;;  %v8591_v21 = vshll.u32 %v3269_v23, 8  ;;  %v8596_v45 = vshll.u32 %v3424_v17, 8 }
 0x700   :  { %vm3272_vm15 = vcmp.gt.s32.totalorder %v3271_v6, 0  ;;  %vm3427_vm1 = vcmp.gt.s32.totalorder %v3426_v57, 0  ;;  %v3310_v32 = vand.u32 65535, %v8591_v21  ;;  %v3311_v44 = vshrl.u32 %v8591_v21, 16 }
 0x701   :  { %v3273_v18 = vsel %vm3272_vm15, %v3271_v6, 0  ;;  %v3428_v39 = vsel %vm3427_vm1, %v3426_v57, 0 }
 0x702   :  { %v3275_v24 = vand.u32 31, %v3273_v18  ;;  %v8594_v26 = vand.u32 31, %v3428_v39  ;;  %v8598_v22 = vshrl.u32 %v3273_v18, 5 }
 0x704   :  { %v3276_v48 = vsub.s32 32, %v3275_v24  ;;  %v3278_v58 = vshll.u32 %v10182_v52, %v3275_v24  ;;  %v3281_v19 = vshll.u32 %v10226_v27, %v3275_v24  ;;  %v3284_v8 = vshll.u32 %v10227_v13, %v3275_v24 }
 0x705   :  { %v3287_v4 = vshll.u32 %v10225_v50, %v3275_v24  ;;  %v3290_v9 = vshll.u32 %v10223_v12, %v3275_v24  ;;  %v8612_v23 = vsub.s32 32, %v8594_v26  ;;  %vm3293_vm15 = vcmp.lt.s32.totalorder %v8598_v22, 1 }
 0x706   :  { %v3279_v38 = vshrl.u32 %v10226_v27, %v3276_v48  ;;  %v3282_v1 = vshrl.u32 %v10227_v13, %v3276_v48  ;;  %v3285_v62 = vshrl.u32 %v10225_v50, %v3276_v48  ;;  %v3288_v20 = vshrl.u32 %v10223_v12, %v3276_v48 }
 0x707   :  { %v3291_v10 = vshrl.u32 %v10224_v33, %v3276_v48  ;;  %vm10160_vm1 = vcmp.lt.s32.totalorder %v8598_v22, 2  ;;  %v3277_v6 = vshrl.u32 %v10182_v52, %v3276_v48  ;;  %vm3296_vm3 = vcmp.lt.s32.totalorder %v8598_v22, 4 }
 0x708   :  { %v3280_v34 = vor.u32 %v3279_v38, %v3278_v58  ;;  %v3283_v15 = vor.u32 %v3282_v1, %v3281_v19  ;;  %v3286_v16 = vor.u32 %v3285_v62, %v3284_v8  ;;  %v3289_v37 = vor.u32 %v3288_v20, %v3287_v4 }
 0x709   :  { %v3292_v28 = vor.u32 %v3291_v10, %v3290_v9  ;;  %vm3295_vm6 = vcmp.lt.s32.totalorder %v8598_v22, 3  ;;  %v3433_v58 = vshll.u32 %v10182_v52, %v8594_v26  ;;  %v3434_v1 = vshrl.u32 %v10226_v27, %v8612_v23 }
 0x70a   :  { %v3301_v57 = vsel %vm3293_vm15, %v3280_v34, %v3283_v15  ;;  %v3305_v17 = vsel %vm3293_vm15, %v3283_v15, %v3286_v16  ;;  %v3302_v18 = vsel %vm3296_vm3, %v3289_v37, 920167782  ;;  %v3298_v19 = vsel %vm3296_vm3, %v3286_v16, 2102212464 }
 0x70b   :  { %v3306_v24 = vsel %vm3296_vm3, %v3292_v28, 1326507024  ;;  %v3303_v38 = vsel %vm3295_vm6, %v3286_v16, %v3302_v18  ;;  %v3436_v4 = vshll.u32 %v10226_v27, %v8594_v26  ;;  %v3437_v20 = vshrl.u32 %v10227_v13, %v8612_v23 }
 0x70c   :  { %v3307_v48 = vsel %vm3295_vm6, %v3289_v37, %v3306_v24  ;;  %v3304_v8 = vsel %vm10160_vm1, %v3301_v57, %v3303_v38  ;;  %v3297_v37 = vsel %vm3293_vm15, %v3277_v6, %v3280_v34  ;;  %v3299_v18 = vsel %vm3295_vm6, %v3283_v15, %v3298_v19 }
 0x70d   :  { %v3308_v62 = vsel %vm10160_vm1, %v3305_v17, %v3307_v48  ;;  %v3334_v16 = vand.u32 65535, %v3304_v8  ;;  %v3335_v28 = vshrl.u32 %v3304_v8, 16  ;;  %v8643_v57 = vshrl.u32 %v3428_v39, 5 }
 0x70e   :  { %v3312_v9 = vand.u32 65535, %v3308_v62  ;;  %v3313_v10 = vshrl.u32 %v3308_v62, 16  ;;  %v8645_v24 = vor.u32 %v3434_v1, %v3433_v58  ;;  %v8647_v48 = vor.u32 %v3437_v20, %v3436_v4 }
 0x70f   :  { %v3440_v7 = vshrl.u32 %v10225_v50, %v8612_v23  ;;  %v3337_v59 = vmul.u32 %v3335_v28, %v3310_v32  ;;  %v3338_v8 = vmul.u32 %v3334_v16, %v3311_v44  ;;  %v3439_v34 = vshll.u32 %v10227_v13, %v8594_v26 }
 0x710   :  { %v3315_v17 = vmul.u32 %v3313_v10, %v3310_v32  ;;  %v3316_v38 = vmul.u32 %v3312_v9, %v3311_v44  ;;  %v3314_v62 = vmul.u32 %v3312_v9, %v3310_v32  ;;  %v3317_v6 = vmul.u32 %v3313_v10, %v3311_v44 }
 0x711   :  { %v3336_v15 = vmul.u32 %v3334_v16, %v3310_v32  ;;  %v3339_v39 = vmul.u32 %v3335_v28, %v3311_v44  ;;  %v3340_v25 = vshll.u32 %v3337_v59, 16  ;;  %v3342_v20 = vshll.u32 %v3338_v8, 16 }
 0x712   :  { %v3318_v54 = vshll.u32 %v3315_v17, 16  ;;  %v3319_v19 = vshrl.u32 %v3315_v17, 16  ;;  %v3320_v58 = vshll.u32 %v3316_v38, 16  ;;  %v3321_v1 = vshrl.u32 %v3316_v38, 16 }
 0x713   :  { %v8653_v29 = vor.u32 %v3440_v7, %v3439_v34  ;;  %vm3344_vm3 = vc.u32 %v3336_v15, %v3340_v25  ;;  %v3346_v14 = vadd.s32 %v3340_v25, %v3336_v15  ;;  %v3443_v31 = vshrl.u32 %v10223_v12, %v8612_v23 }
 0x714   :  { %vm3322_vm6 = vc.u32 %v3314_v62, %v3318_v54  ;;  %v3324_v4 = vadd.s32 %v3318_v54, %v3314_v62  ;;  %v3345_v32 = vsel %vm3344_vm3, 1, %v10186_v60  ;;  %v3442_v44 = vshll.u32 %v10225_v50, %v8594_v26 }
 0x715   :  { %v3323_v9 = vsel %vm3322_vm6, 1, %v10186_v60  ;;  %v3347_v54 = vadd.s32 %v3345_v32, %v3339_v39  ;;  %vm3348_vm1 = vc.u32 %v3346_v14, %v3342_v20  ;;  %v3445_v7 = vshll.u32 %v10223_v12, %v8594_v26 }
 0x716   :  { %v3325_v10 = vadd.s32 %v3323_v9, %v3317_v6  ;;  %vm3326_vm15 = vc.u32 %v3324_v4, %v3320_v58  ;;  %v3349_v25 = vsel %vm3348_vm1, 1, %v10186_v60  ;;  %v3444_v17 = vor.u32 %v3443_v31, %v3442_v44 }
 0x717   :  { %v3327_v16 = vsel %vm3326_vm15, 1, %v10186_v60  ;;  %v3446_v38 = vshrl.u32 %v10224_v33, %v8612_v23  ;;  %v3341_v62 = vshrl.u32 %v3337_v59, 16  ;;  %v3343_v34 = vshrl.u32 %v3338_v8, 16 }
 0x718   :  { %v3329_v28 = vadd.s32 %v3327_v16, %v3325_v10  ;;  %v8667_v6 = vadd.s32 %v3346_v14, %v3342_v20  ;;  %v3351_v15 = vadd.s32 %v3349_v25, %v3347_v54  ;;  %vm3448_vm6 = vcmp.lt.s32.totalorder %v8643_v57, 1 }
 0x719   :  { %v3447_v4 = vor.u32 %v3446_v38, %v3445_v7  ;;  %vm3451_vm3 = vcmp.lt.s32.totalorder %v8643_v57, 4  ;;  %vm10164_vm15 = vcmp.lt.s32.totalorder %v8643_v57, 3  ;;  %v3456_v31 = vsel %vm3448_vm6, %v8645_v24, %v8647_v48 }
 0x71a   :  { %v3330_v58 = vadd.s32 %v3329_v28, %v3319_v19  ;;  %v3352_v39 = vadd.s32 %v3351_v15, %v3341_v62  ;;  %v3457_v59 = vsel %vm3451_vm3, %v3444_v17, 920167782  ;;  %vm10163_vm1 = vcmp.lt.s32.totalorder %v8643_v57, 2 }
 0x71b   :  { %v3458_v26 = vsel %vm10164_vm15, %v8653_v29, %v3457_v59  ;;  %v3460_v8 = vsel %vm3448_vm6, %v8647_v48, %v8653_v29  ;;  %vm10306_vm0 = vcmp.lt.s32.totalorder %v8598_v22, 2  ;;  %v3465_v32 = vand.u32 65535, %v8596_v45 }
 0x71c   :  { %v8678_v14 = vadd.s32 %v3330_v58, %v3321_v1  ;;  %v3300_v19 = vsel %vm10306_vm0, %v3297_v37, %v3299_v18  ;;  %v3353_v20 = vadd.s32 %v3352_v39, %v3343_v34  ;;  %v3459_v9 = vsel %vm10163_vm1, %v3456_v31, %v3458_v26 }
 0x71d   :  { %v3461_v1 = vsel %vm3451_vm3, %v3447_v4, 1326507024  ;;  %v3489_v44 = vand.u32 65535, %v3459_v9  ;;  %v3466_v37 = vshrl.u32 %v8596_v45, 16  ;;  %v3490_v18 = vshrl.u32 %v3459_v9, 16 }
 0x71e   :  { %vm3356_vm4 = vc.u32 %v8678_v14, %v8667_v6  ;;  %v3462_v10 = vsel %vm10164_vm15, %v3444_v17, %v3461_v1  ;;  %v3357_v16 = vadd.s32 1, %v3353_v20  ;;  %v3354_v54 = vmul.u32 %v8591_v21, %v3300_v19 }
 0x71f   :  { %v3463_v22 = vsel %vm10163_vm1, %v3460_v8, %v3462_v10  ;;  %v3492_v38 = vmul.u32 %v3490_v18, %v3465_v32  ;;  %v3493_v62 = vmul.u32 %v3489_v44, %v3466_v37  ;;  %v3491_v58 = vmul.u32 %v3489_v44, %v3465_v32 }
 0x720   :  { %v3467_v7 = vand.u32 65535, %v3463_v22  ;;  %v3468_v28 = vshrl.u32 %v3463_v22, 16  ;;  %v3358_v25 = vsel %vm3356_vm4, %v3357_v16, %v3353_v20  ;;  %v3494_v4 = vmul.u32 %v3490_v18, %v3466_v37 }
 0x721   :  { %v3359_v34 = vadd.s32 %v3358_v25, %v3354_v54  ;;  %v3495_v39 = vshll.u32 %v3492_v38, 16  ;;  %v3497_v10 = vshll.u32 %v3493_v62, 16  ;;  %v3432_v18 = vshrl.u32 %v10182_v52, %v8612_v23 }
 0x722   :  { %v3470_v15 = vmul.u32 %v3468_v28, %v3465_v32  ;;  %v3471_v17 = vmul.u32 %v3467_v7, %v3466_v37  ;;  %v3469_v59 = vmul.u32 %v3467_v7, %v3465_v32  ;;  %v3472_v26 = vmul.u32 %v3468_v28, %v3466_v37 }
 0x723   :  { %v3360_v31 = vadd.s32 536870912, %v3359_v34  ;;  %vm3499_vm0 = vc.u32 %v3491_v58, %v3495_v39  ;;  %v3501_v9 = vadd.s32 %v3495_v39, %v3491_v58  ;;  %v3453_v32 = vsel %vm3451_vm3, %v8653_v29, 2102212464 }
 0x724   :  { %v3473_v8 = vshll.u32 %v3470_v15, 16  ;;  %v3475_v1 = vshll.u32 %v3471_v17, 16  ;;  %v3500_v20 = vsel %vm3499_vm0, 1, %v10186_v60  ;;  %v3474_v25 = vshrl.u32 %v3470_v15, 16 }
 0x725   :  { %v8703_v21 = vshrl.u32 %v3360_v31, 30  ;;  %v3502_v22 = vadd.s32 %v3500_v20, %v3494_v4  ;;  %vm3503_vm4 = vc.u32 %v3501_v9, %v3497_v10  ;;  %v3452_v39 = vsel %vm3448_vm6, %v3432_v18, %v8645_v24 }
 0x726   :  { %vm3477_vm1 = vc.u32 %v3469_v59, %v3473_v8  ;;  %v3479_v19 = vadd.s32 %v3473_v8, %v3469_v59  ;;  %v3504_v7 = vsel %vm3503_vm4, 1, %v10186_v60  ;;  %vm10307_vm3 = vcmp.lt.s32.totalorder %v8643_v57, 3 }
 0x727   :  { %v3478_v16 = vsel %vm3477_vm1, 1, %v10186_v60  ;;  %v3362_v44 = vshll.u32 %v8703_v21, 30  ;;  %v3506_v4 = vadd.s32 %v3504_v7, %v3502_v22  ;;  %v3454_v29 = vsel %vm10307_vm3, %v8647_v48, %v3453_v32 }
 0x728   :  { %v3480_v37 = vadd.s32 %v3478_v16, %v3472_v26  ;;  %vm3481_vm15 = vc.u32 %v3479_v19, %v3475_v1  ;;  %v3496_v31 = vshrl.u32 %v3492_v38, 16  ;;  %v3476_v23 = vshrl.u32 %v3471_v17, 16 }
 0x729   :  { %v3482_v54 = vsel %vm3481_vm15, 1, %v10186_v60  ;;  %v3363_v28 = vsub.s32 %v3359_v34, %v3362_v44  ;;  %v3498_v8 = vshrl.u32 %v3493_v62, 16  ;;  %vm10308_vm15 = vcmp.lt.s32.totalorder %v8643_v57, 2 }
 0x72a   :  { %v3484_v58 = vadd.s32 %v3482_v54, %v3480_v37  ;;  %v3507_v1 = vadd.s32 %v3506_v4, %v3496_v31  ;;  %v3455_v20 = vsel %vm10308_vm15, %v3452_v39, %v3454_v29  ;;  %v3505_v16 = vadd.s32 %v3501_v9, %v3497_v10 }
 0x72b   :  { %vm3364_vm1 = vcmp.lt.s32.totalorder %v3363_v28, 0  ;;  %v3365_v59 = vsub.s32 0, %v3363_v28  ;;  %v3509_v48 = vmul.u32 %v8596_v45, %v3455_v20  ;;  %v3355_v62 = vadd.s32 %v8667_v6, %v8678_v14 }
 0x72c   :  { %v3485_v26 = vadd.s32 %v3484_v58, %v3474_v25  ;;  %v3508_v22 = vadd.s32 %v3507_v1, %v3498_v8  ;;  %vm3263_vm3 = vcmp.lt.s32.totalorder %v8577_v49, 0  ;;  %v3385_v20 = vsub.s32 4, %v8703_v21 }
 0x72d   :  { %v3366_v19 = vsel %vm3364_vm1, %v3365_v59, %v3363_v28 }
 0x72e   :  { %v3486_v34 = vadd.s32 %v3485_v26, %v3476_v23  ;;  %v3367_v15 = vclz %v3366_v19  ;;  %v3512_v44 = vadd.s32 1, %v3508_v22 }
 0x730   :  { %v5840_v24 = vadd.s32 4294967294, %v3367_v15  ;;  %vm3511_vm6 = vc.u32 %v3486_v34, %v3505_v16  ;;  %v8736_v15 = vpop.permute.xlu2 %3679 }
 0x731   :  { %v3513_v38 = vsel %vm3511_vm6, %v3512_v44, %v3508_v22 }
 0x732   :  { %vm5841_vm0 = vcmp.lt.s32.totalorder %v5840_v24, 0  ;;  %v3514_v17 = vadd.s32 %v3513_v38, %v3509_v48 }
 0x733   :  { %v3370_v32 = vsel %vm5841_vm0, 0, %v5840_v24  ;;  %vm3418_vm0 = vcmp.lt.s32.totalorder %v8581_v42, 0 }
 0x734   :  { %v3371_v37 = vsub.s32 32, %v3370_v32  ;;  %v3375_v18 = vsub.s32 4294967266, %v3370_v32  ;;  %v3515_v54 = vadd.s32 536870912, %v3514_v17  ;;  %v3372_v7 = vshll.u32 %v3363_v28, %v3370_v32 }
 0x735   :  { %v10309_v28 = vand.u32 2147483647, %v8577_v49  ;;  %v3510_v32 = vadd.s32 %v3505_v16, %v3486_v34 }
 0x736   :  { %v3373_v57 = vshrl.u32 %v3355_v62, %v3371_v37  ;;  %v3376_v25 = vadd.s32 127, %v3375_v18  ;;  %v8726_v10 = vshrl.u32 %v3515_v54, 30  ;;  %v3386_v62 = vsel %vm3263_vm3, %v3385_v20, %v8703_v21 }
 0x737   :  { %vm8732_vm1 = vcmp.le.f32.partialorder %v10309_v28, 0.7853982 }
 0x738   :  { %v3374_v9 = vor.u32 %v3373_v57, %v3372_v7  ;;  %v3377_v58 = vshll.u32 %v3376_v25, 23  ;;  %v3517_v4 = vshll.u32 %v8726_v10, 30  ;;  %v8743_v57 = vpop.permute.xlu0 %3681  ;;  %v8749_v21 = vpop.permute.xlu2 %3665 }
 0x73a   :  { %v3378_v45 = vor.u32 4788187, %v3377_v58  ;;  %v3518_v39 = vsub.s32 %v3514_v17, %v3517_v4  ;;  %v3381_v31 = vcvt.s32.f32 %v3374_v9  ;;  %v3388_v58 = vsel %vm8732_vm1, 0, %v3386_v62 }
 0x73b   :  { %v10312_v62 = vand.u32 2147483647, %v8581_v42 }
 0x73c   :  { %v3379_v29 = vand.u32 2147483647, %v3378_v45  ;;  %vm3519_vm4 = vcmp.lt.s32.totalorder %v3518_v39, 0  ;;  %v3520_v59 = vsub.s32 0, %v3518_v39 }
 0x73d   :  { %vm8755_vm6 = vcmp.le.f32.partialorder %v10312_v62, 0.7853982 }
 0x73e   :  { %v3382_v23 = vmul.f32 %v3381_v31, %v3379_v29  ;;  %v3521_v6 = vsel %vm3519_vm4, %v3520_v59, %v3518_v39  ;;  %v8747_v29 = vpop.permute.xlu1 %3575  ;;  %vm3686_vm4 = vcmp.lt.s32.totalorder %v8460_v11, 123 }
 0x73f   :  { %v3522_v26 = vclz %v3521_v6 }
 0x740   :  { %v3383_v14 = vxor.u32 2147483648, %v3382_v23 }
 0x741   :  { %v5843_v19 = vadd.s32 4294967294, %v3522_v26 }
 0x742   :  { %v3384_v1 = vsel %vm3263_vm3, %v3383_v14, %v3382_v23  ;;  %v3405_v23 = vadd.s32 3, %v3388_v58 }
 0x743   :  { %v3387_v22 = vsel %vm8732_vm1, %v8577_v49, %v3384_v1  ;;  %vm5844_vm15 = vcmp.lt.s32.totalorder %v5843_v19, 0 }
 0x744   :  { %v3389_v24 = vmul.f32 %v3387_v22, %v3387_v22  ;;  %v3525_v44 = vsel %vm5844_vm15, 0, %v5843_v19  ;;  %v3406_v8 = vand.u32 3, %v3405_v23 }
 0x745   :  { %v3526_v17 = vsub.s32 32, %v3525_v44  ;;  %v3530_v37 = vsub.s32 4294967266, %v3525_v44  ;;  %v3527_v25 = vshll.u32 %v3518_v39, %v3525_v44 }
 0x746   :  { %v3390_v48 = vmul.f32 -0.001358992, %v3389_v24  ;;  %v3397_v38 = vmul.f32 -0.00019511016, %v3389_v24  ;;  %vm3407_vm3 = vcmp.lt.s32.totalorder %v3406_v8, 2  ;;  %vm3408_vm1 = vcmp.eq.s32.totalorder %v3406_v8, 0 }
 0x747   :  { %v3528_v7 = vshrl.u32 %v3510_v32, %v3526_v17  ;;  %v3531_v9 = vadd.s32 127, %v3530_v37  ;;  %vm3411_vm15 = vcmp.eq.s32.totalorder %v3406_v8, 2 }
 0x748   :  { %v3391_v18 = vadd.f32 0.041655596, %v3390_v48  ;;  %v3398_v54 = vadd.f32 0.008332121, %v3397_v38  ;;  %v8751_v38 = vpop.permute.xlu0 %3655 }
 0x749   :  { %v3529_v31 = vor.u32 %v3528_v7, %v3527_v25  ;;  %v3532_v34 = vshll.u32 %v3531_v9, 23  ;;  %v3540_v7 = vsub.s32 4, %v8726_v10  ;;  %v8769_v9 = vpop.permute.xlu2 %3671 }
 0x74a   :  { %v3392_v4 = vmul.f32 %v3391_v18, %v3389_v24  ;;  %v3399_v45 = vmul.f32 %v3398_v54, %v3389_v24 }
 0x74b   :  { %v3533_v6 = vor.u32 4788187, %v3532_v34  ;;  %v3536_v39 = vcvt.s32.f32 %v3529_v31  ;;  %v3541_v23 = vsel %vm3418_vm0, %v3540_v7, %v8726_v10  ;;  %v5824_v10 = vld [vmem:[%s10098_s14 + $0x8] sm:$0xff] }
 0x74c   :  { %v3393_v16 = vadd.f32 -0.4999988, %v3392_v4  ;;  %v3400_v59 = vadd.f32 -0.16666654, %v3399_v45  ;;  %v8773_v45 = vsel %vm3686_vm4, 1, %v10186_v60  ;;  %vm10318_vm4 = vcmp.lt.s32.totalorder %v10240_v2, 125 }
 0x74d   :  { %v3534_v28 = vand.u32 2147483647, %v3533_v6  ;;  %v3688_v6 = vperm.slane %v8773_v45, 0 }
 0x74e   :  { %v3394_v14 = vmul.f32 %v3393_v16, %v3389_v24  ;;  %v3401_v26 = vmul.f32 %v3400_v59, %v3389_v24  ;;  %v8761_v24 = vpop.permute.xlu1 %3663 }
 0x74f   :  { %v3537_v20 = vmul.f32 %v3536_v39, %v3534_v28 }
 0x750   :  { %v3395_v1 = vadd.f32 1.0, %v3394_v14  ;;  %v3402_v19 = vadd.f32 1.0, %v3401_v26  ;;  %v3674_v49 = vpop.permute.xlu0 %3673 }
 0x751   :  { %v3538_v32 = vxor.u32 2147483648, %v3537_v20  ;;  %v3648_v62 = vpop.permute.xlu2 %3647 }
 0x752   :  { %v3403_v44 = vmul.f32 %v3402_v19, %v3387_v22  ;;  %v3412_v48 = vxor.u32 2147483648, %v3395_v1 }
 0x753   :  { %v3539_v22 = vsel %vm3418_vm0, %v3538_v32, %v3537_v20  ;;  %vm3639_vm0 = vcmp.ge.s32.totalorder %v8460_v11, 4 }
 0x754   :  { %v3409_v17 = vxor.u32 2147483648, %v3403_v44  ;;  %v3413_v54 = vsel %vm3411_vm15, %v3412_v48, %v3403_v44  ;;  %v3542_v25 = vsel %vm8755_vm6, %v8581_v42, %v3539_v22 }
 0x755   :  { %v3544_v4 = vmul.f32 %v3542_v25, %v3542_v25 }
 0x756   :  { %v3410_v18 = vsel %vm3408_vm1, %v3395_v1, %v3409_v17  ;;  %v3543_v1 = vsel %vm8755_vm6, 0, %v3541_v23  ;;  %v3658_v44 = vpop.permute.xlu1 %3657  ;;  %vm10317_vm6 = vcmask 64512   ;;  %vm10319_vm1 = vcmp.lt.s32.totalorder %v10240_v2, 126 }
 0x757   :  { %v3414_v58 = vsel %vm3407_vm3, %v3410_v18, %v3413_v54  ;;  %v3545_v16 = vmul.f32 -0.001358992, %v3544_v4  ;;  %v3552_v59 = vmul.f32 -0.00019511016, %v3544_v4  ;;  %vm10166_vm3 = vcmp.lt.s32.totalorder %v10240_v2, 123 }
 0x758   :  { %v3415_v31 = vsel %vm3404_vm12, nan, %v3414_v58  ;;  %vm8787_vm12 = vcmp.eq.s32.totalorder %v3688_v6, 1  ;;  %v3560_v17 = vadd.s32 3, %v3543_v1  ;;  %v3675_v18 = vsel %vm10318_vm4, %v8769_v9, %v3674_v49 }
 0x759   :  { %v3571_v34 = vmul.f32 %v3415_v31, %v3415_v31  ;;  %v3546_v26 = vadd.f32 0.041655596, %v3545_v16  ;;  %v3553_v28 = vadd.f32 0.008332121, %v3552_v59  ;;  %v3640_v58 = vsel %vm3639_vm0, 1, %v10186_v60  ;;  %v3650_v59 = vpop.permute.xlu0 %3649 }
 0x75a   :  { %v3667_v11 = vsel %vm10319_vm1, %v8761_v24, %v8749_v21  ;;  %v3641_v16 = vperm.slane %v3640_v58, 0  ;;  %vm10168_vm0 = vcmp.lt.s32.totalorder %v10240_v2, 4  ;;  %vm3559_vm1 = vweird.f32 %v8581_v42 }
 0x75b   :  { %v3578_v14 = vmul.f32 %v8747_v29, %v3571_v34  ;;  %v3547_v19 = vmul.f32 %v3546_v26, %v3544_v4  ;;  %v3554_v8 = vmul.f32 %v3553_v28, %v3544_v4  ;;  %v3635_v28 = vpop.permute.xlu2 %3634 }
 0x75d   :  { %v3580_v39 = vadd.f32 %v3578_v14, %v8568_v55  ;;  %v3548_v48 = vadd.f32 -0.4999988, %v3547_v19  ;;  %v3555_v32 = vadd.f32 -0.16666654, %v3554_v8  ;;  %v3684_v55 = vsel %vm10166_vm3, %v8736_v15, %v8743_v57 }
 0x75e   :  { %v3633_v6 = vpop.permute.xlu1 %3632  ;;  %vm8821_vm3 = vcmp.eq.s32.totalorder %v3641_v16, 1  ;;  %v3689_v19 = vperm.slane %v8773_v45, 1 }
 0x75f   :  { %3605 = vmatpush.msrb.mxu0 %v3580_v39  ;;  %v3549_v37 = vmul.f32 %v3548_v48, %v3544_v4  ;;  %v3556_v22 = vmul.f32 %v3555_v32, %v3544_v4  ;;  %v3561_v4 = vand.u32 3, %v3560_v17  ;;  %v3638_v1 = vsel %vm10168_vm0, %v3635_v28, %v3633_v6 }
 0x760   :  { %5845 = vmatmul.msk.f32.vlgmr.msrb.gmra.mxu0 %vm10317_vm6, %v5824_v10  ;;  %v3637_v3 = vsel %vm10168_vm0, %v3633_v6, %v3635_v28 }
 0x761   :  { %5847 = vmatpush.msk.msra.mxu0 %vm8787_vm12, %v3684_v55  ;;  %v3550_v54 = vadd.f32 1.0, %v3549_v37  ;;  %v3557_v7 = vadd.f32 1.0, %v3556_v22  ;;  %vm3563_vm15 = vcmp.eq.s32.totalorder %v3561_v4, 0  ;;  %vm3566_vm6 = vcmp.eq.s32.totalorder %v3561_v4, 2 }
 0x762   :  { %vm3562_vm4 = vcmp.lt.s32.totalorder %v3561_v4, 2 }
 0x763   :  { %5848 = vmatpush.msk.msra.mxu0 %vm8480_vm9, %v3675_v18  ;;  %v3558_v31 = vmul.f32 %v3557_v7, %v3542_v25  ;;  %v3567_v34 = vxor.u32 2147483648, %v3550_v54  ;;  %vm10320_vm9 = vcmp.lt.s32.totalorder %v10240_v2, 1 }
 0x764   :  { %v3660_v56 = vsel %vm10320_vm9, %v3658_v44, %v8751_v38  ;;  %vm8836_vm9 = vcmp.eq.s32.totalorder %v3689_v19, 1 }
 0x765   :  { %5849 = vmatpush.msk.msra.mxu0 %vm7454_vm13, %v3667_v11  ;;  %v3564_v23 = vxor.u32 2147483648, %v3558_v31  ;;  %v3568_v14 = vsel %vm3566_vm6, %v3567_v34, %v3558_v31  ;;  %vm10321_vm13 = vcmp.lt.s32.totalorder %v10240_v2, 3  ;;  %vm10329_vm6 = vcmp.lt.s32.totalorder %v10240_v2, 125 }
 0x766   :  { %v3652_v30 = vsel %vm10321_vm13, %v3650_v59, %v3648_v62  ;;  %v3676_v45 = vsel %vm10329_vm6, %v3674_v49, %v8769_v9  ;;  %vm10331_vm13 = vcmp.lt.s32.totalorder %v10240_v2, 1  ;;  %v8884_v49 = vpop.permute.xlu1 %4096 }
 0x767   :  { %3706 = vmatpush.msra.mxu0 %v8378_v5  ;;  %v3565_v25 = vsel %vm3563_vm15, %v3550_v54, %v3564_v23  ;;  %vm10328_vm15 = vcmask 64512  }
 0x768   :  { %v3569_v5 = vsel %vm3562_vm4, %v3565_v25, %v3568_v14  ;;  %vm10330_vm4 = vcmp.lt.s32.totalorder %v10240_v2, 126 }
 0x769   :  { %5850 = vmatpush.msk.msra.mxu0 %vm6747_vm10, %v3660_v56  ;;  %v3570_v39 = vsel %vm3559_vm1, nan, %v3569_v5  ;;  %vm10324_vm10 = vcmask 457728  }
 0x76a   :  { %v3572_v43 = vmul.f32 %v3570_v39, %v3570_v39 }
 0x76b   :  { %5851 = vmatpush.msk.msra.mxu0 %vm8519_vm7, %v3652_v30  ;;  %vm10327_vm7 = vcmp.lt.s32.totalorder %v10240_v2, 123 }
 0x76c   :  { %v3579_v42 = vmul.f32 %v8747_v29, %v3572_v43  ;;  %v3685_v47 = vsel %vm10327_vm7, %v8743_v57, %v8736_v15  ;;  %v3642_v15 = vperm.slane %v3640_v58, 1  ;;  %v3659_v57 = vsel %vm10331_vm13, %v8751_v38, %v3658_v44 }
 0x76d   :  { %5852 = vmatpush.msk.msra.mxu0 %vm8821_vm3, %v3638_v1 }
 0x76e   :  { %5853 = vmatmul.msk.f32.vlgmr.msra.gmra.mxu0 %vm10324_vm10, %v8551_v46  ;;  %v3581_v8 = vadd.f32 %v3579_v42, %v8571_v40  ;;  %v3668_v40 = vsel %vm10330_vm4, %v8749_v21, %v8761_v24  ;;  %vm8866_vm1 = vcmp.eq.s32.totalorder %v3642_v15, 1 }
 0x770   :  { %3625 = vmatpush.msrb.mxu1 %v3581_v8 }
 0x771   :  { %5846 = vmatmul.msk.f32.vlgmr.msrb.gmra.mxu1 %vm10328_vm15, %v5824_v10 }
 0x772   :  { %5854 = vmatpush.msk.msra.mxu1 %vm8836_vm9, %v3685_v47 }
 0x774   :  { %5855 = vmatpush.msk.msra.mxu1 %vm8484_vm2, %v3676_v45  ;;  %vm10333_vm2 = vcmp.lt.s32.totalorder %v10240_v2, 3 }
 0x775   :  { %v3651_v61 = vsel %vm10333_vm2, %v3648_v62, %v3650_v59 }
 0x776   :  { %5856 = vmatpush.msk.msra.mxu1 %vm7458_vm8, %v3668_v40  ;;  %vm10336_vm8 = vmmov %vm10324_vm10 }
 0x778   :  { %3726 = vmatpush.msra.mxu1 %v8404_v51  ;;  %v8878_v51 = vpop.permute.xlu0 %3584 }
 0x77a   :  { %5857 = vmatpush.msk.msra.mxu1 %vm6751_vm11, %v3659_v57 }
 0x77c   :  { %5858 = vmatpush.msk.msra.mxu1 %vm8523_vm14, %v3651_v61 }
 0x77e   :  { %5859 = vmatpush.msk.msra.mxu1 %vm8866_vm1, %v3637_v3 }
 0x77f   :  { %5860 = vmatmul.msk.f32.vlgmr.msra.gmra.mxu1 %vm10336_vm8, %v8551_v46 }
 0x7dd   :  { %v3607_v21 = vpop.f32.mrf.mxu0 }
 0x7de   :  { %v3608_v38 = vadd.f32 %v3607_v21, %v8878_v51 }
 0x7e0   :  { %v8882_v24 = vadd.f32 %v3608_v38, %v7947_v53 }
 0x7e2   :  { %v8888_v63 = vmul.f32 %v8884_v49, %v8882_v24 }
 0x7e4   :  { %v4104_v44 = vand.u32 2139095040, %v8888_v63  ;;  %v4101_v32 = vand.u32 2147483647, %v8888_v63 }
 0x7e6   :  { %v4105_v55 = vshrl.u32 %v4104_v44, 23  ;;  %v4108_v17 = vand.u32 8388607, %v4101_v32 }
 0x7e8   :  { %v5869_v46 = vadd.s32 4294967169, %v4105_v55  ;;  %v4109_v37 = vor.u32 8388608, %v4108_v17 }
 0x7ea   :  { %v4111_v62 = vadd.s32 1, %v5869_v46  ;;  %v8898_v11 = vshll.u32 %v4109_v37, 8 }
 0x7eb   :  { %v3711_v55 = vpop.f32.mrf.mxu0 }
 0x7ec   :  { %vm4112_vm11 = vcmp.gt.s32.totalorder %v4111_v62, 0  ;;  %v4150_v15 = vand.u32 65535, %v8898_v11  ;;  %v4151_v61 = vshrl.u32 %v8898_v11, 16 }
 0x7ed   :  { %v4113_v53 = vsel %vm4112_vm11, %v4111_v62, 0 }
 0x7ee   :  { %v4115_v22 = vand.u32 31, %v4113_v53  ;;  %v8894_v54 = vshrl.u32 %v4113_v53, 5  ;;  %v3627_v4 = vpop.f32.mrf.mxu1 }
 0x7ef   :  { %v3628_v28 = vadd.f32 %v3627_v4, %v8878_v51 }
 0x7f0   :  { %v4116_v18 = vsub.s32 32, %v4115_v22  ;;  %v4118_v7 = vshll.u32 %v10182_v52, %v4115_v22  ;;  %v4121_v58 = vshll.u32 %v10226_v27, %v4115_v22  ;;  %v4124_v16 = vshll.u32 %v10227_v13, %v4115_v22 }
 0x7f1   :  { %v4127_v23 = vshll.u32 %v10225_v50, %v4115_v22  ;;  %v4130_v6 = vshll.u32 %v10223_v12, %v4115_v22  ;;  %vm4133_vm14 = vcmp.lt.s32.totalorder %v8894_v54, 1  ;;  %vm4136_vm10 = vcmp.lt.s32.totalorder %v8894_v54, 4 }
 0x7f2   :  { %v4119_v31 = vshrl.u32 %v10226_v27, %v4116_v18  ;;  %v4122_v34 = vshrl.u32 %v10227_v13, %v4116_v18  ;;  %v4125_v59 = vshrl.u32 %v10225_v50, %v4116_v18  ;;  %v4128_v56 = vshrl.u32 %v10223_v12, %v4116_v18 }
 0x7f3   :  { %v4131_v25 = vshrl.u32 %v10224_v33, %v4116_v18  ;;  %vm4135_vm7 = vcmp.lt.s32.totalorder %v8894_v54, 3  ;;  %v8921_v47 = vadd.f32 %v3628_v28, %v7950_v36  ;;  %vm4134_vm15 = vcmp.lt.s32.totalorder %v8894_v54, 2 }
 0x7f4   :  { %v4120_v14 = vor.u32 %v4119_v31, %v4118_v7  ;;  %v4123_v30 = vor.u32 %v4122_v34, %v4121_v58  ;;  %v4126_v5 = vor.u32 %v4125_v59, %v4124_v16  ;;  %v4129_v39 = vor.u32 %v4128_v56, %v4127_v23 }
 0x7f5   :  { %v4132_v1 = vor.u32 %v4131_v25, %v4130_v6  ;;  %v8936_v36 = vmul.f32 %v8884_v49, %v8921_v47  ;;  %v4117_v46 = vshrl.u32 %v10182_v52, %v4116_v18  ;;  %v8943_v58 = vadd.f32 %v3711_v55, %v8565_v35 }
 0x7f6   :  { %v4141_v43 = vsel %vm4133_vm14, %v4120_v14, %v4123_v30  ;;  %v4145_v19 = vsel %vm4133_vm14, %v4123_v30, %v4126_v5  ;;  %v4142_v42 = vsel %vm4136_vm10, %v4129_v39, 920167782  ;;  %v4138_v4 = vsel %vm4136_vm10, %v4126_v5, 2102212464 }
 0x7f7   :  { %v4146_v8 = vsel %vm4136_vm10, %v4132_v1, 1326507024  ;;  %v4143_v45 = vsel %vm4135_vm7, %v4126_v5, %v4142_v42  ;;  %v4259_v37 = vand.u32 2139095040, %v8936_v36  ;;  %v4137_v53 = vsel %vm4133_vm14, %v4117_v46, %v4120_v14 }
 0x7f8   :  { %v4147_v40 = vsel %vm4135_vm7, %v4129_v39, %v4146_v8  ;;  %v4144_v57 = vsel %vm4134_vm15, %v4141_v43, %v4143_v45  ;;  %v10169_v16 = vand.u32 2147483647, %v8936_v36  ;;  %v4139_v42 = vsel %vm4135_vm7, %v4123_v30, %v4138_v4 }
 0x7f9   :  { %v4148_v10 = vsel %vm4134_vm15, %v4145_v19, %v4147_v40  ;;  %v4174_v38 = vand.u32 65535, %v4144_v57  ;;  %v4175_v44 = vshrl.u32 %v4144_v57, 16  ;;  %v4260_v14 = vshrl.u32 %v4259_v37, 23 }
 0x7fa   :  { %v4152_v3 = vand.u32 65535, %v4148_v10  ;;  %v4153_v21 = vshrl.u32 %v4148_v10, 16  ;;  %v4140_v30 = vsel %vm4134_vm15, %v4137_v53, %v4139_v42 }
 0x7fb   :  { %v4177_v22 = vmul.u32 %v4175_v44, %v4150_v15  ;;  %v4178_v7 = vmul.u32 %v4174_v38, %v4151_v61  ;;  %v4176_v59 = vmul.u32 %v4174_v38, %v4150_v15  ;;  %v4179_v23 = vmul.u32 %v4175_v44, %v4151_v61 }
 0x7fc   :  { %v4155_v17 = vmul.u32 %v4153_v21, %v4150_v15  ;;  %v4156_v62 = vmul.u32 %v4152_v3, %v4151_v61  ;;  %v4154_v31 = vmul.u32 %v4152_v3, %v4150_v15  ;;  %v4157_v18 = vmul.u32 %v4153_v21, %v4151_v61 }
 0x7fd   :  { %v4180_v56 = vshll.u32 %v4177_v22, 16  ;;  %v4182_v39 = vshll.u32 %v4178_v7, 16  ;;  %v5872_v19 = vadd.s32 4294967169, %v4260_v14  ;;  %v4181_v61 = vshrl.u32 %v4177_v22, 16 }
 0x7fe   :  { %v4158_v34 = vshll.u32 %v4155_v17, 16  ;;  %v4160_v6 = vshll.u32 %v4156_v62, 16  ;;  %v4159_v40 = vshrl.u32 %v4155_v17, 16  ;;  %v4263_v21 = vand.u32 8388607, %v10169_v16 }
 0x7ff   :  { %vm4184_vm4 = vc.u32 %v4176_v59, %v4180_v56  ;;  %v4186_v1 = vadd.s32 %v4180_v56, %v4176_v59  ;;  %v4266_v10 = vadd.s32 1, %v5872_v19  ;;  %v8958_v38 = vmul.f32 %v8943_v58, %v8573_v41 }
 0x800   :  { %vm4162_vm6 = vc.u32 %v4154_v31, %v4158_v34  ;;  %v4164_v25 = vadd.s32 %v4158_v34, %v4154_v31  ;;  %v4185_v5 = vsel %vm4184_vm4, 1, %v10186_v60  ;;  %v4161_v44 = vshrl.u32 %v4156_v62, 16 }
 0x801   :  { %v4163_v28 = vsel %vm4162_vm6, 1, %v10186_v60  ;;  %v4187_v45 = vadd.s32 %v4185_v5, %v4179_v23  ;;  %vm4188_vm2 = vc.u32 %v4186_v1, %v4182_v39  ;;  %vm4267_vm8 = vcmp.gt.s32.totalorder %v4266_v10, 0 }
 0x802   :  { %v4165_v43 = vadd.s32 %v4163_v28, %v4157_v18  ;;  %vm4166_vm13 = vc.u32 %v4164_v25, %v4160_v6  ;;  %v4189_v57 = vsel %vm4188_vm2, 1, %v10186_v60  ;;  %v4183_v46 = vshrl.u32 %v4178_v7, 16 }
 0x803   :  { %v4167_v8 = vsel %vm4166_vm13, 1, %v10186_v60  ;;  %v4191_v3 = vadd.s32 %v4189_v57, %v4187_v45  ;;  %v4268_v37 = vsel %vm4267_vm8, %v4266_v10, 0  ;;  %v4190_v31 = vadd.s32 %v4186_v1, %v4182_v39 }
 0x804   :  { %v4169_v15 = vadd.s32 %v4167_v8, %v4165_v43  ;;  %v4270_v22 = vand.u32 31, %v4268_v37  ;;  %v4194_v18 = vmul.u32 %v8898_v11, %v4140_v30  ;;  %v4264_v59 = vor.u32 8388608, %v4263_v21 }
 0x805   :  { %v4192_v17 = vadd.s32 %v4191_v3, %v4181_v61  ;;  %v8963_v23 = vshrl.u32 %v4268_v37, 5  ;;  %v3739_v54 = vand.u32 2139095040, %v8958_v38  ;;  %v10167_v10 = vand.u32 2147483647, %v8958_v38 }
 0x806   :  { %v4170_v55 = vadd.s32 %v4169_v15, %v4159_v40  ;;  %v4271_v56 = vsub.s32 32, %v4270_v22  ;;  %v4273_v62 = vshll.u32 %v10182_v52, %v4270_v22  ;;  %v4276_v7 = vshll.u32 %v10226_v27, %v4270_v22 }
 0x807   :  { %v4193_v34 = vadd.s32 %v4192_v17, %v4183_v46  ;;  %v4279_v6 = vshll.u32 %v10227_v13, %v4270_v22  ;;  %v4282_v28 = vshll.u32 %v10225_v50, %v4270_v22  ;;  %v4285_v43 = vshll.u32 %v10223_v12, %v4270_v22 }
 0x808   :  { %v4171_v4 = vadd.s32 %v4170_v55, %v4161_v44  ;;  %v4274_v25 = vshrl.u32 %v10226_v27, %v4271_v56  ;;  %v4277_v14 = vshrl.u32 %v10227_v13, %v4271_v56  ;;  %v4280_v11 = vshrl.u32 %v10225_v50, %v4271_v56 }
 0x809   :  { %v4197_v53 = vadd.s32 1, %v4193_v34  ;;  %v4283_v1 = vshrl.u32 %v10223_v12, %v4271_v56  ;;  %v4286_v5 = vshrl.u32 %v10224_v33, %v4271_v56  ;;  %v8976_v57 = vshll.u32 %v4264_v59, 8 }
 0x80a   :  { %vm4196_vm11 = vc.u32 %v4171_v4, %v4190_v31  ;;  %v4275_v42 = vor.u32 %v4274_v25, %v4273_v62  ;;  %v4278_v8 = vor.u32 %v4277_v14, %v4276_v7  ;;  %v4281_v45 = vor.u32 %v4280_v11, %v4279_v6 }
 0x80b   :  { %v4198_v39 = vsel %vm4196_vm11, %v4197_v53, %v4193_v34  ;;  %v4284_v40 = vor.u32 %v4283_v1, %v4282_v28  ;;  %v4287_v15 = vor.u32 %v4286_v5, %v4285_v43  ;;  %vm4288_vm14 = vcmp.lt.s32.totalorder %v8963_v23, 1 }
 0x80c   :  { %v4199_v19 = vadd.s32 %v4198_v39, %v4194_v18  ;;  %vm4291_vm10 = vcmp.lt.s32.totalorder %v8963_v23, 4  ;;  %v3740_v3 = vshrl.u32 %v3739_v54, 23  ;;  %vm4290_vm7 = vcmp.lt.s32.totalorder %v8963_v23, 3 }
 0x80d   :  { %v4296_v21 = vsel %vm4288_vm14, %v4275_v42, %v4278_v8  ;;  %v4297_v30 = vsel %vm4291_vm10, %v4284_v40, 920167782  ;;  %v4300_v44 = vsel %vm4288_vm14, %v4278_v8, %v4281_v45  ;;  %vm4289_vm15 = vcmp.lt.s32.totalorder %v8963_v23, 2 }
 0x80e   :  { %v4200_v61 = vadd.s32 536870912, %v4199_v19  ;;  %v4298_v46 = vsel %vm4290_vm7, %v4281_v45, %v4297_v30  ;;  %v4301_v17 = vsel %vm4291_vm10, %v4287_v15, 1326507024  ;;  %v9001_v34 = vand.u32 8388607, %v10167_v10 }
 0x80f   :  { %v4299_v37 = vsel %vm4289_vm15, %v4296_v21, %v4298_v46  ;;  %v4302_v22 = vsel %vm4290_vm7, %v4284_v40, %v4301_v17  ;;  %v4305_v54 = vand.u32 65535, %v8976_v57  ;;  %v4306_v53 = vshrl.u32 %v8976_v57, 16 }
 0x810   :  { %v8988_v55 = vshrl.u32 %v4200_v61, 30  ;;  %v4303_v59 = vsel %vm4289_vm15, %v4300_v44, %v4302_v22  ;;  %v4293_v25 = vsel %vm4291_vm10, %v4281_v45, 2102212464  ;;  %v4330_v14 = vshrl.u32 %v4299_v37, 16 }
 0x811   :  { %v4307_v62 = vand.u32 65535, %v4303_v59  ;;  %v4308_v7 = vshrl.u32 %v4303_v59, 16  ;;  %v5861_v11 = vadd.s32 4294967169, %v3740_v3  ;;  %v4272_v28 = vshrl.u32 %v10182_v52, %v4271_v56 }
 0x812   :  { %v4202_v18 = vshll.u32 %v8988_v55, 30  ;;  %v3744_v43 = vor.u32 8388608, %v9001_v34  ;;  %v4195_v5 = vadd.s32 %v4190_v31, %v4171_v4  ;;  %v4329_v15 = vand.u32 65535, %v4299_v37 }
 0x813   :  { %v4310_v39 = vmul.u32 %v4308_v7, %v4305_v54  ;;  %v4311_v1 = vmul.u32 %v4307_v62, %v4306_v53  ;;  %v4294_v45 = vsel %vm4290_vm7, %v4278_v8, %v4293_v25  ;;  %v4309_v61 = vmul.u32 %v4307_v62, %v4305_v54 }
 0x814   :  { %v9008_v6 = vsub.s32 %v4199_v19, %v4202_v18  ;;  %v4292_v19 = vsel %vm4288_vm14, %v4272_v28, %v4275_v42  ;;  %v4312_v21 = vmul.u32 %v4308_v7, %v4306_v53  ;;  %v4332_v30 = vmul.u32 %v4330_v14, %v4305_v54 }
 0x815   :  { %v4313_v3 = vshll.u32 %v4310_v39, 16  ;;  %v3746_v44 = vadd.s32 1, %v5861_v11  ;;  %v4315_v4 = vshll.u32 %v4311_v1, 16  ;;  %v9023_v17 = vsel %vm4289_vm15, %v4292_v19, %v4294_v45 }
 0x816   :  { %vm4204_vm6 = vcmp.lt.s32.totalorder %v9008_v6, 0  ;;  %v4205_v40 = vsub.s32 0, %v9008_v6  ;;  %v4331_v37 = vmul.u32 %v4329_v15, %v4305_v54  ;;  %v4333_v22 = vmul.u32 %v4329_v15, %v4306_v53 }
 0x817   :  { %vm4317_vm4 = vc.u32 %v4309_v61, %v4313_v3  ;;  %v4319_v31 = vadd.s32 %v4313_v3, %v4309_v61  ;;  %v4335_v59 = vshll.u32 %v4332_v30, 16  ;;  %v4314_v62 = vshrl.u32 %v4310_v39, 16 }
 0x818   :  { %v4206_v56 = vsel %vm4204_vm6, %v4205_v40, %v9008_v6  ;;  %v4318_v42 = vsel %vm4317_vm4, 1, %v10186_v60  ;;  %v4316_v7 = vshrl.u32 %v4311_v1, 16  ;;  %vm3747_vm2 = vcmp.gt.s32.totalorder %v3746_v44, 0 }
 0x819   :  { %v4207_v46 = vclz %v4206_v56  ;;  %v4320_v18 = vadd.s32 %v4318_v42, %v4312_v21  ;;  %vm4321_vm13 = vc.u32 %v4319_v31, %v4315_v4  ;;  %vm4339_vm11 = vc.u32 %v4331_v37, %v4335_v59 }
 0x81a   :  { %v4322_v25 = vsel %vm4321_vm13, 1, %v10186_v60  ;;  %v4341_v28 = vadd.s32 %v4335_v59, %v4331_v37  ;;  %v4334_v40 = vmul.u32 %v4330_v14, %v4306_v53  ;;  %v4337_v19 = vshll.u32 %v4333_v22, 16 }
 0x81b   :  { %v5870_v8 = vadd.s32 4294967294, %v4207_v46  ;;  %v4324_v11 = vadd.s32 %v4322_v25, %v4320_v18  ;;  %v4340_v45 = vsel %vm4339_vm11, 1, %v10186_v60  ;;  %v3748_v3 = vsel %vm3747_vm2, %v3746_v44, 0 }
 0x81c   :  { %vm4103_vm14 = vcmp.lt.s32.totalorder %v8888_v63, 0  ;;  %v4225_v1 = vsub.s32 4, %v8988_v55  ;;  %v4342_v56 = vadd.s32 %v4340_v45, %v4334_v40  ;;  %vm4343_vm10 = vc.u32 %v4341_v28, %v4337_v19 }
 0x81d   :  { %vm5871_vm8 = vcmp.lt.s32.totalorder %v5870_v8, 0  ;;  %v4325_v61 = vadd.s32 %v4324_v11, %v4314_v62  ;;  %v4344_v53 = vsel %vm4343_vm10, 1, %v10186_v60  ;;  %v4336_v14 = vshrl.u32 %v4332_v30, 16 }
 0x81e   :  { %v4210_v23 = vsel %vm5871_vm8, 0, %v5870_v8  ;;  %v9034_v31 = vadd.s32 %v4341_v28, %v4337_v19  ;;  %v4346_v42 = vadd.s32 %v4344_v53, %v4342_v56  ;;  %v3750_v37 = vand.u32 31, %v3748_v3 }
 0x81f   :  { %v4211_v54 = vsub.s32 32, %v4210_v23  ;;  %v4215_v15 = vsub.s32 4294967266, %v4210_v23  ;;  %v4212_v39 = vshll.u32 %v9008_v6, %v4210_v23  ;;  %v9031_v4 = vadd.s32 %v4325_v61, %v4316_v7 }
 0x820   :  { %vm9038_vm7 = vcmp.le.f32.partialorder %v4101_v32, 0.7853982  ;;  %v4338_v18 = vshrl.u32 %v4333_v22, 16  ;;  %v4347_v59 = vadd.s32 %v4346_v42, %v4336_v14  ;;  %v9046_v30 = vshrl.u32 %v3748_v3, 5 }
 0x821   :  { %v4213_v21 = vshrl.u32 %v4195_v5, %v4211_v54  ;;  %v4216_v46 = vadd.s32 127, %v4215_v15  ;;  %v4349_v5 = vmul.u32 %v8976_v57, %v9023_v17  ;;  %vm4351_vm15 = vc.u32 %v9031_v4, %v9034_v31 }
 0x822   :  { %v9048_v62 = vsub.s32 32, %v3750_v37  ;;  %v3753_v32 = vshll.u32 %v10182_v52, %v3750_v37  ;;  %v3756_v11 = vshll.u32 %v10226_v27, %v3750_v37  ;;  %v4348_v28 = vadd.s32 %v4347_v59, %v4338_v18 }
 0x823   :  { %v4214_v6 = vor.u32 %v4213_v21, %v4212_v39  ;;  %v4217_v8 = vshll.u32 %v4216_v46, 23  ;;  %v3759_v17 = vshll.u32 %v10227_v13, %v3750_v37  ;;  %v3762_v19 = vshll.u32 %v10225_v50, %v3750_v37 }
 0x824   :  { %v3754_v22 = vshrl.u32 %v10226_v27, %v9048_v62  ;;  %v3757_v57 = vshrl.u32 %v10227_v13, %v9048_v62  ;;  %v3760_v40 = vshrl.u32 %v10225_v50, %v9048_v62  ;;  %v3763_v45 = vshrl.u32 %v10223_v12, %v9048_v62 }
 0x825   :  { %v4218_v7 = vor.u32 4788187, %v4217_v8  ;;  %v4221_v25 = vcvt.s32.f32 %v4214_v6  ;;  %v4352_v54 = vadd.s32 1, %v4348_v28  ;;  %v3765_v61 = vshll.u32 %v10223_v12, %v3750_v37 }
 0x826   :  { %v9062_v15 = vor.u32 %v3757_v57, %v3756_v11  ;;  %v3766_v3 = vshrl.u32 %v10224_v33, %v9048_v62  ;;  %v4226_v56 = vsel %vm4103_vm14, %v4225_v1, %v8988_v55  ;;  %v9070_v21 = vor.u32 %v3760_v40, %v3759_v17 }
 0x827   :  { %v4219_v23 = vand.u32 2147483647, %v4218_v7  ;;  %v3764_v46 = vor.u32 %v3763_v45, %v3762_v19  ;;  %v4353_v53 = vsel %vm4351_vm15, %v4352_v54, %v4348_v28  ;;  %v9075_v14 = vor.u32 %v3754_v22, %v3753_v32 }
 0x828   :  { %v3767_v42 = vor.u32 %v3766_v3, %v3765_v61  ;;  %v9079_v37 = vshll.u32 %v3744_v43, 8  ;;  %v4354_v8 = vadd.s32 %v4353_v53, %v4349_v5  ;;  %vm3768_vm6 = vcmp.lt.s32.totalorder %v9046_v30, 1 }
 0x829   :  { %v4222_v39 = vmul.f32 %v4221_v25, %v4219_v23  ;;  %vm3771_vm4 = vcmp.lt.s32.totalorder %v9046_v30, 4  ;;  %v4228_v55 = vsel %vm9038_vm7, 0, %v4226_v56  ;;  %v3780_v18 = vsel %vm3768_vm6, %v9062_v15, %v9070_v21 }
 0x82a   :  { %v3777_v1 = vsel %vm3771_vm4, %v3764_v46, 920167782  ;;  %v3781_v34 = vsel %vm3771_vm4, %v3767_v42, 1326507024  ;;  %v4355_v5 = vadd.s32 536870912, %v4354_v8  ;;  %vm3769_vm13 = vcmp.lt.s32.totalorder %v9046_v30, 2 }
 0x82b   :  { %v4223_v6 = vxor.u32 2147483648, %v4222_v39  ;;  %vm3770_vm2 = vcmp.lt.s32.totalorder %v9046_v30, 3  ;;  %v3776_v7 = vsel %vm3768_vm6, %v9075_v14, %v9062_v15  ;;  %v4245_v28 = vadd.s32 3, %v4228_v55 }
 0x82c   :  { %v3778_v25 = vsel %vm3770_vm2, %v9070_v21, %v3777_v1  ;;  %v3782_v32 = vsel %vm3770_vm2, %v3764_v46, %v3781_v34  ;;  %v9109_v22 = vshrl.u32 %v4355_v5, 30  ;;  %v3785_v57 = vand.u32 65535, %v9079_v37 }
 0x82d   :  { %v4224_v43 = vsel %vm4103_vm14, %v4223_v6, %v4222_v39  ;;  %v3783_v44 = vsel %vm3769_vm13, %v3780_v18, %v3782_v32  ;;  %v3786_v17 = vshrl.u32 %v9079_v37, 16  ;;  %v3779_v61 = vsel %vm3769_vm13, %v3776_v7, %v3778_v25 }
 0x82e   :  { %v4227_v59 = vsel %vm9038_vm7, %v8888_v63, %v4224_v43  ;;  %v3787_v23 = vand.u32 65535, %v3783_v44  ;;  %v3788_v40 = vshrl.u32 %v3783_v44, 16  ;;  %v4357_v54 = vshll.u32 %v9109_v22, 30 }
 0x82f   :  { %v4229_v11 = vmul.f32 %v4227_v59, %v4227_v59  ;;  %v4246_v42 = vand.u32 3, %v4245_v28  ;;  %v3810_v1 = vshrl.u32 %v3779_v61, 16  ;;  %v3809_v28 = vand.u32 65535, %v3779_v61 }
 0x830   :  { %v3790_v3 = vmul.u32 %v3788_v40, %v3785_v57  ;;  %v9118_v39 = vmul.u32 %v3787_v23, %v3786_v17  ;;  %v4358_v53 = vsub.s32 %v4354_v8, %v4357_v54  ;;  %v3789_v6 = vmul.u32 %v3787_v23, %v3785_v57 }
 0x831   :  { %v4230_v19 = vmul.f32 -0.001358992, %v4229_v11  ;;  %v4237_v45 = vmul.f32 -0.00019511016, %v4229_v11  ;;  %v3792_v5 = vmul.u32 %v3788_v40, %v3786_v17  ;;  %vm4247_vm10 = vcmp.lt.s32.totalorder %v4246_v42, 2 }
 0x832   :  { %v3793_v55 = vshll.u32 %v3790_v3, 16  ;;  %vm4359_vm8 = vcmp.lt.s32.totalorder %v4358_v53, 0  ;;  %v4360_v43 = vsub.s32 0, %v4358_v53  ;;  %v3795_v32 = vshll.u32 %v9118_v39, 16 }
 0x833   :  { %v4231_v56 = vadd.f32 0.041655596, %v4230_v19  ;;  %v4238_v46 = vadd.f32 0.008332121, %v4237_v45  ;;  %vm4248_vm7 = vcmp.eq.s32.totalorder %v4246_v42, 0  ;;  %vm4244_vm15 = vweird.f32 %v8888_v63 }
 0x834   :  { %vm3797_vm11 = vc.u32 %v3789_v6, %v3793_v55  ;;  %v3799_v44 = vadd.s32 %v3793_v55, %v3789_v6  ;;  %v4361_v10 = vsel %vm4359_vm8, %v4360_v43, %v4358_v53  ;;  %vm4251_vm0 = vcmp.eq.s32.totalorder %v4246_v42, 2 }
 0x835   :  { %v4232_v18 = vmul.f32 %v4231_v56, %v4229_v11  ;;  %v4239_v34 = vmul.f32 %v4238_v46, %v4229_v11  ;;  %v3798_v19 = vsel %vm3797_vm11, 1, %v10186_v60  ;;  %v4362_v45 = vclz %v4361_v10 }
 0x836   :  { %v3800_v8 = vadd.s32 %v3798_v19, %v3792_v5  ;;  %vm3801_vm14 = vc.u32 %v3799_v44, %v3795_v32  ;;  %v4350_v40 = vadd.s32 %v9034_v31, %v9031_v4  ;;  %v3752_v6 = vshrl.u32 %v10182_v52, %v9048_v62  ;;  %v3731_v19 = vpop.f32.mrf.mxu1 }
 0x837   :  { %v4233_v7 = vadd.f32 -0.4999988, %v4232_v18  ;;  %v4240_v25 = vadd.f32 -0.16666654, %v4239_v34  ;;  %v3802_v56 = vsel %vm3801_vm14, 1, %v10186_v60  ;;  %v5873_v46 = vadd.s32 4294967294, %v4362_v45 }
 0x838   :  { %v3804_v18 = vadd.s32 %v3802_v56, %v3800_v8  ;;  %v3812_v61 = vmul.u32 %v3810_v1, %v3785_v57  ;;  %v3773_v34 = vsel %vm3771_vm4, %v9070_v21, 2102212464  ;;  %v3813_v43 = vmul.u32 %v3809_v28, %v3786_v17 }
 0x839   :  { %v4234_v23 = vmul.f32 %v4233_v7, %v4229_v11  ;;  %v4241_v54 = vmul.f32 %v4240_v25, %v4229_v11  ;;  %vm5874_vm8 = vcmp.lt.s32.totalorder %v5873_v46, 0  ;;  %v3772_v11 = vsel %vm3768_vm6, %v3752_v6, %v9075_v14 }
 0x83a   :  { %v4365_v31 = vsel %vm5874_vm8, 0, %v5873_v46  ;;  %v3794_v32 = vshrl.u32 %v3790_v3, 16  ;;  %v3811_v7 = vmul.u32 %v3809_v28, %v3785_v57  ;;  %v3815_v25 = vshll.u32 %v3812_v61, 16 }
 0x83b   :  { %v4235_v10 = vadd.f32 1.0, %v4234_v23  ;;  %v4242_v55 = vadd.f32 1.0, %v4241_v54  ;;  %v4366_v44 = vsub.s32 32, %v4365_v31  ;;  %v4370_v62 = vsub.s32 4294967266, %v4365_v31 }
 0x83c   :  { %v4367_v8 = vshll.u32 %v4358_v53, %v4365_v31  ;;  %v3805_v23 = vadd.s32 %v3804_v18, %v3794_v32  ;;  %v3814_v54 = vmul.u32 %v3810_v1, %v3786_v17  ;;  %v3817_v16 = vshll.u32 %v3813_v43, 16  ;;  %v9148_v18 = vpop.permute.xlu2 %4415 }
 0x83d   :  { %v4243_v5 = vmul.f32 %v4242_v55, %v4227_v59  ;;  %v4252_v4 = vxor.u32 2147483648, %v4235_v10  ;;  %v4368_v56 = vshrl.u32 %v4350_v40, %v4366_v44  ;;  %v4371_v6 = vadd.s32 127, %v4370_v62 }
 0x83e   :  { %vm3819_vm6 = vc.u32 %v3811_v7, %v3815_v25  ;;  %v3821_v59 = vadd.s32 %v3815_v25, %v3811_v7  ;;  %v9137_v3 = vadd.f32 %v3731_v19, %v8565_v35  ;;  %v3774_v1 = vsel %vm3770_vm2, %v9062_v15, %v3773_v34 }
 0x83f   :  { %v4249_v45 = vxor.u32 2147483648, %v4243_v5  ;;  %v4253_v14 = vsel %vm4251_vm0, %v4252_v4, %v4243_v5  ;;  %v4369_v28 = vor.u32 %v4368_v56, %v4367_v8  ;;  %v4372_v46 = vshll.u32 %v4371_v6, 23 }
 0x840   :  { %v3820_v53 = vsel %vm3819_vm6, 1, %v10186_v60  ;;  %vm3823_vm0 = vc.u32 %v3821_v59, %v3817_v16  ;;  %v3796_v35 = vshrl.u32 %v9118_v39, 16  ;;  %v4380_v5 = vsub.s32 4, %v9109_v22 }
 0x841   :  { %v4250_v21 = vsel %vm4248_vm7, %v4235_v10, %v4249_v45  ;;  %v3822_v40 = vadd.s32 %v3820_v53, %v3814_v54  ;;  %v4373_v55 = vor.u32 4788187, %v4372_v46  ;;  %v3824_v42 = vsel %vm3823_vm0, 1, %v10186_v60 }
 0x842   :  { %v4254_v57 = vsel %vm4247_vm10, %v4250_v21, %v4253_v14  ;;  %v3816_v4 = vshrl.u32 %v3812_v61, 16  ;;  %v9153_v63 = vmul.f32 %v9137_v3, %v8573_v41  ;;  %v4376_v32 = vcvt.s32.f32 %v4369_v28 }
 0x843   :  { %v4255_v17 = vsel %vm4244_vm15, nan, %v4254_v57  ;;  %v3826_v31 = vadd.s32 %v3824_v42, %v3822_v40  ;;  %v4374_v34 = vand.u32 2147483647, %v4373_v55  ;;  %v9156_v44 = vadd.s32 %v3805_v23, %v3796_v35 }
 0x844   :  { %v4411_v10 = vmul.f32 %v4255_v17, %v4255_v17  ;;  %v3818_v62 = vshrl.u32 %v3813_v43, 16  ;;  %v3894_v7 = vand.u32 2139095040, %v9153_v63  ;;  %vm4258_vm4 = vcmp.lt.s32.totalorder %v8936_v36, 0 }
 0x845   :  { %v3827_v39 = vadd.s32 %v3826_v31, %v3816_v4  ;;  %v4377_v61 = vmul.f32 %v4376_v32, %v4374_v34  ;;  %v9163_v19 = vadd.s32 %v3821_v59, %v3817_v16  ;;  %v4381_v41 = vsel %vm4258_vm4, %v4380_v5, %v9109_v22 }
 0x846   :  { %v4418_v15 = vmul.f32 %v9148_v18, %v4411_v10  ;;  %v3775_v45 = vsel %vm3769_vm13, %v3772_v11, %v3774_v1  ;;  %v3895_v23 = vshrl.u32 %v3894_v7, 23  ;;  %v10339_v43 = vand.u32 2147483647, %v8936_v36 }
 0x847   :  { %v3828_v8 = vadd.s32 %v3827_v39, %v3818_v62  ;;  %v4378_v54 = vxor.u32 2147483648, %v4377_v61  ;;  %vm3831_vm2 = vc.u32 %v9156_v44, %v9163_v19  ;;  %v3829_v30 = vmul.u32 %v9079_v37, %v3775_v45 }
 0x848   :  { %v9160_v25 = vadd.f32 %v4418_v15, %v8882_v24  ;;  %vm4257_vm11 = vcmp.le.f32.partialorder %v10339_v43, 0.7853982  ;;  %v5864_v14 = vadd.s32 4294967169, %v3895_v23  ;;  %v3891_v21 = vand.u32 2147483647, %v9153_v63 }
 0x849   :  { %v3832_v16 = vadd.s32 1, %v3828_v8  ;;  %v4379_v56 = vsel %vm4258_vm4, %v4378_v54, %v4377_v61  ;;  %v4383_v22 = vsel %vm4257_vm11, 0, %v4381_v41  ;;  %vm4399_vm15 = vweird.f32 %v8936_v36 }
 0x84a   :  { %4790 = vrot.lane.b32.xlu2 %v9160_v25, %s6007_s17  ;;  %v4382_v11 = vsel %vm4257_vm11, %v8936_v36, %v4379_v56  ;;  %v3901_v59 = vadd.s32 1, %v5864_v14  ;;  %v4400_v46 = vadd.s32 3, %v4383_v22  ;;  %v3898_v10 = vand.u32 8388607, %v3891_v21 }
 0x84b   :  { %v3833_v6 = vsel %vm3831_vm2, %v3832_v16, %v3828_v8  ;;  %v4384_v57 = vmul.f32 %v4382_v11, %v4382_v11 }
 0x84c   :  { %v3834_v28 = vadd.s32 %v3833_v6, %v3829_v30  ;;  %vm3902_vm13 = vcmp.gt.s32.totalorder %v3901_v59, 0  ;;  %v4401_v5 = vand.u32 3, %v4400_v46  ;;  %v3899_v7 = vor.u32 8388608, %v3898_v10 }
 0x84d   :  { %v4385_v53 = vmul.f32 -0.001358992, %v4384_v57  ;;  %v4392_v17 = vmul.f32 -0.00019511016, %v4384_v57  ;;  %v3903_v40 = vsel %vm3902_vm13, %v3901_v59, 0 }
 0x84e   :  { %v3835_v1 = vadd.s32 536870912, %v3834_v28  ;;  %v3905_v55 = vand.u32 31, %v3903_v40  ;;  %vm4403_vm14 = vcmp.eq.s32.totalorder %v4401_v5, 0  ;;  %v9188_v61 = vshrl.u32 %v3903_v40, 5 }
 0x84f   :  { %v4386_v35 = vadd.f32 0.041655596, %v4385_v53  ;;  %v4393_v37 = vadd.f32 0.008332121, %v4392_v17  ;;  %vm4402_vm10 = vcmp.lt.s32.totalorder %v4401_v5, 2  ;;  %vm4406_vm8 = vcmp.eq.s32.totalorder %v4401_v5, 2 }
 0x850   :  { %v9179_v42 = vshrl.u32 %v3835_v1, 30  ;;  %v9183_v4 = vsub.s32 32, %v3905_v55  ;;  %v3908_v41 = vshll.u32 %v10182_v52, %v3905_v55  ;;  %v3911_v16 = vshll.u32 %v10226_v27, %v3905_v55 }
 0x851   :  { %v4387_v31 = vmul.f32 %v4386_v35, %v4384_v57  ;;  %v4394_v15 = vmul.f32 %v4393_v37, %v4384_v57  ;;  %v3917_v56 = vshll.u32 %v10225_v50, %v3905_v55  ;;  %v3914_v17 = vshll.u32 %v10227_v13, %v3905_v55 }
 0x852   :  { %4759 = vrot.lane.b32.xlu2 %v9160_v25, %s6008_s2  ;;  %v3837_v34 = vshll.u32 %v9179_v42, 30  ;;  %v3909_v45 = vshrl.u32 %v10226_v27, %v9183_v4  ;;  %v3912_v8 = vshrl.u32 %v10227_v13, %v9183_v4  ;;  %v3915_v14 = vshrl.u32 %v10225_v50, %v9183_v4 }
 0x853   :  { %v4388_v32 = vadd.f32 -0.4999988, %v4387_v31  ;;  %v4395_v62 = vadd.f32 -0.16666654, %v4394_v15  ;;  %v3918_v22 = vshrl.u32 %v10223_v12, %v9183_v4  ;;  %v3920_v35 = vshll.u32 %v10223_v12, %v3905_v55 }
 0x854   :  { %v9186_v39 = vsub.s32 %v3834_v28, %v3837_v34  ;;  %v9207_v46 = vor.u32 %v3909_v45, %v3908_v41  ;;  %v9209_v53 = vor.u32 %v3912_v8, %v3911_v16  ;;  %v3830_v37 = vadd.s32 %v9163_v19, %v9156_v44 }
 0x855   :  { %v4389_v23 = vmul.f32 %v4388_v32, %v4384_v57  ;;  %v4396_v54 = vmul.f32 %v4395_v62, %v4384_v57  ;;  %v3921_v57 = vshrl.u32 %v10224_v33, %v9183_v4  ;;  %v3919_v10 = vor.u32 %v3918_v22, %v3917_v56 }
 0x856   :  { %vm3839_vm7 = vcmp.lt.s32.totalorder %v9186_v39, 0  ;;  %v3840_v43 = vsub.s32 0, %v9186_v39  ;;  %v9215_v15 = vshll.u32 %v3899_v7, 8  ;;  %v3916_v32 = vor.u32 %v3915_v14, %v3914_v17 }
 0x857   :  { %v4390_v30 = vadd.f32 1.0, %v4389_v23  ;;  %v4397_v6 = vadd.f32 1.0, %v4396_v54  ;;  %v3922_v62 = vor.u32 %v3921_v57, %v3920_v35  ;;  %vm3923_vm6 = vcmp.lt.s32.totalorder %v9188_v61, 1 }
 0x858   :  { %v3841_v59 = vsel %vm3839_vm7, %v3840_v43, %v9186_v39  ;;  %vm3924_vm4 = vcmp.lt.s32.totalorder %v9188_v61, 2  ;;  %vm3926_vm2 = vcmp.lt.s32.totalorder %v9188_v61, 4  ;;  %v3931_v44 = vsel %vm3923_vm6, %v9207_v46, %v9209_v53 }
 0x859   :  { %v3842_v28 = vclz %v3841_v59  ;;  %v4398_v1 = vmul.f32 %v4397_v6, %v4382_v11  ;;  %v4407_v40 = vxor.u32 2147483648, %v4390_v30  ;;  %v3932_v19 = vsel %vm3926_vm2, %v3919_v10, 920167782 }
 0x85a   :  { %vm3925_vm11 = vcmp.lt.s32.totalorder %v9188_v61, 3  ;;  %v3935_v16 = vsel %vm3923_vm6, %v9209_v53, %v3916_v32  ;;  %v3940_v36 = vand.u32 65535, %v9215_v15 }
 0x85b   :  { %v5862_v31 = vadd.s32 4294967294, %v3842_v28  ;;  %v4404_v34 = vxor.u32 2147483648, %v4398_v1  ;;  %v4408_v41 = vsel %vm4406_vm8, %v4407_v40, %v4398_v1  ;;  %v3933_v43 = vsel %vm3925_vm11, %v3916_v32, %v3932_v19 }
 0x85c   :  { %v3934_v22 = vsel %vm3924_vm4, %v3931_v44, %v3933_v43  ;;  %v3941_v40 = vshrl.u32 %v9215_v15, 16  ;;  %v10340_v44 = vand.u32 2147483647, %v8958_v38  ;;  %v3860_v43 = vsub.s32 4, %v9179_v42 }
 0x85d   :  { %vm5863_vm0 = vcmp.lt.s32.totalorder %v5862_v31, 0  ;;  %v4405_v11 = vsel %vm4403_vm14, %v4390_v30, %v4404_v34  ;;  %v3936_v30 = vsel %vm3926_vm2, %v3922_v62, 1326507024  ;;  %v3964_v6 = vand.u32 65535, %v3934_v22 }
 0x85e   :  { %v3845_v55 = vsel %vm5863_vm0, 0, %v5862_v31  ;;  %v4409_v7 = vsel %vm4402_vm10, %v4405_v11, %v4408_v41  ;;  %v3937_v17 = vsel %vm3925_vm11, %v3919_v10, %v3936_v30  ;;  %vm9253_vm13 = vcmp.le.f32.partialorder %v10340_v44, 0.7853982 }
 0x85f   :  { %v3846_v45 = vsub.s32 32, %v3845_v55  ;;  %v3850_v8 = vsub.s32 4294967266, %v3845_v55  ;;  %v4410_v23 = vsel %vm4399_vm15, nan, %v4409_v7  ;;  %v3847_v54 = vshll.u32 %v9186_v39, %v3845_v55 }
 0x860   :  { %v4412_v14 = vmul.f32 %v4410_v23, %v4410_v23  ;;  %v3965_v39 = vshrl.u32 %v3934_v22, 16  ;;  %v3938_v1 = vsel %vm3924_vm4, %v3935_v16, %v3937_v17  ;;  %v3966_v41 = vmul.u32 %v3964_v6, %v3940_v36 }
 0x861   :  { %v3848_v56 = vshrl.u32 %v3830_v37, %v3846_v45  ;;  %v3851_v5 = vadd.s32 127, %v3850_v8  ;;  %v3942_v34 = vand.u32 65535, %v3938_v1  ;;  %v3943_v62 = vshrl.u32 %v3938_v1, 16 }
 0x862   :  { %v4419_v59 = vmul.f32 %v9148_v18, %v4412_v14  ;;  %v3967_v35 = vmul.u32 %v3965_v39, %v3940_v36  ;;  %v3968_v11 = vmul.u32 %v3964_v6, %v3941_v40  ;;  %vm3738_vm14 = vcmp.lt.s32.totalorder %v8958_v38, 0 }
 0x863   :  { %v3849_v57 = vor.u32 %v3848_v56, %v3847_v54  ;;  %v3852_v28 = vshll.u32 %v3851_v5, 23  ;;  %v3945_v45 = vmul.u32 %v3943_v62, %v3940_v36  ;;  %v3946_v8 = vmul.u32 %v3942_v34, %v3941_v40 }
 0x864   :  { %v9249_v37 = vadd.f32 %v4419_v59, %v8921_v47  ;;  %v3970_v55 = vshll.u32 %v3967_v35, 16  ;;  %v3969_v23 = vmul.u32 %v3965_v39, %v3941_v40  ;;  %v3944_v16 = vmul.u32 %v3942_v34, %v3940_v36 }
 0x865   :  { %v3853_v31 = vor.u32 4788187, %v3852_v28  ;;  %v3856_v7 = vcvt.s32.f32 %v3849_v57  ;;  %v3948_v56 = vshll.u32 %v3945_v45, 16  ;;  %v3972_v5 = vshll.u32 %v3968_v11, 16 }
 0x866   :  { %4792 = vrot.lane.b32.xlu0 %v9249_v37, %s6007_s17  ;;  %vm3974_vm10 = vc.u32 %v3966_v41, %v3970_v55  ;;  %v3976_v22 = vadd.s32 %v3970_v55, %v3966_v41  ;;  %v3907_v59 = vshrl.u32 %v10182_v52, %v9183_v4  ;;  %v3928_v57 = vsel %vm3926_vm2, %v3916_v32, 2102212464 }
 0x867   :  { %v3854_v10 = vand.u32 2147483647, %v3853_v31  ;;  %v3975_v14 = vsel %vm3974_vm10, 1, %v10186_v60  ;;  %v3947_v28 = vmul.u32 %v3943_v62, %v3941_v40  ;;  %v3950_v39 = vshll.u32 %v3946_v8, 16 }
 0x868   :  { %v3977_v30 = vadd.s32 %v3975_v14, %v3969_v23  ;;  %vm3952_vm7 = vc.u32 %v3944_v16, %v3948_v56  ;;  %v3954_v17 = vadd.s32 %v3948_v56, %v3944_v16  ;;  %vm3978_vm15 = vc.u32 %v3976_v22, %v3972_v5 }
 0x869   :  { %v3857_v54 = vmul.f32 %v3856_v7, %v3854_v10  ;;  %v3953_v1 = vsel %vm3952_vm7, 1, %v10186_v60  ;;  %v3971_v31 = vshrl.u32 %v3967_v35, 16  ;;  %v3979_v34 = vsel %vm3978_vm15, 1, %v10186_v60 }
 0x86a   :  { %v3955_v41 = vadd.s32 %v3953_v1, %v3947_v28  ;;  %vm3956_vm8 = vc.u32 %v3954_v17, %v3950_v39  ;;  %v3981_v32 = vadd.s32 %v3979_v34, %v3977_v30  ;;  %v3927_v62 = vsel %vm3923_vm6, %v3907_v59, %v9207_v46 }
 0x86b   :  { %v3858_v6 = vxor.u32 2147483648, %v3857_v54  ;;  %v3929_v55 = vsel %vm3925_vm11, %v9209_v53, %v3928_v57  ;;  %v3957_v35 = vsel %vm3956_vm8, 1, %v10186_v60  ;;  %v3949_v44 = vshrl.u32 %v3945_v45, 16 }
 0x86c   :  { %v3959_v10 = vadd.s32 %v3957_v35, %v3955_v41  ;;  %v3973_v7 = vshrl.u32 %v3968_v11, 16  ;;  %v3982_v23 = vadd.s32 %v3981_v32, %v3971_v31  ;;  %v3861_v14 = vsel %vm3738_vm14, %v3860_v43, %v9179_v42 }
 0x86d   :  { %v3859_v36 = vsel %vm3738_vm14, %v3858_v6, %v3857_v54  ;;  %v3951_v56 = vshrl.u32 %v3946_v8, 16  ;;  %v3930_v53 = vsel %vm3924_vm4, %v3927_v62, %v3929_v55  ;;  %v3980_v28 = vadd.s32 %v3976_v22, %v3972_v5 }
 0x86e   :  { %v3862_v4 = vsel %vm9253_vm13, %v8958_v38, %v3859_v36  ;;  %v3960_v30 = vadd.s32 %v3959_v10, %v3949_v44  ;;  %v3983_v6 = vadd.s32 %v3982_v23, %v3973_v7  ;;  %v3863_v11 = vsel %vm9253_vm13, 0, %v3861_v14 }
 0x86f   :  { %v3864_v40 = vmul.f32 %v3862_v4, %v3862_v4  ;;  %v3984_v36 = vmul.u32 %v9215_v15, %v3930_v53  ;;  %v3880_v1 = vadd.s32 3, %v3863_v11  ;;  %vm3879_vm11 = vweird.f32 %v8958_v38  ;;  %v5962_v38 = vld [vmem:[%s10098_s14 + $0x8] sm:$0xff] }
 0x870   :  { %v3961_v57 = vadd.s32 %v3960_v30, %v3951_v56  ;;  %v3987_v45 = vadd.s32 1, %v3983_v6  ;;  %vm10343_vm10 = vcmask 64512   ;;  %vm3893_vm7 = vcmp.lt.s32.totalorder %v9153_v63, 0 }
 0x871   :  { %v3865_v54 = vmul.f32 -0.001358992, %v3864_v40  ;;  %v3872_v16 = vmul.f32 -0.00019511016, %v3864_v40  ;;  %v3881_v5 = vand.u32 3, %v3880_v1 }
 0x872   :  { %vm3986_vm6 = vc.u32 %v3961_v57, %v3980_v28  ;;  %vm3892_vm15 = vcmp.le.f32.partialorder %v3891_v21, 0.7853982 }
 0x873   :  { %v3866_v46 = vadd.f32 0.041655596, %v3865_v54  ;;  %v3873_v59 = vadd.f32 0.008332121, %v3872_v16  ;;  %v3988_v43 = vsel %vm3986_vm6, %v3987_v45, %v3983_v6  ;;  %vm3883_vm0 = vcmp.eq.s32.totalorder %v3881_v5, 0 }
 0x874   :  { %v3989_v31 = vadd.s32 %v3988_v43, %v3984_v36  ;;  %vm3886_vm4 = vcmp.eq.s32.totalorder %v3881_v5, 2  ;;  %vm3882_vm2 = vcmp.lt.s32.totalorder %v3881_v5, 2 }
 0x875   :  { %v3867_v39 = vmul.f32 %v3866_v46, %v3864_v40  ;;  %v3874_v17 = vmul.f32 %v3873_v59, %v3864_v40  ;;  %v3985_v59 = vadd.s32 %v3980_v28, %v3961_v57 }
 0x876   :  { %v3990_v61 = vadd.s32 536870912, %v3989_v31 }
 0x877   :  { %v3868_v42 = vadd.f32 -0.4999988, %v3867_v39  ;;  %v3875_v8 = vadd.f32 -0.16666654, %v3874_v17 }
 0x878   :  { %v3991_v22 = vshrl.u32 %v3990_v61, 30 }
 0x879   :  { %v3869_v34 = vmul.f32 %v3868_v42, %v3864_v40  ;;  %v3876_v41 = vmul.f32 %v3875_v8, %v3864_v40 }
 0x87a   :  { %v3992_v35 = vshll.u32 %v3991_v22, 30  ;;  %v4015_v28 = vsub.s32 4, %v3991_v22 }
 0x87b   :  { %v3870_v32 = vadd.f32 1.0, %v3869_v34  ;;  %v3877_v62 = vadd.f32 1.0, %v3876_v41 }
 0x87c   :  { %v3993_v15 = vsub.s32 %v3989_v31, %v3992_v35 }
 0x87d   :  { %v3878_v55 = vmul.f32 %v3877_v62, %v3862_v4  ;;  %v3887_v19 = vxor.u32 2147483648, %v3870_v32  ;;  %v4016_v62 = vsel %vm3893_vm7, %v4015_v28, %v3991_v22 }
 0x87e   :  { %vm3994_vm13 = vcmp.lt.s32.totalorder %v3993_v15, 0  ;;  %v3995_v40 = vsub.s32 0, %v3993_v15 }
 0x87f   :  { %v3884_v44 = vxor.u32 2147483648, %v3878_v55  ;;  %v3888_v7 = vsel %vm3886_vm4, %v3887_v19, %v3878_v55  ;;  %v4018_v19 = vsel %vm3892_vm15, 0, %v4016_v62  ;;  %vm4034_vm4 = vweird.f32 %v9153_v63 }
 0x880   :  { %v3996_v14 = vsel %vm3994_vm13, %v3995_v40, %v3993_v15 }
 0x881   :  { %v3885_v10 = vsel %vm3883_vm0, %v3870_v32, %v3884_v44  ;;  %v3997_v56 = vclz %v3996_v14 }
 0x882   :  { %v3889_v23 = vsel %vm3882_vm2, %v3885_v10, %v3888_v7  ;;  %v4035_v7 = vadd.s32 3, %v4018_v19  ;;  %vm10344_vm2 = vmmov %vm10343_vm10 }
 0x883   :  { %v3890_v54 = vsel %vm3879_vm11, nan, %v3889_v23  ;;  %v5865_v30 = vadd.s32 4294967294, %v3997_v56 }
 0x884   :  { %v4046_v16 = vmul.f32 %v3890_v54, %v3890_v54 }
 0x885   :  { %vm5866_vm14 = vcmp.lt.s32.totalorder %v5865_v30, 0 }
 0x886   :  { %v4048_v4 = vmul.f32 %v4046_v16, %v8747_v29  ;;  %v4000_v46 = vsel %vm5866_vm14, 0, %v5865_v30  ;;  %v4036_v16 = vand.u32 3, %v4035_v7 }
 0x887   :  { %v4001_v53 = vsub.s32 32, %v4000_v46  ;;  %v4005_v45 = vsub.s32 4294967266, %v4000_v46  ;;  %v4002_v11 = vshll.u32 %v3993_v15, %v4000_v46 }
 0x888   :  { %v4050_v6 = vadd.f32 %v4048_v4, %v8943_v58  ;;  %vm4038_vm8 = vcmp.eq.s32.totalorder %v4036_v16, 0  ;;  %vm4041_vm6 = vcmp.eq.s32.totalorder %v4036_v16, 2  ;;  %vm4037_vm0 = vcmp.lt.s32.totalorder %v4036_v16, 2 }
 0x889   :  { %v4003_v39 = vshrl.u32 %v3985_v59, %v4001_v53  ;;  %v4006_v17 = vadd.s32 127, %v4005_v45 }
 0x88a   :  { %4067 = vmatpush.msrb.mxu2 %v4050_v6 }
 0x88b   :  { %5867 = vmatmul.msk.f32.vlgmr.msrb.gmra.mxu2 %vm10343_vm10, %v5962_v38  ;;  %v4004_v36 = vor.u32 %v4003_v39, %v4002_v11  ;;  %v4007_v42 = vshll.u32 %v4006_v17, 23 }
 0x88d   :  { %v4008_v8 = vor.u32 4788187, %v4007_v42  ;;  %v4011_v58 = vcvt.s32.f32 %v4004_v36 }
 0x88f   :  { %v4009_v43 = vand.u32 2147483647, %v4008_v8 }
 0x891   :  { %v4012_v1 = vmul.f32 %v4011_v58, %v4009_v43 }
 0x893   :  { %v4013_v31 = vxor.u32 2147483648, %v4012_v1 }
 0x895   :  { %v4014_v57 = vsel %vm3893_vm7, %v4013_v31, %v4012_v1 }
 0x896   :  { %v4017_v34 = vsel %vm3892_vm15, %v9153_v63, %v4014_v57 }
 0x897   :  { %v4019_v41 = vmul.f32 %v4017_v34, %v4017_v34 }
 0x899   :  { %v4020_v61 = vmul.f32 -0.001358992, %v4019_v41  ;;  %v4027_v32 = vmul.f32 -0.00019511016, %v4019_v41 }
 0x89b   :  { %v4021_v5 = vadd.f32 0.041655596, %v4020_v61  ;;  %v4028_v55 = vadd.f32 0.008332121, %v4027_v32 }
 0x89d   :  { %v4022_v35 = vmul.f32 %v4021_v5, %v4019_v41  ;;  %v4029_v44 = vmul.f32 %v4028_v55, %v4019_v41 }
 0x89f   :  { %v4023_v15 = vadd.f32 -0.4999988, %v4022_v35  ;;  %v4030_v10 = vadd.f32 -0.16666654, %v4029_v44 }
 0x8a1   :  { %v4024_v23 = vmul.f32 %v4023_v15, %v4019_v41  ;;  %v4031_v40 = vmul.f32 %v4030_v10, %v4019_v41 }
 0x8a3   :  { %v4025_v54 = vadd.f32 1.0, %v4024_v23  ;;  %v4032_v21 = vadd.f32 1.0, %v4031_v40 }
 0x8a5   :  { %v4033_v14 = vmul.f32 %v4032_v21, %v4017_v34  ;;  %v4042_v56 = vxor.u32 2147483648, %v4025_v54 }
 0x8a7   :  { %v4039_v4 = vxor.u32 2147483648, %v4033_v14  ;;  %v4043_v30 = vsel %vm4041_vm6, %v4042_v56, %v4033_v14 }
 0x8a9   :  { %v4040_v22 = vsel %vm4038_vm8, %v4025_v54, %v4039_v4 }
 0x8aa   :  { %v4044_v6 = vsel %vm4037_vm0, %v4040_v22, %v4043_v30 }
 0x8ab   :  { %v4045_v46 = vsel %vm4034_vm4, nan, %v4044_v6 }
 0x8ac   :  { %v4047_v59 = vmul.f32 %v4045_v46, %v4045_v46 }
 0x8ae   :  { %v4049_v53 = vmul.f32 %v4047_v59, %v8747_v29 }
 0x8b0   :  { %v4051_v45 = vadd.f32 %v4049_v53, %v9137_v3 }
 0x8b2   :  { %4087 = vmatpush.msrb.mxu3 %v4051_v45 }
 0x8b3   :  { %5868 = vmatmul.msk.f32.vlgmr.msrb.gmra.mxu3 %vm10344_vm2, %v5962_v38 }
 0x90e   :  { %v4069_v11 = vpop.f32.mrf.mxu2 }
 0x90f   :  { %v4070_v39 = vadd.f32 %v4069_v11, %v8878_v51 }
 0x911   :  { %v9305_v17 = vadd.f32 %v4070_v39, %v7984_v0 }
 0x913   :  { %10345 = vst [vmem:[#allocation7_spill] sm:$0xff] %v9305_v17  ;;  %v9309_v36 = vmul.f32 %v8884_v49, %v9305_v17 }
 0x915   :  { %v4427_v63 = vand.u32 2139095040, %v9309_v36  ;;  %v4424_v29 = vand.u32 2147483647, %v9309_v36 }
 0x917   :  { %v4428_v42 = vshrl.u32 %v4427_v63, 23  ;;  %v4431_v38 = vand.u32 8388607, %v4424_v29 }
 0x919   :  { %v5875_v8 = vadd.s32 4294967169, %v4428_v42  ;;  %v4432_v0 = vor.u32 8388608, %v4431_v38 }
 0x91b   :  { %v4434_v3 = vadd.s32 1, %v5875_v8  ;;  %v9328_v23 = vshll.u32 %v4432_v0, 8 }
 0x91d   :  { %vm4435_vm11 = vcmp.gt.s32.totalorder %v4434_v3, 0  ;;  %v4473_v30 = vand.u32 65535, %v9328_v23  ;;  %v4474_v6 = vshrl.u32 %v9328_v23, 16 }
 0x91e   :  { %v4436_v43 = vsel %vm4435_vm11, %v4434_v3, 0 }
 0x91f   :  { %v4438_v58 = vand.u32 31, %v4436_v43  ;;  %v9315_v31 = vshrl.u32 %v4436_v43, 5 }
 0x921   :  { %v4439_v1 = vsub.s32 32, %v4438_v58  ;;  %v4441_v57 = vshll.u32 %v10182_v52, %v4438_v58  ;;  %v4444_v28 = vshll.u32 %v10226_v27, %v4438_v58  ;;  %v4447_v61 = vshll.u32 %v10227_v13, %v4438_v58 }
 0x922   :  { %v4450_v62 = vshll.u32 %v10225_v50, %v4438_v58  ;;  %v4453_v55 = vshll.u32 %v10223_v12, %v4438_v58  ;;  %vm4456_vm13 = vcmp.lt.s32.totalorder %v9315_v31, 1  ;;  %vm4459_vm14 = vcmp.lt.s32.totalorder %v9315_v31, 4 }
 0x923   :  { %v4442_v34 = vshrl.u32 %v10226_v27, %v4439_v1  ;;  %v4445_v41 = vshrl.u32 %v10227_v13, %v4439_v1  ;;  %v4448_v32 = vshrl.u32 %v10225_v50, %v4439_v1  ;;  %v4451_v5 = vshrl.u32 %v10223_v12, %v4439_v1 }
 0x924   :  { %v4454_v19 = vshrl.u32 %v10224_v33, %v4439_v1  ;;  %vm4458_vm10 = vcmp.lt.s32.totalorder %v9315_v31, 3  ;;  %vm4457_vm7 = vcmp.lt.s32.totalorder %v9315_v31, 2 }
 0x925   :  { %v4443_v35 = vor.u32 %v4442_v34, %v4441_v57  ;;  %v4446_v44 = vor.u32 %v4445_v41, %v4444_v28  ;;  %v4449_v15 = vor.u32 %v4448_v32, %v4447_v61  ;;  %v4452_v10 = vor.u32 %v4451_v5, %v4450_v62 }
 0x926   :  { %v4455_v7 = vor.u32 %v4454_v19, %v4453_v55 }
 0x927   :  { %v4464_v40 = vsel %vm4456_vm13, %v4443_v35, %v4446_v44  ;;  %v4468_v54 = vsel %vm4456_vm13, %v4446_v44, %v4449_v15  ;;  %v4465_v21 = vsel %vm4459_vm14, %v4452_v10, 920167782  ;;  %v4461_v5 = vsel %vm4459_vm14, %v4449_v15, 2102212464 }
 0x928   :  { %v4469_v16 = vsel %vm4459_vm14, %v4455_v7, 1326507024  ;;  %v4466_v14 = vsel %vm4458_vm10, %v4449_v15, %v4465_v21 }
 0x929   :  { %v4470_v56 = vsel %vm4458_vm10, %v4452_v10, %v4469_v16  ;;  %v4467_v4 = vsel %vm4457_vm7, %v4464_v40, %v4466_v14  ;;  %v4440_v10 = vshrl.u32 %v10182_v52, %v4439_v1 }
 0x92a   :  { %v4471_v22 = vsel %vm4457_vm7, %v4468_v54, %v4470_v56  ;;  %v4497_v53 = vand.u32 65535, %v4467_v4  ;;  %v4498_v45 = vshrl.u32 %v4467_v4, 16  ;;  %v4462_v56 = vsel %vm4458_vm10, %v4446_v44, %v4461_v5 }
 0x92b   :  { %v4475_v46 = vand.u32 65535, %v4471_v22  ;;  %v4476_v59 = vshrl.u32 %v4471_v22, 16  ;;  %v4460_v14 = vsel %vm4456_vm13, %v4440_v10, %v4443_v35 }
 0x92c   :  { %v4500_v63 = vmul.u32 %v4498_v45, %v4473_v30  ;;  %v4501_v42 = vmul.u32 %v4497_v53, %v4474_v6  ;;  %v4499_v43 = vmul.u32 %v4497_v53, %v4473_v30  ;;  %v4502_v28 = vmul.u32 %v4498_v45, %v4474_v6 }
 0x92d   :  { %v4478_v11 = vmul.u32 %v4476_v59, %v4473_v30  ;;  %v4479_v39 = vmul.u32 %v4475_v46, %v4474_v6  ;;  %v4477_v8 = vmul.u32 %v4475_v46, %v4473_v30  ;;  %v4480_v38 = vmul.u32 %v4476_v59, %v4474_v6 }
 0x92e   :  { %v4503_v58 = vshll.u32 %v4500_v63, 16  ;;  %v4505_v41 = vshll.u32 %v4501_v42, 16  ;;  %v4504_v21 = vshrl.u32 %v4500_v63, 16  ;;  %v4506_v22 = vshrl.u32 %v4501_v42, 16  ;;  %v10346_v63 = vld [vmem:[#allocation10_spill] sm:$0xff] }
 0x92f   :  { %v4481_v3 = vshll.u32 %v4478_v11, 16  ;;  %v4483_v0 = vshll.u32 %v4479_v39, 16  ;;  %v4482_v7 = vshrl.u32 %v4478_v11, 16  ;;  %v4484_v4 = vshrl.u32 %v4479_v39, 16 }
 0x930   :  { %vm4507_vm8 = vc.u32 %v4499_v43, %v4503_v58  ;;  %v4509_v61 = vadd.s32 %v4503_v58, %v4499_v43  ;;  %v4463_v1 = vsel %vm4457_vm7, %v4460_v14, %v4462_v56 }
 0x931   :  { %vm4485_vm15 = vc.u32 %v4477_v8, %v4481_v3  ;;  %v4487_v57 = vadd.s32 %v4481_v3, %v4477_v8  ;;  %v4508_v62 = vsel %vm4507_vm8, 1, %v10186_v60  ;;  %v4517_v35 = vmul.u32 %v9328_v23, %v4463_v1 }
 0x932   :  { %v4486_v34 = vsel %vm4485_vm15, 1, %v10186_v60  ;;  %v4510_v19 = vadd.s32 %v4508_v62, %v4502_v28  ;;  %vm4511_vm0 = vc.u32 %v4509_v61, %v4505_v41  ;;  %v4513_v46 = vadd.s32 %v4509_v61, %v4505_v41 }
 0x933   :  { %v4488_v32 = vadd.s32 %v4486_v34, %v4480_v38  ;;  %vm4489_vm6 = vc.u32 %v4487_v57, %v4483_v0  ;;  %v4512_v54 = vsel %vm4511_vm0, 1, %v10186_v60  ;;  %vm4426_vm8 = vcmp.lt.s32.totalorder %v9309_v36, 0 }
 0x934   :  { %v4490_v55 = vsel %vm4489_vm6, 1, %v10186_v60  ;;  %v4514_v16 = vadd.s32 %v4512_v54, %v4510_v19  ;;  %vm9427_vm6 = vcmp.le.f32.partialorder %v4424_v29, 0.7853982 }
 0x935   :  { %v4492_v40 = vadd.s32 %v4490_v55, %v4488_v32 }
 0x936   :  { %v4515_v30 = vadd.s32 %v4514_v16, %v4504_v21  ;;  %v4089_v53 = vpop.f32.mrf.mxu3 }
 0x937   :  { %v4493_v15 = vadd.s32 %v4492_v40, %v4482_v7  ;;  %v4090_v45 = vadd.f32 %v4089_v53, %v8878_v51 }
 0x938   :  { %v4516_v59 = vadd.s32 %v4515_v30, %v4506_v22 }
 0x939   :  { %v4494_v6 = vadd.s32 %v4493_v15, %v4484_v4  ;;  %v9367_v8 = vadd.f32 %v4090_v45, %v10346_v63 }
 0x93a   :  { %v4520_v11 = vadd.s32 1, %v4516_v59 }
 0x93b   :  { %vm4519_vm4 = vc.u32 %v4494_v6, %v4513_v46  ;;  %10347 = vst [vmem:[#allocation10_spill] sm:$0xff] %v9367_v8  ;;  %v9371_v42 = vmul.f32 %v8884_v49, %v9367_v8 }
 0x93c   :  { %v4521_v44 = vsel %vm4519_vm4, %v4520_v11, %v4516_v59  ;;  %v4518_v59 = vadd.s32 %v4513_v46, %v4494_v6 }
 0x93d   :  { %v4522_v39 = vadd.s32 %v4521_v44, %v4517_v35  ;;  %v4582_v31 = vand.u32 2139095040, %v9371_v42  ;;  %v4579_v58 = vand.u32 2147483647, %v9371_v42 }
 0x93f   :  { %v4523_v3 = vadd.s32 536870912, %v4522_v39  ;;  %v4583_v43 = vshrl.u32 %v4582_v31, 23  ;;  %v4586_v34 = vand.u32 8388607, %v4579_v58 }
 0x941   :  { %v9374_v38 = vshrl.u32 %v4523_v3, 30  ;;  %v5878_v23 = vadd.s32 4294967169, %v4583_v43  ;;  %v4587_v62 = vor.u32 8388608, %v4586_v34 }
 0x943   :  { %v4525_v51 = vshll.u32 %v9374_v38, 30  ;;  %v4589_v57 = vadd.s32 1, %v5878_v23  ;;  %v9402_v43 = vshll.u32 %v4587_v62, 8  ;;  %v4548_v34 = vsub.s32 4, %v9374_v38 }
 0x945   :  { %v4526_v0 = vsub.s32 %v4522_v39, %v4525_v51  ;;  %vm4590_vm11 = vcmp.gt.s32.totalorder %v4589_v57, 0 }
 0x946   :  { %v4591_v49 = vsel %vm4590_vm11, %v4589_v57, 0 }
 0x947   :  { %vm4527_vm2 = vcmp.lt.s32.totalorder %v4526_v0, 0  ;;  %v4528_v28 = vsub.s32 0, %v4526_v0  ;;  %v4593_v61 = vand.u32 31, %v4591_v49  ;;  %v9380_v19 = vshrl.u32 %v4591_v49, 5 }
 0x949   :  { %v4529_v41 = vsel %vm4527_vm2, %v4528_v28, %v4526_v0  ;;  %v4594_v5 = vsub.s32 32, %v4593_v61  ;;  %v4596_v10 = vshll.u32 %v10182_v52, %v4593_v61  ;;  %v4599_v7 = vshll.u32 %v10226_v27, %v4593_v61 }
 0x94a   :  { %v4530_v32 = vclz %v4529_v41  ;;  %v4602_v21 = vshll.u32 %v10227_v13, %v4593_v61  ;;  %v4605_v14 = vshll.u32 %v10225_v50, %v4593_v61  ;;  %v4608_v1 = vshll.u32 %v10223_v12, %v4593_v61 }
 0x94b   :  { %v4597_v40 = vshrl.u32 %v10226_v27, %v4594_v5  ;;  %v4600_v54 = vshrl.u32 %v10227_v13, %v4594_v5  ;;  %v4603_v16 = vshrl.u32 %v10225_v50, %v4594_v5  ;;  %v4606_v56 = vshrl.u32 %v10223_v12, %v4594_v5 }
 0x94c   :  { %v5876_v55 = vadd.s32 4294967294, %v4530_v32  ;;  %v4609_v4 = vshrl.u32 %v10224_v33, %v4594_v5  ;;  %vm4611_vm14 = vcmp.lt.s32.totalorder %v9380_v19, 1  ;;  %vm4614_vm10 = vcmp.lt.s32.totalorder %v9380_v19, 4 }
 0x94d   :  { %v9391_v22 = vor.u32 %v4597_v40, %v4596_v10  ;;  %v9393_v30 = vor.u32 %v4600_v54, %v4599_v7  ;;  %v4604_v11 = vor.u32 %v4603_v16, %v4602_v21  ;;  %v4607_v35 = vor.u32 %v4606_v56, %v4605_v14 }
 0x94e   :  { %vm5877_vm13 = vcmp.lt.s32.totalorder %v5876_v55, 0  ;;  %v4610_v63 = vor.u32 %v4609_v4, %v4608_v1  ;;  %vm4613_vm7 = vcmp.lt.s32.totalorder %v9380_v19, 3  ;;  %vm4612_vm15 = vcmp.lt.s32.totalorder %v9380_v19, 2 }
 0x94f   :  { %v4533_v15 = vsel %vm5877_vm13, 0, %v5876_v55  ;;  %v4619_v31 = vsel %vm4611_vm14, %v9391_v22, %v9393_v30  ;;  %v4620_v51 = vsel %vm4614_vm10, %v4607_v35, 920167782  ;;  %v4628_v61 = vand.u32 65535, %v9402_v43 }
 0x950   :  { %v4534_v53 = vsub.s32 32, %v4533_v15  ;;  %v4538_v45 = vsub.s32 4294967266, %v4533_v15  ;;  %v4535_v44 = vshll.u32 %v4526_v0, %v4533_v15  ;;  %v4621_v23 = vsel %vm4613_vm7, %v4604_v11, %v4620_v51 }
 0x951   :  { %v4623_v0 = vsel %vm4611_vm14, %v9393_v30, %v4604_v11  ;;  %v4624_v57 = vsel %vm4614_vm10, %v4610_v63, 1326507024  ;;  %v4622_v49 = vsel %vm4612_vm15, %v4619_v31, %v4621_v23  ;;  %v4629_v40 = vshrl.u32 %v9402_v43, 16 }
 0x952   :  { %v4536_v39 = vshrl.u32 %v4518_v59, %v4534_v53  ;;  %v4539_v3 = vadd.s32 127, %v4538_v45  ;;  %v4625_v41 = vsel %vm4613_vm7, %v4607_v35, %v4624_v57  ;;  %v4652_v32 = vand.u32 65535, %v4622_v49 }
 0x953   :  { %v4653_v62 = vshrl.u32 %v4622_v49, 16  ;;  %v4626_v7 = vsel %vm4612_vm15, %v4623_v0, %v4625_v41  ;;  %v4549_v4 = vsel %vm4426_vm8, %v4548_v34, %v9374_v38  ;;  %v4595_v1 = vshrl.u32 %v10182_v52, %v4594_v5 }
 0x954   :  { %v4537_v6 = vor.u32 %v4536_v39, %v4535_v44  ;;  %v4540_v46 = vshll.u32 %v4539_v3, 23  ;;  %v4630_v54 = vand.u32 65535, %v4626_v7  ;;  %v4631_v21 = vshrl.u32 %v4626_v7, 16 }
 0x955   :  { %v4655_v16 = vmul.u32 %v4653_v62, %v4628_v61  ;;  %v4656_v15 = vmul.u32 %v4652_v32, %v4629_v40  ;;  %v4616_v59 = vsel %vm4614_vm10, %v4604_v11, 2102212464  ;;  %v4654_v63 = vmul.u32 %v4652_v32, %v4628_v61 }
 0x956   :  { %v4541_v28 = vor.u32 4788187, %v4540_v46  ;;  %v4544_v10 = vcvt.s32.f32 %v4537_v6  ;;  %v4633_v53 = vmul.u32 %v4631_v21, %v4628_v61  ;;  %v4634_v45 = vmul.u32 %v4630_v54, %v4629_v40 }
 0x957   :  { %v4657_v44 = vmul.u32 %v4653_v62, %v4629_v40  ;;  %v4658_v29 = vshll.u32 %v4655_v16, 16  ;;  %v4632_v39 = vmul.u32 %v4630_v54, %v4628_v61  ;;  %v4635_v3 = vmul.u32 %v4631_v21, %v4629_v40 }
 0x958   :  { %v4542_v55 = vand.u32 2147483647, %v4541_v28  ;;  %v4636_v31 = vshll.u32 %v4633_v53, 16  ;;  %v4660_v6 = vshll.u32 %v4656_v15, 16  ;;  %v4638_v38 = vshll.u32 %v4634_v45, 16 }
 0x959   :  { %vm4662_vm0 = vc.u32 %v4654_v63, %v4658_v29  ;;  %v4664_v51 = vadd.s32 %v4658_v29, %v4654_v63  ;;  %v4659_v49 = vshrl.u32 %v4655_v16, 16  ;;  %v4617_v7 = vsel %vm4613_vm7, %v9393_v30, %v4616_v59 }
 0x95a   :  { %v4545_v56 = vmul.f32 %v4544_v10, %v4542_v55  ;;  %vm4640_vm4 = vc.u32 %v4632_v39, %v4636_v31  ;;  %v4642_v11 = vadd.s32 %v4636_v31, %v4632_v39  ;;  %v4663_v23 = vsel %vm4662_vm0, 1, %v10186_v60 }
 0x95b   :  { %v4641_v57 = vsel %vm4640_vm4, 1, %v10186_v60  ;;  %v4665_v28 = vadd.s32 %v4663_v23, %v4657_v44  ;;  %vm4666_vm2 = vc.u32 %v4664_v51, %v4660_v6  ;;  %v4615_v10 = vsel %vm4611_vm14, %v4595_v1, %v9391_v22 }
 0x95c   :  { %v4546_v35 = vxor.u32 2147483648, %v4545_v56  ;;  %v4643_v34 = vadd.s32 %v4641_v57, %v4635_v3  ;;  %vm4644_vm11 = vc.u32 %v4642_v11, %v4638_v38  ;;  %v4667_v41 = vsel %vm4666_vm2, 1, %v10186_v60 }
 0x95d   :  { %v4645_v62 = vsel %vm4644_vm11, 1, %v10186_v60  ;;  %v4669_v55 = vadd.s32 %v4667_v41, %v4665_v28  ;;  %v4637_v40 = vshrl.u32 %v4633_v53, 16  ;;  %v4661_v16 = vshrl.u32 %v4656_v15, 16 }
 0x95e   :  { %v4547_v46 = vsel %vm4426_vm8, %v4546_v35, %v4545_v56  ;;  %v4647_v54 = vadd.s32 %v4645_v62, %v4643_v34  ;;  %v4551_v63 = vsel %vm9427_vm6, 0, %v4549_v4  ;;  %v4639_v44 = vshrl.u32 %v4634_v45, 16 }
 0x95f   :  { %v4550_v5 = vsel %vm9427_vm6, %v9309_v36, %v4547_v46  ;;  %v4670_v35 = vadd.s32 %v4669_v55, %v4659_v49  ;;  %v4618_v22 = vsel %vm4612_vm15, %v4615_v10, %v4617_v7  ;;  %v4668_v46 = vadd.s32 %v4664_v51, %v4660_v6 }
 0x960   :  { %v4552_v0 = vmul.f32 %v4550_v5, %v4550_v5  ;;  %v4648_v29 = vadd.s32 %v4647_v54, %v4637_v40  ;;  %v4568_v38 = vadd.s32 3, %v4551_v63  ;;  %v4672_v15 = vmul.u32 %v9402_v43, %v4618_v22 }
 0x961   :  { %v4671_v1 = vadd.s32 %v4670_v35, %v4661_v16  ;;  %vm4567_vm15 = vweird.f32 %v9309_v36  ;;  %vm4581_vm0 = vcmp.lt.s32.totalorder %v9371_v42, 0  ;;  %vm4580_vm4 = vcmp.le.f32.partialorder %v4579_v58, 0.7853982 }
 0x962   :  { %v4553_v61 = vmul.f32 -0.001358992, %v4552_v0  ;;  %v4560_v32 = vmul.f32 -0.00019511016, %v4552_v0  ;;  %v4649_v31 = vadd.s32 %v4648_v29, %v4639_v44  ;;  %v4569_v28 = vand.u32 3, %v4568_v38 }
 0x963   :  { %v4675_v53 = vadd.s32 1, %v4671_v1 }
 0x964   :  { %v4554_v21 = vadd.f32 0.041655596, %v4553_v61  ;;  %v4561_v56 = vadd.f32 0.008332121, %v4560_v32  ;;  %vm4674_vm13 = vc.u32 %v4649_v31, %v4668_v46  ;;  %vm4571_vm14 = vcmp.eq.s32.totalorder %v4569_v28, 0 }
 0x965   :  { %v4676_v4 = vsel %vm4674_vm13, %v4675_v53, %v4671_v1  ;;  %vm4574_vm10 = vcmp.eq.s32.totalorder %v4569_v28, 2  ;;  %vm4570_vm7 = vcmp.lt.s32.totalorder %v4569_v28, 2 }
 0x966   :  { %v4555_v39 = vmul.f32 %v4554_v21, %v4552_v0  ;;  %v4562_v3 = vmul.f32 %v4561_v56, %v4552_v0  ;;  %v4677_v45 = vadd.s32 %v4676_v4, %v4672_v15  ;;  %v4673_v56 = vadd.s32 %v4668_v46, %v4649_v31 }
 0x968   :  { %v4556_v30 = vadd.f32 -0.4999988, %v4555_v39  ;;  %v4563_v59 = vadd.f32 -0.16666654, %v4562_v3  ;;  %v4678_v34 = vadd.s32 536870912, %v4677_v45 }
 0x96a   :  { %v4557_v11 = vmul.f32 %v4556_v30, %v4552_v0  ;;  %v4564_v14 = vmul.f32 %v4563_v59, %v4552_v0  ;;  %v4679_v41 = vshrl.u32 %v4678_v34, 30 }
 0x96c   :  { %v4558_v23 = vadd.f32 1.0, %v4557_v11  ;;  %v4565_v57 = vadd.f32 1.0, %v4564_v14  ;;  %v4680_v6 = vshll.u32 %v4679_v41, 30  ;;  %v4703_v46 = vsub.s32 4, %v4679_v41 }
 0x96e   :  { %v4566_v19 = vmul.f32 %v4565_v57, %v4550_v5  ;;  %v4575_v49 = vxor.u32 2147483648, %v4558_v23  ;;  %v4681_v0 = vsub.s32 %v4677_v45, %v4680_v6  ;;  %v4704_v4 = vsel %vm4581_vm0, %v4703_v46, %v4679_v41 }
 0x96f   :  { %v4706_v57 = vsel %vm4580_vm4, 0, %v4704_v4 }
 0x970   :  { %v4572_v61 = vxor.u32 2147483648, %v4566_v19  ;;  %v4576_v32 = vsel %vm4574_vm10, %v4575_v49, %v4566_v19  ;;  %vm4682_vm8 = vcmp.lt.s32.totalorder %v4681_v0, 0  ;;  %v4683_v10 = vsub.s32 0, %v4681_v0 }
 0x972   :  { %v4573_v51 = vsel %vm4571_vm14, %v4558_v23, %v4572_v61  ;;  %v4684_v5 = vsel %vm4682_vm8, %v4683_v10, %v4681_v0  ;;  %v4723_v61 = vadd.s32 3, %v4706_v57  ;;  %vm4722_vm14 = vweird.f32 %v9371_v42 }
 0x973   :  { %v4577_v43 = vsel %vm4570_vm7, %v4573_v51, %v4576_v32  ;;  %v4685_v40 = vclz %v4684_v5  ;;  %v938_v5 = vld [vmem:[%s10095_s11 + $0x10] sm:$0xff]  ;;  %s6011_s11 = smov 14  }
 0x974   :  { %v4578_v62 = vsel %vm4567_vm15, nan, %v4577_v43  ;;  %v4724_v43 = vand.u32 3, %v4723_v61  ;;  %vm4809_vm15 = vcmp.lt.s32.totalorder %v10240_v2, 115 }
 0x975   :  { %v4734_v55 = vmul.f32 %v4578_v62, %v4578_v62  ;;  %v5879_v21 = vadd.s32 4294967294, %v4685_v40 }
 0x976   :  { %vm4726_vm2 = vcmp.eq.s32.totalorder %v4724_v43, 0  ;;  %vm4729_vm11 = vcmp.eq.s32.totalorder %v4724_v43, 2  ;;  %vm4725_vm13 = vcmp.lt.s32.totalorder %v4724_v43, 2 }
 0x977   :  { %v4736_v7 = vmul.f32 %v4734_v55, %v9148_v18  ;;  %vm5880_vm6 = vcmp.lt.s32.totalorder %v5879_v21, 0 }
 0x978   :  { %v4688_v36 = vsel %vm5880_vm6, 0, %v5879_v21 }
 0x979   :  { %v9460_v54 = vadd.f32 %v4736_v7, %v9305_v17  ;;  %v4689_v16 = vsub.s32 32, %v4688_v36  ;;  %v4693_v35 = vsub.s32 4294967266, %v4688_v36  ;;  %v4690_v63 = vshll.u32 %v4681_v0, %v4688_v36 }
 0x97b   :  { %4805 = vrot.lane.b32.xlu0 %v9460_v54, %s6009_s20  ;;  %v4691_v44 = vshrl.u32 %v4673_v56, %v4689_v16  ;;  %v4694_v29 = vadd.s32 127, %v4693_v35  ;;  %v935_v16 = vld [vmem:[%s10097_s13 + $0x10] sm:$0xff]  ;;  %v4793_v35 = vpop.permute.xlu0 %4792 }
 0x97d   :  { %v4692_v39 = vor.u32 %v4691_v44, %v4690_v63  ;;  %v4695_v3 = vshll.u32 %v4694_v29, 23  ;;  %v9522_v63 = vld [vmem:[%s10085_s1] sm:$0x3]  ;;  %v4791_v44 = vpop.permute.xlu2 %4790 }
 0x97e   :  { %vm4812_vm10 = vcmp.lt.s32.totalorder %v9522_v63, 115  ;;  %vm4797_vm7 = vcmp.lt.s32.totalorder %v9522_v63, 119 }
 0x97f   :  { %v4696_v22 = vor.u32 4788187, %v4695_v3  ;;  %v4699_v30 = vcvt.s32.f32 %v4692_v39  ;;  %v4813_v29 = vsel %vm4812_vm10, 1, %v10186_v60  ;;  %v4798_v39 = vsel %vm4797_vm7, 1, %v10186_v60 }
 0x980   :  { %v4814_v3 = vperm.slane %v4813_v29, 0  ;;  %vm4751_vm7 = vcmp.ge.s32.totalorder %v9522_v63, 14 }
 0x981   :  { %v4697_v1 = vand.u32 2147483647, %v4696_v22  ;;  %v4815_v22 = vperm.slane %v4813_v29, 1  ;;  %v4752_v43 = vsel %vm4751_vm7, 1, %v10186_v60 }
 0x982   :  { %vm4816_vm8 = vcmp.eq.s32.totalorder %v4814_v3, 1 }
 0x983   :  { %4774 = vrot.lane.b32.xlu0 %v9460_v54, %s6005_s0  ;;  %v4700_v59 = vmul.f32 %v4699_v30, %v4697_v1  ;;  %v4799_v30 = vperm.slane %v4798_v39, 0  ;;  %vm4817_vm6 = vcmp.eq.s32.totalorder %v4815_v22, 1 }
 0x985   :  { %v4701_v53 = vxor.u32 2147483648, %v4700_v59 }
 0x987   :  { %v4702_v31 = vsel %vm4581_vm0, %v4701_v53, %v4700_v59  ;;  %v4800_v59 = vperm.slane %v4798_v39, 1  ;;  %v4760_v53 = vpop.permute.xlu2 %4759  ;;  %vm10175_vm0 = vcmp.lt.s32.totalorder %v10240_v2, 119 }
 0x988   :  { %v4705_v38 = vsel %vm4580_vm4, %v9371_v42, %v4702_v31  ;;  %v941_v42 = vld [vmem:[%s10099_s15 + $0x10] sm:$0xff]  ;;  %vm9530_vm4 = vcmp.eq.s32.totalorder %v4799_v30, 1  ;;  %v4796_v4 = vsel %vm10175_vm0, %v4793_v35, %v4791_v44 }
 0x989   :  { %v4707_v15 = vmul.f32 %v4705_v38, %v4705_v38 }
 0x98b   :  { %4761 = vrot.lane.b32.xlu0 %v9249_v37, %s6008_s2  ;;  %v4708_v11 = vmul.f32 -0.001358992, %v4707_v15  ;;  %v4715_v14 = vmul.f32 -0.00019511016, %v4707_v15 }
 0x98d   :  { %v4709_v45 = vadd.f32 0.041655596, %v4708_v11  ;;  %v4716_v23 = vadd.f32 0.008332121, %v4715_v14  ;;  %v4795_v14 = vsel %vm10175_vm0, %v4791_v44, %v4793_v35 }
 0x98f   :  { %v4710_v28 = vmul.f32 %v4709_v45, %v4707_v15  ;;  %v4717_v34 = vmul.f32 %v4716_v23, %v4707_v15 }
 0x991   :  { %v4711_v19 = vadd.f32 -0.4999988, %v4710_v28  ;;  %v4718_v49 = vadd.f32 -0.16666654, %v4717_v34 }
 0x993   :  { %v4712_v6 = vmul.f32 %v4711_v19, %v4707_v15  ;;  %v4719_v51 = vmul.f32 %v4718_v49, %v4707_v15  ;;  %4822 = vperm.xlu0 %5953, %v938_v5   ;;  %v10357_v49 = vld [vmem:[#allocation8_spill] sm:$0xff]  ;;  %v4753_v5 = vperm.slane %v4752_v43, 0 }
 0x994   :  { %vm10358_vm10 = vnez %v10357_v49 }
 0x995   :  { %v4713_v32 = vadd.f32 1.0, %v4712_v6  ;;  %v4720_v58 = vadd.f32 1.0, %v4719_v51  ;;  %vm4755_vm7 = vcmp.eq.s32.totalorder %v4753_v5, 1 }
 0x997   :  { %v4721_v0 = vmul.f32 %v4720_v58, %v4705_v38  ;;  %v4730_v62 = vxor.u32 2147483648, %v4713_v32 }
 0x999   :  { %v4727_v55 = vxor.u32 2147483648, %v4721_v0  ;;  %v4731_v10 = vsel %vm4729_vm11, %v4730_v62, %v4721_v0  ;;  %vm4766_vm11 = vcmp.ge.s32.totalorder %v9522_v63, 9 }
 0x99a   :  { %v4767_v61 = vsel %vm4766_vm11, 1, %v10186_v60 }
 0x99b   :  { %v4728_v41 = vsel %vm4726_vm2, %v4713_v32, %v4727_v55  ;;  %5295 = vrot.lane.b32.xlu0 %v9249_v37, %s6010_s22  ;;  %vm9534_vm2 = vcmp.eq.s32.totalorder %v4800_v59, 1  ;;  %v4768_v6 = vperm.slane %v4767_v61, 0  ;;  %v4769_v51 = vperm.slane %v4767_v61, 1  ;;  %v10365_v55 = vld [vmem:[#allocation9_spill] sm:$0xff] }
 0x99c   :  { %v4732_v7 = vsel %vm4725_vm13, %v4728_v41, %v4731_v10  ;;  %vm10354_vm13 = vcmp.lt.s32.totalorder %v10240_v2, 124  ;;  %v10367_v41 = vld [vmem:[#allocation6_spill] sm:$0xff] }
 0x99d   :  { %v4733_v40 = vsel %vm4722_vm14, nan, %v4732_v7  ;;  %vm10355_vm14 = vmmov %vm10354_vm13  ;;  %vm9569_vm11 = vcmp.eq.s32.totalorder %v4769_v51, 1 }
 0x99e   :  { %v4735_v21 = vmul.f32 %v4733_v40, %v4733_v40  ;;  %v4754_v40 = vperm.slane %v4752_v43, 1 }
 0x9a0   :  { %v4737_v36 = vmul.f32 %v4735_v21, %v9148_v18  ;;  %v932_v18 = vld [vmem:[%s10096_s12 + $0x10] sm:$0xff]  ;;  %s6012_s12 = smov 13  }
 0x9a2   :  { %v9478_v56 = vadd.f32 %v4737_v36, %v9367_v8 }
 0x9a3   :  { %5269 = vrot.lane.b32.xlu0 %v9160_v25, %s6006_s25 }
 0x9a4   :  { %4807 = vrot.lane.b32.xlu1 %v9478_v56, %s6009_s20  ;;  %4784 = vrot.lane.b32.xlu2 %v9478_v56, %s6003_s7 }
 0x9ab   :  { %5287 = vrot.lane.b32.xlu0 %v9478_v56, %s6007_s17 }
 0x9ac   :  { %4782 = vrot.lane.b32.xlu1 %v9460_v54, %s6003_s7  ;;  %4746 = vrot.lane.b32.xlu2 %v9478_v56, %s6011_s11 }
 0x9b3   :  { %5263 = vrot.lane.b32.xlu0 %v9478_v56, %s6008_s2 }
 0x9b4   :  { %4776 = vrot.lane.b32.xlu1 %v9478_v56, %s6005_s0  ;;  %5293 = vrot.lane.b32.xlu2 %v9160_v25, %s6010_s22 }
 0x9bb   :  { %5198 = vperm.xlu0 %5953, %v941_v42  }
 0x9bc   :  { %4744 = vrot.lane.b32.xlu1 %v9460_v54, %s6011_s11  ;;  %5279 = vrot.lane.b32.xlu2 %v9249_v37, %s6004_s19 }
 0x9c4   :  { %4870 = vperm.xlu1 %5954, %v932_v18   ;;  %5285 = vrot.lane.b32.xlu2 %v9460_v54, %s6007_s17  ;;  %v9589_v18 = vld [vmem:[%s10094_s10 + $0x10] sm:$0xff] }
 0x9cc   :  { %5189 = vperm.xlu1 %5954, %v935_v16   ;;  %5261 = vrot.lane.b32.xlu2 %v9460_v54, %s6008_s2 }
 0x9d4   :  { %5277 = vrot.lane.b32.xlu1 %v9160_v25, %s6004_s19  ;;  %5248 = vrot.lane.b32.xlu2 %v9249_v37, %s6012_s12 }
 0x9dc   :  { %5271 = vrot.lane.b32.xlu1 %v9249_v37, %s6006_s25 }
 0x9e4   :  { %5246 = vrot.lane.b32.xlu1 %v9160_v25, %s6012_s12 }
 0x9ed   :  { %v4806_v1 = vpop.permute.xlu0 %4805 }
 0x9f5   :  { %v4775_v45 = vpop.permute.xlu0 %4774 }
 0x9fd   :  { %v4762_v58 = vpop.permute.xlu0 %4761 }
 0x9fe   :  { %v4785_v23 = vpop.permute.xlu2 %4784 }
 0xa05   :  { %v9595_v35 = vpop.permute.xlu0 %4822 }
 0xa06   :  { %v4747_v21 = vpop.permute.xlu2 %4746 }
 0xa16   :  { %v4808_v31 = vpop.permute.xlu1 %4807 }
 0xa17   :  { %v4810_v46 = vsel %vm4809_vm15, %v4806_v1, %v4808_v31  ;;  %v4811_v38 = vsel %vm4809_vm15, %v4808_v31, %v4806_v1  ;;  %vm10174_vm15 = vcmp.lt.s32.totalorder %v10240_v2, 9 }
 0xa18   :  { %5883 = vmatpush.msk.msra.mxu2 %vm4816_vm8, %v4810_v46  ;;  %5890 = vmatpush.msk.msra.mxu3 %vm4817_vm6, %v4811_v38  ;;  %vm9565_vm6 = vcmp.eq.s32.totalorder %v4768_v6, 1  ;;  %v4764_v10 = vsel %vm10174_vm15, %v4760_v53, %v4762_v58  ;;  %v4765_v7 = vsel %vm10174_vm15, %v4762_v58, %v4760_v53 }
 0xa1a   :  { %5884 = vmatpush.msk.msra.mxu2 %vm9530_vm4, %v4795_v14  ;;  %5891 = vmatpush.msk.msra.mxu3 %vm9534_vm2, %v4796_v4 }
 0xa1e   :  { %v4783_v57 = vpop.permute.xlu1 %4782 }
 0xa1f   :  { %v4786_v28 = vsel %vm10354_vm13, %v4783_v57, %v4785_v23  ;;  %v4787_v34 = vsel %vm10355_vm14, %v4785_v23, %v4783_v57  ;;  %vm10366_vm13 = vnez %v10365_v55  ;;  %vm10368_vm14 = vnez %v10367_v41 }
 0xa20   :  { %5885 = vmatpush.msk.msra.mxu2 %vm8467_vm5, %v4786_v28  ;;  %5892 = vmatpush.msk.msra.mxu3 %vm10358_vm10, %v4787_v34  ;;  %vm10359_vm5 = vcmp.lt.s32.totalorder %v10240_v2, 5  ;;  %vm4748_vm10 = vcmp.lt.s32.totalorder %v10240_v2, 14 }
 0xa21   :  { %vm10360_vm8 = vmmov %vm10359_vm5 }
 0xa22   :  { %4840 = vmatpush.msra.mxu2 %v9160_v25  ;;  %4860 = vmatpush.msra.mxu3 %v9249_v37 }
 0xa26   :  { %v4777_v32 = vpop.permute.xlu1 %4776 }
 0xa27   :  { %v4778_v0 = vsel %vm10359_vm5, %v4775_v45, %v4777_v32  ;;  %v4779_v62 = vsel %vm10360_vm8, %v4777_v32, %v4775_v45  ;;  %vm4756_vm5 = vcmp.eq.s32.totalorder %v4754_v40, 1  ;;  %vm10369_vm8 = vcmask 457728  }
 0xa28   :  { %5886 = vmatpush.msk.msra.mxu2 %vm10366_vm13, %v4779_v62  ;;  %5893 = vmatpush.msk.msra.mxu3 %vm10368_vm14, %v4778_v0  ;;  %vm10370_vm13 = vmmov %vm10369_vm8 }
 0xa2a   :  { %5887 = vmatpush.msk.msra.mxu2 %vm9565_vm6, %v4765_v7  ;;  %5894 = vmatpush.msk.msra.mxu3 %vm9569_vm11, %v4764_v10 }
 0xa2e   :  { %v4745_v36 = vpop.permute.xlu1 %4744 }
 0xa2f   :  { %v4749_v42 = vsel %vm4748_vm10, %v4745_v36, %v4747_v21  ;;  %v4750_v16 = vsel %vm4748_vm10, %v4747_v21, %v4745_v36 }
 0xa30   :  { %5888 = vmatpush.msk.msra.mxu2 %vm4755_vm7, %v4750_v16  ;;  %5895 = vmatpush.msk.msra.mxu3 %vm4756_vm5, %v4749_v42 }
 0xa31   :  { %5889 = vmatmul.msk.f32.vlgmr.msra.gmra.mxu2 %vm10369_vm8, %v9589_v18  ;;  %5896 = vmatmul.msk.f32.vlgmr.msra.gmra.mxu3 %vm10370_vm13, %v9589_v18 }
 0xa36   :  { %v9603_v22 = vpop.permute.xlu1 %4870 }
 0xab4   :  { %v4845_v44 = vpop.f32.mrf.mxu2  ;;  %v4865_v29 = vpop.f32.mrf.mxu3 }
 0xab5   :  { %v9598_v39 = vadd.f32 %v4845_v44, %v9595_v35  ;;  %v9601_v3 = vadd.f32 %v4865_v29, %v9595_v35 }
 0xab7   :  { %v9607_v1 = vmul.f32 %v9603_v22, %v9598_v39  ;;  %v9611_v30 = vmul.f32 %v9603_v22, %v9601_v3 }
 0xab9   :  { %v10171_v59 = vand.u32 2147483647, %v9607_v1  ;;  %v4878_v53 = vand.u32 2139095040, %v9607_v1  ;;  %v10170_v31 = vand.u32 2147483647, %v9611_v30  ;;  %v5033_v46 = vand.u32 2139095040, %v9611_v30 }
 0xabb   :  { %v4879_v38 = vshrl.u32 %v4878_v53, 23  ;;  %v4882_v14 = vand.u32 8388607, %v10171_v59  ;;  %v5034_v4 = vshrl.u32 %v5033_v46, 23  ;;  %v5037_v57 = vand.u32 8388607, %v10170_v31 }
 0xabd   :  { %v5897_v45 = vadd.s32 4294967169, %v4879_v38  ;;  %v4883_v23 = vor.u32 8388608, %v4882_v14  ;;  %v5900_v28 = vadd.s32 4294967169, %v5034_v4  ;;  %v5038_v61 = vor.u32 8388608, %v5037_v57 }
 0xabf   :  { %v4885_v34 = vadd.s32 1, %v5897_v45  ;;  %v5040_v19 = vadd.s32 1, %v5900_v28  ;;  %v9621_v49 = vshll.u32 %v4883_v23, 8  ;;  %v9626_v62 = vshll.u32 %v5038_v61, 8 }
 0xac1   :  { %vm4886_vm14 = vcmp.gt.s32.totalorder %v4885_v34, 0  ;;  %vm5041_vm10 = vcmp.gt.s32.totalorder %v5040_v19, 0  ;;  %v4924_v43 = vand.u32 65535, %v9621_v49  ;;  %v4925_v7 = vshrl.u32 %v9621_v49, 16 }
 0xac2   :  { %v4887_v6 = vsel %vm4886_vm14, %v4885_v34, 0  ;;  %v5042_v32 = vsel %vm5041_vm10, %v5040_v19, 0 }
 0xac3   :  { %v4889_v51 = vand.u32 31, %v4887_v6  ;;  %v9624_v0 = vand.u32 31, %v5042_v32  ;;  %v9628_v55 = vshrl.u32 %v4887_v6, 5 }
 0xac5   :  { %v4890_v58 = vsub.s32 32, %v4889_v51  ;;  %v4892_v41 = vshll.u32 %v10182_v52, %v4889_v51  ;;  %v4895_v10 = vshll.u32 %v10226_v27, %v4889_v51  ;;  %v4898_v21 = vshll.u32 %v10227_v13, %v4889_v51 }
 0xac6   :  { %v4901_v42 = vshll.u32 %v10225_v50, %v4889_v51  ;;  %v4904_v44 = vshll.u32 %v10223_v12, %v4889_v51  ;;  %v9642_v14 = vsub.s32 32, %v9624_v0  ;;  %vm4907_vm7 = vcmp.lt.s32.totalorder %v9628_v55, 1 }
 0xac7   :  { %v4893_v5 = vshrl.u32 %v10226_v27, %v4890_v58  ;;  %v4896_v40 = vshrl.u32 %v10227_v13, %v4890_v58  ;;  %v4899_v36 = vshrl.u32 %v10225_v50, %v4890_v58  ;;  %v4902_v16 = vshrl.u32 %v10223_v12, %v4890_v58 }
 0xac8   :  { %v4905_v29 = vshrl.u32 %v10224_v33, %v4890_v58  ;;  %vm4908_vm5 = vcmp.lt.s32.totalorder %v9628_v55, 2  ;;  %v4891_v23 = vshrl.u32 %v10182_v52, %v4890_v58  ;;  %vm4910_vm8 = vcmp.lt.s32.totalorder %v9628_v55, 4 }
 0xac9   :  { %v4894_v53 = vor.u32 %v4893_v5, %v4892_v41  ;;  %v4897_v46 = vor.u32 %v4896_v40, %v4895_v10  ;;  %v4900_v38 = vor.u32 %v4899_v36, %v4898_v21  ;;  %v4903_v4 = vor.u32 %v4902_v16, %v4901_v42 }
 0xaca   :  { %v4906_v45 = vor.u32 %v4905_v29, %v4904_v44  ;;  %vm4909_vm13 = vcmp.lt.s32.totalorder %v9628_v55, 3  ;;  %v5047_v61 = vshll.u32 %v10182_v52, %v9624_v0  ;;  %v5048_v41 = vshrl.u32 %v10226_v27, %v9642_v14 }
 0xacb   :  { %v4915_v57 = vsel %vm4907_vm7, %v4894_v53, %v4897_v46  ;;  %v4919_v28 = vsel %vm4907_vm7, %v4897_v46, %v4900_v38  ;;  %v4916_v34 = vsel %vm4910_vm8, %v4903_v4, 920167782  ;;  %v4912_v6 = vsel %vm4910_vm8, %v4900_v38, 2102212464 }
 0xacc   :  { %v4920_v19 = vsel %vm4910_vm8, %v4906_v45, 1326507024  ;;  %v4917_v51 = vsel %vm4909_vm13, %v4900_v38, %v4916_v34  ;;  %v5050_v40 = vshll.u32 %v10226_v27, %v9624_v0  ;;  %v5051_v21 = vshrl.u32 %v10227_v13, %v9642_v14 }
 0xacd   :  { %v4921_v58 = vsel %vm4909_vm13, %v4903_v4, %v4920_v19  ;;  %v4918_v10 = vsel %vm4908_vm5, %v4915_v57, %v4917_v51  ;;  %v4911_v29 = vsel %vm4907_vm7, %v4891_v23, %v4894_v53  ;;  %v4913_v38 = vsel %vm4909_vm13, %v4897_v46, %v4912_v6 }
 0xace   :  { %v4922_v5 = vsel %vm4908_vm5, %v4919_v28, %v4921_v58  ;;  %v4948_v16 = vand.u32 65535, %v4918_v10  ;;  %v4949_v44 = vshrl.u32 %v4918_v10, 16  ;;  %v9673_v4 = vshrl.u32 %v5042_v32, 5 }
 0xacf   :  { %v4926_v36 = vand.u32 65535, %v4922_v5  ;;  %v4927_v42 = vshrl.u32 %v4922_v5, 16  ;;  %v9675_v45 = vor.u32 %v5048_v41, %v5047_v61  ;;  %v9677_v34 = vor.u32 %v5051_v21, %v5050_v40 }
 0xad0   :  { %v5054_v19 = vshrl.u32 %v10225_v50, %v9642_v14  ;;  %v4951_v58 = vmul.u32 %v4949_v44, %v4924_v43  ;;  %v4952_v10 = vmul.u32 %v4948_v16, %v4925_v7  ;;  %v5053_v53 = vshll.u32 %v10227_v13, %v9624_v0 }
 0xad1   :  { %v4929_v57 = vmul.u32 %v4927_v42, %v4924_v43  ;;  %v4930_v28 = vmul.u32 %v4926_v36, %v4925_v7  ;;  %v4928_v51 = vmul.u32 %v4926_v36, %v4924_v43  ;;  %v4931_v23 = vmul.u32 %v4927_v42, %v4925_v7 }
 0xad2   :  { %v4950_v46 = vmul.u32 %v4948_v16, %v4924_v43  ;;  %v4953_v32 = vmul.u32 %v4949_v44, %v4925_v7  ;;  %v4954_v31 = vshll.u32 %v4951_v58, 16  ;;  %v4956_v21 = vshll.u32 %v4952_v10, 16 }
 0xad3   :  { %v4932_v5 = vshll.u32 %v4929_v57, 16  ;;  %v4933_v6 = vshrl.u32 %v4929_v57, 16  ;;  %v4934_v61 = vshll.u32 %v4930_v28, 16  ;;  %v4935_v41 = vshrl.u32 %v4930_v28, 16 }
 0xad4   :  { %v9683_v59 = vor.u32 %v5054_v19, %v5053_v53  ;;  %vm4958_vm10 = vc.u32 %v4950_v46, %v4954_v31  ;;  %v4960_v8 = vadd.s32 %v4954_v31, %v4950_v46  ;;  %v5057_v17 = vshrl.u32 %v10223_v12, %v9642_v14 }
 0xad5   :  { %vm4936_vm14 = vc.u32 %v4928_v51, %v4932_v5  ;;  %v4938_v40 = vadd.s32 %v4932_v5, %v4928_v51  ;;  %v4959_v43 = vsel %vm4958_vm10, 1, %v10186_v60  ;;  %v5056_v7 = vshll.u32 %v10225_v50, %v9624_v0 }
 0xad6   :  { %v4937_v36 = vsel %vm4936_vm14, 1, %v10186_v60  ;;  %v4961_v44 = vadd.s32 %v4959_v43, %v4953_v32  ;;  %vm4962_vm8 = vc.u32 %v4960_v8, %v4956_v21  ;;  %v5059_v57 = vshll.u32 %v10223_v12, %v9624_v0 }
 0xad7   :  { %v4939_v42 = vadd.s32 %v4937_v36, %v4931_v23  ;;  %vm4940_vm7 = vc.u32 %v4938_v40, %v4934_v61  ;;  %v4963_v31 = vsel %vm4962_vm8, 1, %v10186_v60  ;;  %v5058_v19 = vor.u32 %v5057_v17, %v5056_v7 }
 0xad8   :  { %v4941_v16 = vsel %vm4940_vm7, 1, %v10186_v60  ;;  %v5060_v51 = vshrl.u32 %v10224_v33, %v9642_v14  ;;  %v4955_v53 = vshrl.u32 %v4951_v58, 16  ;;  %v4957_v23 = vshrl.u32 %v4952_v10, 16 }
 0xad9   :  { %v4943_v28 = vadd.s32 %v4941_v16, %v4939_v42  ;;  %v9697_v5 = vadd.s32 %v4960_v8, %v4956_v21  ;;  %v4965_v46 = vadd.s32 %v4963_v31, %v4961_v44  ;;  %vm5062_vm13 = vcmp.lt.s32.totalorder %v9673_v4, 1 }
 0xada   :  { %v5061_v40 = vor.u32 %v5060_v51, %v5059_v57  ;;  %vm5065_vm14 = vcmp.lt.s32.totalorder %v9673_v4, 4  ;;  %vm5064_vm10 = vcmp.lt.s32.totalorder %v9673_v4, 3  ;;  %v5070_v17 = vsel %vm5062_vm13, %v9675_v45, %v9677_v34 }
 0xadb   :  { %v4944_v61 = vadd.s32 %v4943_v28, %v4933_v6  ;;  %v4966_v32 = vadd.s32 %v4965_v46, %v4955_v53  ;;  %v5071_v0 = vsel %vm5065_vm14, %v5058_v19, 920167782  ;;  %vm5063_vm7 = vcmp.lt.s32.totalorder %v9673_v4, 2 }
 0xadc   :  { %v5072_v58 = vsel %vm5064_vm10, %v9683_v59, %v5071_v0  ;;  %v5074_v10 = vsel %vm5062_vm13, %v9677_v34, %v9683_v59  ;;  %v4914_v6 = vsel %vm4908_vm5, %v4911_v29, %v4913_v38  ;;  %v5079_v43 = vand.u32 65535, %v9626_v62 }
 0xadd   :  { %v9708_v8 = vadd.s32 %v4944_v61, %v4935_v41  ;;  %v4967_v21 = vadd.s32 %v4966_v32, %v4957_v23  ;;  %v5073_v36 = vsel %vm5063_vm7, %v5070_v17, %v5072_v58  ;;  %v5075_v41 = vsel %vm5065_vm14, %v5061_v40, 1326507024 }
 0xade   :  { %v5076_v42 = vsel %vm5064_vm10, %v5058_v19, %v5075_v41  ;;  %v5103_v7 = vand.u32 65535, %v5073_v36  ;;  %v5080_v29 = vshrl.u32 %v9626_v62, 16  ;;  %v5104_v38 = vshrl.u32 %v5073_v36, 16 }
 0xadf   :  { %vm4970_vm8 = vc.u32 %v9708_v8, %v9697_v5  ;;  %v4971_v16 = vadd.s32 1, %v4967_v21  ;;  %v5077_v55 = vsel %vm5063_vm7, %v5074_v10, %v5076_v42  ;;  %v4968_v44 = vmul.u32 %v9621_v49, %v4914_v6 }
 0xae0   :  { %v5081_v57 = vand.u32 65535, %v5077_v55  ;;  %v5082_v28 = vshrl.u32 %v5077_v55, 16  ;;  %v5106_v51 = vmul.u32 %v5104_v38, %v5079_v43  ;;  %v5107_v53 = vmul.u32 %v5103_v7, %v5080_v29 }
 0xae1   :  { %v4972_v31 = vsel %vm4970_vm8, %v4971_v16, %v4967_v21  ;;  %v5105_v61 = vmul.u32 %v5103_v7, %v5079_v43  ;;  %v5108_v40 = vmul.u32 %v5104_v38, %v5080_v29  ;;  %v5046_v38 = vshrl.u32 %v10182_v52, %v9642_v14 }
 0xae2   :  { %v4973_v23 = vadd.s32 %v4972_v31, %v4968_v44  ;;  %v5084_v46 = vmul.u32 %v5082_v28, %v5079_v43  ;;  %v5085_v19 = vmul.u32 %v5081_v57, %v5080_v29  ;;  %v5109_v32 = vshll.u32 %v5106_v51, 16 }
 0xae3   :  { %v5083_v0 = vmul.u32 %v5081_v57, %v5079_v43  ;;  %v5086_v58 = vmul.u32 %v5082_v28, %v5080_v29  ;;  %v5111_v42 = vshll.u32 %v5107_v53, 16  ;;  %v5067_v43 = vsel %vm5065_vm14, %v9683_v59, 2102212464 }
 0xae4   :  { %v4974_v17 = vadd.s32 536870912, %v4973_v23  ;;  %v5087_v10 = vshll.u32 %v5084_v46, 16  ;;  %v5089_v41 = vshll.u32 %v5085_v19, 16  ;;  %vm5113_vm5 = vc.u32 %v5105_v61, %v5109_v32 }
 0xae5   :  { %v5115_v36 = vadd.s32 %v5109_v32, %v5105_v61  ;;  %v5114_v21 = vsel %vm5113_vm5, 1, %v10186_v60  ;;  %v5088_v31 = vshrl.u32 %v5084_v46, 16  ;;  %v5066_v32 = vsel %vm5062_vm13, %v5046_v38, %v9675_v45 }
 0xae6   :  { %v9733_v49 = vshrl.u32 %v4974_v17, 30  ;;  %vm5091_vm15 = vc.u32 %v5083_v0, %v5087_v10  ;;  %v5093_v6 = vadd.s32 %v5087_v10, %v5083_v0  ;;  %v5116_v55 = vadd.s32 %v5114_v21, %v5108_v40 }
 0xae7   :  { %v5092_v16 = vsel %vm5091_vm15, 1, %v10186_v60  ;;  %vm5117_vm8 = vc.u32 %v5115_v36, %v5111_v42  ;;  %v5068_v59 = vsel %vm5064_vm10, %v9677_v34, %v5067_v43  ;;  %v5110_v17 = vshrl.u32 %v5106_v51, 16 }
 0xae8   :  { %v4976_v7 = vshll.u32 %v9733_v49, 30  ;;  %v5094_v29 = vadd.s32 %v5092_v16, %v5086_v58  ;;  %vm5095_vm0 = vc.u32 %v5093_v6, %v5089_v41  ;;  %v5118_v57 = vsel %vm5117_vm8, 1, %v10186_v60 }
 0xae9   :  { %v5096_v44 = vsel %vm5095_vm0, 1, %v10186_v60  ;;  %v5120_v40 = vadd.s32 %v5118_v57, %v5116_v55  ;;  %v5090_v14 = vshrl.u32 %v5085_v19, 16  ;;  %v5112_v10 = vshrl.u32 %v5107_v53, 16 }
 0xaea   :  { %v4977_v28 = vsub.s32 %v4973_v23, %v4976_v7  ;;  %v5098_v61 = vadd.s32 %v5096_v44, %v5094_v29  ;;  %v5069_v21 = vsel %vm5063_vm7, %v5066_v32, %v5068_v59  ;;  %v5119_v16 = vadd.s32 %v5115_v36, %v5111_v42 }
 0xaeb   :  { %v5121_v41 = vadd.s32 %v5120_v40, %v5110_v17  ;;  %v5123_v34 = vmul.u32 %v9626_v62, %v5069_v21  ;;  %v4969_v53 = vadd.s32 %v9697_v5, %v9708_v8  ;;  %vm4877_vm10 = vcmp.lt.s32.totalorder %v9607_v1, 0 }
 0xaec   :  { %vm4978_vm15 = vcmp.lt.s32.totalorder %v4977_v28, 0  ;;  %v4979_v0 = vsub.s32 0, %v4977_v28  ;;  %v5099_v58 = vadd.s32 %v5098_v61, %v5088_v31  ;;  %v4999_v21 = vsub.s32 4, %v9733_v49 }
 0xaed   :  { %v5122_v55 = vadd.s32 %v5121_v41, %v5112_v10 }
 0xaee   :  { %v4980_v6 = vsel %vm4978_vm15, %v4979_v0, %v4977_v28  ;;  %v5100_v23 = vadd.s32 %v5099_v58, %v5090_v14  ;;  %vm5032_vm15 = vcmp.lt.s32.totalorder %v9611_v30, 0 }
 0xaef   :  { %v4981_v46 = vclz %v4980_v6  ;;  %v5126_v7 = vadd.s32 1, %v5122_v55 }
 0xaf0   :  { %vm5125_vm0 = vc.u32 %v5100_v23, %v5119_v16 }
 0xaf1   :  { %v5898_v45 = vadd.s32 4294967294, %v4981_v46  ;;  %v5127_v51 = vsel %vm5125_vm0, %v5126_v7, %v5122_v55  ;;  %v9766_v46 = vpop.permute.xlu2 %5293  ;;  %vm5300_vm0 = vcmp.lt.s32.totalorder %v9522_v63, 114 }
 0xaf2   :  { %v5128_v19 = vadd.s32 %v5127_v51, %v5123_v34 }
 0xaf3   :  { %vm5899_vm13 = vcmp.lt.s32.totalorder %v5898_v45, 0 }
 0xaf4   :  { %v4984_v43 = vsel %vm5899_vm13, 0, %v5898_v45  ;;  %v5129_v44 = vadd.s32 536870912, %v5128_v19 }
 0xaf5   :  { %v4985_v29 = vsub.s32 32, %v4984_v43  ;;  %v4989_v38 = vsub.s32 4294967266, %v4984_v43  ;;  %v4986_v57 = vshll.u32 %v4977_v28, %v4984_v43  ;;  %v10371_v28 = vand.u32 2147483647, %v9607_v1 }
 0xaf6   :  { %v9756_v42 = vshrl.u32 %v5129_v44, 30  ;;  %v5124_v43 = vadd.s32 %v5119_v16, %v5100_v23 }
 0xaf7   :  { %v4987_v4 = vshrl.u32 %v4969_v53, %v4985_v29  ;;  %v4990_v31 = vadd.s32 127, %v4989_v38  ;;  %vm9762_vm7 = vcmp.le.f32.partialorder %v10371_v28, 0.7853982  ;;  %v5000_v53 = vsel %vm4877_vm10, %v4999_v21, %v9733_v49 }
 0xaf8   :  { %v5131_v40 = vshll.u32 %v9756_v42, 30 }
 0xaf9   :  { %v4988_v36 = vor.u32 %v4987_v4, %v4986_v57  ;;  %v4991_v61 = vshll.u32 %v4990_v31, 23  ;;  %v9773_v4 = vpop.permute.xlu0 %5295  ;;  %v9779_v49 = vpop.permute.xlu2 %5279 }
 0xafa   :  { %v5132_v32 = vsub.s32 %v5128_v19, %v5131_v40 }
 0xafb   :  { %v4992_v62 = vor.u32 4788187, %v4991_v61  ;;  %v4995_v17 = vcvt.s32.f32 %v4988_v36  ;;  %v5002_v61 = vsel %vm9762_vm7, 0, %v5000_v53  ;;  %v10374_v53 = vand.u32 2147483647, %v9611_v30 }
 0xafc   :  { %vm5133_vm14 = vcmp.lt.s32.totalorder %v5132_v32, 0  ;;  %v5134_v0 = vsub.s32 0, %v5132_v32 }
 0xafd   :  { %v4993_v59 = vand.u32 2147483647, %v4992_v62  ;;  %vm9785_vm8 = vcmp.le.f32.partialorder %v10374_v53, 0.7853982 }
 0xafe   :  { %v5135_v5 = vsel %vm5133_vm14, %v5134_v0, %v5132_v32 }
 0xaff   :  { %v4996_v14 = vmul.f32 %v4995_v17, %v4993_v59  ;;  %v5136_v58 = vclz %v5135_v5  ;;  %v9777_v59 = vpop.permute.xlu1 %5189 }
 0xb01   :  { %v4997_v8 = vxor.u32 2147483648, %v4996_v14  ;;  %v5901_v6 = vadd.s32 4294967294, %v5136_v58 }
 0xb03   :  { %v4998_v41 = vsel %vm4877_vm10, %v4997_v8, %v4996_v14  ;;  %vm5902_vm5 = vcmp.lt.s32.totalorder %v5901_v6, 0  ;;  %v5019_v14 = vadd.s32 3, %v5002_v61 }
 0xb04   :  { %v5001_v55 = vsel %vm9762_vm7, %v9607_v1, %v4998_v41  ;;  %v5139_v7 = vsel %vm5902_vm5, 0, %v5901_v6  ;;  %vm5018_vm7 = vweird.f32 %v9607_v1  ;;  %vm5297_vm5 = vcmp.lt.s32.totalorder %v10240_v2, 114 }
 0xb05   :  { %v5003_v45 = vmul.f32 %v5001_v55, %v5001_v55  ;;  %v5140_v19 = vsub.s32 32, %v5139_v7  ;;  %v5144_v29 = vsub.s32 4294967266, %v5139_v7  ;;  %v5141_v31 = vshll.u32 %v5132_v32, %v5139_v7 }
 0xb06   :  { %v5020_v10 = vand.u32 3, %v5019_v14  ;;  %v5299_v25 = vsel %vm5297_vm5, %v9773_v4, %v9766_v46 }
 0xb07   :  { %v5004_v34 = vmul.f32 -0.001358992, %v5003_v45  ;;  %v5011_v51 = vmul.f32 -0.00019511016, %v5003_v45  ;;  %v5142_v57 = vshrl.u32 %v5124_v43, %v5140_v19  ;;  %v5145_v36 = vadd.s32 127, %v5144_v29 }
 0xb08   :  { %vm5021_vm13 = vcmp.lt.s32.totalorder %v5020_v10, 2  ;;  %vm5022_vm14 = vcmp.eq.s32.totalorder %v5020_v10, 0  ;;  %vm5025_vm10 = vcmp.eq.s32.totalorder %v5020_v10, 2 }
 0xb09   :  { %v5005_v38 = vadd.f32 0.041655596, %v5004_v34  ;;  %v5012_v44 = vadd.f32 0.008332121, %v5011_v51  ;;  %v5143_v17 = vor.u32 %v5142_v57, %v5141_v31  ;;  %v5146_v23 = vshll.u32 %v5145_v36, 23  ;;  %v9781_v51 = vpop.permute.xlu0 %5269  ;;  %v9799_v36 = vpop.permute.xlu2 %5285 }
 0xb0a   :  { %v5154_v57 = vsub.s32 4, %v9756_v42 }
 0xb0b   :  { %v5006_v40 = vmul.f32 %v5005_v38, %v5003_v45  ;;  %v5013_v62 = vmul.f32 %v5012_v44, %v5003_v45  ;;  %v5147_v5 = vor.u32 4788187, %v5146_v23  ;;  %v5150_v32 = vcvt.s32.f32 %v5143_v17 }
 0xb0c   :  { %v5155_v14 = vsel %vm5032_vm15, %v5154_v57, %v9756_v42  ;;  %v9817_v42 = vld [vmem:[%s10098_s14 + $0x10] sm:$0xff]  ;;  %s6013_s14 = smov [#allocation2]  }
 0xb0d   :  { %v5007_v16 = vadd.f32 -0.4999988, %v5006_v40  ;;  %v5014_v0 = vadd.f32 -0.16666654, %v5013_v62  ;;  %v5148_v28 = vand.u32 2147483647, %v5147_v5 }
 0xb0e   :  { %v9803_v62 = vsel %vm5300_vm0, 1, %v10186_v60  ;;  %vm5253_vm0 = vcmp.ge.s32.totalorder %v9522_v63, 13  ;;  %s5717_s25 = sshll.u32 %s6013_s14, 4  ;;  %s5718_s25 = int_to_ptr.vmem [resolvable:$true] %s5717_s25 }
 0xb0f   :  { %v5008_v8 = vmul.f32 %v5007_v16, %v5003_v45  ;;  %v5015_v58 = vmul.f32 %v5014_v0, %v5003_v45  ;;  %v5151_v21 = vmul.f32 %v5150_v32, %v5148_v28  ;;  %v9791_v45 = vpop.permute.xlu1 %5277  ;;  %v5302_v5 = vperm.slane %v9803_v62, 0 }
 0xb10   :  { %v5254_v57 = vsel %vm5253_vm0, 1, %v10186_v60  ;;  %vm5173_vm0 = vweird.f32 %v9611_v30 }
 0xb11   :  { %v5009_v41 = vadd.f32 1.0, %v5008_v8  ;;  %v5016_v6 = vadd.f32 1.0, %v5015_v58  ;;  %v5152_v43 = vxor.u32 2147483648, %v5151_v21  ;;  %v5288_v1 = vpop.permute.xlu0 %5287 }
 0xb13   :  { %v5017_v7 = vmul.f32 %v5016_v6, %v5001_v55  ;;  %v5026_v34 = vxor.u32 2147483648, %v5009_v41  ;;  %v5153_v55 = vsel %vm5032_vm15, %v5152_v43, %v5151_v21  ;;  %vm5304_vm15 = vcmp.eq.s32.totalorder %v5302_v5, 1 }
 0xb14   :  { %v5156_v31 = vsel %vm9785_vm8, %v9611_v30, %v5153_v55 }
 0xb15   :  { %v5023_v19 = vxor.u32 2147483648, %v5017_v7  ;;  %v5027_v44 = vsel %vm5025_vm10, %v5026_v34, %v5017_v7  ;;  %v5158_v40 = vmul.f32 %v5156_v31, %v5156_v31 }
 0xb17   :  { %v5024_v38 = vsel %vm5022_vm14, %v5009_v41, %v5023_v19  ;;  %v5159_v16 = vmul.f32 -0.001358992, %v5158_v40  ;;  %v5166_v0 = vmul.f32 -0.00019511016, %v5158_v40  ;;  %v5157_v41 = vsel %vm9785_vm8, 0, %v5155_v14  ;;  %v5272_v21 = vpop.permute.xlu1 %5271  ;;  %v5262_v19 = vpop.permute.xlu2 %5261 }
 0xb18   :  { %v5028_v61 = vsel %vm5021_vm13, %v5024_v38, %v5027_v44  ;;  %v5174_v43 = vadd.s32 3, %v5157_v41  ;;  %vm10377_vm8 = vcmask 64512   ;;  %vm10378_vm13 = vcmp.lt.s32.totalorder %v10240_v2, 119 }
 0xb19   :  { %v5029_v17 = vsel %vm5018_vm7, nan, %v5028_v61  ;;  %v5160_v58 = vadd.f32 0.041655596, %v5159_v16  ;;  %v5167_v28 = vadd.f32 0.008332121, %v5166_v0  ;;  %v5289_v55 = vsel %vm10378_vm13, %v9799_v36, %v5288_v1  ;;  %v5264_v16 = vpop.permute.xlu0 %5263 }
 0xb1a   :  { %v5185_v23 = vmul.f32 %v5029_v17, %v5029_v17  ;;  %vm10379_vm14 = vcmp.lt.s32.totalorder %v10240_v2, 123  ;;  %v5175_v61 = vand.u32 3, %v5174_v43  ;;  %v5303_v41 = vperm.slane %v9803_v62, 1 }
 0xb1b   :  { %v5161_v6 = vmul.f32 %v5160_v58, %v5158_v40  ;;  %v5168_v10 = vmul.f32 %v5167_v28, %v5158_v40  ;;  %v5281_v63 = vsel %vm10379_vm14, %v9791_v45, %v9779_v49 }
 0xb1c   :  { %v5192_v8 = vmul.f32 %v9777_v59, %v5185_v23  ;;  %v5255_v23 = vperm.slane %v5254_v57, 0  ;;  %vm5177_vm10 = vcmp.eq.s32.totalorder %v5175_v61, 0  ;;  %vm5180_vm7 = vcmp.eq.s32.totalorder %v5175_v61, 2 }
 0xb1d   :  { %v5162_v7 = vadd.f32 -0.4999988, %v5161_v6  ;;  %v5169_v34 = vadd.f32 -0.16666654, %v5168_v10  ;;  %vm5305_vm14 = vcmp.eq.s32.totalorder %v5303_v41, 1 }
 0xb1e   :  { %v5194_v32 = vadd.f32 %v5192_v8, %v9598_v39  ;;  %v5298_v39 = vsel %vm5297_vm5, %v9766_v46, %v9773_v4  ;;  %vm5257_vm13 = vcmp.eq.s32.totalorder %v5255_v23, 1  ;;  %v5256_v46 = vperm.slane %v5254_v57, 1 }
 0xb1f   :  { %v5163_v53 = vmul.f32 %v5162_v7, %v5158_v40  ;;  %v5170_v29 = vmul.f32 %v5169_v34, %v5158_v40  ;;  %v5247_v14 = vpop.permute.xlu1 %5246  ;;  %v5249_v8 = vpop.permute.xlu2 %5248  ;;  %vm10386_vm5 = vcmp.lt.s32.totalorder %v10240_v2, 4 }
 0xb20   :  { %5219 = vmatpush.msrb.mxu0 %v5194_v32  ;;  %v5273_v4 = vsel %vm10386_vm5, %v9781_v51, %v5272_v21 }
 0xb21   :  { %5903 = vmatmul.msk.f32.vlgmr.msrb.gmra.mxu0 %vm10377_vm8, %v9817_v42  ;;  %v5164_v38 = vadd.f32 1.0, %v5163_v53  ;;  %v5171_v44 = vadd.f32 1.0, %v5170_v29  ;;  %vm5176_vm8 = vcmp.lt.s32.totalorder %v5175_v61, 2 }
 0xb22   :  { %5905 = vmatpush.msk.msra.mxu0 %vm5304_vm15, %v5298_v39  ;;  %vm5250_vm15 = vcmp.lt.s32.totalorder %v10240_v2, 13 }
 0xb23   :  { %v5172_v17 = vmul.f32 %v5171_v44, %v5156_v31  ;;  %v5181_v40 = vxor.u32 2147483648, %v5164_v38  ;;  %v5252_v28 = vsel %vm5250_vm15, %v5249_v8, %v5247_v14  ;;  %v5251_v48 = vsel %vm5250_vm15, %v5247_v14, %v5249_v8 }
 0xb24   :  { %5906 = vmatpush.msk.msra.mxu0 %vm9530_vm4, %v5289_v55  ;;  %vm10380_vm4 = vcmp.lt.s32.totalorder %v10240_v2, 4 }
 0xb25   :  { %v5178_v0 = vxor.u32 2147483648, %v5172_v17  ;;  %v5274_v15 = vsel %vm10380_vm4, %v5272_v21, %v9781_v51  ;;  %v5182_v5 = vsel %vm5180_vm7, %v5181_v40, %v5172_v17  ;;  %vm10384_vm4 = vcmp.lt.s32.totalorder %v10240_v2, 119 }
 0xb26   :  { %5907 = vmatpush.msk.msra.mxu0 %vm8787_vm12, %v5281_v63  ;;  %vm10381_vm12 = vcmp.lt.s32.totalorder %v10240_v2, 9  ;;  %v5290_v62 = vsel %vm10384_vm4, %v5288_v1, %v9799_v36  ;;  %vm5258_vm7 = vcmp.eq.s32.totalorder %v5256_v46, 1 }
 0xb27   :  { %v5179_v31 = vsel %vm5177_vm10, %v5164_v38, %v5178_v0  ;;  %v5266_v20 = vsel %vm10381_vm12, %v5264_v16, %v5262_v19  ;;  %vm10385_vm10 = vcmp.lt.s32.totalorder %v10240_v2, 123 }
 0xb28   :  { %5320 = vmatpush.msra.mxu0 %v9460_v54  ;;  %v5183_v54 = vsel %vm5176_vm8, %v5179_v31, %v5182_v5 }
 0xb29   :  { %v5184_v58 = vsel %vm5173_vm0, nan, %v5183_v54 }
 0xb2a   :  { %5908 = vmatpush.msk.msra.mxu0 %vm8821_vm3, %v5274_v15  ;;  %v5186_v32 = vmul.f32 %v5184_v58, %v5184_v58  ;;  %vm10382_vm3 = vcmask 457728  }
 0xb2c   :  { %5909 = vmatpush.msk.msra.mxu0 %vm9565_vm6, %v5266_v20  ;;  %v5193_v26 = vmul.f32 %v9777_v59, %v5186_v32  ;;  %vm10383_vm6 = vcmask 64512  }
 0xb2e   :  { %5910 = vmatpush.msk.msra.mxu0 %vm5257_vm13, %v5252_v28  ;;  %v5195_v30 = vadd.f32 %v5193_v26, %v9601_v3  ;;  %v5282_v3 = vsel %vm10385_vm10, %v9779_v49, %v9791_v45 }
 0xb2f   :  { %5911 = vmatmul.msk.f32.vlgmr.msra.gmra.mxu0 %vm10382_vm3, %v9589_v18 }
 0xb30   :  { %5239 = vmatpush.msrb.mxu1 %v5195_v30 }
 0xb31   :  { %5904 = vmatmul.msk.f32.vlgmr.msrb.gmra.mxu1 %vm10383_vm6, %v9817_v42 }
 0xb32   :  { %5912 = vmatpush.msk.msra.mxu1 %vm5305_vm14, %v5299_v25 }
 0xb34   :  { %5913 = vmatpush.msk.msra.mxu1 %vm9534_vm2, %v5290_v62  ;;  %vm10387_vm2 = vmmov %vm10381_vm12 }
 0xb35   :  { %v5265_v11 = vsel %vm10387_vm2, %v5262_v19, %v5264_v16 }
 0xb36   :  { %5914 = vmatpush.msk.msra.mxu1 %vm8836_vm9, %v5282_v3  ;;  %vm10388_vm9 = vmmov %vm10382_vm3 }
 0xb38   :  { %5340 = vmatpush.msra.mxu1 %v9478_v56  ;;  %v9888_v56 = vpop.permute.xlu0 %5198 }
 0xb3a   :  { %5915 = vmatpush.msk.msra.mxu1 %vm8866_vm1, %v5273_v4 }
 0xb3c   :  { %5916 = vmatpush.msk.msra.mxu1 %vm9569_vm11, %v5265_v11 }
 0xb3e   :  { %5917 = vmatpush.msk.msra.mxu1 %vm5258_vm7, %v5251_v48 }
 0xb3f   :  { %5918 = vmatmul.msk.f32.vlgmr.msra.gmra.mxu1 %vm10388_vm9, %v9589_v18 }
 0xb9e   :  { %v5221_v49 = vpop.f32.mrf.mxu0 }
 0xb9f   :  { %v5222_v9 = vadd.f32 %v5221_v49, %v9888_v56 }
 0xba1   :  { %v5244_v51 = vadd.f32 %v5222_v9, %v8882_v24 }
 0xba3   :  { %5708 = vst [vmem:[#allocation2] sm:$0xff] %v5244_v51 }
 0xbac   :  { %v5325_v45 = vpop.f32.mrf.mxu0 }
 0xbad   :  { %v9893_v36 = vadd.f32 %v5325_v45, %v9595_v35 }
 0xbae   :  { %v5241_v37 = vpop.f32.mrf.mxu1 }
 0xbaf   :  { %v9897_v2 = vmul.f32 %v9893_v36, %v9603_v22  ;;  %v5242_v18 = vadd.f32 %v5241_v37, %v9888_v56 }
 0xbb1   :  { %v5353_v1 = vand.u32 2139095040, %v9897_v2  ;;  %v5245_v10 = vadd.f32 %v5242_v18, %v8921_v47  ;;  %v5350_v24 = vand.u32 2147483647, %v9897_v2 }
 0xbb3   :  { %v5354_v6 = vshrl.u32 %v5353_v1, 23  ;;  %5709 = vst [vmem:[#allocation2 + $0x8] sm:$0xff] %v5245_v10  ;;  %v5357_v34 = vand.u32 8388607, %v5350_v24 }
 0xbb5   :  { %v5919_v21 = vadd.s32 4294967169, %v5354_v6  ;;  %v5358_v53 = vor.u32 8388608, %v5357_v34 }
 0xbb7   :  { %v5360_v7 = vadd.s32 1, %v5919_v21  ;;  %v9921_v54 = vshll.u32 %v5358_v53, 8 }
 0xbb9   :  { %vm5361_vm1 = vcmp.gt.s32.totalorder %v5360_v7, 0  ;;  %v5399_v62 = vand.u32 65535, %v9921_v54  ;;  %v5400_v3 = vshrl.u32 %v9921_v54, 16 }
 0xbba   :  { %v5362_v39 = vsel %vm5361_vm1, %v5360_v7, 0 }
 0xbbb   :  { %v5364_v43 = vand.u32 31, %v5362_v39  ;;  %v9905_v29 = vshrl.u32 %v5362_v39, 5 }
 0xbbc   :  { %v5345_v61 = vpop.f32.mrf.mxu1 }
 0xbbd   :  { %v5365_v19 = vsub.s32 32, %v5364_v43  ;;  %v5367_v55 = vshll.u32 %v10182_v52, %v5364_v43  ;;  %v5370_v38 = vshll.u32 %v10226_v27, %v5364_v43  ;;  %v5373_v57 = vshll.u32 %v10227_v13, %v5364_v43 }
 0xbbe   :  { %v5376_v17 = vshll.u32 %v10225_v50, %v5364_v43  ;;  %v5379_v23 = vshll.u32 %v10223_v12, %v5364_v43  ;;  %v9918_v31 = vadd.f32 %v5345_v61, %v9595_v35  ;;  %vm5382_vm11 = vcmp.lt.s32.totalorder %v9905_v29, 1 }
 0xbbf   :  { %v5368_v47 = vshrl.u32 %v10226_v27, %v5365_v19  ;;  %v5371_v44 = vshrl.u32 %v10227_v13, %v5365_v19  ;;  %v5374_v63 = vshrl.u32 %v10225_v50, %v5365_v19  ;;  %v5377_v40 = vshrl.u32 %v10223_v12, %v5365_v19 }
 0xbc0   :  { %v5380_v16 = vshrl.u32 %v10224_v33, %v5365_v19  ;;  %vm5385_vm15 = vcmp.lt.s32.totalorder %v9905_v29, 4  ;;  %vm5384_vm8 = vcmp.lt.s32.totalorder %v9905_v29, 3  ;;  %vm5383_vm12 = vcmp.lt.s32.totalorder %v9905_v29, 2 }
 0xbc1   :  { %v5369_v0 = vor.u32 %v5368_v47, %v5367_v55  ;;  %v5372_v15 = vor.u32 %v5371_v44, %v5370_v38  ;;  %v5375_v14 = vor.u32 %v5374_v63, %v5373_v57  ;;  %v5378_v5 = vor.u32 %v5377_v40, %v5376_v17 }
 0xbc2   :  { %v5381_v20 = vor.u32 %v5380_v16, %v5379_v23  ;;  %v9940_v26 = vmul.f32 %v9918_v31, %v9603_v22  ;;  %v5366_v49 = vshrl.u32 %v10182_v52, %v5365_v19 }
 0xbc3   :  { %v5390_v8 = vsel %vm5382_vm11, %v5369_v0, %v5372_v15  ;;  %v5394_v58 = vsel %vm5382_vm11, %v5372_v15, %v5375_v14  ;;  %v5391_v35 = vsel %vm5385_vm15, %v5378_v5, 920167782  ;;  %v5387_v22 = vsel %vm5385_vm15, %v5375_v14, 2102212464 }
 0xbc4   :  { %v5395_v28 = vsel %vm5385_vm15, %v5381_v20, 1326507024  ;;  %v5392_v32 = vsel %vm5384_vm8, %v5375_v14, %v5391_v35  ;;  %v5508_v45 = vand.u32 2139095040, %v9940_v26  ;;  %v5386_v37 = vsel %vm5382_vm11, %v5366_v49, %v5369_v0 }
 0xbc5   :  { %v5396_v41 = vsel %vm5384_vm8, %v5378_v5, %v5395_v28  ;;  %v5393_v30 = vsel %vm5383_vm12, %v5390_v8, %v5392_v32  ;;  %v5388_v6 = vsel %vm5384_vm8, %v5372_v15, %v5387_v22  ;;  %v5505_v7 = vand.u32 2147483647, %v9940_v26 }
 0xbc6   :  { %v5397_v25 = vsel %vm5383_vm12, %v5394_v58, %v5396_v41  ;;  %v5423_v11 = vand.u32 65535, %v5393_v30  ;;  %v5424_v48 = vshrl.u32 %v5393_v30, 16  ;;  %v5509_v38 = vshrl.u32 %v5508_v45, 23 }
 0xbc7   :  { %v5401_v46 = vand.u32 65535, %v5397_v25  ;;  %v5402_v4 = vshrl.u32 %v5397_v25, 16  ;;  %v5389_v5 = vsel %vm5383_vm12, %v5386_v37, %v5388_v6  ;;  %v5512_v28 = vand.u32 8388607, %v5505_v7 }
 0xbc8   :  { %v5426_v1 = vmul.u32 %v5424_v48, %v5399_v62  ;;  %v5427_v18 = vmul.u32 %v5423_v11, %v5400_v3  ;;  %v5425_v39 = vmul.u32 %v5423_v11, %v5399_v62  ;;  %v5428_v43 = vmul.u32 %v5424_v48, %v5400_v3 }
 0xbc9   :  { %v5404_v9 = vmul.u32 %v5402_v4, %v5399_v62  ;;  %v5405_v51 = vmul.u32 %v5401_v46, %v5400_v3  ;;  %v5403_v10 = vmul.u32 %v5401_v46, %v5399_v62  ;;  %v5406_v34 = vmul.u32 %v5402_v4, %v5400_v3 }
 0xbca   :  { %v5429_v19 = vshll.u32 %v5426_v1, 16  ;;  %v5431_v44 = vshll.u32 %v5427_v18, 16  ;;  %v5922_v17 = vadd.s32 4294967169, %v5509_v38  ;;  %v5430_v20 = vshrl.u32 %v5426_v1, 16 }
 0xbcb   :  { %v5407_v21 = vshll.u32 %v5404_v9, 16  ;;  %v5409_v53 = vshll.u32 %v5405_v51, 16  ;;  %v5408_v16 = vshrl.u32 %v5404_v9, 16  ;;  %v5410_v58 = vshrl.u32 %v5405_v51, 16 }
 0xbcc   :  { %vm5433_vm13 = vc.u32 %v5425_v39, %v5429_v19  ;;  %v5435_v57 = vadd.s32 %v5429_v19, %v5425_v39  ;;  %v5515_v14 = vadd.s32 1, %v5922_v17  ;;  %v5432_v32 = vshrl.u32 %v5427_v18, 16 }
 0xbcd   :  { %vm5411_vm0 = vc.u32 %v5403_v10, %v5407_v21  ;;  %v5413_v55 = vadd.s32 %v5407_v21, %v5403_v10  ;;  %v5434_v61 = vsel %vm5433_vm13, 1, %v10186_v60  ;;  %v5443_v29 = vmul.u32 %v9921_v54, %v5389_v5 }
 0xbce   :  { %v5412_v47 = vsel %vm5411_vm0, 1, %v10186_v60  ;;  %v5436_v23 = vadd.s32 %v5434_v61, %v5428_v43  ;;  %vm5437_vm14 = vc.u32 %v5435_v57, %v5431_v44  ;;  %vm5516_vm6 = vcmp.gt.s32.totalorder %v5515_v14, 0 }
 0xbcf   :  { %v5414_v63 = vadd.s32 %v5412_v47, %v5406_v34  ;;  %vm5415_vm3 = vc.u32 %v5413_v55, %v5409_v53  ;;  %v5438_v15 = vsel %vm5437_vm14, 1, %v10186_v60  ;;  %v5517_v30 = vsel %vm5516_vm6, %v5515_v14, 0 }
 0xbd0   :  { %v5416_v40 = vsel %vm5415_vm3, 1, %v10186_v60  ;;  %v5440_v8 = vadd.s32 %v5438_v15, %v5436_v23  ;;  %v9967_v62 = vadd.s32 %v5435_v57, %v5431_v44  ;;  %v5519_v3 = vand.u32 31, %v5517_v30 }
 0xbd1   :  { %v5418_v0 = vadd.s32 %v5416_v40, %v5414_v63  ;;  %v5513_v4 = vor.u32 8388608, %v5512_v28  ;;  %v9972_v11 = vshrl.u32 %v5517_v30, 5  ;;  %vm5352_vm13 = vcmp.lt.s32.totalorder %v9897_v2, 0 }
 0xbd2   :  { %v5441_v41 = vadd.s32 %v5440_v8, %v5430_v20  ;;  %v9974_v48 = vsub.s32 32, %v5519_v3  ;;  %v5522_v22 = vshll.u32 %v10182_v52, %v5519_v3  ;;  %v5525_v9 = vshll.u32 %v10226_v27, %v5519_v3 }
 0xbd3   :  { %v5419_v35 = vadd.s32 %v5418_v0, %v5408_v16  ;;  %v5528_v51 = vshll.u32 %v10227_v13, %v5519_v3  ;;  %v5531_v1 = vshll.u32 %v10225_v50, %v5519_v3  ;;  %v5534_v10 = vshll.u32 %v10223_v12, %v5519_v3 }
 0xbd4   :  { %v5442_v46 = vadd.s32 %v5441_v41, %v5432_v32  ;;  %v5523_v45 = vshrl.u32 %v10226_v27, %v9974_v48  ;;  %v5526_v54 = vshrl.u32 %v10227_v13, %v9974_v48  ;;  %v5529_v37 = vshrl.u32 %v10225_v50, %v9974_v48 }
 0xbd5   :  { %v9965_v25 = vadd.s32 %v5419_v35, %v5410_v58  ;;  %v5532_v6 = vshrl.u32 %v10223_v12, %v9974_v48  ;;  %v5535_v21 = vshrl.u32 %v10224_v33, %v9974_v48  ;;  %vm5537_vm10 = vcmp.lt.s32.totalorder %v9972_v11, 1 }
 0xbd6   :  { %v5446_v49 = vadd.s32 1, %v5442_v46  ;;  %v9991_v39 = vor.u32 %v5523_v45, %v5522_v22  ;;  %v9993_v27 = vor.u32 %v5526_v54, %v5525_v9  ;;  %v5530_v13 = vor.u32 %v5529_v37, %v5528_v51 }
 0xbd7   :  { %vm5445_vm4 = vc.u32 %v9965_v25, %v9967_v62  ;;  %v5533_v43 = vor.u32 %v5532_v6, %v5531_v1  ;;  %v5536_v19 = vor.u32 %v5535_v21, %v5534_v10  ;;  %vm5540_vm5 = vcmp.lt.s32.totalorder %v9972_v11, 4 }
 0xbd8   :  { %v5447_v18 = vsel %vm5445_vm4, %v5446_v49, %v5442_v46  ;;  %v9997_v50 = vshll.u32 %v5513_v4, 8  ;;  %vm5539_vm2 = vcmp.lt.s32.totalorder %v9972_v11, 3  ;;  %v5545_v12 = vsel %vm5537_vm10, %v9991_v39, %v9993_v27 }
 0xbd9   :  { %v5448_v34 = vadd.s32 %v5447_v18, %v5443_v29  ;;  %v5546_v33 = vsel %vm5540_vm5, %v5533_v43, 920167782  ;;  %v5549_v55 = vsel %vm5537_vm10, %v9993_v27, %v5530_v13  ;;  %vm5538_vm7 = vcmp.lt.s32.totalorder %v9972_v11, 2 }
 0xbda   :  { %v5547_v47 = vsel %vm5539_vm2, %v5530_v13, %v5546_v33  ;;  %v5550_v44 = vsel %vm5540_vm5, %v5536_v19, 1326507024  ;;  %v5554_v40 = vand.u32 65535, %v9997_v50  ;;  %v5555_v23 = vshrl.u32 %v9997_v50, 16 }
 0xbdb   :  { %v5449_v53 = vadd.s32 536870912, %v5448_v34  ;;  %v5548_v57 = vsel %vm5538_vm7, %v5545_v12, %v5547_v47  ;;  %v5551_v63 = vsel %vm5539_vm2, %v5533_v43, %v5550_v44  ;;  %v5444_v54 = vadd.s32 %v9967_v62, %v9965_v25 }
 0xbdc   :  { %v5552_v17 = vsel %vm5538_vm7, %v5549_v55, %v5551_v63  ;;  %v5579_v14 = vshrl.u32 %v5548_v57, 16  ;;  %v5578_v58 = vand.u32 65535, %v5548_v57  ;;  %v5521_v12 = vshrl.u32 %v10182_v52, %v9974_v48 }
 0xbdd   :  { %v10009_v38 = vshrl.u32 %v5449_v53, 30  ;;  %v5556_v16 = vand.u32 65535, %v5552_v17  ;;  %v5557_v0 = vshrl.u32 %v5552_v17, 16  ;;  %v5542_v25 = vsel %vm5540_vm5, %v5530_v13, 2102212464 }
 0xbde   :  { %v5581_v30 = vmul.u32 %v5579_v14, %v5554_v40  ;;  %v5580_v49 = vmul.u32 %v5578_v58, %v5554_v40  ;;  %v5582_v22 = vmul.u32 %v5578_v58, %v5555_v23  ;;  %v5583_v21 = vmul.u32 %v5579_v14, %v5555_v23 }
 0xbdf   :  { %v5451_v61 = vshll.u32 %v10009_v38, 30  ;;  %v5559_v5 = vmul.u32 %v5557_v0, %v5554_v40  ;;  %v5560_v20 = vmul.u32 %v5556_v16, %v5555_v23  ;;  %v5558_v35 = vmul.u32 %v5556_v16, %v5554_v40 }
 0xbe0   :  { %v5561_v41 = vmul.u32 %v5557_v0, %v5555_v23  ;;  %v5584_v45 = vshll.u32 %v5581_v30, 16  ;;  %v5585_v17 = vshrl.u32 %v5581_v30, 16  ;;  %v5543_v48 = vsel %vm5539_vm2, %v9993_v27, %v5542_v25 }
 0xbe1   :  { %v5452_v15 = vsub.s32 %v5448_v34, %v5451_v61  ;;  %v5562_v28 = vshll.u32 %v5559_v5, 16  ;;  %v5564_v46 = vshll.u32 %v5560_v20, 16  ;;  %v5563_v37 = vshrl.u32 %v5559_v5, 16 }
 0xbe2   :  { %vm5588_vm8 = vc.u32 %v5580_v49, %v5584_v45  ;;  %v5590_v6 = vadd.s32 %v5584_v45, %v5580_v49  ;;  %v5586_v34 = vshll.u32 %v5582_v22, 16  ;;  %v5565_v62 = vshrl.u32 %v5560_v20, 16 }
 0xbe3   :  { %vm5453_vm9 = vcmp.lt.s32.totalorder %v5452_v15, 0  ;;  %v5454_v8 = vsub.s32 0, %v5452_v15  ;;  %vm5566_vm1 = vc.u32 %v5558_v35, %v5562_v28  ;;  %v5568_v29 = vadd.s32 %v5562_v28, %v5558_v35 }
 0xbe4   :  { %v5567_v4 = vsel %vm5566_vm1, 1, %v10186_v60  ;;  %v5589_v43 = vsel %vm5588_vm8, 1, %v10186_v60  ;;  %vm5592_vm12 = vc.u32 %v5590_v6, %v5586_v34  ;;  %v5541_v61 = vsel %vm5537_vm10, %v5521_v12, %v9991_v39 }
 0xbe5   :  { %v5455_v32 = vsel %vm5453_vm9, %v5454_v8, %v5452_v15  ;;  %v5569_v51 = vadd.s32 %v5567_v4, %v5561_v41  ;;  %vm5570_vm11 = vc.u32 %v5568_v29, %v5564_v46  ;;  %v5591_v55 = vadd.s32 %v5589_v43, %v5583_v21 }
 0xbe6   :  { %v5456_v3 = vclz %v5455_v32  ;;  %v5571_v1 = vsel %vm5570_vm11, 1, %v10186_v60  ;;  %v5593_v63 = vsel %vm5592_vm12, 1, %v10186_v60  ;;  %v5587_v16 = vshrl.u32 %v5582_v22, 16 }
 0xbe7   :  { %v5573_v18 = vadd.s32 %v5571_v1, %v5569_v51  ;;  %v5595_v40 = vadd.s32 %v5593_v63, %v5591_v55  ;;  %v5594_v14 = vadd.s32 %v5590_v6, %v5586_v34  ;;  %v5544_v60 = vsel %vm5538_vm7, %v5541_v61, %v5543_v48 }
 0xbe8   :  { %v5920_v9 = vadd.s32 4294967294, %v5456_v3  ;;  %v5598_v35 = vmul.u32 %v9997_v50, %v5544_v60  ;;  %vm10047_vm3 = vcmp.le.f32.partialorder %v5350_v24, 0.7853982  ;;  %v5474_v30 = vsub.s32 4, %v10009_v38 }
 0xbe9   :  { %v5574_v33 = vadd.s32 %v5573_v18, %v5563_v37  ;;  %v5596_v0 = vadd.s32 %v5595_v40, %v5585_v17  ;;  %vm5493_vm2 = vweird.f32 %v9897_v2  ;;  %vm5507_vm7 = vcmp.lt.s32.totalorder %v9940_v26, 0 }
 0xbea   :  { %vm5921_vm15 = vcmp.lt.s32.totalorder %v5920_v9, 0  ;;  %v5475_v4 = vsel %vm5352_vm13, %v5474_v30, %v10009_v38  ;;  %vm10391_vm9 = vcmask 64512   ;;  %vm5506_vm1 = vcmp.le.f32.partialorder %v5505_v7, 0.7853982 }
 0xbeb   :  { %v5459_v10 = vsel %vm5921_vm15, 0, %v5920_v9  ;;  %v5575_v13 = vadd.s32 %v5574_v33, %v5565_v62  ;;  %v5597_v5 = vadd.s32 %v5596_v0, %v5587_v16  ;;  %vm5648_vm12 = vweird.f32 %v9940_v26 }
 0xbec   :  { %v5460_v19 = vsub.s32 32, %v5459_v10  ;;  %v5464_v53 = vsub.s32 4294967266, %v5459_v10  ;;  %v5461_v47 = vshll.u32 %v5452_v15, %v5459_v10 }
 0xbed   :  { %vm5600_vm0 = vc.u32 %v5575_v13, %v5594_v14  ;;  %v5601_v39 = vadd.s32 1, %v5597_v5 }
 0xbee   :  { %v5462_v44 = vshrl.u32 %v5444_v54, %v5460_v19  ;;  %v5465_v57 = vadd.s32 127, %v5464_v53  ;;  %v5477_v54 = vsel %vm10047_vm3, 0, %v5475_v4 }
 0xbef   :  { %v5602_v28 = vsel %vm5600_vm0, %v5601_v39, %v5597_v5  ;;  %v5494_v21 = vadd.s32 3, %v5477_v54  ;;  %vm10392_vm0 = vmmov %vm10391_vm9 }
 0xbf0   :  { %v5463_v23 = vor.u32 %v5462_v44, %v5461_v47  ;;  %v5466_v52 = vshll.u32 %v5465_v57, 23  ;;  %v5603_v41 = vadd.s32 %v5602_v28, %v5598_v35  ;;  %v5599_v44 = vadd.s32 %v5594_v14, %v5575_v13 }
 0xbf1   :  { %v5495_v25 = vand.u32 3, %v5494_v21 }
 0xbf2   :  { %v5467_v15 = vor.u32 4788187, %v5466_v52  ;;  %v5470_v8 = vcvt.s32.f32 %v5463_v23  ;;  %v5604_v3 = vadd.s32 536870912, %v5603_v41 }
 0xbf3   :  { %vm5497_vm4 = vcmp.eq.s32.totalorder %v5495_v25, 0  ;;  %vm5500_vm10 = vcmp.eq.s32.totalorder %v5495_v25, 2  ;;  %vm5496_vm5 = vcmp.lt.s32.totalorder %v5495_v25, 2 }
 0xbf4   :  { %v5468_v20 = vand.u32 2147483647, %v5467_v15  ;;  %v10055_v29 = vshrl.u32 %v5604_v3, 30 }
 0xbf6   :  { %v5471_v58 = vmul.f32 %v5470_v8, %v5468_v20  ;;  %v5606_v24 = vshll.u32 %v10055_v29, 30  ;;  %v5629_v28 = vsub.s32 4, %v10055_v29 }
 0xbf8   :  { %v5472_v32 = vxor.u32 2147483648, %v5471_v58  ;;  %v5607_v45 = vsub.s32 %v5603_v41, %v5606_v24 }
 0xbfa   :  { %v5473_v11 = vsel %vm5352_vm13, %v5472_v32, %v5471_v58  ;;  %vm5608_vm14 = vcmp.lt.s32.totalorder %v5607_v45, 0  ;;  %v5609_v18 = vsub.s32 0, %v5607_v45 }
 0xbfb   :  { %v5476_v46 = vsel %vm10047_vm3, %v9897_v2, %v5473_v11 }
 0xbfc   :  { %v5478_v50 = vmul.f32 %v5476_v46, %v5476_v46  ;;  %v5610_v34 = vsel %vm5608_vm14, %v5609_v18, %v5607_v45 }
 0xbfd   :  { %v5611_v43 = vclz %v5610_v34 }
 0xbfe   :  { %v5479_v49 = vmul.f32 -0.001358992, %v5478_v50  ;;  %v5486_v22 = vmul.f32 -0.00019511016, %v5478_v50 }
 0xbff   :  { %v5923_v53 = vadd.s32 4294967294, %v5611_v43 }
 0xc00   :  { %v5480_v9 = vadd.f32 0.041655596, %v5479_v49  ;;  %v5487_v51 = vadd.f32 0.008332121, %v5486_v22 }
 0xc01   :  { %vm5924_vm6 = vcmp.lt.s32.totalorder %v5923_v53, 0 }
 0xc02   :  { %v5481_v37 = vmul.f32 %v5480_v9, %v5478_v50  ;;  %v5488_v1 = vmul.f32 %v5487_v51, %v5478_v50  ;;  %v5614_v47 = vsel %vm5924_vm6, 0, %v5923_v53 }
 0xc03   :  { %v5615_v57 = vsub.s32 32, %v5614_v47  ;;  %v5619_v63 = vsub.s32 4294967266, %v5614_v47  ;;  %v5616_v17 = vshll.u32 %v5607_v45, %v5614_v47 }
 0xc04   :  { %v5482_v6 = vadd.f32 -0.4999988, %v5481_v37  ;;  %v5489_v10 = vadd.f32 -0.16666654, %v5488_v1 }
 0xc05   :  { %v5617_v40 = vshrl.u32 %v5599_v44, %v5615_v57  ;;  %v5620_v23 = vadd.s32 127, %v5619_v63 }
 0xc06   :  { %v5483_v38 = vmul.f32 %v5482_v6, %v5478_v50  ;;  %v5490_v19 = vmul.f32 %v5489_v10, %v5478_v50 }
 0xc07   :  { %v5618_v0 = vor.u32 %v5617_v40, %v5616_v17  ;;  %v5621_v15 = vshll.u32 %v5620_v23, 23 }
 0xc08   :  { %v5484_v12 = vadd.f32 1.0, %v5483_v38  ;;  %v5491_v33 = vadd.f32 1.0, %v5490_v19 }
 0xc09   :  { %v5622_v20 = vor.u32 4788187, %v5621_v15  ;;  %v5625_v8 = vcvt.s32.f32 %v5618_v0 }
 0xc0a   :  { %v5492_v62 = vmul.f32 %v5491_v33, %v5476_v46  ;;  %v5501_v55 = vxor.u32 2147483648, %v5484_v12 }
 0xc0b   :  { %v5623_v14 = vand.u32 2147483647, %v5622_v20 }
 0xc0c   :  { %v5498_v61 = vxor.u32 2147483648, %v5492_v62  ;;  %v5502_v48 = vsel %vm5500_vm10, %v5501_v55, %v5492_v62 }
 0xc0d   :  { %v5626_v58 = vmul.f32 %v5625_v8, %v5623_v14 }
 0xc0e   :  { %v5499_v52 = vsel %vm5497_vm4, %v5484_v12, %v5498_v61  ;;  %v10393_v12 = vld [vmem:[#allocation7_spill] sm:$0xff] }
 0xc0f   :  { %v5503_v16 = vsel %vm5496_vm5, %v5499_v52, %v5502_v48  ;;  %v5627_v35 = vxor.u32 2147483648, %v5626_v58 }
 0xc10   :  { %v5504_v60 = vsel %vm5493_vm2, nan, %v5503_v16 }
 0xc11   :  { %v5660_v5 = vmul.f32 %v5504_v60, %v5504_v60  ;;  %v5628_v2 = vsel %vm5507_vm7, %v5627_v35, %v5626_v58 }
 0xc12   :  { %v5631_v32 = vsel %vm5506_vm1, %v9940_v26, %v5628_v2 }
 0xc13   :  { %v5662_v13 = vmul.f32 %v5660_v5, %v9777_v59  ;;  %v5633_v41 = vmul.f32 %v5631_v32, %v5631_v32 }
 0xc15   :  { %v5664_v39 = vadd.f32 %v5662_v13, %v9893_v36  ;;  %v5634_v27 = vmul.f32 -0.001358992, %v5633_v41  ;;  %v5641_v11 = vmul.f32 -0.00019511016, %v5633_v41  ;;  %v5630_v36 = vsel %vm5507_vm7, %v5629_v28, %v10055_v29 }
 0xc16   :  { %v5632_v46 = vsel %vm5506_vm1, 0, %v5630_v36 }
 0xc17   :  { %5681 = vmatpush.msrb.mxu2 %v5664_v39  ;;  %v5635_v30 = vadd.f32 0.041655596, %v5634_v27  ;;  %v5642_v3 = vadd.f32 0.008332121, %v5641_v11  ;;  %v5649_v24 = vadd.s32 3, %v5632_v46 }
 0xc18   :  { %5925 = vmatmul.msk.f32.vlgmr.msrb.gmra.mxu2 %vm10391_vm9, %v9817_v42 }
 0xc19   :  { %v5636_v50 = vmul.f32 %v5635_v30, %v5633_v41  ;;  %v5643_v4 = vmul.f32 %v5642_v3, %v5633_v41  ;;  %v5650_v54 = vand.u32 3, %v5649_v24 }
 0xc1b   :  { %v5637_v49 = vadd.f32 -0.4999988, %v5636_v50  ;;  %v5644_v22 = vadd.f32 -0.16666654, %v5643_v4  ;;  %vm5652_vm11 = vcmp.eq.s32.totalorder %v5650_v54, 0  ;;  %vm5655_vm15 = vcmp.eq.s32.totalorder %v5650_v54, 2 }
 0xc1c   :  { %vm5651_vm8 = vcmp.lt.s32.totalorder %v5650_v54, 2 }
 0xc1d   :  { %v5638_v9 = vmul.f32 %v5637_v49, %v5633_v41  ;;  %v5645_v7 = vmul.f32 %v5644_v22, %v5633_v41 }
 0xc1f   :  { %v5639_v51 = vadd.f32 1.0, %v5638_v9  ;;  %v5646_v45 = vadd.f32 1.0, %v5645_v7 }
 0xc21   :  { %v5647_v37 = vmul.f32 %v5646_v45, %v5631_v32  ;;  %v5656_v1 = vxor.u32 2147483648, %v5639_v51 }
 0xc23   :  { %v5653_v18 = vxor.u32 2147483648, %v5647_v37  ;;  %v5657_v6 = vsel %vm5655_vm15, %v5656_v1, %v5647_v37 }
 0xc25   :  { %v5654_v29 = vsel %vm5652_vm11, %v5639_v51, %v5653_v18 }
 0xc26   :  { %v5658_v10 = vsel %vm5651_vm8, %v5654_v29, %v5657_v6 }
 0xc27   :  { %v5659_v21 = vsel %vm5648_vm12, nan, %v5658_v10 }
 0xc28   :  { %v5661_v34 = vmul.f32 %v5659_v21, %v5659_v21 }
 0xc2a   :  { %v5663_v43 = vmul.f32 %v5661_v34, %v9777_v59 }
 0xc2c   :  { %v5665_v38 = vadd.f32 %v5663_v43, %v9918_v31  ;;  %v10394_v31 = vld [vmem:[#allocation10_spill] sm:$0xff] }
 0xc2e   :  { %5701 = vmatpush.msrb.mxu3 %v5665_v38 }
 0xc2f   :  { %5926 = vmatmul.msk.f32.vlgmr.msrb.gmra.mxu3 %vm10392_vm0, %v9817_v42 }
 0xc9b   :  { %v5683_v19 = vpop.f32.mrf.mxu2 }
 0xc9c   :  { %v5684_v53 = vadd.f32 %v5683_v19, %v9888_v56 }
 0xc9e   :  { %v5706_v33 = vadd.f32 %v5684_v53, %v10393_v12 }
 0xca0   :  { %5711 = vst [vmem:[#allocation2 + $0x10] sm:$0xff] %v5706_v33 }
 0xcb2   :  { %v5703_v26 = vpop.f32.mrf.mxu3 }
 0xcb3   :  { %v5704_v59 = vadd.f32 %v5703_v26, %v9888_v56 }
 0xcb5   :  { %v5707_v25 = vadd.f32 %v5704_v59, %v10394_v31 }
 0xcb7   :  { %5712 = vst [vmem:[#allocation2 + $0x18] sm:$0xff] %v5707_v25 }
 0xcb8   :  { %5725 = dma.vmem_to_hbm [thread:$0]  %s5718_s25, 512, %s5720_s8, [#allocation3], %s6014_s9, %s6014_s9, %s6015_s23  }
 0xcb9   :  { %5988 = dma.done.wait [#allocation3], 512  }
 0xcba   :  { %5989 = vsyncadd [#allocation3], 4294966784 }
 0xcbb   :  { %5730 = vsyncpa [#allocation3], 1 }

</bundles_post_ra>
